<compile_context>
chip_gen: v6e
topology: v6e:2x2x1
jax: 0.10.0
libtpu: 0.0.40
codegen_flags: <defaults>
</compile_context>

<pallas_src>
import functools

import jax
import jax.numpy as jnp
from jax.experimental import pallas as pl
from jax.experimental.pallas import tpu as pltpu

F32 = jnp.float32
BF16 = jnp.bfloat16
BN_EPS = 1e-5
_W_OFF = 8     # sublane-aligned column offset of the h1 interior inside the
               # padded-h1 VMEM scratch (keeps every scratch STORE aligned)


# ---------------------------------------------------------------------------
# generation-aware scoped-VMEM budget
# ---------------------------------------------------------------------------
def _vmem_limit_bytes():
    try:
        cap = int(pltpu.get_tpu_info().vmem_capacity_bytes)
        if cap < 16 * 1024 * 1024:
            raise ValueError(cap)
    except Exception:
        cap = 64 * 1024 * 1024          # conservative fallback (= v7x physical)
    return min((cap * 3) // 4, 96 * 1024 * 1024)


# ---------------------------------------------------------------------------
# in-kernel im2col: pack the 9 shifted (Ho, Wo, Cin) windows of a zero-padded
# image into a (Ho*Wo, 9*Cin) bf16 scratch -> the 3x3 conv is ONE deep-K GEMM.
# ---------------------------------------------------------------------------
def _im2col_3x3_s1(pat_ref, img, ho, wo, cin, col0=0):
    t = 0
    for kh in range(3):
        for kw in range(3):
            sl = img[kh:kh + ho, col0 + kw:col0 + kw + wo, :]
            pat_ref[:, t * cin:(t + 1) * cin] = (
                sl.reshape(ho * wo, cin).astype(BF16))
            t += 1


# ---------------------------------------------------------------------------
# Fully-fused SE_BasicBlock kernel (one image per grid step)
# ---------------------------------------------------------------------------
def _se_block_kernel(*refs, ho, wo, cin, cout, has_sc_conv):
    if has_sc_conv:
        (xp_ref, w1_ref, s1_ref, b1_ref, w2_ref, s2_ref, b2_ref,
         wsc_ref, ssc_ref, bsc_ref, wse1_ref, wse2_ref,
         o_ref, pat1_ref, h1p_ref, pat2_ref) = refs
    else:
        (xp_ref, w1_ref, s1_ref, b1_ref, w2_ref, s2_ref, b2_ref,
         wse1_ref, wse2_ref,
         o_ref, pat1_ref, h1p_ref, pat2_ref) = refs
        wsc_ref = ssc_ref = bsc_ref = None

    m = ho * wo
    xpad = xp_ref[0]                                    # (ho+2, wo+2, cin) f32

    # ---- conv1 (3x3, s=1) + BN1 + ReLU : one deep-K MXU GEMM ---------------
    _im2col_3x3_s1(pat1_ref, xpad, ho, wo, cin)
    h1 = jnp.dot(pat1_ref[...], w1_ref[...], preferred_element_type=F32)
    h1 = jnp.maximum(h1 * s1_ref[...] + b1_ref[...], 0.0)          # (m, cout)

    # ---- re-pad h1 entirely in VMEM (no HBM round trip) --------------------
    # Interior stored at sublane-aligned column offset _W_OFF -> aligned store.
    h1p_ref[...] = jnp.zeros_like(h1p_ref)
    h1p_ref[1:ho + 1, _W_OFF:_W_OFF + wo, :] = h1.reshape(ho, wo, cout)

    # ---- conv2 (3x3, s=1) + BN2 : one deep-K MXU GEMM ----------------------
    _im2col_3x3_s1(pat2_ref, h1p_ref[...], ho, wo, cout, col0=_W_OFF - 1)
    res = jnp.dot(pat2_ref[...], w2_ref[...], preferred_element_type=F32)
    res = res * s2_ref[...] + b2_ref[...]

    # ---- shortcut branch: fused 1x1 conv + BN, or identity -----------------
    xin = xpad[1:ho + 1, 1:wo + 1, :].reshape(m, cin)
    if has_sc_conv:
        sc = jnp.dot(xin.astype(BF16), wsc_ref[...],
                     preferred_element_type=F32)
        sc = sc * ssc_ref[...] + bsc_ref[...]
    else:
        sc = xin                                        # identity (f32)

    y = jnp.maximum(res + sc, 0.0)                      # ReLU(residual + sc)

    # ---- SE: GAP -> fc1 -> ReLU -> fc2 -> sigmoid -> channel gate ----------
    pooled = jnp.mean(y, axis=0, keepdims=True)                        # (1, C)
    hse = jnp.maximum(jnp.dot(pooled, wse1_ref[...],
                              preferred_element_type=F32), 0.0)        # (1,Cr)
    gate = jax.nn.sigmoid(jnp.dot(hse, wse2_ref[...],
                                  preferred_element_type=F32))         # (1, C)
    o_ref[0] = (y * gate).astype(o_ref.dtype)


# ---------------------------------------------------------------------------
# Block forward (host-facing NCHW, like PyTorch)
# ---------------------------------------------------------------------------
def _fold_bn(gamma, beta, mean, var, eps=BN_EPS):
    scale = gamma / jnp.sqrt(var + eps)
    bias = beta - mean * scale
    return scale.reshape(1, -1).astype(F32), bias.reshape(1, -1).astype(F32)


def se_basic_block_forward(params, x_nchw, *, stride=1):
    if stride != 1:
        # TODO(synk): reference applies `stride` to BOTH 3x3 convs -> only
        # stride=1 is shape-consistent; mirror that limitation explicitly.
        raise ValueError("SE_BasicBlock forward is only shape-consistent for "
                         "stride=1")

    x = jnp.transpose(x_nchw, (0, 2, 3, 1)).astype(F32)        # NCHW -> NHWC
    N, H, W, cin = x.shape
    cout = params["w1"].shape[-1]
    ho, wo, m = H, W, H * W

    s1, b1 = _fold_bn(**params["bn1"])
    s2, b2 = _fold_bn(**params["bn2"])
    wf1 = params["w1"].reshape(9 * cin, cout).astype(BF16)
    wf2 = params["w2"].reshape(9 * cout, cout).astype(BF16)
    wse1 = params["wse1"].astype(F32)
    wse2 = params["wse2"].astype(F32)

    xp = jnp.pad(x, ((0, 0), (1, 1), (1, 1), (0, 0)))          # pad=1, f32

    has_sc_conv = params["wsc"] is not None
    ins = [xp, wf1, s1, b1, wf2, s2, b2]
    in_specs = [
        pl.BlockSpec((1, H + 2, W + 2, cin), lambda n: (n, 0, 0, 0)),
        pl.BlockSpec((9 * cin, cout), lambda n: (0, 0)),
        pl.BlockSpec((1, cout), lambda n: (0, 0)),
        pl.BlockSpec((1, cout), lambda n: (0, 0)),
        pl.BlockSpec((9 * cout, cout), lambda n: (0, 0)),
        pl.BlockSpec((1, cout), lambda n: (0, 0)),
        pl.BlockSpec((1, cout), lambda n: (0, 0)),
    ]
    if has_sc_conv:
        ssc, bsc = _fold_bn(**params["bnsc"])
        wsc = params["wsc"].reshape(cin, cout).astype(BF16)
        ins += [wsc, ssc, bsc]
        in_specs += [
            pl.BlockSpec((cin, cout), lambda n: (0, 0)),
            pl.BlockSpec((1, cout), lambda n: (0, 0)),
            pl.BlockSpec((1, cout), lambda n: (0, 0)),
        ]
    ins += [wse1, wse2]
    in_specs += [
        pl.BlockSpec(wse1.shape, lambda n: (0, 0)),
        pl.BlockSpec(wse2.shape, lambda n: (0, 0)),
    ]

    kern = functools.partial(_se_block_kernel, ho=ho, wo=wo, cin=cin,
                             cout=cout, has_sc_conv=has_sc_conv)
    out = pl.pallas_call(
        kern,
        out_shape=jax.ShapeDtypeStruct((N, m, cout), F32),
        grid=(N,),
        in_specs=in_specs,
        out_specs=pl.BlockSpec((1, m, cout), lambda n: (n, 0, 0)),
        scratch_shapes=[
            pltpu.VMEM((m, 9 * cin), BF16),                    # conv1 patches
            pltpu.VMEM((ho + 2, wo + 2 * _W_OFF, cout), F32),  # padded h1
            pltpu.VMEM((m, 9 * cout), BF16),                   # conv2 patches
        ],
        compiler_params=pltpu.CompilerParams(
            dimension_semantics=("parallel",),
            vmem_limit_bytes=_vmem_limit_bytes()),
    )(*ins)
    return jnp.transpose(out.reshape(N, ho, wo, cout), (0, 3, 1, 2))  # NCHW


# ---------------------------------------------------------------------------
# Deterministic parameter init (mirrors the PyTorch module's layer shapes)
# ---------------------------------------------------------------------------
def _he_conv(key, k, cin, cout):
    std = (2.0 / (k * k * cin)) ** 0.5
    return jax.random.normal(key, (k, k, cin, cout), F32) * std      # HWIO


def _torch_linear_w(key, fin, fout):
    bound = 1.0 / (fin ** 0.5)
    return jax.random.uniform(key, (fin, fout), F32, -bound, bound)


def _fresh_bn(c):
    # PyTorch BatchNorm2d fresh init, eval mode.
    return {"gamma": jnp.ones((c,), F32), "beta": jnp.zeros((c,), F32),
            "mean": jnp.zeros((c,), F32), "var": jnp.ones((c,), F32)}


def init_se_basic_block(key, in_channels, out_channels, stride=1, reduction=16):
    assert out_channels // reduction >= 1
    k1, k2, k3, k4, k5 = jax.random.split(key, 5)
    p = {
        "w1": _he_conv(k1, 3, in_channels, out_channels),
        "bn1": _fresh_bn(out_channels),
        "w2": _he_conv(k2, 3, out_channels, out_channels),
        "bn2": _fresh_bn(out_channels),
        "wse1": _torch_linear_w(k3, out_channels, out_channels // reduction),
        "wse2": _torch_linear_w(k4, out_channels // reduction, out_channels),
    }
    if stride != 1 or in_channels != out_channels:
        p["wsc"] = _he_conv(k5, 1, in_channels, out_channels)
        p["bnsc"] = _fresh_bn(out_channels)
    else:
        p["wsc"] = None
        p["bnsc"] = None
    return p


# ---------------------------------------------------------------------------
# Pure-JAX reference (for correctness check)
# ---------------------------------------------------------------------------
def se_basic_block_reference(params, x_nchw, *, stride=1):
    x = jnp.transpose(x_nchw, (0, 2, 3, 1)).astype(F32)

    def conv(inp, w, s, pad):
        return jax.lax.conv_general_dilated(
            inp, w, window_strides=(s, s), padding=pad,
            dimension_numbers=("NHWC", "HWIO", "NHWC"))

    s1, b1 = _fold_bn(**params["bn1"])
    s2, b2 = _fold_bn(**params["bn2"])
    h = jax.nn.relu(conv(x, params["w1"], stride, [(1, 1), (1, 1)]) * s1 + b1)
    h = conv(h, params["w2"], stride, [(1, 1), (1, 1)]) * s2 + b2
    if params["wsc"] is not None:
        ssc, bsc = _fold_bn(**params["bnsc"])
        sc = conv(x, params["wsc"], stride, [(0, 0), (0, 0)]) * ssc + bsc
    else:
        sc = x
    y = jax.nn.relu(h + sc)
    pooled = jnp.mean(y, axis=(1, 2))                                  # (N, C)
    gate = jax.nn.sigmoid(jax.nn.relu(pooled @ params["wse1"]) @ params["wse2"])
    out = y * gate[:, None, None, :]
    return jnp.transpose(out, (0, 3, 1, 2))


# ---------------------------------------------------------------------------
if __name__ == "__main__":
    key = jax.random.PRNGKey(0)
    kp1, kp2, kx1, kx2 = jax.random.split(key, 4)

    def run_case(kp, kx, N, cin, cout, H, W):
        params = init_se_basic_block(kp, cin, cout, stride=1, reduction=16)
        x = jax.random.normal(kx, (N, cin, H, W), F32)       # NCHW input
        fwd = jax.jit(functools.partial(se_basic_block_forward, stride=1))
        out = fwd(params, x)
        jax.block_until_ready(out)
        assert out.shape == (N, cout, H, W), out.shape
        assert bool(jnp.all(jnp.isfinite(out)))
        ref = se_basic_block_reference(params, x, stride=1)
        scale = float(jnp.max(jnp.abs(ref)))
        err = float(jnp.max(jnp.abs(out - ref)))
        assert err <= 0.08 * scale + 0.02, (err, scale)       # bf16-MXU tol

    # conv-shortcut path (channel change) and identity-shortcut path
    run_case(kp1, kx1, N=2, cin=128, cout=256, H=16, W=16)
    run_case(kp2, kx2, N=2, cin=128, cout=128, H=8, W=8)

    print("KERNEL_OK")
</pallas_src>

<mosaic_0001>
module attributes {stable_mosaic.version = 11 : i64} {
  func.func @_se_block_kernel(%arg0: i32, %arg1: memref<1x18x18x128xf32, #tpu.memory_space<vmem>>, %arg2: memref<1152x256xbf16, #tpu.memory_space<vmem>>, %arg3: memref<1x256xf32, #tpu.memory_space<vmem>>, %arg4: memref<1x256xf32, #tpu.memory_space<vmem>>, %arg5: memref<2304x256xbf16, #tpu.memory_space<vmem>>, %arg6: memref<1x256xf32, #tpu.memory_space<vmem>>, %arg7: memref<1x256xf32, #tpu.memory_space<vmem>>, %arg8: memref<128x256xbf16, #tpu.memory_space<vmem>>, %arg9: memref<1x256xf32, #tpu.memory_space<vmem>>, %arg10: memref<1x256xf32, #tpu.memory_space<vmem>>, %arg11: memref<256x16xf32, #tpu.memory_space<vmem>>, %arg12: memref<16x256xf32, #tpu.memory_space<vmem>>, %arg13: memref<1x256x256xf32, #tpu.memory_space<vmem>>, %arg14: memref<256x1152xbf16, #tpu.memory_space<vmem>>, %arg15: memref<18x32x256xf32, #tpu.memory_space<vmem>>, %arg16: memref<256x2304xbf16, #tpu.memory_space<vmem>>) attributes {dimension_semantics = [#tpu.dimension_semantics<parallel>], iteration_bounds = array<i64: 2>, scalar_prefetch = 0 : i64, scratch_operands = 3 : i64, tpu.core_type = #tpu.core_type<tc>, window_params = [{transform_indices = @transform_0, window_bounds = array<i64: 1, 18, 18, 128>}, {pipeline_mode = #tpu.pipeline_mode<synchronous>, transform_indices = @transform_1, window_bounds = array<i64: 1152, 256>}, {pipeline_mode = #tpu.pipeline_mode<synchronous>, transform_indices = @transform_2, window_bounds = array<i64: 1, 256>}, {pipeline_mode = #tpu.pipeline_mode<synchronous>, transform_indices = @transform_3, window_bounds = array<i64: 1, 256>}, {pipeline_mode = #tpu.pipeline_mode<synchronous>, transform_indices = @transform_4, window_bounds = array<i64: 2304, 256>}, {pipeline_mode = #tpu.pipeline_mode<synchronous>, transform_indices = @transform_5, window_bounds = array<i64: 1, 256>}, {pipeline_mode = #tpu.pipeline_mode<synchronous>, transform_indices = @transform_6, window_bounds = array<i64: 1, 256>}, {pipeline_mode = #tpu.pipeline_mode<synchronous>, transform_indices = @transform_7, window_bounds = array<i64: 128, 256>}, {pipeline_mode = #tpu.pipeline_mode<synchronous>, transform_indices = @transform_8, window_bounds = array<i64: 1, 256>}, {pipeline_mode = #tpu.pipeline_mode<synchronous>, transform_indices = @transform_9, window_bounds = array<i64: 1, 256>}, {pipeline_mode = #tpu.pipeline_mode<synchronous>, transform_indices = @transform_10, window_bounds = array<i64: 256, 16>}, {pipeline_mode = #tpu.pipeline_mode<synchronous>, transform_indices = @transform_11, window_bounds = array<i64: 16, 256>}, {transform_indices = @transform_12, window_bounds = array<i64: 1, 256, 256>}]} {
    %c0 = arith.constant 0 : index
    %c0_0 = arith.constant 0 : index
    %c0_1 = arith.constant 0 : index
    %c0_2 = arith.constant 0 : index
    %0 = vector.load %arg1[%c0, %c0_0, %c0_1, %c0_2] : memref<1x18x18x128xf32, #tpu.memory_space<vmem>>, vector<1x18x18x128xf32>
    %1 = vector.shape_cast %0 : vector<1x18x18x128xf32> to vector<18x18x128xf32>
    %2 = vector.extract_strided_slice %1 {offsets = [0, 0, 0], sizes = [16, 16, 128], strides = [1, 1, 1]} : vector<18x18x128xf32> to vector<16x16x128xf32>
    %3 = vector.shape_cast %2 : vector<16x16x128xf32> to vector<256x128xf32>
    %4 = arith.truncf %3 : vector<256x128xf32> to vector<256x128xbf16>
    %c0_3 = arith.constant 0 : index
    %c0_4 = arith.constant 0 : index
    %5 = vector.load %arg14[%c0_3, %c0_4] : memref<256x1152xbf16, #tpu.memory_space<vmem>>, vector<256x128xbf16>
    tpu.vector_store %arg14[%c0_3, %c0_4], %4 {strides = array<i32>} : memref<256x1152xbf16, #tpu.memory_space<vmem>>, vector<256x128xbf16>,
    %6 = vector.extract_strided_slice %1 {offsets = [0, 1, 0], sizes = [16, 16, 128], strides = [1, 1, 1]} : vector<18x18x128xf32> to vector<16x16x128xf32>
    %7 = vector.shape_cast %6 : vector<16x16x128xf32> to vector<256x128xf32>
    %8 = arith.truncf %7 : vector<256x128xf32> to vector<256x128xbf16>
    %c0_5 = arith.constant 0 : index
    %c128 = arith.constant 128 : index
    %9 = vector.load %arg14[%c0_5, %c128] : memref<256x1152xbf16, #tpu.memory_space<vmem>>, vector<256x128xbf16>
    tpu.vector_store %arg14[%c0_5, %c128], %8 {strides = array<i32>} : memref<256x1152xbf16, #tpu.memory_space<vmem>>, vector<256x128xbf16>,
    %10 = vector.extract_strided_slice %1 {offsets = [0, 2, 0], sizes = [16, 16, 128], strides = [1, 1, 1]} : vector<18x18x128xf32> to vector<16x16x128xf32>
    %11 = vector.shape_cast %10 : vector<16x16x128xf32> to vector<256x128xf32>
    %12 = arith.truncf %11 : vector<256x128xf32> to vector<256x128xbf16>
    %c0_6 = arith.constant 0 : index
    %c256 = arith.constant 256 : index
    %13 = vector.load %arg14[%c0_6, %c256] : memref<256x1152xbf16, #tpu.memory_space<vmem>>, vector<256x128xbf16>
    tpu.vector_store %arg14[%c0_6, %c256], %12 {strides = array<i32>} : memref<256x1152xbf16, #tpu.memory_space<vmem>>, vector<256x128xbf16>,
    %14 = vector.extract_strided_slice %1 {offsets = [1, 0, 0], sizes = [16, 16, 128], strides = [1, 1, 1]} : vector<18x18x128xf32> to vector<16x16x128xf32>
    %15 = vector.shape_cast %14 : vector<16x16x128xf32> to vector<256x128xf32>
    %16 = arith.truncf %15 : vector<256x128xf32> to vector<256x128xbf16>
    %c0_7 = arith.constant 0 : index
    %c384 = arith.constant 384 : index
    %17 = vector.load %arg14[%c0_7, %c384] : memref<256x1152xbf16, #tpu.memory_space<vmem>>, vector<256x128xbf16>
    tpu.vector_store %arg14[%c0_7, %c384], %16 {strides = array<i32>} : memref<256x1152xbf16, #tpu.memory_space<vmem>>, vector<256x128xbf16>,
    %18 = vector.extract_strided_slice %1 {offsets = [1, 1, 0], sizes = [16, 16, 128], strides = [1, 1, 1]} : vector<18x18x128xf32> to vector<16x16x128xf32>
    %19 = vector.shape_cast %18 : vector<16x16x128xf32> to vector<256x128xf32>
    %20 = arith.truncf %19 : vector<256x128xf32> to vector<256x128xbf16>
    %c0_8 = arith.constant 0 : index
    %c512 = arith.constant 512 : index
    %21 = vector.load %arg14[%c0_8, %c512] : memref<256x1152xbf16, #tpu.memory_space<vmem>>, vector<256x128xbf16>
    tpu.vector_store %arg14[%c0_8, %c512], %20 {strides = array<i32>} : memref<256x1152xbf16, #tpu.memory_space<vmem>>, vector<256x128xbf16>,
    %22 = vector.extract_strided_slice %1 {offsets = [1, 2, 0], sizes = [16, 16, 128], strides = [1, 1, 1]} : vector<18x18x128xf32> to vector<16x16x128xf32>
    %23 = vector.shape_cast %22 : vector<16x16x128xf32> to vector<256x128xf32>
    %24 = arith.truncf %23 : vector<256x128xf32> to vector<256x128xbf16>
    %c0_9 = arith.constant 0 : index
    %c640 = arith.constant 640 : index
    %25 = vector.load %arg14[%c0_9, %c640] : memref<256x1152xbf16, #tpu.memory_space<vmem>>, vector<256x128xbf16>
    tpu.vector_store %arg14[%c0_9, %c640], %24 {strides = array<i32>} : memref<256x1152xbf16, #tpu.memory_space<vmem>>, vector<256x128xbf16>,
    %26 = vector.extract_strided_slice %1 {offsets = [2, 0, 0], sizes = [16, 16, 128], strides = [1, 1, 1]} : vector<18x18x128xf32> to vector<16x16x128xf32>
    %27 = vector.shape_cast %26 : vector<16x16x128xf32> to vector<256x128xf32>
    %28 = arith.truncf %27 : vector<256x128xf32> to vector<256x128xbf16>
    %c0_10 = arith.constant 0 : index
    %c768 = arith.constant 768 : index
    %29 = vector.load %arg14[%c0_10, %c768] : memref<256x1152xbf16, #tpu.memory_space<vmem>>, vector<256x128xbf16>
    tpu.vector_store %arg14[%c0_10, %c768], %28 {strides = array<i32>} : memref<256x1152xbf16, #tpu.memory_space<vmem>>, vector<256x128xbf16>,
    %30 = vector.extract_strided_slice %1 {offsets = [2, 1, 0], sizes = [16, 16, 128], strides = [1, 1, 1]} : vector<18x18x128xf32> to vector<16x16x128xf32>
    %31 = vector.shape_cast %30 : vector<16x16x128xf32> to vector<256x128xf32>
    %32 = arith.truncf %31 : vector<256x128xf32> to vector<256x128xbf16>
    %c0_11 = arith.constant 0 : index
    %c896 = arith.constant 896 : index
    %33 = vector.load %arg14[%c0_11, %c896] : memref<256x1152xbf16, #tpu.memory_space<vmem>>, vector<256x128xbf16>
    tpu.vector_store %arg14[%c0_11, %c896], %32 {strides = array<i32>} : memref<256x1152xbf16, #tpu.memory_space<vmem>>, vector<256x128xbf16>,
    %34 = vector.extract_strided_slice %1 {offsets = [2, 2, 0], sizes = [16, 16, 128], strides = [1, 1, 1]} : vector<18x18x128xf32> to vector<16x16x128xf32>
    %35 = vector.shape_cast %34 : vector<16x16x128xf32> to vector<256x128xf32>
    %36 = arith.truncf %35 : vector<256x128xf32> to vector<256x128xbf16>
    %c0_12 = arith.constant 0 : index
    %c1024 = arith.constant 1024 : index
    %37 = vector.load %arg14[%c0_12, %c1024] : memref<256x1152xbf16, #tpu.memory_space<vmem>>, vector<256x128xbf16>
    tpu.vector_store %arg14[%c0_12, %c1024], %36 {strides = array<i32>} : memref<256x1152xbf16, #tpu.memory_space<vmem>>, vector<256x128xbf16>,
    %c0_13 = arith.constant 0 : index
    %c0_14 = arith.constant 0 : index
    %38 = vector.load %arg14[%c0_13, %c0_14] : memref<256x1152xbf16, #tpu.memory_space<vmem>>, vector<256x1152xbf16>
    %c0_15 = arith.constant 0 : index
    %c0_16 = arith.constant 0 : index
    %39 = vector.load %arg2[%c0_15, %c0_16] : memref<1152x256xbf16, #tpu.memory_space<vmem>>, vector<1152x256xbf16>
    %cst = arith.constant dense<0.000000e+00> : vector<256x256xf32>
    %40 = tpu.matmul %38, %39, %cst {dimension_numbers = #tpu.dot_dimension_numbers<[1], [0], [0], [1], [0, 0, 1, 1], [], []>} : vector<256x1152xbf16>, vector<1152x256xbf16>, vector<256x256xf32> -> vector<256x256xf32>
    %c0_17 = arith.constant 0 : index
    %c0_18 = arith.constant 0 : index
    %41 = vector.load %arg3[%c0_17, %c0_18] : memref<1x256xf32, #tpu.memory_space<vmem>>, vector<1x256xf32>
    %42 = vector.broadcast %41 : vector<1x256xf32> to vector<256x256xf32>
    %43 = arith.mulf %40, %42 : vector<256x256xf32>
    %c0_19 = arith.constant 0 : index
    %c0_20 = arith.constant 0 : index
    %44 = vector.load %arg4[%c0_19, %c0_20] : memref<1x256xf32, #tpu.memory_space<vmem>>, vector<1x256xf32>
    %45 = vector.broadcast %44 : vector<1x256xf32> to vector<256x256xf32>
    %46 = arith.addf %43, %45 : vector<256x256xf32>
    %cst_21 = arith.constant 0.000000e+00 : f32
    %47 = vector.broadcast %cst_21 : f32 to vector<256x256xf32>
    %48 = arith.maximumf %46, %47 : vector<256x256xf32>
    %cst_22 = arith.constant 0.000000e+00 : f32
    %49 = vector.broadcast %cst_22 : f32 to vector<18x32x256xf32>
    %c0_23 = arith.constant 0 : index
    %c0_24 = arith.constant 0 : index
    %c0_25 = arith.constant 0 : index
    %50 = vector.load %arg15[%c0_23, %c0_24, %c0_25] : memref<18x32x256xf32, #tpu.memory_space<vmem>>, vector<18x32x256xf32>
    tpu.vector_store %arg15[%c0_23, %c0_24, %c0_25], %49 {strides = array<i32>} : memref<18x32x256xf32, #tpu.memory_space<vmem>>, vector<18x32x256xf32>,
    %51 = vector.shape_cast %48 : vector<256x256xf32> to vector<16x16x256xf32>
    %c1 = arith.constant 1 : index
    %c8 = arith.constant 8 : index
    %c0_26 = arith.constant 0 : index
    %52 = vector.load %arg15[%c1, %c8, %c0_26] : memref<18x32x256xf32, #tpu.memory_space<vmem>>, vector<16x16x256xf32>
    tpu.vector_store %arg15[%c1, %c8, %c0_26], %51 {strides = array<i32>} : memref<18x32x256xf32, #tpu.memory_space<vmem>>, vector<16x16x256xf32>,
    %c0_27 = arith.constant 0 : index
    %c0_28 = arith.constant 0 : index
    %c0_29 = arith.constant 0 : index
    %53 = vector.load %arg15[%c0_27, %c0_28, %c0_29] : memref<18x32x256xf32, #tpu.memory_space<vmem>>, vector<18x32x256xf32>
    %54 = vector.extract_strided_slice %53 {offsets = [0, 7, 0], sizes = [16, 16, 256], strides = [1, 1, 1]} : vector<18x32x256xf32> to vector<16x16x256xf32>
    %55 = vector.shape_cast %54 : vector<16x16x256xf32> to vector<256x256xf32>
    %56 = arith.truncf %55 : vector<256x256xf32> to vector<256x256xbf16>
    %c0_30 = arith.constant 0 : index
    %c0_31 = arith.constant 0 : index
    %57 = vector.load %arg16[%c0_30, %c0_31] : memref<256x2304xbf16, #tpu.memory_space<vmem>>, vector<256x256xbf16>
    tpu.vector_store %arg16[%c0_30, %c0_31], %56 {strides = array<i32>} : memref<256x2304xbf16, #tpu.memory_space<vmem>>, vector<256x256xbf16>,
    %58 = vector.extract_strided_slice %53 {offsets = [0, 8, 0], sizes = [16, 16, 256], strides = [1, 1, 1]} : vector<18x32x256xf32> to vector<16x16x256xf32>
    %59 = vector.shape_cast %58 : vector<16x16x256xf32> to vector<256x256xf32>
    %60 = arith.truncf %59 : vector<256x256xf32> to vector<256x256xbf16>
    %c0_32 = arith.constant 0 : index
    %c256_33 = arith.constant 256 : index
    %61 = vector.load %arg16[%c0_32, %c256_33] : memref<256x2304xbf16, #tpu.memory_space<vmem>>, vector<256x256xbf16>
    tpu.vector_store %arg16[%c0_32, %c256_33], %60 {strides = array<i32>} : memref<256x2304xbf16, #tpu.memory_space<vmem>>, vector<256x256xbf16>,
    %62 = vector.extract_strided_slice %53 {offsets = [0, 9, 0], sizes = [16, 16, 256], strides = [1, 1, 1]} : vector<18x32x256xf32> to vector<16x16x256xf32>
    %63 = vector.shape_cast %62 : vector<16x16x256xf32> to vector<256x256xf32>
    %64 = arith.truncf %63 : vector<256x256xf32> to vector<256x256xbf16>
    %c0_34 = arith.constant 0 : index
    %c512_35 = arith.constant 512 : index
    %65 = vector.load %arg16[%c0_34, %c512_35] : memref<256x2304xbf16, #tpu.memory_space<vmem>>, vector<256x256xbf16>
    tpu.vector_store %arg16[%c0_34, %c512_35], %64 {strides = array<i32>} : memref<256x2304xbf16, #tpu.memory_space<vmem>>, vector<256x256xbf16>,
    %66 = vector.extract_strided_slice %53 {offsets = [1, 7, 0], sizes = [16, 16, 256], strides = [1, 1, 1]} : vector<18x32x256xf32> to vector<16x16x256xf32>
    %67 = vector.shape_cast %66 : vector<16x16x256xf32> to vector<256x256xf32>
    %68 = arith.truncf %67 : vector<256x256xf32> to vector<256x256xbf16>
    %c0_36 = arith.constant 0 : index
    %c768_37 = arith.constant 768 : index
    %69 = vector.load %arg16[%c0_36, %c768_37] : memref<256x2304xbf16, #tpu.memory_space<vmem>>, vector<256x256xbf16>
    tpu.vector_store %arg16[%c0_36, %c768_37], %68 {strides = array<i32>} : memref<256x2304xbf16, #tpu.memory_space<vmem>>, vector<256x256xbf16>,
    %70 = vector.extract_strided_slice %53 {offsets = [1, 8, 0], sizes = [16, 16, 256], strides = [1, 1, 1]} : vector<18x32x256xf32> to vector<16x16x256xf32>
    %71 = vector.shape_cast %70 : vector<16x16x256xf32> to vector<256x256xf32>
    %72 = arith.truncf %71 : vector<256x256xf32> to vector<256x256xbf16>
    %c0_38 = arith.constant 0 : index
    %c1024_39 = arith.constant 1024 : index
    %73 = vector.load %arg16[%c0_38, %c1024_39] : memref<256x2304xbf16, #tpu.memory_space<vmem>>, vector<256x256xbf16>
    tpu.vector_store %arg16[%c0_38, %c1024_39], %72 {strides = array<i32>} : memref<256x2304xbf16, #tpu.memory_space<vmem>>, vector<256x256xbf16>,
    %74 = vector.extract_strided_slice %53 {offsets = [1, 9, 0], sizes = [16, 16, 256], strides = [1, 1, 1]} : vector<18x32x256xf32> to vector<16x16x256xf32>
    %75 = vector.shape_cast %74 : vector<16x16x256xf32> to vector<256x256xf32>
    %76 = arith.truncf %75 : vector<256x256xf32> to vector<256x256xbf16>
    %c0_40 = arith.constant 0 : index
    %c1280 = arith.constant 1280 : index
    %77 = vector.load %arg16[%c0_40, %c1280] : memref<256x2304xbf16, #tpu.memory_space<vmem>>, vector<256x256xbf16>
    tpu.vector_store %arg16[%c0_40, %c1280], %76 {strides = array<i32>} : memref<256x2304xbf16, #tpu.memory_space<vmem>>, vector<256x256xbf16>,
    %78 = vector.extract_strided_slice %53 {offsets = [2, 7, 0], sizes = [16, 16, 256], strides = [1, 1, 1]} : vector<18x32x256xf32> to vector<16x16x256xf32>
    %79 = vector.shape_cast %78 : vector<16x16x256xf32> to vector<256x256xf32>
    %80 = arith.truncf %79 : vector<256x256xf32> to vector<256x256xbf16>
    %c0_41 = arith.constant 0 : index
    %c1536 = arith.constant 1536 : index
    %81 = vector.load %arg16[%c0_41, %c1536] : memref<256x2304xbf16, #tpu.memory_space<vmem>>, vector<256x256xbf16>
    tpu.vector_store %arg16[%c0_41, %c1536], %80 {strides = array<i32>} : memref<256x2304xbf16, #tpu.memory_space<vmem>>, vector<256x256xbf16>,
    %82 = vector.extract_strided_slice %53 {offsets = [2, 8, 0], sizes = [16, 16, 256], strides = [1, 1, 1]} : vector<18x32x256xf32> to vector<16x16x256xf32>
    %83 = vector.shape_cast %82 : vector<16x16x256xf32> to vector<256x256xf32>
    %84 = arith.truncf %83 : vector<256x256xf32> to vector<256x256xbf16>
    %c0_42 = arith.constant 0 : index
    %c1792 = arith.constant 1792 : index
    %85 = vector.load %arg16[%c0_42, %c1792] : memref<256x2304xbf16, #tpu.memory_space<vmem>>, vector<256x256xbf16>
    tpu.vector_store %arg16[%c0_42, %c1792], %84 {strides = array<i32>} : memref<256x2304xbf16, #tpu.memory_space<vmem>>, vector<256x256xbf16>,
    %86 = vector.extract_strided_slice %53 {offsets = [2, 9, 0], sizes = [16, 16, 256], strides = [1, 1, 1]} : vector<18x32x256xf32> to vector<16x16x256xf32>
    %87 = vector.shape_cast %86 : vector<16x16x256xf32> to vector<256x256xf32>
    %88 = arith.truncf %87 : vector<256x256xf32> to vector<256x256xbf16>
    %c0_43 = arith.constant 0 : index
    %c2048 = arith.constant 2048 : index
    %89 = vector.load %arg16[%c0_43, %c2048] : memref<256x2304xbf16, #tpu.memory_space<vmem>>, vector<256x256xbf16>
    tpu.vector_store %arg16[%c0_43, %c2048], %88 {strides = array<i32>} : memref<256x2304xbf16, #tpu.memory_space<vmem>>, vector<256x256xbf16>,
    %c0_44 = arith.constant 0 : index
    %c0_45 = arith.constant 0 : index
    %90 = vector.load %arg16[%c0_44, %c0_45] : memref<256x2304xbf16, #tpu.memory_space<vmem>>, vector<256x2304xbf16>
    %c0_46 = arith.constant 0 : index
    %c0_47 = arith.constant 0 : index
    %91 = vector.load %arg5[%c0_46, %c0_47] : memref<2304x256xbf16, #tpu.memory_space<vmem>>, vector<2304x256xbf16>
    %cst_48 = arith.constant dense<0.000000e+00> : vector<256x256xf32>
    %92 = tpu.matmul %90, %91, %cst_48 {dimension_numbers = #tpu.dot_dimension_numbers<[1], [0], [0], [1], [0, 0, 1, 1], [], []>} : vector<256x2304xbf16>, vector<2304x256xbf16>, vector<256x256xf32> -> vector<256x256xf32>
    %c0_49 = arith.constant 0 : index
    %c0_50 = arith.constant 0 : index
    %93 = vector.load %arg6[%c0_49, %c0_50] : memref<1x256xf32, #tpu.memory_space<vmem>>, vector<1x256xf32>
    %94 = vector.broadcast %93 : vector<1x256xf32> to vector<256x256xf32>
    %95 = arith.mulf %92, %94 : vector<256x256xf32>
    %c0_51 = arith.constant 0 : index
    %c0_52 = arith.constant 0 : index
    %96 = vector.load %arg7[%c0_51, %c0_52] : memref<1x256xf32, #tpu.memory_space<vmem>>, vector<1x256xf32>
    %97 = vector.broadcast %96 : vector<1x256xf32> to vector<256x256xf32>
    %98 = arith.addf %95, %97 : vector<256x256xf32>
    %99 = vector.extract_strided_slice %1 {offsets = [1, 1, 0], sizes = [16, 16, 128], strides = [1, 1, 1]} : vector<18x18x128xf32> to vector<16x16x128xf32>
    %100 = vector.shape_cast %99 : vector<16x16x128xf32> to vector<256x128xf32>
    %101 = arith.truncf %100 : vector<256x128xf32> to vector<256x128xbf16>
    %c0_53 = arith.constant 0 : index
    %c0_54 = arith.constant 0 : index
    %102 = vector.load %arg8[%c0_53, %c0_54] : memref<128x256xbf16, #tpu.memory_space<vmem>>, vector<128x256xbf16>
    %cst_55 = arith.constant dense<0.000000e+00> : vector<256x256xf32>
    %103 = tpu.matmul %101, %102, %cst_55 {dimension_numbers = #tpu.dot_dimension_numbers<[1], [0], [0], [1], [0, 0, 1, 1], [], []>} : vector<256x128xbf16>, vector<128x256xbf16>, vector<256x256xf32> -> vector<256x256xf32>
    %c0_56 = arith.constant 0 : index
    %c0_57 = arith.constant 0 : index
    %104 = vector.load %arg9[%c0_56, %c0_57] : memref<1x256xf32, #tpu.memory_space<vmem>>, vector<1x256xf32>
    %105 = vector.broadcast %104 : vector<1x256xf32> to vector<256x256xf32>
    %106 = arith.mulf %103, %105 : vector<256x256xf32>
    %c0_58 = arith.constant 0 : index
    %c0_59 = arith.constant 0 : index
    %107 = vector.load %arg10[%c0_58, %c0_59] : memref<1x256xf32, #tpu.memory_space<vmem>>, vector<1x256xf32>
    %108 = vector.broadcast %107 : vector<1x256xf32> to vector<256x256xf32>
    %109 = arith.addf %106, %108 : vector<256x256xf32>
    %110 = arith.addf %98, %109 : vector<256x256xf32>
    %cst_60 = arith.constant 0.000000e+00 : f32
    %111 = vector.broadcast %cst_60 : f32 to vector<256x256xf32>
    %112 = arith.maximumf %110, %111 : vector<256x256xf32>
    %cst_61 = arith.constant dense<0.000000e+00> : vector<256xf32>
    %113 = vector.multi_reduction <add>, %112, %cst_61 [0] : vector<256x256xf32> to vector<256xf32>
    %114 = vector.shape_cast %113 : vector<256xf32> to vector<1x256xf32>
    %cst_62 = arith.constant 2.560000e+02 : f32
    %115 = vector.broadcast %cst_62 : f32 to vector<1x256xf32>
    %116 = arith.divf %114, %115 : vector<1x256xf32>
    %c0_63 = arith.constant 0 : index
    %c0_64 = arith.constant 0 : index
    %117 = vector.load %arg11[%c0_63, %c0_64] : memref<256x16xf32, #tpu.memory_space<vmem>>, vector<256x16xf32>
    %cst_65 = arith.constant dense<0.000000e+00> : vector<1x16xf32>
    %118 = tpu.matmul %116, %117, %cst_65 {dimension_numbers = #tpu.dot_dimension_numbers<[1], [0], [0], [1], [0, 0, 1, 1], [], []>} : vector<1x256xf32>, vector<256x16xf32>, vector<1x16xf32> -> vector<1x16xf32>
    %cst_66 = arith.constant 0.000000e+00 : f32
    %119 = vector.broadcast %cst_66 : f32 to vector<1x16xf32>
    %120 = arith.maximumf %118, %119 : vector<1x16xf32>
    %c0_67 = arith.constant 0 : index
    %c0_68 = arith.constant 0 : index
    %121 = vector.load %arg12[%c0_67, %c0_68] : memref<16x256xf32, #tpu.memory_space<vmem>>, vector<16x256xf32>
    %cst_69 = arith.constant dense<0.000000e+00> : vector<1x256xf32>
    %122 = tpu.matmul %120, %121, %cst_69 {dimension_numbers = #tpu.dot_dimension_numbers<[1], [0], [0], [1], [0, 0, 1, 1], [], []>} : vector<1x16xf32>, vector<16x256xf32>, vector<1x256xf32> -> vector<1x256xf32>
    %123 = arith.negf %122 : vector<1x256xf32>
    %124 = math.exp %123 : vector<1x256xf32>
    %cst_70 = arith.constant 1.000000e+00 : f32
    %125 = vector.broadcast %cst_70 : f32 to vector<1x256xf32>
    %126 = arith.addf %125, %124 : vector<1x256xf32>
    %127 = arith.divf %125, %126 : vector<1x256xf32>
    %128 = vector.broadcast %127 : vector<1x256xf32> to vector<256x256xf32>
    %129 = arith.mulf %112, %128 : vector<256x256xf32>
    %c0_71 = arith.constant 0 : index
    %c0_72 = arith.constant 0 : index
    %c0_73 = arith.constant 0 : index
    %130 = vector.load %arg13[%c0_71, %c0_72, %c0_73] : memref<1x256x256xf32, #tpu.memory_space<vmem>>, vector<1x256x256xf32>
    %131 = vector.shape_cast %130 : vector<1x256x256xf32> to vector<256x256xf32>
    %132 = vector.shape_cast %129 : vector<256x256xf32> to vector<1x256x256xf32>
    tpu.vector_store %arg13[%c0_71, %c0_72, %c0_73], %132 {strides = array<i32>} : memref<1x256x256xf32, #tpu.memory_space<vmem>>, vector<1x256x256xf32>,
    return
  }
  func.func @transform_0(%arg0: i32) -> (i32, i32, i32, i32) {
    %c0_i32 = arith.constant 0 : i32
    %c0_i32_0 = arith.constant 0 : i32
    %c0_i32_1 = arith.constant 0 : i32
    %c0_i32_2 = arith.constant 0 : i32
    return %arg0, %c0_i32, %c0_i32_0, %c0_i32_1 : i32, i32, i32, i32
  }
  func.func @transform_1(%arg0: i32) -> (i32, i32) {
    %c0_i32 = arith.constant 0 : i32
    %c0_i32_0 = arith.constant 0 : i32
    %c0_i32_1 = arith.constant 0 : i32
    return %c0_i32, %c0_i32_0 : i32, i32
  }
  func.func @transform_2(%arg0: i32) -> (i32, i32) {
    %c0_i32 = arith.constant 0 : i32
    %c0_i32_0 = arith.constant 0 : i32
    %c0_i32_1 = arith.constant 0 : i32
    return %c0_i32, %c0_i32_0 : i32, i32
  }
  func.func @transform_3(%arg0: i32) -> (i32, i32) {
    %c0_i32 = arith.constant 0 : i32
    %c0_i32_0 = arith.constant 0 : i32
    %c0_i32_1 = arith.constant 0 : i32
    return %c0_i32, %c0_i32_0 : i32, i32
  }
  func.func @transform_4(%arg0: i32) -> (i32, i32) {
    %c0_i32 = arith.constant 0 : i32
    %c0_i32_0 = arith.constant 0 : i32
    %c0_i32_1 = arith.constant 0 : i32
    return %c0_i32, %c0_i32_0 : i32, i32
  }
  func.func @transform_5(%arg0: i32) -> (i32, i32) {
    %c0_i32 = arith.constant 0 : i32
    %c0_i32_0 = arith.constant 0 : i32
    %c0_i32_1 = arith.constant 0 : i32
    return %c0_i32, %c0_i32_0 : i32, i32
  }
  func.func @transform_6(%arg0: i32) -> (i32, i32) {
    %c0_i32 = arith.constant 0 : i32
    %c0_i32_0 = arith.constant 0 : i32
    %c0_i32_1 = arith.constant 0 : i32
    return %c0_i32, %c0_i32_0 : i32, i32
  }
  func.func @transform_7(%arg0: i32) -> (i32, i32) {
    %c0_i32 = arith.constant 0 : i32
    %c0_i32_0 = arith.constant 0 : i32
    %c0_i32_1 = arith.constant 0 : i32
    return %c0_i32, %c0_i32_0 : i32, i32
  }
  func.func @transform_8(%arg0: i32) -> (i32, i32) {
    %c0_i32 = arith.constant 0 : i32
    %c0_i32_0 = arith.constant 0 : i32
    %c0_i32_1 = arith.constant 0 : i32
    return %c0_i32, %c0_i32_0 : i32, i32
  }
  func.func @transform_9(%arg0: i32) -> (i32, i32) {
    %c0_i32 = arith.constant 0 : i32
    %c0_i32_0 = arith.constant 0 : i32
    %c0_i32_1 = arith.constant 0 : i32
    return %c0_i32, %c0_i32_0 : i32, i32
  }
  func.func @transform_10(%arg0: i32) -> (i32, i32) {
    %c0_i32 = arith.constant 0 : i32
    %c0_i32_0 = arith.constant 0 : i32
    %c0_i32_1 = arith.constant 0 : i32
    return %c0_i32, %c0_i32_0 : i32, i32
  }
  func.func @transform_11(%arg0: i32) -> (i32, i32) {
    %c0_i32 = arith.constant 0 : i32
    %c0_i32_0 = arith.constant 0 : i32
    %c0_i32_1 = arith.constant 0 : i32
    return %c0_i32, %c0_i32_0 : i32, i32
  }
  func.func @transform_12(%arg0: i32) -> (i32, i32, i32) {
    %c0_i32 = arith.constant 0 : i32
    %c0_i32_0 = arith.constant 0 : i32
    %c0_i32_1 = arith.constant 0 : i32
    return %arg0, %c0_i32, %c0_i32_0 : i32, i32, i32
  }
}

</mosaic_0001>

<bundles_post_ra>
// kernel: se_basic_block_forward.1
= control target key start
LH: loop header
LB: loop body
LE: loop exit
PB: predicated region body
PF: predicated region fallthrough
CT: control target
= control target key end

     0   :  { %17 = vsyncpa [#allocation6], 0  ;;  %s20806_s0 = inlined_call_operand.vmem [shape: f32[2,18,18,128], index: 0, kind: input, shape index: {}]   ;;  %s20807_s1 = inlined_call_operand.vmem [shape: bf16[1152,256], index: 1, kind: input, shape index: {}]   ;;  %s20808_s2 = inlined_call_operand.vmem [shape: f32[1,256], index: 2, kind: input, shape index: {}]   ;;  %s20809_s3 = inlined_call_operand.vmem [shape: f32[1,256], index: 3, kind: input, shape index: {}]   ;;  %s20810_s4 = inlined_call_operand.vmem [shape: bf16[2304,256], index: 4, kind: input, shape index: {}]   ;;  %s20811_s5 = inlined_call_operand.vmem [shape: f32[1,256], index: 5, kind: input, shape index: {}]   ;;  %s20812_s6 = inlined_call_operand.vmem [shape: f32[1,256], index: 6, kind: input, shape index: {}]   ;;  %s20813_s7 = inlined_call_operand.vmem [shape: bf16[128,256], index: 7, kind: input, shape index: {}]   ;;  %s20814_s8 = inlined_call_operand.vmem [shape: f32[1,256], index: 8, kind: input, shape index: {}]   ;;  %s20815_s9 = inlined_call_operand.vmem [shape: f32[1,256], index: 9, kind: input, shape index: {}]   ;;  %s20816_s10 = inlined_call_operand.vmem [shape: f32[256,16], index: 10, kind: input, shape index: {}]   ;;  %s20817_s11 = inlined_call_operand.vmem [shape: f32[16,256], index: 11, kind: input, shape index: {}]   ;;  %s20818_s12 = inlined_call_operand.hbm [shape: f32[2,256,256], index: 12, kind: output, shape index: {}]  }
   0x1   :  { %19 = vsyncpa [#allocation6 + $0x1], 0  ;;  %s15330_s21 = smov 0   ;;  %s15332_s22 = smov 0  }
   0x2   :  { %s15334_s23 = smov 0   ;;  %s15336_s24 = smov 0  }
   0x3 LB: > { %21095 = sst [smem:[#allocation8_spill]] %s15253_s23  ;;  %s15351_s25 = sadd.s32 4294967295, %s15257_s24   ;;  %s15257_s24 = sphi %s15336_s24, %s22004_s24   ;;  %s15253_s23 = sphi %s15334_s23, %s22001_s23   ;;  %s15249_s22 = sphi %s15332_s22, %s22003_s22   ;;  %s15245_s21 = sphi %s15330_s21, %s22002_s21  }
   0x4   : > { %s12771_s26 = sadd.s32 4294967294, %s15257_s24   ;;  %s15355_s27 = sadd.s32 1, %s15257_s24  }
   0x5   : > { %s289_s28 = sadd.s32 1, %s15253_s23  ;;  %s286_s29 = ssub.s32 %s15257_s24, %s15355_s27 }
   0x6   : > { %p299_p0 = scmp.ne.s32.totalorder %s15253_s23, %s15249_s22  ;;  %p287_p1 = scmp.eq.s32.totalorder %s286_s29, 0 }
   0x7   : > { %p300_p2 = scmp.eq.s32.totalorder %s15351_s25, 1  ;;  %p305_p3 = scmp.ne.s32.totalorder %s15249_s22, %s15245_s21 }
   0x8   : > { %p306_p4 = scmp.eq.s32.totalorder %s12771_s26, 1  ;;  %p12774_p7 = scmp.ge.s32.totalorder %s15257_s24, 1 }
   0x9   : > { %s15366_s30 = scalar_select %p287_p1, %s15253_s23, %s289_s28  }
   0xa   : > { %p15368_p5 = por %p300_p2, %p299_p0  ;;  %p15372_p6 = por %p306_p4, %p305_p3 }
   0xb   : > { %21096 = sst [smem:[#allocation9_spill]] %s15366_s30  ;;  %p365_p8 = scmp.lt.s32.totalorder %s15257_s24, 3 }
   0xd   : > { %p366_p9 = pnand %p12774_p7, %p365_p8 }
   0xf   : > { %369 = sbr.rel (%p366_p9) target bundleno = 1880 (0x758), region = 68 }
  0x14   : > { %v14310_v0 = vld [vmem:[%s20807_s1 + $0x74] ss:$8 sps:$4 sm:$0xff]   ;;  %v14312_v1 = vld [vmem:[%s20807_s1 + $0x70] ss:$8 sps:$4 sm:$0xff]   ;;  %v14313_v2 = vld [vmem:[%s20807_s1 + $0x64] ss:$8 sps:$4 sm:$0xff]  }
  0x15   : > { %3255 = vmatprep.subr.bf16.mxu0 %v14310_v0  ;;  %14233 = vmatprep.subr.bf16.mxu1 %v14310_v0  ;;  %v14315_v3 = vld [vmem:[%s20807_s1 + $0x60] ss:$8 sps:$4 sm:$0xff]   ;;  %v14316_v4 = vld [vmem:[%s20807_s1 + $0x54] ss:$8 sps:$4 sm:$0xff]   ;;  %p407_p10 = scmp.lt.s32.totalorder %s15351_s25, 1  ;;  %vm675_vm0 = vcmask 1046528  }
  0x16   : > { %3256 = vmatpush1.bf16.msra.mxu0 %v14312_v1  ;;  %14249 = vmatpush1.bf16.msra.mxu1 %v14312_v1  ;;  %v14318_v5 = vld [vmem:[%s20807_s1 + $0x50] ss:$8 sps:$4 sm:$0xff]   ;;  %v14319_v6 = vld [vmem:[%s20807_s1 + $0x44] ss:$8 sps:$4 sm:$0xff]   ;;  %v14321_v7 = vld [vmem:[%s20807_s1 + $0x40] ss:$8 sps:$4 sm:$0xff]  }
  0x17   : > { %3257 = vmatprep.subr.bf16.mxu0 %v14313_v2  ;;  %14234 = vmatprep.subr.bf16.mxu1 %v14313_v2  ;;  %s408_s20 = scalar_select %p407_p10, %s15351_s25, 1  ;;  %v14322_v8 = vld [vmem:[%s20807_s1 + $0x34] ss:$8 sps:$4 sm:$0xff]   ;;  %v14324_v9 = vld [vmem:[%s20807_s1 + $0x30] ss:$8 sps:$4 sm:$0xff]   ;;  %vm948_vm1 = vcmask 1045504  }
  0x18   : > { %v14325_v10 = vld [vmem:[%s20807_s1 + $0x24] ss:$8 sps:$4 sm:$0xff]   ;;  %v14327_v11 = vld [vmem:[%s20807_s1 + $0x20] ss:$8 sps:$4 sm:$0xff]   ;;  %v14328_v12 = vld [vmem:[%s20807_s1 + $0x14] ss:$8 sps:$4 sm:$0xff]  }
  0x19   : > { %s14265_s16 = smul.u32 432, %s408_s20  ;;  %v14330_v13 = vld [vmem:[%s20807_s1 + $0x10] ss:$8 sps:$4 sm:$0xff]   ;;  %v14331_v28 = vld [vmem:[%s20807_s1 + $0x4] ss:$8 sps:$4 sm:$0xff]   ;;  %vm4885_vm2 = vcmask 1040384  }
  0x1a   : > { %3258 = vmatpush1.bf16.msra.mxu0 %v14315_v3  ;;  %14250 = vmatpush1.bf16.msra.mxu1 %v14315_v3  ;;  %v14333_v38 = vld [vmem:[%s20807_s1] ss:$8 sps:$4 sm:$0xff]   ;;  %v14334_v42 = vld [vmem:[%s20807_s1 + $0xf4] ss:$8 sps:$4 sm:$0xff]   ;;  %v14336_v46 = vld [vmem:[%s20807_s1 + $0xf0] ss:$8 sps:$4 sm:$0xff]  }
  0x1b   : > { %3259 = vmatprep.subr.bf16.mxu0 %v14316_v4  ;;  %14235 = vmatprep.subr.bf16.mxu1 %v14316_v4  ;;  %s15416_s23 = scalar_lea.vmem %s20806_s0, %s14265_s16  ;;  %v14337_v62 = vld [vmem:[%s20807_s1 + $0xe4] ss:$8 sps:$4 sm:$0xff]   ;;  %vm12472_vm3 = vcmask 130048   ;;  %s404_s16 = sand.u32 1, %s15249_s22  }
  0x1c   : > { %v413_v14 = vld [vmem:[%s15416_s23] sm:$0xff]  ;;  %v414_v15 = vld [vmem:[%s15416_s23 + $0x8] sm:$0xff]  ;;  %v415_v16 = vld [vmem:[%s15416_s23 + $0x10] sm:$0x3]  ;;  %s12775_s18 = sshll.u32 %s404_s16, 9  ;;  %s14097_s26 = sshll.u32 %s15351_s25, 13 }
  0x1d   : > { %v13881_v17 = vpack.c.bf16 %v413_v14, %v413_v14  ;;  %v13882_v18 = vpack.c.bf16 %v414_v15, %v414_v15  ;;  %v676_v19 = vrot.slane %v413_v14, 1  ;;  %v677_v20 = vrot.slane %v414_v15, 1  ;;  %v15431_v21 = vld [vmem:[%s15416_s23 + $0xc0] sm:$0xff]  ;;  %v15434_v22 = vld [vmem:[%s15416_s23 + $0xc8] sm:$0xff]  ;;  %v15437_v27 = vld [vmem:[%s15416_s23 + $0xd0] sm:$0x3]  ;;  %s20736_s20 = scalar_lea.hbm %s20818_s12, %s14097_s26 }
  0x1e   : > { %3260 = vmatpush1.bf16.msra.mxu0 %v14318_v5  ;;  %14251 = vmatpush1.bf16.msra.mxu1 %v14318_v5  ;;  %v679_v23 = vrot.slane %v415_v16, 1  ;;  %v949_v24 = vrot.slane %v413_v14, 2  ;;  %v950_v25 = vrot.slane %v414_v15, 2  ;;  %v952_v26 = vrot.slane %v415_v16, 2  ;;  %v416_v47 = vld [vmem:[%s15416_s23 + $0x18] sm:$0xff]  ;;  %v417_v50 = vld [vmem:[%s15416_s23 + $0x20] sm:$0xff] }
  0x1f   : > { %3261 = vmatprep.subr.bf16.mxu0 %v14319_v6  ;;  %14236 = vmatprep.subr.bf16.mxu1 %v14319_v6  ;;  %595 = vst [vmem:[#allocation2] sm:$0xf] %v13881_v17  ;;  %596 = vst [vmem:[#allocation2 + $0x24] sm:$0xf] %v13882_v18  ;;  %v678_v29 = vsel %vm675_vm0, %v676_v19, %v677_v20  ;;  %v13897_v30 = vpack.c.bf16 %v15431_v21, %v15431_v21  ;;  %v716_v32 = vrot.slane %v15431_v21, 1  ;;  %v15476_v55 = vld [vmem:[%s15416_s23 + $0xd8] sm:$0xff] }
  0x20   : > { %v13898_v31 = vpack.c.bf16 %v15434_v22, %v15434_v22  ;;  %v680_v33 = vsel %vm675_vm0, %v677_v20, %v679_v23  ;;  %v13913_v34 = vpack.c.bf16 %v678_v29, %v678_v29  ;;  %v717_v35 = vrot.slane %v15434_v22, 1  ;;  %v418_v51 = vld [vmem:[%s15416_s23 + $0x28] sm:$0x3]  ;;  %v15479_v60 = vld [vmem:[%s15416_s23 + $0xe0] sm:$0xff]  ;;  %v14340_v15 = vld [vmem:[%s20807_s1 + $0xd4] ss:$8 sps:$4 sm:$0xff]  }
  0x21   : > { %v719_v36 = vrot.slane %v15437_v27, 1  ;;  %v13914_v37 = vpack.c.bf16 %v680_v33, %v680_v33  ;;  %611 = vst [vmem:[#allocation2 + $0x240] sm:$0xf] %v13897_v30  ;;  %1243 = vst [vmem:[#allocation2 + $0x204] sm:$0xf] %v13897_v30  ;;  %v951_v41 = vsel %vm948_vm1, %v949_v24, %v950_v25  ;;  %v953_v45 = vsel %vm948_vm1, %v950_v25, %v952_v26  ;;  %v419_v29 = vld [vmem:[%s15416_s23 + $0x30] sm:$0xff] }
  0x22   : > { %3262 = vmatpush1.bf16.msra.mxu0 %v14321_v7  ;;  %14252 = vmatpush1.bf16.msra.mxu1 %v14321_v7  ;;  %612 = vst [vmem:[#allocation2 + $0x264] sm:$0xf] %v13898_v31  ;;  %1244 = vst [vmem:[#allocation2 + $0x228] sm:$0xf] %v13898_v31  ;;  %v15455_v39 = vsel %vm675_vm0, %v716_v32, %v717_v35  ;;  %v13945_v48 = vpack.c.bf16 %v951_v41, %v951_v41  ;;  %v681_v53 = vrot.slane %v416_v47, 1  ;;  %s20550_s19 = scalar_lea.vmem [#allocation5], %s12775_s18 }
  0x23   : > { %3263 = vmatprep.subr.bf16.mxu0 %v14322_v8  ;;  %14237 = vmatprep.subr.bf16.mxu1 %v14322_v8  ;;  %1378 = vst [vmem:[#allocation2 + $0x1c8] sm:$0xf] %v13897_v30  ;;  %1379 = vst [vmem:[#allocation2 + $0x1ec] sm:$0xf] %v13898_v31  ;;  %v15458_v40 = vsel %vm675_vm0, %v717_v35, %v719_v36  ;;  %v13929_v43 = vpack.c.bf16 %v15455_v39, %v15455_v39  ;;  %v954_v54 = vrot.slane %v416_v47, 2  ;;  %v15533_v30 = vld [vmem:[%s15416_s23 + $0x38] sm:$0xff] }
  0x24   : > { %916 = vst [vmem:[#allocation2 + $0x4] sm:$0xf] %v13913_v34  ;;  %21099 = vst [vmem:[#allocation10_spill] sm:$0xff] %v15455_v39  ;;  %v13930_v44 = vpack.c.bf16 %v15458_v40, %v15458_v40  ;;  %v13946_v49 = vpack.c.bf16 %v953_v45, %v953_v45  ;;  %v13883_v52 = vpack.c.bf16 %v416_v47, %v416_v47  ;;  %v682_v57 = vrot.slane %v417_v50, 1  ;;  %v15482_v61 = vld [vmem:[%s15416_s23 + $0xe8] sm:$0x3] }
  0x25   : > { %21100 = vst [vmem:[#allocation11_spill] sm:$0xff] %v15458_v40  ;;  %917 = vst [vmem:[#allocation2 + $0x28] sm:$0xf] %v13914_v37  ;;  %v13884_v56 = vpack.c.bf16 %v417_v50, %v417_v50  ;;  %v684_v58 = vrot.slane %v418_v51, 1  ;;  %v955_v59 = vrot.slane %v417_v50, 2  ;;  %v13899_v63 = vpack.c.bf16 %v15476_v55, %v15476_v55  ;;  %v15542_v35 = vld [vmem:[%s15416_s23 + $0xf0] sm:$0xff] }
  0x26   : > { %3264 = vmatpush1.bf16.msra.mxu0 %v14324_v9  ;;  %14253 = vmatpush1.bf16.msra.mxu1 %v14324_v9  ;;  %932 = vst [vmem:[#allocation2 + $0x244] sm:$0xf] %v13929_v43  ;;  %933 = vst [vmem:[#allocation2 + $0x268] sm:$0xf] %v13930_v44  ;;  %v13900_v0 = vpack.c.bf16 %v15479_v60, %v15479_v60  ;;  %v721_v1 = vrot.slane %v15476_v55, 1  ;;  %v722_v2 = vrot.slane %v15479_v60, 1 }
  0x27   : > { %3265 = vmatprep.subr.bf16.mxu0 %v14325_v10  ;;  %14238 = vmatprep.subr.bf16.mxu1 %v14325_v10  ;;  %1293 = vst [vmem:[#allocation2 + $0x208] sm:$0xf] %v13929_v43  ;;  %1294 = vst [vmem:[#allocation2 + $0x22c] sm:$0xf] %v13930_v44  ;;  %v15494_v3 = vsel %vm675_vm0, %v681_v53, %v682_v57  ;;  %v15497_v4 = vsel %vm675_vm0, %v682_v57, %v684_v58  ;;  %v724_v5 = vrot.slane %v15482_v61, 1  ;;  %v15545_v36 = vld [vmem:[%s15416_s23 + $0xf8] sm:$0xff] }
  0x28   : > { %1428 = vst [vmem:[#allocation2 + $0x1cc] sm:$0xf] %v13929_v43  ;;  %1429 = vst [vmem:[#allocation2 + $0x1f0] sm:$0xf] %v13930_v44  ;;  %v13915_v6 = vpack.c.bf16 %v15494_v3, %v15494_v3  ;;  %v13916_v7 = vpack.c.bf16 %v15497_v4, %v15497_v4  ;;  %v15505_v8 = vsel %vm675_vm0, %v721_v1, %v722_v2  ;;  %v14339_v9 = vld [vmem:[%s20807_s1 + $0xe0] ss:$8 sps:$4 sm:$0xff]  }
  0x29   : > { %1189 = vst [vmem:[#allocation2 + $0x8] sm:$0xf] %v13945_v48  ;;  %1190 = vst [vmem:[#allocation2 + $0x2c] sm:$0xf] %v13946_v49  ;;  %v957_v14 = vrot.slane %v418_v51, 2  ;;  %v989_v25 = vrot.slane %v15431_v21, 2  ;;  %v13885_v32 = vpack.c.bf16 %v419_v29, %v419_v29  ;;  %v13886_v21 = vpack.c.bf16 %v15533_v30, %v15533_v30 }
  0x2a   : > { %3266 = vmatpush1.bf16.msra.mxu0 %v14327_v11  ;;  %14254 = vmatpush1.bf16.msra.mxu1 %v14327_v11  ;;  %597 = vst [vmem:[#allocation2 + $0x48] sm:$0xf] %v13883_v52  ;;  %1229 = vst [vmem:[#allocation2 + $0xc] sm:$0xf] %v13883_v52  ;;  %v15511_v11 = vsel %vm675_vm0, %v722_v2, %v724_v5  ;;  %v14342_v23 = vld [vmem:[%s20807_s1 + $0xd0] ss:$8 sps:$4 sm:$0xff]   ;;  %v13902_v45 = vpack.c.bf16 %v15545_v36, %v15545_v36 }
  0x2b   : > { %3267 = vmatprep.subr.bf16.mxu0 %v14328_v12  ;;  %14239 = vmatprep.subr.bf16.mxu1 %v14328_v12  ;;  %598 = vst [vmem:[#allocation2 + $0x6c] sm:$0xf] %v13884_v56  ;;  %21101 = vst [vmem:[#allocation12_spill] sm:$0xff] %v15494_v3  ;;  %v13931_v12 = vpack.c.bf16 %v15505_v8, %v15505_v8  ;;  %v13932_v16 = vpack.c.bf16 %v15511_v11, %v15511_v11  ;;  %v14343_v24 = vld [vmem:[%s20807_s1 + $0xc4] ss:$8 sps:$4 sm:$0xff]   ;;  %v990_v26 = vrot.slane %v15434_v22, 2 }
  0x2c   : > { %21102 = vst [vmem:[#allocation13_spill] sm:$0xff] %v15497_v4  ;;  %1230 = vst [vmem:[#allocation2 + $0x30] sm:$0xf] %v13884_v56  ;;  %v14360_v10 = vld [vmem:[#allocation2 + $0x4] ss:$36 sps:$4 sm:$0xff]   ;;  %v958_v18 = vsel %vm948_vm1, %v955_v59, %v957_v14  ;;  %v686_v33 = vrot.slane %v419_v29, 1 }
  0x2d   : > { %613 = vst [vmem:[#allocation2 + $0x288] sm:$0xf] %v13899_v63  ;;  %614 = vst [vmem:[#allocation2 + $0x2ac] sm:$0xf] %v13900_v0  ;;  %3287 = vmatprep.mubr.bf16.mxu0 %v14360_v10  ;;  %v14363_v19 = vld [vmem:[#allocation2 + $0x244] ss:$36 sps:$4 sm:$0xff]   ;;  %v13948_v20 = vpack.c.bf16 %v958_v18, %v958_v18 }
  0x2e   : > { %3268 = vmatpush1.bf16.msra.mxu0 %v14330_v13  ;;  %14255 = vmatpush1.bf16.msra.mxu1 %v14330_v13  ;;  %21103 = vst [vmem:[#allocation14_spill] sm:$0xff] %v15505_v8  ;;  %1245 = vst [vmem:[#allocation2 + $0x24c] sm:$0xf] %v13899_v63  ;;  %v956_v13 = vsel %vm948_vm1, %v954_v54, %v955_v59  ;;  %v15536_v31 = vld [vmem:[%s15416_s23 + $0x40] sm:$0x3]  ;;  %v687_v34 = vrot.slane %v15533_v30, 1  ;;  %v991_v59 = vsel %vm948_vm1, %v989_v25, %v990_v26 }
  0x2f   : > { %3269 = vmatprep.subr.bf16.mxu0 %v14331_v28  ;;  %14240 = vmatprep.subr.bf16.mxu1 %v14331_v28  ;;  %1246 = vst [vmem:[#allocation2 + $0x270] sm:$0xf] %v13900_v0  ;;  %1380 = vst [vmem:[#allocation2 + $0x210] sm:$0xf] %v13899_v63  ;;  %v13947_v17 = vpack.c.bf16 %v956_v13, %v956_v13  ;;  %v992_v28 = vrot.slane %v15437_v27, 2  ;;  %v689_v37 = vrot.slane %v15536_v31, 1 }
  0x30   : > { %1381 = vst [vmem:[#allocation2 + $0x234] sm:$0xf] %v13900_v0  ;;  %21104 = vst [vmem:[#allocation15_spill] sm:$0xff] %v15511_v11  ;;  %3367 = vmatprep.mubr.bf16.mxu1 %v14363_v19  ;;  %v15548_v27 = vld [vmem:[%s15416_s23 + $0x100] sm:$0x3]  ;;  %v960_v41 = vrot.slane %v15533_v30, 2  ;;  %v15558_v44 = vsel %vm675_vm0, %v686_v33, %v687_v34  ;;  %v13961_v2 = vpack.c.bf16 %v991_v59, %v991_v59 }
  0x31   : > { %918 = vst [vmem:[#allocation2 + $0x4c] sm:$0xf] %v13915_v6  ;;  %919 = vst [vmem:[#allocation2 + $0x70] sm:$0xf] %v13916_v7  ;;  %v14345_v43 = vld [vmem:[%s20807_s1 + $0xc0] ss:$8 sps:$4 sm:$0xff]   ;;  %v15568_v49 = vsel %vm675_vm0, %v687_v34, %v689_v37  ;;  %v13917_v50 = vpack.c.bf16 %v15558_v44, %v15558_v44  ;;  %v993_v1 = vsel %vm948_vm1, %v990_v26, %v992_v28 }
  0x32   : > { %3270 = vmatpush1.bf16.msra.mxu0 %v14333_v38  ;;  %14256 = vmatpush1.bf16.msra.mxu1 %v14333_v38  ;;  %1279 = vst [vmem:[#allocation2 + $0x10] sm:$0xf] %v13915_v6  ;;  %1280 = vst [vmem:[#allocation2 + $0x34] sm:$0xf] %v13916_v7  ;;  %v959_v38 = vrot.slane %v419_v29, 2  ;;  %v727_v47 = vrot.slane %v15545_v36, 1  ;;  %v13918_v52 = vpack.c.bf16 %v15568_v49, %v15568_v49 }
  0x33   : > { %3271 = vmatprep.subr.bf16.mxu0 %v14334_v42  ;;  %14241 = vmatprep.subr.bf16.mxu1 %v14334_v42  ;;  %934 = vst [vmem:[#allocation2 + $0x28c] sm:$0xf] %v13931_v12  ;;  %1295 = vst [vmem:[#allocation2 + $0x250] sm:$0xf] %v13931_v12  ;;  %v13901_v42 = vpack.c.bf16 %v15542_v35, %v15542_v35  ;;  %v14346_v48 = vld [vmem:[%s20807_s1 + $0xb4] ss:$8 sps:$4 sm:$0xff]   ;;  %v13962_v6 = vpack.c.bf16 %v993_v1, %v993_v1 }
  0x34   : > { %1430 = vst [vmem:[#allocation2 + $0x214] sm:$0xf] %v13931_v12  ;;  %935 = vst [vmem:[#allocation2 + $0x2b0] sm:$0xf] %v13932_v16  ;;  %v729_v51 = vrot.slane %v15548_v27, 1  ;;  %v961_v54 = vsel %vm948_vm1, %v959_v38, %v960_v41  ;;  %v962_v0 = vrot.slane %v15536_v31, 2 }
  0x35   : > { %1296 = vst [vmem:[#allocation2 + $0x274] sm:$0xf] %v13932_v16  ;;  %1431 = vst [vmem:[#allocation2 + $0x238] sm:$0xf] %v13932_v16  ;;  %v13949_v58 = vpack.c.bf16 %v961_v54, %v961_v54  ;;  %v14349_v5 = vld [vmem:[%s20807_s1 + $0xa4] ss:$8 sps:$4 sm:$0xff]  }
  0x36   : > { %3272 = vmatpush2.bf16.msra.mxu0 %v14336_v46  ;;  %14257 = vmatpush2.bf16.msra.mxu1 %v14336_v46  ;;  %1326 = vst [vmem:[#allocation2 + $0x14] sm:$0xf] %v13947_v17  ;;  %1191 = vst [vmem:[#allocation2 + $0x50] sm:$0xf] %v13947_v17  ;;  %v726_v46 = vrot.slane %v15542_v35, 1  ;;  %v15580_v56 = vsel %vm675_vm0, %v727_v47, %v729_v51  ;;  %v963_v7 = vsel %vm948_vm1, %v960_v41, %v962_v0  ;;  %v422_v13 = vld [vmem:[%s15416_s23 + $0x48] sm:$0xff] }
  0x37   : > { %3273 = vmatprep.subr.bf16.mxu0 %v14337_v62  ;;  %14242 = vmatprep.subr.bf16.mxu1 %v14337_v62  ;;  %1327 = vst [vmem:[#allocation2 + $0x38] sm:$0xf] %v13948_v20  ;;  %1192 = vst [vmem:[#allocation2 + $0x74] sm:$0xf] %v13948_v20  ;;  %v14348_v62 = vld [vmem:[%s20807_s1 + $0xb0] ss:$8 sps:$4 sm:$0xff]   ;;  %v13934_v63 = vpack.c.bf16 %v15580_v56, %v15580_v56  ;;  %v13950_v16 = vpack.c.bf16 %v963_v7, %v963_v7 }
  0x38   : > { %599 = vst [vmem:[#allocation2 + $0x90] sm:$0xf] %v13885_v32  ;;  %600 = vst [vmem:[#allocation2 + $0xb4] sm:$0xf] %v13886_v21  ;;  %v15576_v53 = vsel %vm675_vm0, %v726_v46, %v727_v47  ;;  %v14351_v22 = vld [vmem:[%s20807_s1 + $0xa0] ss:$8 sps:$4 sm:$0xff]   ;;  %v13887_v17 = vpack.c.bf16 %v422_v13, %v422_v13 }
  0x39   : > { %21105 = vst [vmem:[#allocation16_spill] sm:$0xff] %v15558_v44  ;;  %1231 = vst [vmem:[#allocation2 + $0x54] sm:$0xf] %v13885_v32  ;;  %v13933_v57 = vpack.c.bf16 %v15576_v53, %v15576_v53  ;;  %v994_v10 = vrot.slane %v15476_v55, 2  ;;  %v995_v12 = vrot.slane %v15479_v60, 2  ;;  %v15610_v14 = vld [vmem:[%s15416_s23 + $0x50] sm:$0xff] }
  0x3a   : > { %3274 = vmatpush2.bf16.msra.mxu0 %v14339_v9  ;;  %14258 = vmatpush2.bf16.msra.mxu1 %v14339_v9  ;;  %1232 = vst [vmem:[#allocation2 + $0x78] sm:$0xf] %v13886_v21  ;;  %1366 = vst [vmem:[#allocation2 + $0x18] sm:$0xf] %v13885_v32  ;;  %v14352_v9 = vld [vmem:[%s20807_s1 + $0x94] ss:$8 sps:$4 sm:$0xff]   ;;  %v13888_v18 = vpack.c.bf16 %v15610_v14, %v15610_v14 }
  0x3b   : > { %3275 = vmatprep.subr.bf16.mxu0 %v14340_v15  ;;  %14243 = vmatprep.subr.bf16.mxu1 %v14340_v15  ;;  %1367 = vst [vmem:[#allocation2 + $0x3c] sm:$0xf] %v13886_v21  ;;  %21106 = vst [vmem:[#allocation17_spill] sm:$0xff] %v15568_v49  ;;  %v15613_v15 = vld [vmem:[%s15416_s23 + $0x58] sm:$0x3]  ;;  %v691_v19 = vrot.slane %v422_v13, 1  ;;  %v996_v54 = vsel %vm948_vm1, %v994_v10, %v995_v12 }
  0x3c   : > { %615 = vst [vmem:[#allocation2 + $0x2d0] sm:$0xf] %v13901_v42  ;;  %1247 = vst [vmem:[#allocation2 + $0x294] sm:$0xf] %v13901_v42  ;;  %v692_v20 = vrot.slane %v15610_v14, 1  ;;  %v694_v26 = vrot.slane %v15613_v15, 1 }
  0x3d   : > { %1382 = vst [vmem:[#allocation2 + $0x258] sm:$0xf] %v13901_v42  ;;  %616 = vst [vmem:[#allocation2 + $0x2f4] sm:$0xf] %v13902_v45  ;;  %v15625_v25 = vld [vmem:[%s15416_s23 + $0x118] sm:$0x3] }
  0x3e   : > { %3276 = vmatpush2.bf16.msra.mxu0 %v14342_v23  ;;  %14259 = vmatpush2.bf16.msra.mxu1 %v14342_v23  ;;  %21107 = vst [vmem:[#allocation18_spill] sm:$0xff] %v15576_v53  ;;  %1248 = vst [vmem:[#allocation2 + $0x2b8] sm:$0xf] %v13902_v45  ;;  %v15619_v23 = vld [vmem:[%s15416_s23 + $0x108] sm:$0xff]  ;;  %v964_v28 = vrot.slane %v422_v13, 2  ;;  %v965_v29 = vrot.slane %v15610_v14, 2  ;;  %v15632_v31 = vsel %vm675_vm0, %v691_v19, %v692_v20 }
  0x3f   : > { %3277 = vmatprep.subr.bf16.mxu0 %v14343_v24  ;;  %14244 = vmatprep.subr.bf16.mxu1 %v14343_v24  ;;  %1383 = vst [vmem:[#allocation2 + $0x27c] sm:$0xf] %v13902_v45  ;;  %920 = vst [vmem:[#allocation2 + $0x94] sm:$0xf] %v13917_v50  ;;  %v15622_v24 = vld [vmem:[%s15416_s23 + $0x110] sm:$0xff]  ;;  %v13903_v30 = vpack.c.bf16 %v15619_v23, %v15619_v23  ;;  %v731_v21 = vrot.slane %v15619_v23, 1  ;;  %v15639_v34 = vsel %vm675_vm0, %v692_v20, %v694_v26 }
  0x40   : > { %1281 = vst [vmem:[#allocation2 + $0x58] sm:$0xf] %v13917_v50  ;;  %1416 = vst [vmem:[#allocation2 + $0x1c] sm:$0xf] %v13917_v50  ;;  %v13904_v32 = vpack.c.bf16 %v15622_v24, %v15622_v24  ;;  %v732_v33 = vrot.slane %v15622_v24, 1  ;;  %v13919_v37 = vpack.c.bf16 %v15632_v31, %v15632_v31  ;;  %v734_v38 = vrot.slane %v15625_v25, 1 }
  0x41   : > { %21108 = vst [vmem:[#allocation19_spill] sm:$0xff] %v15580_v56  ;;  %921 = vst [vmem:[#allocation2 + $0xb8] sm:$0xf] %v13918_v52  ;;  %v966_v41 = vsel %vm948_vm1, %v964_v28, %v965_v29  ;;  %v14354_v42 = vld [vmem:[%s20807_s1 + $0x90] ss:$8 sps:$4 sm:$0xff]   ;;  %v967_v50 = vrot.slane %v15613_v15, 2 }
  0x42   : > { %3278 = vmatpush2.bf16.msra.mxu0 %v14345_v43  ;;  %14260 = vmatpush2.bf16.msra.mxu1 %v14345_v43  ;;  %1282 = vst [vmem:[#allocation2 + $0x7c] sm:$0xf] %v13918_v52  ;;  %1417 = vst [vmem:[#allocation2 + $0x40] sm:$0xf] %v13918_v52  ;;  %v13920_v43 = vpack.c.bf16 %v15639_v34, %v15639_v34  ;;  %v15651_v45 = vsel %vm675_vm0, %v731_v21, %v732_v33  ;;  %v14355_v46 = vld [vmem:[%s20807_s1 + $0x84] ss:$8 sps:$4 sm:$0xff]  }
  0x43   : > { %3279 = vmatprep.subr.bf16.mxu0 %v14346_v48  ;;  %14245 = vmatprep.subr.bf16.mxu1 %v14346_v48  ;;  %936 = vst [vmem:[#allocation2 + $0x2d4] sm:$0xf] %v13933_v57  ;;  %1297 = vst [vmem:[#allocation2 + $0x298] sm:$0xf] %v13933_v57  ;;  %v15657_v47 = vsel %vm675_vm0, %v732_v33, %v734_v38  ;;  %v13935_v48 = vpack.c.bf16 %v15651_v45, %v15651_v45  ;;  %v14366_v55 = vld [vmem:[%s20807_s1 + $0x174] ss:$8 sps:$4 sm:$0xff]  }
  0x44   : > { %1432 = vst [vmem:[#allocation2 + $0x25c] sm:$0xf] %v13933_v57  ;;  %1328 = vst [vmem:[#allocation2 + $0x5c] sm:$0xf] %v13949_v58  ;;  %v13951_v51 = vpack.c.bf16 %v966_v41, %v966_v41  ;;  %v13936_v52 = vpack.c.bf16 %v15657_v47, %v15657_v47  ;;  %v997_v57 = vrot.slane %v15482_v61, 2  ;;  %v968_v59 = vsel %vm948_vm1, %v965_v29, %v967_v50  ;;  %v15687_v7 = vld [vmem:[%s15416_s23 + $0x68] sm:$0xff] }
  0x45   : > { %1193 = vst [vmem:[#allocation2 + $0x98] sm:$0xf] %v13949_v58  ;;  %1463 = vst [vmem:[#allocation2 + $0x20] sm:$0xf] %v13949_v58  ;;  %v14357_v58 = vld [vmem:[%s20807_s1 + $0x80] ss:$8 sps:$4 sm:$0xff]   ;;  %v13952_v0 = vpack.c.bf16 %v968_v59, %v968_v59  ;;  %v13890_v15 = vpack.c.bf16 %v15687_v7, %v15687_v7 }
  0x46   : > { %937 = vst [vmem:[#allocation2 + $0x2f8] sm:$0xf] %v13934_v63  ;;  %1298 = vst [vmem:[#allocation2 + $0x2bc] sm:$0xf] %v13934_v63  ;;  %3280 = vmatpush2.bf16.msra.mxu0 %v14348_v62  ;;  %14261 = vmatpush2.bf16.msra.mxu1 %v14348_v62  ;;  %v13963_v62 = vpack.c.bf16 %v996_v54, %v996_v54  ;;  %v14369_v61 = vld [vmem:[%s20807_s1 + $0x274] ss:$8 sps:$4 sm:$0xff]   ;;  %v998_v1 = vsel %vm948_vm1, %v995_v12, %v997_v57 }
  0x47   : > { %1433 = vst [vmem:[#allocation2 + $0x280] sm:$0xf] %v13934_v63  ;;  %1340 = vst [vmem:[#allocation2 + $0x20c] sm:$0xf] %v13961_v2  ;;  %3281 = vmatprep.subr.bf16.mxu0 %v14349_v5  ;;  %14246 = vmatprep.subr.bf16.mxu1 %v14349_v5  ;;  %v999_v63 = vrot.slane %v15542_v35, 2  ;;  %v13964_v10 = vpack.c.bf16 %v998_v1, %v998_v1  ;;  %v1002_v60 = vrot.slane %v15548_v27, 2 }
  0x48   : > { %1205 = vst [vmem:[#allocation2 + $0x248] sm:$0xf] %v13961_v2  ;;  %1475 = vst [vmem:[#allocation2 + $0x1d0] sm:$0xf] %v13961_v2  ;;  %v14358_v2 = vld [vmem:[#allocation2] ss:$36 sps:$4 sm:$0xff]  }
  0x49   : > { %1341 = vst [vmem:[#allocation2 + $0x230] sm:$0xf] %v13962_v6  ;;  %1206 = vst [vmem:[#allocation2 + $0x26c] sm:$0xf] %v13962_v6  ;;  %v14361_v5 = vld [vmem:[#allocation2 + $0x240] ss:$36 sps:$4 sm:$0xff]  }
  0x4a   : > { %1476 = vst [vmem:[#allocation2 + $0x1f4] sm:$0xf] %v13962_v6  ;;  %1329 = vst [vmem:[#allocation2 + $0x80] sm:$0xf] %v13950_v16  ;;  %3282 = vmatpush2.bf16.msra.mxu0 %v14351_v22  ;;  %14262 = vmatpush2.bf16.msra.mxu1 %v14351_v22  ;;  %v1000_v6 = vrot.slane %v15545_v36, 2  ;;  %v425_v22 = vld [vmem:[%s15416_s23 + $0x60] sm:$0xff] }
  0x4b   : > { %1194 = vst [vmem:[#allocation2 + $0xbc] sm:$0xf] %v13950_v16  ;;  %1464 = vst [vmem:[#allocation2 + $0x44] sm:$0xf] %v13950_v16  ;;  %3283 = vmatprep.subr.bf16.mxu0 %v14352_v9  ;;  %14247 = vmatprep.subr.bf16.mxu1 %v14352_v9  ;;  %v15690_v9 = vld [vmem:[%s15416_s23 + $0x70] sm:$0x3]  ;;  %v13889_v14 = vpack.c.bf16 %v425_v22, %v425_v22 }
  0x4c   : > { %601 = vst [vmem:[#allocation2 + $0xd8] sm:$0xf] %v13887_v17  ;;  %602 = vst [vmem:[#allocation2 + $0xfc] sm:$0xf] %v13888_v18  ;;  %v14364_v12 = vld [vmem:[%s20807_s1 + $0x170] ss:$8 sps:$4 sm:$0xff]   ;;  %v1001_v1 = vsel %vm948_vm1, %v999_v63, %v1000_v6 }
  0x4d   : > { %21109 = vst [vmem:[#allocation20_spill] sm:$0xff] %v15632_v31  ;;  %1233 = vst [vmem:[#allocation2 + $0x9c] sm:$0xf] %v13887_v17  ;;  %v14367_v13 = vld [vmem:[%s20807_s1 + $0x270] ss:$8 sps:$4 sm:$0xff]   ;;  %v696_v16 = vrot.slane %v425_v22, 1  ;;  %v13965_v27 = vpack.c.bf16 %v1001_v1, %v1001_v1 }
  0x4e   : > { %1234 = vst [vmem:[#allocation2 + $0xc0] sm:$0xf] %v13888_v18  ;;  %1368 = vst [vmem:[#allocation2 + $0x60] sm:$0xf] %v13887_v17  ;;  %3284 = vmatpush2.bf16.msra.mxu0 %v14354_v42  ;;  %14263 = vmatpush2.bf16.msra.mxu1 %v14354_v42  ;;  %v697_v17 = vrot.slane %v15687_v7, 1  ;;  %v15706_v19 = vld [vmem:[%s15416_s23 + $0x128] sm:$0xff] }
  0x4f   : > { %1369 = vst [vmem:[#allocation2 + $0x84] sm:$0xf] %v13888_v18  ;;  %21110 = vst [vmem:[#allocation21_spill] sm:$0xff] %v15639_v34  ;;  %3285 = vmatprep.subr.bf16.mxu0 %v14355_v46  ;;  %14248 = vmatprep.subr.bf16.mxu1 %v14355_v46  ;;  %v15703_v18 = vld [vmem:[%s15416_s23 + $0x120] sm:$0xff]  ;;  %v15709_v20 = vld [vmem:[%s15416_s23 + $0x130] sm:$0x3]  ;;  %v13906_v33 = vpack.c.bf16 %v15706_v19, %v15706_v19 }
  0x50   : > { %617 = vst [vmem:[#allocation2 + $0x318] sm:$0xf] %v13903_v30  ;;  %1249 = vst [vmem:[#allocation2 + $0x2dc] sm:$0xf] %v13903_v30  ;;  %v699_v26 = vrot.slane %v15690_v9, 1  ;;  %v969_v28 = vrot.slane %v425_v22, 2  ;;  %v15719_v21 = vsel %vm675_vm0, %v696_v16, %v697_v17 }
  0x51   : > { %1384 = vst [vmem:[#allocation2 + $0x2a0] sm:$0xf] %v13903_v30  ;;  %618 = vst [vmem:[#allocation2 + $0x33c] sm:$0xf] %v13904_v32  ;;  %v970_v29 = vrot.slane %v15687_v7, 2  ;;  %v13905_v30 = vpack.c.bf16 %v15703_v18, %v15703_v18  ;;  %v737_v38 = vrot.slane %v15706_v19, 1  ;;  %v13921_v46 = vpack.c.bf16 %v15719_v21, %v15719_v21 }
  0x52   : > { %21111 = vst [vmem:[#allocation22_spill] sm:$0xff] %v15651_v45  ;;  %1250 = vst [vmem:[#allocation2 + $0x300] sm:$0xf] %v13904_v32  ;;  %3286 = vmatpush2.bf16.msra.mxu0 %v14357_v58  ;;  %14264 = vmatpush2.bf16.msra.mxu1 %v14357_v58  ;;  %v14375_v41 = vld [vmem:[%s20807_s1 + $0x264] ss:$8 sps:$4 sm:$0xff]   ;;  %v1005_v54 = vrot.slane %v15622_v24, 2 }
  0x53   : > { %1385 = vst [vmem:[#allocation2 + $0x2c4] sm:$0xf] %v13904_v32  ;;  %922 = vst [vmem:[#allocation2 + $0xdc] sm:$0xf] %v13919_v37  ;;  %v14372_v32 = vld [vmem:[%s20807_s1 + $0x164] ss:$8 sps:$4 sm:$0xff]   ;;  %3448 = vmatprep.subr.bf16.mxu1 %v14366_v55  ;;  %3641 = vmatprep.subr.bf16.mxu0 %v14369_v61  ;;  %v971_v50 = vsel %vm948_vm1, %v969_v28, %v970_v29 }
  0x54   : > { %1283 = vst [vmem:[#allocation2 + $0xa0] sm:$0xf] %v13919_v37  ;;  %1418 = vst [vmem:[#allocation2 + $0x64] sm:$0xf] %v13919_v37  ;;  %v736_v37 = vrot.slane %v15703_v18, 1  ;;  %v972_v24 = vrot.slane %v15690_v9, 2 }
  0x55   : > { %21112 = vst [vmem:[#allocation23_spill] sm:$0xff] %v15657_v47  ;;  %923 = vst [vmem:[#allocation2 + $0x100] sm:$0xf] %v13920_v43  ;;  %v14376_v42 = vld [vmem:[#allocation2 + $0x4c] ss:$36 sps:$4 sm:$0xff]   ;;  %3288 = vmatmul.mubr.bf16.vlgmr.msra.gmra.mxu0 %v14358_v2  ;;  %3368 = vmatmul.mubr.bf16.vlgmr.msra.gmra.mxu1 %v14361_v5  ;;  %v1003_v2 = vsel %vm948_vm1, %v1000_v6, %v1002_v60  ;;  %v1007_v5 = vrot.slane %v15625_v25, 2 }
  0x56   : > { %1284 = vst [vmem:[#allocation2 + $0xc4] sm:$0xf] %v13920_v43  ;;  %1419 = vst [vmem:[#allocation2 + $0x88] sm:$0xf] %v13920_v43  ;;  %v15729_v43 = vsel %vm675_vm0, %v697_v17, %v699_v26  ;;  %v15742_v58 = vsel %vm675_vm0, %v736_v37, %v737_v38  ;;  %3449 = vmatpush1.bf16.msra.mxu1 %v14364_v12  ;;  %3642 = vmatpush1.bf16.msra.mxu0 %v14367_v13  ;;  %v14370_v55 = vld [vmem:[%s20807_s1 + $0x160] ss:$8 sps:$4 sm:$0xff]  }
  0x57   : > { %938 = vst [vmem:[#allocation2 + $0x31c] sm:$0xf] %v13935_v48  ;;  %1299 = vst [vmem:[#allocation2 + $0x2e0] sm:$0xf] %v13935_v48  ;;  %v13922_v57 = vpack.c.bf16 %v15729_v43, %v15729_v43  ;;  %v14373_v61 = vld [vmem:[%s20807_s1 + $0x260] ss:$8 sps:$4 sm:$0xff]   ;;  %3450 = vmatprep.subr.bf16.mxu1 %v14372_v32  ;;  %3643 = vmatprep.subr.bf16.mxu0 %v14375_v41  ;;  %v973_v36 = vsel %vm948_vm1, %v970_v29, %v972_v24 }
  0x58   : > { %1434 = vst [vmem:[#allocation2 + $0x2a4] sm:$0xf] %v13935_v48  ;;  %1330 = vst [vmem:[#allocation2 + $0xa4] sm:$0xf] %v13951_v51  ;;  %v739_v48 = vrot.slane %v15709_v20, 1  ;;  %v13966_v25 = vpack.c.bf16 %v1003_v2, %v1003_v2  ;;  %3297 = vmatprep.mubr.bf16.mxu0 %v14376_v42  ;;  %v1008_v12 = vsel %vm948_vm1, %v1005_v54, %v1007_v5  ;;  %v1010_v16 = vrot.slane %v15706_v19, 2 }
  0x59   : > { %1195 = vst [vmem:[#allocation2 + $0xe0] sm:$0xf] %v13951_v51  ;;  %1465 = vst [vmem:[#allocation2 + $0x68] sm:$0xf] %v13951_v51  ;;  %v14378_v51 = vld [vmem:[#allocation2 + $0x28c] ss:$36 sps:$4 sm:$0xff]  }
  0x5a   : > { %939 = vst [vmem:[#allocation2 + $0x340] sm:$0xf] %v13936_v52  ;;  %1300 = vst [vmem:[#allocation2 + $0x304] sm:$0xf] %v13936_v52  ;;  %v15745_v59 = vsel %vm675_vm0, %v737_v38, %v739_v48  ;;  %v14384_v22 = vld [vmem:[%s20807_s1 + $0x154] ss:$8 sps:$4 sm:$0xff]   ;;  %3377 = vmatprep.mubr.bf16.mxu1 %v14378_v51  ;;  %3451 = vmatpush1.bf16.msra.mxu1 %v14370_v55 }
  0x5b   : > { %1435 = vst [vmem:[#allocation2 + $0x2c8] sm:$0xf] %v13936_v52  ;;  %1342 = vst [vmem:[#allocation2 + $0x254] sm:$0xf] %v13963_v62  ;;  %v1004_v52 = vrot.slane %v15619_v23, 2  ;;  %v13937_v23 = vpack.c.bf16 %v15742_v58, %v15742_v58  ;;  %v428_v17 = vld [vmem:[%s15416_s23 + $0x78] sm:$0xff]  ;;  %3644 = vmatpush1.bf16.msra.mxu0 %v14373_v61  ;;  %3452 = vmatprep.subr.bf16.mxu1 %v14384_v22 }
  0x5c   : > { %1207 = vst [vmem:[#allocation2 + $0x290] sm:$0xf] %v13963_v62  ;;  %1477 = vst [vmem:[#allocation2 + $0x218] sm:$0xf] %v13963_v62  ;;  %v13953_v62 = vpack.c.bf16 %v971_v50, %v971_v50  ;;  %v14387_v35 = vld [vmem:[%s20807_s1 + $0x254] ss:$8 sps:$4 sm:$0xff]  }
  0x5d   : > { %1331 = vst [vmem:[#allocation2 + $0xc8] sm:$0xf] %v13952_v0  ;;  %1196 = vst [vmem:[#allocation2 + $0x104] sm:$0xf] %v13952_v0  ;;  %v14380_v63 = vld [vmem:[#allocation2 + $0x48] ss:$36 sps:$4 sm:$0xff]   ;;  %v1006_v60 = vsel %vm948_vm1, %v1004_v52, %v1005_v54  ;;  %3645 = vmatprep.subr.bf16.mxu0 %v14387_v35 }
  0x5e   : > { %1466 = vst [vmem:[#allocation2 + $0x8c] sm:$0xf] %v13952_v0  ;;  %1343 = vst [vmem:[#allocation2 + $0x278] sm:$0xf] %v13964_v10  ;;  %v13938_v0 = vpack.c.bf16 %v15745_v59, %v15745_v59  ;;  %v14381_v6 = vld [vmem:[#allocation2 + $0x288] ss:$36 sps:$4 sm:$0xff]   ;;  %v13967_v29 = vpack.c.bf16 %v1006_v60, %v1006_v60  ;;  %3298 = vmatmul.mubr.bf16.gmra.mxu0 %v14380_v63 }
  0x5f   : > { %1208 = vst [vmem:[#allocation2 + $0x2b4] sm:$0xf] %v13964_v10  ;;  %1478 = vst [vmem:[#allocation2 + $0x23c] sm:$0xf] %v13964_v10  ;;  %v15781_v9 = vld [vmem:[%s20807_s1 + $0x150] ss:$8 sps:$4 sm:$0xff]   ;;  %v13954_v10 = vpack.c.bf16 %v973_v36, %v973_v36  ;;  %3378 = vmatmul.mubr.bf16.gmra.mxu1 %v14381_v6 }
  0x60   : > { %603 = vst [vmem:[#allocation2 + $0x120] sm:$0xf] %v13889_v14  ;;  %604 = vst [vmem:[#allocation2 + $0x144] sm:$0xf] %v13890_v15  ;;  %v15786_v7 = vld [vmem:[%s20807_s1 + $0x250] ss:$8 sps:$4 sm:$0xff]   ;;  %3453 = vmatpush1.bf16.msra.mxu1 %v15781_v9 }
  0x61   : > { %21113 = vst [vmem:[#allocation24_spill] sm:$0xff] %v15719_v21  ;;  %1235 = vst [vmem:[#allocation2 + $0xe4] sm:$0xf] %v13889_v14  ;;  %v15793_v13 = vld [vmem:[%s20807_s1 + $0x144] ss:$8 sps:$4 sm:$0xff]   ;;  %v701_v38 = vrot.slane %v428_v17, 1  ;;  %3646 = vmatpush1.bf16.msra.mxu0 %v15786_v7 }
  0x62   : > { %1236 = vst [vmem:[#allocation2 + $0x108] sm:$0xf] %v13890_v15  ;;  %1370 = vst [vmem:[#allocation2 + $0xa8] sm:$0xf] %v13889_v14  ;;  %v15798_v14 = vld [vmem:[%s20807_s1 + $0x244] ss:$8 sps:$4 sm:$0xff]   ;;  %3454 = vmatprep.subr.bf16.mxu1 %v15793_v13 }
  0x63   : > { %1371 = vst [vmem:[#allocation2 + $0xcc] sm:$0xf] %v13890_v15  ;;  %21114 = vst [vmem:[#allocation25_spill] sm:$0xff] %v15729_v43  ;;  %v1009_v15 = vrot.slane %v15703_v18, 2  ;;  %v15804_v26 = vld [vmem:[%s15416_s23 + $0x80] sm:$0xff]  ;;  %v15815_v42 = vld [vmem:[%s15416_s23 + $0x138] sm:$0xff]  ;;  %3647 = vmatprep.subr.bf16.mxu0 %v15798_v14 }
  0x64   : > { %619 = vst [vmem:[#allocation2 + $0x360] sm:$0xf] %v13905_v30  ;;  %1251 = vst [vmem:[#allocation2 + $0x324] sm:$0xf] %v13905_v30  ;;  %v15807_v28 = vld [vmem:[%s15416_s23 + $0x88] sm:$0x3]  ;;  %v13892_v37 = vpack.c.bf16 %v15804_v26, %v15804_v26  ;;  %v13907_v54 = vpack.c.bf16 %v15815_v42, %v15815_v42 }
  0x65   : > { %1386 = vst [vmem:[#allocation2 + $0x2e8] sm:$0xf] %v13905_v30  ;;  %620 = vst [vmem:[#allocation2 + $0x384] sm:$0xf] %v13906_v33  ;;  %v13968_v30 = vpack.c.bf16 %v1008_v12, %v1008_v12  ;;  %v15809_v32 = vld [vmem:[#allocation2 + $0x94] ss:$36 sps:$4 sm:$0xff]   ;;  %v1011_v13 = vsel %vm948_vm1, %v1009_v15, %v1010_v16 }
  0x66   : > { %21115 = vst [vmem:[#allocation26_spill] sm:$0xff] %v15742_v58  ;;  %1252 = vst [vmem:[#allocation2 + $0x348] sm:$0xf] %v13906_v33  ;;  %v702_v41 = vrot.slane %v15804_v26, 1  ;;  %v15821_v48 = vld [vmem:[%s15416_s23 + $0x148] sm:$0x3]  ;;  %3307 = vmatprep.mubr.bf16.mxu0 %v15809_v32 }
  0x67   : > { %1387 = vst [vmem:[#allocation2 + $0x30c] sm:$0xf] %v13906_v33  ;;  %924 = vst [vmem:[#allocation2 + $0x124] sm:$0xf] %v13921_v46  ;;  %v13891_v33 = vpack.c.bf16 %v428_v17, %v428_v17  ;;  %v704_v50 = vrot.slane %v15807_v28, 1  ;;  %v974_v51 = vrot.slane %v428_v17, 2 }
  0x68   : > { %1285 = vst [vmem:[#allocation2 + $0xe8] sm:$0xf] %v13921_v46  ;;  %1420 = vst [vmem:[#allocation2 + $0xac] sm:$0xf] %v13921_v46  ;;  %v15818_v46 = vld [vmem:[%s15416_s23 + $0x140] sm:$0xff]  ;;  %v975_v52 = vrot.slane %v15804_v26, 2 }
  0x69   : > { %21116 = vst [vmem:[#allocation27_spill] sm:$0xff] %v15745_v59  ;;  %925 = vst [vmem:[#allocation2 + $0x148] sm:$0xf] %v13922_v57  ;;  %v13908_v24 = vpack.c.bf16 %v15818_v46, %v15818_v46  ;;  %v742_v55 = vrot.slane %v15818_v46, 1  ;;  %v14388_v61 = vld [vmem:[%s20807_s1 + $0x140] ss:$8 sps:$4 sm:$0xff]  }
  0x6a   : > { %1286 = vst [vmem:[#allocation2 + $0x10c] sm:$0xf] %v13922_v57  ;;  %1421 = vst [vmem:[#allocation2 + $0xd0] sm:$0xf] %v13922_v57  ;;  %v14396_v57 = vld [vmem:[#allocation2 + $0x2d4] ss:$36 sps:$4 sm:$0xff]   ;;  %v976_v5 = vsel %vm948_vm1, %v974_v51, %v975_v52  ;;  %3455 = vmatpush1.bf16.msra.mxu1 %v14388_v61 }
  0x6b   : > { %940 = vst [vmem:[#allocation2 + $0x364] sm:$0xf] %v13937_v23  ;;  %1301 = vst [vmem:[#allocation2 + $0x328] sm:$0xf] %v13937_v23  ;;  %v744_v2 = vrot.slane %v15821_v48, 1  ;;  %v977_v9 = vrot.slane %v15807_v28, 2  ;;  %v13955_v7 = vpack.c.bf16 %v976_v5, %v976_v5  ;;  %3387 = vmatprep.mubr.bf16.mxu1 %v14396_v57 }
  0x6c   : > { %1436 = vst [vmem:[#allocation2 + $0x2ec] sm:$0xf] %v13937_v23  ;;  %1332 = vst [vmem:[#allocation2 + $0xec] sm:$0xf] %v13953_v62  ;;  %v15828_v23 = vsel %vm675_vm0, %v701_v38, %v702_v41  ;;  %v14391_v22 = vld [vmem:[%s20807_s1 + $0x240] ss:$8 sps:$4 sm:$0xff]  }
  0x6d   : > { %1197 = vst [vmem:[#allocation2 + $0x128] sm:$0xf] %v13953_v62  ;;  %1467 = vst [vmem:[#allocation2 + $0xb0] sm:$0xf] %v13953_v62  ;;  %v741_v62 = vrot.slane %v15815_v42, 1  ;;  %v13923_v1 = vpack.c.bf16 %v15828_v23, %v15828_v23  ;;  %v15865_v63 = vsel %vm675_vm0, %v742_v55, %v744_v2  ;;  %v1012_v14 = vrot.slane %v15709_v20, 2  ;;  %3648 = vmatpush1.bf16.msra.mxu0 %v14391_v22 }
  0x6e   : > { %941 = vst [vmem:[#allocation2 + $0x388] sm:$0xf] %v13938_v0  ;;  %1302 = vst [vmem:[#allocation2 + $0x34c] sm:$0xf] %v13938_v0  ;;  %v14403_v60 = vld [vmem:[%s20807_s1 + $0x230] ss:$8 sps:$4 sm:$0xff]   ;;  %v13940_v12 = vpack.c.bf16 %v15865_v63, %v15865_v63  ;;  %v978_v18 = vsel %vm948_vm1, %v975_v52, %v977_v9  ;;  %v13969_v20 = vpack.c.bf16 %v1011_v13, %v1011_v13 }
  0x6f   : > { %1437 = vst [vmem:[#allocation2 + $0x310] sm:$0xf] %v13938_v0  ;;  %1344 = vst [vmem:[#allocation2 + $0x29c] sm:$0xf] %v13965_v27  ;;  %v15838_v0 = vsel %vm675_vm0, %v702_v41, %v704_v50  ;;  %v15854_v36 = vsel %vm675_vm0, %v741_v62, %v742_v55  ;;  %v14398_v17 = vld [vmem:[#allocation2 + $0x90] ss:$36 sps:$4 sm:$0xff]   ;;  %v1013_v26 = vsel %vm948_vm1, %v1010_v16, %v1012_v14 }
  0x70   : > { %1345 = vst [vmem:[#allocation2 + $0x2c0] sm:$0xf] %v13966_v25  ;;  %1209 = vst [vmem:[#allocation2 + $0x2d8] sm:$0xf] %v13965_v27  ;;  %v13924_v35 = vpack.c.bf16 %v15838_v0, %v15838_v0  ;;  %v13939_v6 = vpack.c.bf16 %v15854_v36, %v15854_v36  ;;  %v14399_v28 = vld [vmem:[#allocation2 + $0x2d0] ss:$36 sps:$4 sm:$0xff]   ;;  %v13970_v52 = vpack.c.bf16 %v1013_v26, %v1013_v26  ;;  %3308 = vmatmul.mubr.bf16.gmra.mxu0 %v14398_v17 }
  0x71   : > { %1210 = vst [vmem:[#allocation2 + $0x2fc] sm:$0xf] %v13966_v25  ;;  %1479 = vst [vmem:[#allocation2 + $0x260] sm:$0xf] %v13965_v27  ;;  %v14402_v27 = vld [vmem:[%s20807_s1 + $0x134] ss:$8 sps:$4 sm:$0xff]   ;;  %3388 = vmatmul.mubr.bf16.gmra.mxu1 %v14399_v28 }
  0x72   : > { %1480 = vst [vmem:[#allocation2 + $0x284] sm:$0xf] %v13966_v25  ;;  %1333 = vst [vmem:[#allocation2 + $0x110] sm:$0xf] %v13954_v10  ;;  %v14405_v25 = vld [vmem:[%s20807_s1 + $0x234] ss:$8 sps:$4 sm:$0xff]   ;;  %3456 = vmatprep.subr.bf16.mxu1 %v14402_v27 }
  0x73   : > { %1198 = vst [vmem:[#allocation2 + $0x14c] sm:$0xf] %v13954_v10  ;;  %1468 = vst [vmem:[#allocation2 + $0xd4] sm:$0xf] %v13954_v10  ;;  %v14400_v10 = vld [vmem:[%s20807_s1 + $0x130] ss:$8 sps:$4 sm:$0xff]   ;;  %3649 = vmatprep.subr.bf16.mxu0 %v14405_v25 }
  0x74   : > { %1346 = vst [vmem:[#allocation2 + $0x2e4] sm:$0xf] %v13967_v29  ;;  %1347 = vst [vmem:[#allocation2 + $0x308] sm:$0xf] %v13968_v30  ;;  %v15894_v15 = vld [vmem:[#allocation2 + $0xdc] ss:$36 sps:$4 sm:$0xff]   ;;  %3457 = vmatpush1.bf16.msra.mxu1 %v14400_v10  ;;  %3650 = vmatpush1.bf16.msra.mxu0 %v14403_v60 }
  0x75   : > { %1211 = vst [vmem:[#allocation2 + $0x320] sm:$0xf] %v13967_v29  ;;  %1212 = vst [vmem:[#allocation2 + $0x344] sm:$0xf] %v13968_v30  ;;  %v14414_v32 = vld [vmem:[#allocation2 + $0x31c] ss:$36 sps:$4 sm:$0xff]   ;;  %3317 = vmatprep.mubr.bf16.mxu0 %v15894_v15 }
  0x76   : > { %1481 = vst [vmem:[#allocation2 + $0x2a8] sm:$0xf] %v13967_v29  ;;  %1482 = vst [vmem:[#allocation2 + $0x2cc] sm:$0xf] %v13968_v30  ;;  %v14408_v29 = vld [vmem:[%s20807_s1 + $0x124] ss:$8 sps:$4 sm:$0xff]   ;;  %3397 = vmatprep.mubr.bf16.mxu1 %v14414_v32 }
  0x77   : > { %605 = vst [vmem:[#allocation2 + $0x168] sm:$0xf] %v13891_v33  ;;  %606 = vst [vmem:[#allocation2 + $0x18c] sm:$0xf] %v13892_v37  ;;  %v14411_v30 = vld [vmem:[%s20807_s1 + $0x224] ss:$8 sps:$4 sm:$0xff]   ;;  %3458 = vmatprep.subr.bf16.mxu1 %v14408_v29 }
  0x78   : > { %21117 = vst [vmem:[#allocation28_spill] sm:$0xff] %v15828_v23  ;;  %1237 = vst [vmem:[#allocation2 + $0x12c] sm:$0xf] %v13891_v33  ;;  %v1015_v38 = vrot.slane %v15818_v46, 2  ;;  %v431_v41 = vld [vmem:[%s15416_s23 + $0x90] sm:$0xff]  ;;  %v15903_v50 = vld [vmem:[%s15416_s23 + $0x98] sm:$0xff]  ;;  %3651 = vmatprep.subr.bf16.mxu0 %v14411_v30 }
  0x79   : > { %1238 = vst [vmem:[#allocation2 + $0x150] sm:$0xf] %v13892_v37  ;;  %1372 = vst [vmem:[#allocation2 + $0xf0] sm:$0xf] %v13891_v33  ;;  %v13956_v33 = vpack.c.bf16 %v978_v18, %v978_v18  ;;  %v15906_v51 = vld [vmem:[%s15416_s23 + $0xa0] sm:$0x3]  ;;  %v13893_v16 = vpack.c.bf16 %v431_v41, %v431_v41 }
  0x7a   : > { %1373 = vst [vmem:[#allocation2 + $0x114] sm:$0xf] %v13892_v37  ;;  %21118 = vst [vmem:[#allocation29_spill] sm:$0xff] %v15838_v0  ;;  %v1014_v37 = vrot.slane %v15815_v42, 2  ;;  %v14406_v19 = vld [vmem:[%s20807_s1 + $0x120] ss:$8 sps:$4 sm:$0xff]  }
  0x7b   : > { %621 = vst [vmem:[#allocation2 + $0x3a8] sm:$0xf] %v13907_v54  ;;  %1253 = vst [vmem:[#allocation2 + $0x36c] sm:$0xf] %v13907_v54  ;;  %v706_v57 = vrot.slane %v431_v41, 1  ;;  %v15915_v62 = vld [vmem:[%s15416_s23 + $0x150] sm:$0xff]  ;;  %3459 = vmatpush1.bf16.msra.mxu1 %v14406_v19 }
  0x7c   : > { %1388 = vst [vmem:[#allocation2 + $0x330] sm:$0xf] %v13907_v54  ;;  %622 = vst [vmem:[#allocation2 + $0x3cc] sm:$0xf] %v13908_v24  ;;  %v13894_v54 = vpack.c.bf16 %v15903_v50, %v15903_v50  ;;  %v15918_v55 = vld [vmem:[%s15416_s23 + $0x158] sm:$0xff]  ;;  %v979_v2 = vrot.slane %v431_v41, 2  ;;  %v13909_v22 = vpack.c.bf16 %v15915_v62, %v15915_v62 }
  0x7d   : > { %21119 = vst [vmem:[#allocation30_spill] sm:$0xff] %v15854_v36  ;;  %1254 = vst [vmem:[#allocation2 + $0x390] sm:$0xf] %v13908_v24  ;;  %v15921_v61 = vld [vmem:[%s15416_s23 + $0x160] sm:$0x3]  ;;  %v980_v5 = vrot.slane %v15903_v50, 2  ;;  %v13910_v25 = vpack.c.bf16 %v15918_v55, %v15918_v55 }
  0x7e   : > { %1389 = vst [vmem:[#allocation2 + $0x354] sm:$0xf] %v13908_v24  ;;  %926 = vst [vmem:[#allocation2 + $0x16c] sm:$0xf] %v13923_v1  ;;  %v707_v24 = vrot.slane %v15903_v50, 1  ;;  %v747_v9 = vrot.slane %v15918_v55, 1 }
  0x7f   : > { %1287 = vst [vmem:[#allocation2 + $0x130] sm:$0xf] %v13923_v1  ;;  %1422 = vst [vmem:[#allocation2 + $0xf4] sm:$0xf] %v13923_v1  ;;  %v709_v1 = vrot.slane %v15906_v51, 1  ;;  %v749_v13 = vrot.slane %v15921_v61, 1  ;;  %v981_v14 = vsel %vm948_vm1, %v979_v2, %v980_v5 }
  0x80   : > { %21120 = vst [vmem:[#allocation31_spill] sm:$0xff] %v15865_v63  ;;  %927 = vst [vmem:[#allocation2 + $0x190] sm:$0xf] %v13924_v35  ;;  %v15931_v27 = vsel %vm675_vm0, %v706_v57, %v707_v24  ;;  %v14423_v10 = vld [vmem:[%s20807_s1 + $0x214] ss:$8 sps:$4 sm:$0xff]   ;;  %v982_v15 = vrot.slane %v15906_v51, 2  ;;  %v13957_v32 = vpack.c.bf16 %v981_v14, %v981_v14  ;;  %v1016_v51 = vsel %vm948_vm1, %v1014_v37, %v1015_v38 }
  0x81   : > { %1288 = vst [vmem:[#allocation2 + $0x154] sm:$0xf] %v13924_v35  ;;  %1423 = vst [vmem:[#allocation2 + $0x118] sm:$0xf] %v13924_v35  ;;  %v14409_v35 = vld [vmem:[%s20807_s1 + $0x220] ss:$8 sps:$4 sm:$0xff]   ;;  %v15944_v60 = vsel %vm675_vm0, %v707_v24, %v709_v1  ;;  %v15959_v18 = vsel %vm675_vm0, %v747_v9, %v749_v13 }
  0x82   : > { %942 = vst [vmem:[#allocation2 + $0x3ac] sm:$0xf] %v13939_v6  ;;  %1303 = vst [vmem:[#allocation2 + $0x370] sm:$0xf] %v13939_v6  ;;  %v13926_v17 = vpack.c.bf16 %v15944_v60, %v15944_v60  ;;  %v14416_v29 = vld [vmem:[#allocation2 + $0xd8] ss:$36 sps:$4 sm:$0xff]   ;;  %3652 = vmatpush1.bf16.msra.mxu0 %v14409_v35  ;;  %v13942_v41 = vpack.c.bf16 %v15959_v18, %v15959_v18  ;;  %v983_v42 = vsel %vm948_vm1, %v980_v5, %v982_v15 }
  0x83   : > { %1438 = vst [vmem:[#allocation2 + $0x334] sm:$0xf] %v13939_v6  ;;  %1334 = vst [vmem:[#allocation2 + $0x134] sm:$0xf] %v13955_v7  ;;  %v746_v6 = vrot.slane %v15915_v62, 1  ;;  %3653 = vmatprep.subr.bf16.mxu0 %v14423_v10  ;;  %v13958_v24 = vpack.c.bf16 %v983_v42, %v983_v42  ;;  %3318 = vmatmul.mubr.bf16.gmra.mxu0 %v14416_v29  ;;  %v1020_v46 = vrot.slane %v15918_v55, 2 }
  0x84   : > { %1199 = vst [vmem:[#allocation2 + $0x170] sm:$0xf] %v13955_v7  ;;  %1469 = vst [vmem:[#allocation2 + $0xf8] sm:$0xf] %v13955_v7  ;;  %v14420_v7 = vld [vmem:[%s20807_s1 + $0x114] ss:$8 sps:$4 sm:$0xff]  }
  0x85   : > { %943 = vst [vmem:[#allocation2 + $0x3d0] sm:$0xf] %v13940_v12  ;;  %1304 = vst [vmem:[#allocation2 + $0x394] sm:$0xf] %v13940_v12  ;;  %v15956_v28 = vsel %vm675_vm0, %v746_v6, %v747_v9  ;;  %v14417_v30 = vld [vmem:[#allocation2 + $0x318] ss:$36 sps:$4 sm:$0xff]   ;;  %3460 = vmatprep.subr.bf16.mxu1 %v14420_v7 }
  0x86   : > { %1439 = vst [vmem:[#allocation2 + $0x358] sm:$0xf] %v13940_v12  ;;  %1348 = vst [vmem:[#allocation2 + $0x32c] sm:$0xf] %v13969_v20  ;;  %v13925_v12 = vpack.c.bf16 %v15931_v27, %v15931_v27  ;;  %v14421_v26 = vld [vmem:[%s20807_s1 + $0x210] ss:$8 sps:$4 sm:$0xff]   ;;  %3398 = vmatmul.mubr.bf16.gmra.mxu1 %v14417_v30 }
  0x87   : > { %1213 = vst [vmem:[#allocation2 + $0x368] sm:$0xf] %v13969_v20  ;;  %1483 = vst [vmem:[#allocation2 + $0x2f0] sm:$0xf] %v13969_v20  ;;  %v13941_v20 = vpack.c.bf16 %v15956_v28, %v15956_v28  ;;  %v14426_v19 = vld [vmem:[%s20807_s1 + $0x104] ss:$8 sps:$4 sm:$0xff]   ;;  %3654 = vmatpush1.bf16.msra.mxu0 %v14421_v26 }
  0x88   : > { %1335 = vst [vmem:[#allocation2 + $0x158] sm:$0xf] %v13956_v33  ;;  %1200 = vst [vmem:[#allocation2 + $0x194] sm:$0xf] %v13956_v33  ;;  %v15990_v37 = vld [vmem:[%s20807_s1 + $0x100] ss:$8 sps:$4 sm:$0xff]  }
  0x89   : > { %1470 = vst [vmem:[#allocation2 + $0x11c] sm:$0xf] %v13956_v33  ;;  %1349 = vst [vmem:[#allocation2 + $0x350] sm:$0xf] %v13970_v52  ;;  %v14418_v33 = vld [vmem:[%s20807_s1 + $0x110] ss:$8 sps:$4 sm:$0xff]  }
  0x8a   : > { %1214 = vst [vmem:[#allocation2 + $0x38c] sm:$0xf] %v13970_v52  ;;  %1484 = vst [vmem:[#allocation2 + $0x314] sm:$0xf] %v13970_v52  ;;  %v1017_v52 = vrot.slane %v15821_v48, 2  ;;  %v13971_v48 = vpack.c.bf16 %v1016_v51, %v1016_v51  ;;  %v16014_v35 = vld [vmem:[%s15416_s23 + $0xb0] sm:$0xff]  ;;  %3461 = vmatpush1.bf16.msra.mxu1 %v14418_v33 }
  0x8b   : > { %607 = vst [vmem:[#allocation2 + $0x1b0] sm:$0xf] %v13893_v16  ;;  %608 = vst [vmem:[#allocation2 + $0x1d4] sm:$0xf] %v13894_v54  ;;  %v14430_v50 = vld [vmem:[#allocation2 + $0x124] ss:$36 sps:$4 sm:$0xff]   ;;  %v13896_v7 = vpack.c.bf16 %v16014_v35, %v16014_v35  ;;  %3462 = vmatprep.subr.bf16.mxu1 %v14426_v19 }
  0x8c   : > { %21121 = vst [vmem:[#allocation32_spill] sm:$0xff] %v15931_v27  ;;  %1239 = vst [vmem:[#allocation2 + $0x174] sm:$0xf] %v13893_v16  ;;  %v14432_v57 = vld [vmem:[#allocation2 + $0x364] ss:$36 sps:$4 sm:$0xff]   ;;  %v1018_v1 = vsel %vm948_vm1, %v1015_v38, %v1017_v52  ;;  %v16026_v14 = vld [vmem:[%s15416_s23 + $0x170] sm:$0xff]  ;;  %3327 = vmatprep.mubr.bf16.mxu0 %v14430_v50 }
  0x8d   : > { %1240 = vst [vmem:[#allocation2 + $0x198] sm:$0xf] %v13894_v54  ;;  %1374 = vst [vmem:[#allocation2 + $0x138] sm:$0xf] %v13893_v16  ;;  %v14429_v16 = vld [vmem:[%s20807_s1 + $0x204] ss:$8 sps:$4 sm:$0xff]   ;;  %v13972_v6 = vpack.c.bf16 %v1018_v1, %v1018_v1  ;;  %3407 = vmatprep.mubr.bf16.mxu1 %v14432_v57 }
  0x8e   : > { %1375 = vst [vmem:[#allocation2 + $0x15c] sm:$0xf] %v13894_v54  ;;  %21122 = vst [vmem:[#allocation33_spill] sm:$0xff] %v15944_v60  ;;  %v15995_v54 = vld [vmem:[%s20807_s1 + $0x200] ss:$8 sps:$4 sm:$0xff]   ;;  %3655 = vmatprep.subr.bf16.mxu0 %v14429_v16  ;;  %v752_v52 = vrot.slane %v16026_v14, 1  ;;  %3463 = vmatpush1.bf16.msra.mxu1 %v15990_v37 }
  0x8f   : > { %623 = vst [vmem:[#allocation2 + $0x3f0] sm:$0xf] %v13909_v22  ;;  %1255 = vst [vmem:[#allocation2 + $0x3b4] sm:$0xf] %v13909_v22  ;;  %v16003_v2 = vld [vmem:[%s20807_s1 + $0x1f4] ss:$8 sps:$4 sm:$0xff]   ;;  %3656 = vmatpush1.bf16.msra.mxu0 %v15995_v54 }
  0x90   : > { %1390 = vst [vmem:[#allocation2 + $0x378] sm:$0xf] %v13909_v22  ;;  %624 = vst [vmem:[#allocation2 + $0x414] sm:$0xf] %v13910_v25  ;;  %v16008_v5 = vld [vmem:[%s20807_s1 + $0x2f4] ss:$8 sps:$4 sm:$0xff]   ;;  %3464 = vmatprep.subr.bf16.mxu1 %v16003_v2 }
  0x91   : > { %21123 = vst [vmem:[#allocation34_spill] sm:$0xff] %v15956_v28  ;;  %1256 = vst [vmem:[#allocation2 + $0x3d8] sm:$0xf] %v13910_v25  ;;  %v1019_v22 = vrot.slane %v15915_v62, 2  ;;  %v434_v38 = vld [vmem:[%s15416_s23 + $0xa8] sm:$0xff]  ;;  %3657 = vmatprep.subr.bf16.mxu0 %v16008_v5  ;;  %v21134_v28 = vmov 0  }
  0x92   : > { %1391 = vst [vmem:[#allocation2 + $0x39c] sm:$0xf] %v13910_v25  ;;  %928 = vst [vmem:[#allocation2 + $0x1b4] sm:$0xf] %v13925_v12  ;;  %v16017_v25 = vld [vmem:[%s15416_s23 + $0xb8] sm:$0x3]  ;;  %v13895_v9 = vpack.c.bf16 %v434_v38, %v434_v38 }
  0x93   : > { %1289 = vst [vmem:[#allocation2 + $0x178] sm:$0xf] %v13925_v12  ;;  %1424 = vst [vmem:[#allocation2 + $0x13c] sm:$0xf] %v13925_v12  ;;  %v711_v10 = vrot.slane %v434_v38, 1  ;;  %v712_v12 = vrot.slane %v16014_v35, 1 }
  0x94   : > { %21124 = vst [vmem:[#allocation35_spill] sm:$0xff] %v15959_v18  ;;  %929 = vst [vmem:[#allocation2 + $0x1d8] sm:$0xf] %v13926_v17  ;;  %v16023_v13 = vld [vmem:[%s15416_s23 + $0x168] sm:$0xff]  ;;  %v714_v29 = vrot.slane %v16017_v25, 1  ;;  %v984_v30 = vrot.slane %v434_v38, 2 }
  0x95   : > { %1290 = vst [vmem:[#allocation2 + $0x19c] sm:$0xf] %v13926_v17  ;;  %1425 = vst [vmem:[#allocation2 + $0x160] sm:$0xf] %v13926_v17  ;;  %v16029_v17 = vld [vmem:[%s15416_s23 + $0x178] sm:$0x3]  ;;  %v13911_v15 = vpack.c.bf16 %v16023_v13, %v16023_v13  ;;  %v16042_v26 = vsel %vm675_vm0, %v711_v10, %v712_v12 }
  0x96   : > { %944 = vst [vmem:[#allocation2 + $0x3f4] sm:$0xf] %v13941_v20  ;;  %1305 = vst [vmem:[#allocation2 + $0x3b8] sm:$0xf] %v13941_v20  ;;  %v14439_v33 = vld [vmem:[%s20807_s1 + $0x2f0] ss:$8 sps:$4 sm:$0xff]   ;;  %v16049_v42 = vsel %vm675_vm0, %v712_v12, %v714_v29  ;;  %v1021_v29 = vsel %vm948_vm1, %v1019_v22, %v1020_v46 }
  0x97   : > { %1440 = vst [vmem:[#allocation2 + $0x37c] sm:$0xf] %v13941_v20  ;;  %1336 = vst [vmem:[#allocation2 + $0x17c] sm:$0xf] %v13957_v32  ;;  %v985_v20 = vrot.slane %v16014_v35, 2  ;;  %v751_v51 = vrot.slane %v16023_v13, 1  ;;  %v13928_v1 = vpack.c.bf16 %v16049_v42, %v16049_v42  ;;  %v13973_v62 = vpack.c.bf16 %v1021_v29, %v1021_v29  ;;  %3658 = vmatpush2.bf16.msra.mxu0 %v14439_v33 }
  0x98   : > { %1201 = vst [vmem:[#allocation2 + $0x1b8] sm:$0xf] %v13957_v32  ;;  %1471 = vst [vmem:[#allocation2 + $0x140] sm:$0xf] %v13957_v32  ;;  %v14436_v32 = vld [vmem:[%s20807_s1 + $0x1f0] ss:$8 sps:$4 sm:$0xff]  }
  0x99   : > { %945 = vst [vmem:[#allocation2 + $0x418] sm:$0xf] %v13942_v41  ;;  %1306 = vst [vmem:[#allocation2 + $0x3dc] sm:$0xf] %v13942_v41  ;;  %v14434_v19 = vld [vmem:[#allocation2 + $0x120] ss:$36 sps:$4 sm:$0xff]   ;;  %v986_v57 = vsel %vm948_vm1, %v984_v30, %v985_v20  ;;  %v16065_v38 = vsel %vm675_vm0, %v751_v51, %v752_v52  ;;  %3465 = vmatpush2.bf16.msra.mxu1 %v14436_v32 }
  0x9a   : > { %1441 = vst [vmem:[#allocation2 + $0x3a0] sm:$0xf] %v13942_v41  ;;  %1350 = vst [vmem:[#allocation2 + $0x374] sm:$0xf] %v13971_v48  ;;  %v13912_v41 = vpack.c.bf16 %v16026_v14, %v16026_v14  ;;  %v14435_v16 = vld [vmem:[#allocation2 + $0x360] ss:$36 sps:$4 sm:$0xff]   ;;  %v13959_v12 = vpack.c.bf16 %v986_v57, %v986_v57  ;;  %3328 = vmatmul.mubr.bf16.gmra.mxu0 %v14434_v19 }
  0x9b   : > { %1215 = vst [vmem:[#allocation2 + $0x3b0] sm:$0xf] %v13971_v48  ;;  %1485 = vst [vmem:[#allocation2 + $0x338] sm:$0xf] %v13971_v48  ;;  %v13927_v48 = vpack.c.bf16 %v16042_v26, %v16042_v26  ;;  %v754_v50 = vrot.slane %v16029_v17, 1  ;;  %v987_v10 = vrot.slane %v16017_v25, 2  ;;  %3408 = vmatmul.mubr.bf16.gmra.mxu1 %v14435_v16 }
  0x9c   : > { %1337 = vst [vmem:[#allocation2 + $0x1a0] sm:$0xf] %v13958_v24  ;;  %1202 = vst [vmem:[#allocation2 + $0x1dc] sm:$0xf] %v13958_v24  ;;  %v14447_v37 = vld [vmem:[%s20807_s1 + $0x2e4] ss:$8 sps:$4 sm:$0xff]  }
  0x9d   : > { %1472 = vst [vmem:[#allocation2 + $0x164] sm:$0xf] %v13958_v24  ;;  %1351 = vst [vmem:[#allocation2 + $0x398] sm:$0xf] %v13972_v6  ;;  %v14444_v24 = vld [vmem:[%s20807_s1 + $0x1e4] ss:$8 sps:$4 sm:$0xff]   ;;  %3659 = vmatprep.subr.bf16.mxu0 %v14447_v37 }
  0x9e   : > { %1216 = vst [vmem:[#allocation2 + $0x3d4] sm:$0xf] %v13972_v6  ;;  %1486 = vst [vmem:[#allocation2 + $0x35c] sm:$0xf] %v13972_v6  ;;  %v1024_v6 = vrot.slane %v16023_v13, 2  ;;  %v1025_v13 = vrot.slane %v16026_v14, 2  ;;  %v988_v14 = vsel %vm948_vm1, %v985_v20, %v987_v10  ;;  %3466 = vmatprep.subr.bf16.mxu1 %v14444_v24 }
  0x9f   : > { %609 = vst [vmem:[#allocation2 + $0x1f8] sm:$0xf] %v13895_v9  ;;  %610 = vst [vmem:[#allocation2 + $0x21c] sm:$0xf] %v13896_v7  ;;  %v14448_v54 = vld [vmem:[#allocation2 + $0x16c] ss:$36 sps:$4 sm:$0xff]   ;;  %v13960_v35 = vpack.c.bf16 %v988_v14, %v988_v14 }
  0xa0   : > { %21125 = vst [vmem:[#allocation36_spill] sm:$0xff] %v16042_v26  ;;  %1241 = vst [vmem:[#allocation2 + $0x1bc] sm:$0xf] %v13895_v9  ;;  %v14450_v2 = vld [vmem:[#allocation2 + $0x3ac] ss:$36 sps:$4 sm:$0xff]   ;;  %v1022_v30 = vrot.slane %v15921_v61, 2  ;;  %3337 = vmatprep.mubr.bf16.mxu0 %v14448_v54 }
  0xa1   : > { %1242 = vst [vmem:[#allocation2 + $0x1e0] sm:$0xf] %v13896_v7  ;;  %1376 = vst [vmem:[#allocation2 + $0x180] sm:$0xf] %v13895_v9  ;;  %v16074_v9 = vsel %vm675_vm0, %v752_v52, %v754_v50  ;;  %v14442_v25 = vld [vmem:[%s20807_s1 + $0x1e0] ss:$8 sps:$4 sm:$0xff]   ;;  %3417 = vmatprep.mubr.bf16.mxu1 %v14450_v2 }
  0xa2   : > { %1377 = vst [vmem:[#allocation2 + $0x1a4] sm:$0xf] %v13896_v7  ;;  %21126 = vst [vmem:[#allocation37_spill] sm:$0xff] %v16049_v42  ;;  %v13943_v7 = vpack.c.bf16 %v16065_v38, %v16065_v38  ;;  %v13944_v5 = vpack.c.bf16 %v16074_v9, %v16074_v9  ;;  %v14445_v61 = vld [vmem:[%s20807_s1 + $0x2e0] ss:$8 sps:$4 sm:$0xff]   ;;  %v1023_v20 = vsel %vm948_vm1, %v1020_v46, %v1022_v30  ;;  %3467 = vmatpush2.bf16.msra.mxu1 %v14442_v25  ;;  %s12709_s28 = sshll.u32 %s20550_s19, 4  ;;  %s20738_s28 = int_to_ptr.vmem [resolvable:$true] %s12709_s28 }
  0xa3   : > { %625 = vst [vmem:[#allocation2 + $0x438] sm:$0xf] %v13911_v15  ;;  %1257 = vst [vmem:[#allocation2 + $0x3fc] sm:$0xf] %v13911_v15  ;;  %v14456_v22 = vld [vmem:[%s20807_s1 + $0x1d4] ss:$8 sps:$4 sm:$0xff]   ;;  %v13974_v33 = vpack.c.bf16 %v1023_v20, %v1023_v20  ;;  %3660 = vmatpush2.bf16.msra.mxu0 %v14445_v61 }
  0xa4   : > { %1392 = vst [vmem:[#allocation2 + $0x3c0] sm:$0xf] %v13911_v15  ;;  %626 = vst [vmem:[#allocation2 + $0x45c] sm:$0xf] %v13912_v41  ;;  %v1027_v15 = vrot.slane %v16029_v17, 2  ;;  %v1026_v17 = vsel %vm948_vm1, %v1024_v6, %v1025_v13  ;;  %3468 = vmatprep.subr.bf16.mxu1 %v14456_v22  ;;  %s20766_s30 = scalar_lea.sflag [#allocation6], %s404_s16 }
  0xa5   : > { %21127 = vst [vmem:[#allocation38_spill] sm:$0xff] %v16065_v38  ;;  %1258 = vst [vmem:[#allocation2 + $0x420] sm:$0xf] %v13912_v41  ;;  %v14459_v32 = vld [vmem:[%s20807_s1 + $0x2d4] ss:$8 sps:$4 sm:$0xff]   ;;  %v13975_v19 = vpack.c.bf16 %v1026_v17, %v1026_v17  ;;  %s15197_s29 = scalar_lea.vmem %s20738_s28, 8192 }
  0xa6   : > { %1393 = vst [vmem:[#allocation2 + $0x3e4] sm:$0xf] %v13912_v41  ;;  %930 = vst [vmem:[#allocation2 + $0x1fc] sm:$0xf] %v13927_v48  ;;  %v14454_v55 = vld [vmem:[%s20807_s1 + $0x1d0] ss:$8 sps:$4 sm:$0xff]   ;;  %v1028_v41 = vsel %vm948_vm1, %v1025_v13, %v1027_v15  ;;  %3661 = vmatprep.subr.bf16.mxu0 %v14459_v32  ;;  %p15198_p11 = scmp.ne.s32.totalorder %s20738_s28, %s15197_s29 }
  0xa7   : > { %1291 = vst [vmem:[#allocation2 + $0x1c0] sm:$0xf] %v13927_v48  ;;  %1426 = vst [vmem:[#allocation2 + $0x184] sm:$0xf] %v13927_v48  ;;  %v14457_v46 = vld [vmem:[%s20807_s1 + $0x2d0] ss:$8 sps:$4 sm:$0xff]   ;;  %v13976_v16 = vpack.c.bf16 %v1028_v41, %v1028_v41  ;;  %3469 = vmatpush2.bf16.msra.mxu1 %v14454_v55 }
  0xa8   : > { %21128 = vst [vmem:[#allocation39_spill] sm:$0xff] %v16074_v9  ;;  %931 = vst [vmem:[#allocation2 + $0x220] sm:$0xf] %v13928_v1  ;;  %v14452_v51 = vld [vmem:[#allocation2 + $0x168] ss:$36 sps:$4 sm:$0xff]   ;;  %3662 = vmatpush2.bf16.msra.mxu0 %v14457_v46  ;;  %p15199_p12 = pnand %p15198_p11, %p15368_p5  ;;  %s15262_s15 = smov [#allocation5]  }
  0xa9   : > { %1292 = vst [vmem:[#allocation2 + $0x1e4] sm:$0xf] %v13928_v1  ;;  %1427 = vst [vmem:[#allocation2 + $0x1a8] sm:$0xf] %v13928_v1  ;;  %v14453_v52 = vld [vmem:[#allocation2 + $0x3a8] ss:$36 sps:$4 sm:$0xff]   ;;  %3338 = vmatmul.mubr.bf16.gmra.mxu0 %v14452_v51 }
  0xaa   : > { %946 = vst [vmem:[#allocation2 + $0x43c] sm:$0xf] %v13943_v7  ;;  %1307 = vst [vmem:[#allocation2 + $0x400] sm:$0xf] %v13943_v7  ;;  %v14462_v48 = vld [vmem:[%s20807_s1 + $0x1c4] ss:$8 sps:$4 sm:$0xff]   ;;  %3418 = vmatmul.mubr.bf16.gmra.mxu1 %v14453_v52  ;;  %p15200_p13 = pneg %p15199_p12 }
  0xab   : > { %1442 = vst [vmem:[#allocation2 + $0x3c4] sm:$0xf] %v13943_v7  ;;  %1338 = vst [vmem:[#allocation2 + $0x1c4] sm:$0xf] %v13959_v12  ;;  %v14465_v50 = vld [vmem:[%s20807_s1 + $0x2c4] ss:$8 sps:$4 sm:$0xff]   ;;  %3470 = vmatprep.subr.bf16.mxu1 %v14462_v48 }
  0xac   : > { %1203 = vst [vmem:[#allocation2 + $0x200] sm:$0xf] %v13959_v12  ;;  %1473 = vst [vmem:[#allocation2 + $0x188] sm:$0xf] %v13959_v12  ;;  %v14466_v57 = vld [vmem:[#allocation2 + $0x1b4] ss:$36 sps:$4 sm:$0xff]   ;;  %3663 = vmatprep.subr.bf16.mxu0 %v14465_v50 }
  0xad   : > { %947 = vst [vmem:[#allocation2 + $0x460] sm:$0xf] %v13944_v5  ;;  %1308 = vst [vmem:[#allocation2 + $0x424] sm:$0xf] %v13944_v5  ;;  %v14468_v24 = vld [vmem:[#allocation2 + $0x3f4] ss:$36 sps:$4 sm:$0xff]   ;;  %3347 = vmatprep.mubr.bf16.mxu0 %v14466_v57 }
  0xae   : > { %1443 = vst [vmem:[#allocation2 + $0x3e8] sm:$0xf] %v13944_v5  ;;  %1352 = vst [vmem:[#allocation2 + $0x3bc] sm:$0xf] %v13973_v62  ;;  %v14460_v1 = vld [vmem:[%s20807_s1 + $0x1c0] ss:$8 sps:$4 sm:$0xff]   ;;  %3427 = vmatprep.mubr.bf16.mxu1 %v14468_v24 }
  0xaf   : > { %1217 = vst [vmem:[#allocation2 + $0x3f8] sm:$0xf] %v13973_v62  ;;  %1487 = vst [vmem:[#allocation2 + $0x380] sm:$0xf] %v13973_v62  ;;  %v14463_v6 = vld [vmem:[%s20807_s1 + $0x2c0] ss:$8 sps:$4 sm:$0xff]   ;;  %3471 = vmatpush2.bf16.msra.mxu1 %v14460_v1 }
  0xb0   : > { %1339 = vst [vmem:[#allocation2 + $0x1e8] sm:$0xf] %v13960_v35  ;;  %1204 = vst [vmem:[#allocation2 + $0x224] sm:$0xf] %v13960_v35  ;;  %v14474_v37 = vld [vmem:[%s20807_s1 + $0x1b4] ss:$8 sps:$4 sm:$0xff]   ;;  %3664 = vmatpush2.bf16.msra.mxu0 %v14463_v6 }
  0xb1   : > { %1474 = vst [vmem:[#allocation2 + $0x1ac] sm:$0xf] %v13960_v35  ;;  %1353 = vst [vmem:[#allocation2 + $0x3e0] sm:$0xf] %v13974_v33  ;;  %v14477_v54 = vld [vmem:[%s20807_s1 + $0x2b4] ss:$8 sps:$4 sm:$0xff]   ;;  %3472 = vmatprep.subr.bf16.mxu1 %v14474_v37 }
  0xb2   : > { %1218 = vst [vmem:[#allocation2 + $0x41c] sm:$0xf] %v13974_v33  ;;  %1488 = vst [vmem:[#allocation2 + $0x3a4] sm:$0xf] %v13974_v33  ;;  %v14472_v7 = vld [vmem:[%s20807_s1 + $0x1b0] ss:$8 sps:$4 sm:$0xff]   ;;  %3665 = vmatprep.subr.bf16.mxu0 %v14477_v54 }
  0xb3   : > { %1354 = vst [vmem:[#allocation2 + $0x404] sm:$0xf] %v13975_v19  ;;  %1355 = vst [vmem:[#allocation2 + $0x428] sm:$0xf] %v13976_v16  ;;  %v14475_v10 = vld [vmem:[%s20807_s1 + $0x2b0] ss:$8 sps:$4 sm:$0xff]   ;;  %3473 = vmatpush2.bf16.msra.mxu1 %v14472_v7 }
  0xb4   : > { %1219 = vst [vmem:[#allocation2 + $0x440] sm:$0xf] %v13975_v19  ;;  %1220 = vst [vmem:[#allocation2 + $0x464] sm:$0xf] %v13976_v16  ;;  %v14470_v12 = vld [vmem:[#allocation2 + $0x1b0] ss:$36 sps:$4 sm:$0xff]   ;;  %3666 = vmatpush2.bf16.msra.mxu0 %v14475_v10 }
  0xb5   : > { %1489 = vst [vmem:[#allocation2 + $0x3c8] sm:$0xf] %v13975_v19  ;;  %1490 = vst [vmem:[#allocation2 + $0x3ec] sm:$0xf] %v13976_v16  ;;  %v14471_v2 = vld [vmem:[#allocation2 + $0x3f0] ss:$36 sps:$4 sm:$0xff]   ;;  %3348 = vmatmul.mubr.bf16.gmra.mxu0 %v14470_v12 }
  0xb6   : > { %v14480_v5 = vld [vmem:[%s20807_s1 + $0x1a4] ss:$8 sps:$4 sm:$0xff]   ;;  %v14484_v29 = vld [vmem:[#allocation2 + $0x1fc] ss:$36 sps:$4 sm:$0xff]   ;;  %3428 = vmatmul.mubr.bf16.gmra.mxu1 %v14471_v2  ;;  %v14490_v35 = vld [vmem:[%s20807_s1 + $0x190] ss:$8 sps:$4 sm:$0xff]  }
  0xb7   : > { %v14483_v13 = vld [vmem:[%s20807_s1 + $0x2a4] ss:$8 sps:$4 sm:$0xff]   ;;  %v14486_v30 = vld [vmem:[#allocation2 + $0x43c] ss:$36 sps:$4 sm:$0xff]   ;;  %3474 = vmatprep.subr.bf16.mxu1 %v14480_v5  ;;  %3357 = vmatprep.mubr.bf16.mxu0 %v14484_v29  ;;  %v14493_v15 = vld [vmem:[%s20807_s1 + $0x290] ss:$8 sps:$4 sm:$0xff]  }
  0xb8   : > { %v14478_v25 = vld [vmem:[%s20807_s1 + $0x1a0] ss:$8 sps:$4 sm:$0xff]   ;;  %v14492_v62 = vld [vmem:[%s20807_s1 + $0x194] ss:$8 sps:$4 sm:$0xff]   ;;  %3667 = vmatprep.subr.bf16.mxu0 %v14483_v13  ;;  %3437 = vmatprep.mubr.bf16.mxu1 %v14486_v30  ;;  %v14498_v32 = vld [vmem:[%s20807_s1 + $0x184] ss:$8 sps:$4 sm:$0xff]  }
  0xb9   : > { %v14481_v14 = vld [vmem:[%s20807_s1 + $0x2a0] ss:$8 sps:$4 sm:$0xff]   ;;  %v14495_v61 = vld [vmem:[%s20807_s1 + $0x294] ss:$8 sps:$4 sm:$0xff]   ;;  %3475 = vmatpush2.bf16.msra.mxu1 %v14478_v25  ;;  %v14501_v33 = vld [vmem:[%s20807_s1 + $0x284] ss:$8 sps:$4 sm:$0xff]  }
  0xba   : > { %v14488_v22 = vld [vmem:[#allocation2 + $0x1f8] ss:$36 sps:$4 sm:$0xff]   ;;  %3668 = vmatpush2.bf16.msra.mxu0 %v14481_v14  ;;  %3476 = vmatprep.subr.bf16.mxu1 %v14492_v62  ;;  %v14504_v55 = vld [vmem:[#allocation2 + $0xc] ss:$36 sps:$4 sm:$0xff]   ;;  %v14496_v17 = vld [vmem:[%s20807_s1 + $0x180] ss:$8 sps:$4 sm:$0xff]  }
  0xbb   : > { %v14489_v20 = vld [vmem:[#allocation2 + $0x438] ss:$36 sps:$4 sm:$0xff]   ;;  %3669 = vmatprep.subr.bf16.mxu0 %v14495_v61  ;;  %v14499_v41 = vld [vmem:[%s20807_s1 + $0x280] ss:$8 sps:$4 sm:$0xff]   ;;  %v14505_v16 = vld [vmem:[#allocation2 + $0x10] ss:$36 sps:$4 sm:$0xff]  }
  0xbc   : > { %v14507_v46 = vld [vmem:[#allocation2 + $0x14] ss:$36 sps:$4 sm:$0xff]   ;;  %v14502_v52 = vld [vmem:[#allocation2 + $0x8] ss:$36 sps:$4 sm:$0xff]   ;;  %v14516_v24 = vld [vmem:[#allocation2 + $0x5c] ss:$36 sps:$4 sm:$0xff]  }
  0xbd   : > { %3358 = vmatmul.mubr.bf16.gmra.mxu0 %v14488_v22  ;;  %3477 = vmatpush2.bf16.msra.mxu1 %v14490_v35  ;;  %v14510_v51 = vld [vmem:[%s20807_s1 + $0x374] ss:$8 sps:$4 sm:$0xff]   ;;  %v14508_v48 = vld [vmem:[%s20807_s1 + $0x370] ss:$8 sps:$4 sm:$0xff]   ;;  %v14522_v1 = vld [vmem:[%s20807_s1 + $0x364] ss:$8 sps:$4 sm:$0xff]  }
  0xbe   : > { %3438 = vmatmul.mubr.bf16.gmra.mxu1 %v14489_v20  ;;  %3670 = vmatpush2.bf16.msra.mxu0 %v14493_v15  ;;  %v14513_v19 = vld [vmem:[%s20807_s1 + $0x474] ss:$8 sps:$4 sm:$0xff]   ;;  %v14511_v50 = vld [vmem:[%s20807_s1 + $0x470] ss:$8 sps:$4 sm:$0xff]   ;;  %v14534_v6 = vld [vmem:[%s20807_s1 + $0x464] ss:$8 sps:$4 sm:$0xff]  }
  0xbf   : > { %3478 = vmatprep.subr.bf16.mxu1 %v14498_v32  ;;  %3671 = vmatprep.subr.bf16.mxu0 %v14501_v33  ;;  %v14514_v57 = vld [vmem:[#allocation2 + $0x54] ss:$36 sps:$4 sm:$0xff]   ;;  %v14520_v37 = vld [vmem:[%s20807_s1 + $0x360] ss:$8 sps:$4 sm:$0xff]   ;;  %v14543_v30 = vld [vmem:[%s20807_s1 + $0x344] ss:$8 sps:$4 sm:$0xff]  }
  0xc0   : > { %3480 = vmatprep.mubr.bf16.mxu1 %v14504_v55  ;;  %3673 = vmatprep.mubr.bf16.mxu0 %v14507_v46  ;;  %v14532_v54 = vld [vmem:[%s20807_s1 + $0x460] ss:$8 sps:$4 sm:$0xff]   ;;  %v14518_v7 = vld [vmem:[#allocation2 + $0x50] ss:$36 sps:$4 sm:$0xff]   ;;  %v14519_v2 = vld [vmem:[#allocation2 + $0x58] ss:$36 sps:$4 sm:$0xff]  }
  0xc1   : > { %3479 = vmatpush2.bf16.msra.mxu1 %v14496_v17  ;;  %v14531_v10 = vld [vmem:[%s20807_s1 + $0x354] ss:$8 sps:$4 sm:$0xff]   ;;  %v14525_v13 = vld [vmem:[#allocation2 + $0xa4] ss:$36 sps:$4 sm:$0xff]   ;;  %v14529_v29 = vld [vmem:[%s20807_s1 + $0x350] ss:$8 sps:$4 sm:$0xff]  }
  0xc2   : > { %3672 = vmatpush2.bf16.msra.mxu0 %v14499_v41  ;;  %3834 = vmatprep.subr.bf16.mxu1 %v14510_v51  ;;  %v14555_v12 = vld [vmem:[%s20807_s1 + $0x454] ss:$8 sps:$4 sm:$0xff]   ;;  %v14553_v25 = vld [vmem:[%s20807_s1 + $0x450] ss:$8 sps:$4 sm:$0xff]   ;;  %v14576_v14 = vld [vmem:[%s20807_s1 + $0x444] ss:$8 sps:$4 sm:$0xff]  }
  0xc3   : > { %4027 = vmatprep.subr.bf16.mxu0 %v14513_v19  ;;  %v14523_v5 = vld [vmem:[#allocation2 + $0x9c] ss:$36 sps:$4 sm:$0xff]   ;;  %v14535_v15 = vld [vmem:[#allocation2 + $0xe4] ss:$36 sps:$4 sm:$0xff]   ;;  %v14537_v32 = vld [vmem:[#allocation2 + $0xec] ss:$36 sps:$4 sm:$0xff]  }
  0xc4   : > { %v14541_v62 = vld [vmem:[%s20807_s1 + $0x340] ss:$8 sps:$4 sm:$0xff]   ;;  %v14527_v61 = vld [vmem:[#allocation2 + $0x98] ss:$36 sps:$4 sm:$0xff]   ;;  %v14564_v55 = vld [vmem:[%s20807_s1 + $0x324] ss:$8 sps:$4 sm:$0xff]  }
  0xc5   : > { %3674 = vmatmul.mubr.bf16.vlgmr.msra.gmra.mxu0 %v14505_v16  ;;  %v14528_v22 = vld [vmem:[#allocation2 + $0xa0] ss:$36 sps:$4 sm:$0xff]   ;;  %v14552_v20 = vld [vmem:[%s20807_s1 + $0x334] ss:$8 sps:$4 sm:$0xff]   ;;  %v14550_v33 = vld [vmem:[%s20807_s1 + $0x330] ss:$8 sps:$4 sm:$0xff]  }
  0xc6   : > { %3481 = vmatmul.mubr.bf16.vlgmr.msra.gmra.mxu1 %v14502_v52  ;;  %4028 = vmatpush1.bf16.msra.mxu0 %v14511_v50  ;;  %v14574_v35 = vld [vmem:[%s20807_s1 + $0x440] ss:$8 sps:$4 sm:$0xff]   ;;  %v14595_v46 = vld [vmem:[%s20807_s1 + $0x430] ss:$8 sps:$4 sm:$0xff]   ;;  %v14597_v17 = vld [vmem:[%s20807_s1 + $0x434] ss:$8 sps:$4 sm:$0xff]  }
  0xc7   : > { %3835 = vmatpush1.bf16.msra.mxu1 %v14508_v48  ;;  %3490 = vmatprep.mubr.bf16.mxu1 %v14514_v57  ;;  %v14539_v41 = vld [vmem:[#allocation2 + $0xe0] ss:$36 sps:$4 sm:$0xff]   ;;  %v14573_v52 = vld [vmem:[%s20807_s1 + $0x314] ss:$8 sps:$4 sm:$0xff]   ;;  %v14540_v19 = vld [vmem:[#allocation2 + $0xe8] ss:$36 sps:$4 sm:$0xff]  }
  0xc8   : > { %3683 = vmatprep.mubr.bf16.mxu0 %v14516_v24  ;;  %3836 = vmatprep.subr.bf16.mxu1 %v14522_v1  ;;  %v14562_v51 = vld [vmem:[%s20807_s1 + $0x320] ss:$8 sps:$4 sm:$0xff]   ;;  %v14544_v16 = vld [vmem:[#allocation2 + $0x12c] ss:$36 sps:$4 sm:$0xff]   ;;  %v14546_v48 = vld [vmem:[#allocation2 + $0x134] ss:$36 sps:$4 sm:$0xff]  }
  0xc9   : > { %4029 = vmatprep.subr.bf16.mxu0 %v14534_v6  ;;  %v14571_v50 = vld [vmem:[%s20807_s1 + $0x310] ss:$8 sps:$4 sm:$0xff]   ;;  %v14585_v57 = vld [vmem:[%s20807_s1 + $0x304] ss:$8 sps:$4 sm:$0xff]   ;;  %v14616_v24 = vld [vmem:[%s20807_s1 + $0x420] ss:$8 sps:$4 sm:$0xff]  }
  0xca   : > { %4030 = vmatpush1.bf16.msra.mxu0 %v14532_v54  ;;  %v14618_v1 = vld [vmem:[%s20807_s1 + $0x424] ss:$8 sps:$4 sm:$0xff]   ;;  %v14594_v54 = vld [vmem:[%s20807_s1 + $0x3f4] ss:$8 sps:$4 sm:$0xff]   ;;  %v14775_v63 = vld [vmem:[%s20810_s4] ss:$8 sps:$4 sm:$0xff]  }
  0xcb   : > { %3837 = vmatpush1.bf16.msra.mxu1 %v14520_v37  ;;  %4031 = vmatprep.subr.bf16.mxu0 %v14555_v12  ;;  %v14548_v6 = vld [vmem:[#allocation2 + $0x128] ss:$36 sps:$4 sm:$0xff]   ;;  %v14558_v12 = vld [vmem:[#allocation2 + $0x17c] ss:$36 sps:$4 sm:$0xff]   ;;  %v14696_v27 = vld [vmem:[#allocation2 + $0x1d0] ss:$36 sps:$4 sm:$0xff]  }
  0xcc   : > { %3838 = vmatprep.subr.bf16.mxu1 %v14531_v10  ;;  %v14583_v37 = vld [vmem:[%s20807_s1 + $0x300] ss:$8 sps:$4 sm:$0xff]   ;;  %v14556_v10 = vld [vmem:[#allocation2 + $0x174] ss:$36 sps:$4 sm:$0xff]   ;;  %s15201_s17 = sshll.u32 %s15262_s15, 4  ;;  %s15202_s17 = int_to_ptr.vmem [resolvable:$false] %s15201_s17 }
  0xcd   : > { %3684 = vmatmul.mubr.bf16.gmra.mxu0 %v14519_v2  ;;  %v14592_v2 = vld [vmem:[%s20807_s1 + $0x3f0] ss:$8 sps:$4 sm:$0xff]   ;;  %v14688_v36 = vld [vmem:[#allocation2 + $0x140] ss:$36 sps:$4 sm:$0xff]   ;;  %v14692_v8 = vld [vmem:[#allocation2 + $0x188] ss:$36 sps:$4 sm:$0xff]   ;;  %p15204_p0 = scmp.lt.s32.totalorder %s20738_s28, %s15202_s17 }
  0xce   : > { %3491 = vmatmul.mubr.bf16.gmra.mxu1 %v14518_v7  ;;  %3693 = vmatprep.mubr.bf16.mxu0 %v14525_v13  ;;  %v14549_v7 = vld [vmem:[#allocation2 + $0x130] ss:$36 sps:$4 sm:$0xff]   ;;  %v14787_v11 = vld [vmem:[%s20810_s4 + $0xe0] ss:$8 sps:$4 sm:$0xff]   ;;  %v14700_v31 = vld [vmem:[#allocation2 + $0x218] ss:$36 sps:$4 sm:$0xff]  }
  0xcf   : > { %3500 = vmatprep.mubr.bf16.mxu1 %v14523_v5  ;;  %3839 = vmatpush1.bf16.msra.mxu1 %v14529_v29  ;;  %v14606_v5 = vld [vmem:[%s20807_s1 + $0x3e4] ss:$8 sps:$4 sm:$0xff]   ;;  %v14637_v13 = vld [vmem:[%s20807_s1 + $0x410] ss:$8 sps:$4 sm:$0xff]   ;;  %v14639_v29 = vld [vmem:[%s20807_s1 + $0x414] ss:$8 sps:$4 sm:$0xff]  }
  0xd0   : > { %4032 = vmatpush1.bf16.msra.mxu0 %v14553_v25  ;;  %3840 = vmatprep.subr.bf16.mxu1 %v14543_v30  ;;  %v14604_v30 = vld [vmem:[%s20807_s1 + $0x3e0] ss:$8 sps:$4 sm:$0xff]   ;;  %v14615_v25 = vld [vmem:[%s20807_s1 + $0x3d4] ss:$8 sps:$4 sm:$0xff]   ;;  %s15203_s18 = scalar_lea.vmem %s15202_s17, 16384 }
  0xd1   : > { %4033 = vmatprep.subr.bf16.mxu0 %v14576_v14  ;;  %v14560_v14 = vld [vmem:[#allocation2 + $0x170] ss:$36 sps:$4 sm:$0xff]   ;;  %v14799_v60 = vld [vmem:[%s20810_s4 + $0xc0] ss:$8 sps:$4 sm:$0xff]   ;;  %p15205_p1 = scmp.lt.s32.totalorder %s15203_s18, %s15197_s29 }
  0xd2   : > { %v14703_v49 = vld [vmem:[#allocation2 + $0x25c] ss:$36 sps:$4 sm:$0xff]  }
  0xd3   : > { %3841 = vmatpush1.bf16.msra.mxu1 %v14541_v62  ;;  %v14561_v62 = vld [vmem:[#allocation2 + $0x178] ss:$36 sps:$4 sm:$0xff]   ;;  %p15206_p2 = por %p15205_p1, %p15204_p0 }
  0xd4   : > { %4034 = vmatpush1.bf16.msra.mxu0 %v14574_v35  ;;  %3842 = vmatprep.subr.bf16.mxu1 %v14552_v20  ;;  %v14613_v35 = vld [vmem:[%s20807_s1 + $0x3d0] ss:$8 sps:$4 sm:$0xff]   ;;  %v14627_v20 = vld [vmem:[%s20807_s1 + $0x3c4] ss:$8 sps:$4 sm:$0xff]  }
  0xd5   : > { %3694 = vmatmul.mubr.bf16.gmra.mxu0 %v14528_v22  ;;  %4035 = vmatprep.subr.bf16.mxu0 %v14597_v17  ;;  %v14567_v22 = vld [vmem:[#allocation2 + $0x1c4] ss:$36 sps:$4 sm:$0xff]   ;;  %p15207_p3 = pnand %p15206_p2, %p15200_p13 }
  0xd6   : > { %3501 = vmatmul.mubr.bf16.gmra.mxu1 %v14527_v61  ;;  %3703 = vmatprep.mubr.bf16.mxu0 %v14537_v32  ;;  %v14565_v61 = vld [vmem:[#allocation2 + $0x1bc] ss:$36 sps:$4 sm:$0xff]   ;;  %v14577_v17 = vld [vmem:[#allocation2 + $0x204] ss:$36 sps:$4 sm:$0xff]  }
  0xd7   : > { %3510 = vmatprep.mubr.bf16.mxu1 %v14535_v15  ;;  %3843 = vmatpush1.bf16.msra.mxu1 %v14550_v33  ;;  %v14625_v15 = vld [vmem:[%s20807_s1 + $0x3c0] ss:$8 sps:$4 sm:$0xff]   ;;  %v14636_v32 = vld [vmem:[%s20807_s1 + $0x3b4] ss:$8 sps:$4 sm:$0xff]  }
  0xd8   : > { %3844 = vmatprep.subr.bf16.mxu1 %v14564_v55  ;;  %4036 = vmatpush1.bf16.msra.mxu0 %v14595_v46  ;;  %v14569_v33 = vld [vmem:[#allocation2 + $0x1b8] ss:$36 sps:$4 sm:$0xff]   ;;  %v14570_v55 = vld [vmem:[#allocation2 + $0x1c0] ss:$36 sps:$4 sm:$0xff]  }
  0xd9   : > { %4037 = vmatprep.subr.bf16.mxu0 %v14618_v1  ;;  %v14658_v46 = vld [vmem:[%s20807_s1 + $0x400] ss:$8 sps:$4 sm:$0xff]  }
  0xdb   : > { %3845 = vmatpush1.bf16.msra.mxu1 %v14562_v51  ;;  %v461_v51 = vld [vmem:[%s15416_s23 + $0x180] sm:$0xff] }
  0xdc   : > { %3846 = vmatprep.subr.bf16.mxu1 %v14573_v52  ;;  %4038 = vmatpush1.bf16.msra.mxu0 %v14616_v24  ;;  %v462_v52 = vld [vmem:[%s15416_s23 + $0x188] sm:$0xff]  ;;  %v1311_v1 = vrot.slane %v461_v51, 2 }
  0xdd   : > { %3704 = vmatmul.mubr.bf16.gmra.mxu0 %v14540_v19  ;;  %4039 = vmatprep.subr.bf16.mxu0 %v14639_v29  ;;  %v13977_v19 = vpack.c.bf16 %v461_v51, %v461_v51  ;;  %v14579_v24 = vld [vmem:[#allocation2 + $0x20c] ss:$36 sps:$4 sm:$0xff]  }
  0xde   : > { %3511 = vmatmul.mubr.bf16.gmra.mxu1 %v14539_v41  ;;  %3713 = vmatprep.mubr.bf16.mxu0 %v14546_v48  ;;  %v14660_v41 = vld [vmem:[%s20807_s1 + $0x404] ss:$8 sps:$4 sm:$0xff]   ;;  %v1264_v48 = vrot.slane %v461_v51, 1  ;;  %v14600_v51 = vld [vmem:[#allocation2 + $0x29c] ss:$36 sps:$4 sm:$0xff]  }
  0xdf   : > { %3520 = vmatprep.mubr.bf16.mxu1 %v14544_v16  ;;  %3847 = vmatpush1.bf16.msra.mxu1 %v14571_v50  ;;  %v13978_v16 = vpack.c.bf16 %v462_v52, %v462_v52  ;;  %v1265_v50 = vrot.slane %v462_v52, 1  ;;  %1259 = vst [vmem:[#allocation2 + $0x444] sm:$0xf] %v13977_v19  ;;  %1394 = vst [vmem:[#allocation2 + $0x408] sm:$0xf] %v13977_v19 }
  0xe0   : > { %3848 = vmatprep.subr.bf16.mxu1 %v14585_v57  ;;  %4040 = vmatpush1.bf16.msra.mxu0 %v14637_v13  ;;  %v463_v57 = vld [vmem:[%s15416_s23 + $0x190] sm:$0x3]  ;;  %v14603_v19 = vld [vmem:[#allocation2 + $0x298] ss:$36 sps:$4 sm:$0xff]  }
  0xe1   : > { %4041 = vmatprep.subr.bf16.mxu0 %v14660_v41  ;;  %1260 = vst [vmem:[#allocation2 + $0x468] sm:$0xf] %v13978_v16  ;;  %1395 = vst [vmem:[#allocation2 + $0x42c] sm:$0xf] %v13978_v16  ;;  %v14598_v41 = vld [vmem:[#allocation2 + $0x294] ss:$36 sps:$4 sm:$0xff]  }
  0xe2   : > { %v14607_v16 = vld [vmem:[#allocation2 + $0x2dc] ss:$36 sps:$4 sm:$0xff]  }
  0xe3   : > { %3849 = vmatpush1.bf16.msra.mxu1 %v14583_v37  ;;  %v1267_v37 = vrot.slane %v463_v57, 1 }
  0xe4   : > { %3850 = vmatprep.subr.bf16.mxu1 %v14594_v54  ;;  %v1314_v54 = vrot.slane %v463_v57, 2  ;;  %4042 = vmatpush1.bf16.msra.mxu0 %v14658_v46  ;;  %v14590_v46 = vld [vmem:[#allocation2 + $0x248] ss:$36 sps:$4 sm:$0xff]   ;;  %v14612_v57 = vld [vmem:[#allocation2 + $0x2e0] ss:$36 sps:$4 sm:$0xff]  }
  0xe5   : > { %3714 = vmatmul.mubr.bf16.gmra.mxu0 %v14549_v7  ;;  %v14634_v7 = vld [vmem:[%s20807_s1 + $0x3b0] ss:$8 sps:$4 sm:$0xff]  }
  0xe6   : > { %3521 = vmatmul.mubr.bf16.gmra.mxu1 %v14548_v6  ;;  %3723 = vmatprep.mubr.bf16.mxu0 %v14558_v12  ;;  %v1312_v6 = vrot.slane %v462_v52, 2  ;;  %v14648_v12 = vld [vmem:[%s20807_s1 + $0x3a4] ss:$8 sps:$4 sm:$0xff]   ;;  %v14602_v52 = vld [vmem:[#allocation2 + $0x290] ss:$36 sps:$4 sm:$0xff]  }
  0xe7   : > { %3530 = vmatprep.mubr.bf16.mxu1 %v14556_v10  ;;  %3851 = vmatpush2.bf16.msra.mxu1 %v14592_v2  ;;  %v16305_v10 = vsel %vm675_vm0, %v1264_v48, %v1265_v50  ;;  %v16311_v2 = vsel %vm675_vm0, %v1265_v50, %v1267_v37  ;;  %v14609_v48 = vld [vmem:[#allocation2 + $0x2e4] ss:$36 sps:$4 sm:$0xff]   ;;  %v14611_v50 = vld [vmem:[#allocation2 + $0x2d8] ss:$36 sps:$4 sm:$0xff]  }
  0xe8   : > { %3852 = vmatprep.subr.bf16.mxu1 %v14606_v5  ;;  %21129 = vst [vmem:[#allocation40_spill] sm:$0xff] %v16305_v10  ;;  %21130 = vst [vmem:[#allocation41_spill] sm:$0xff] %v16311_v2  ;;  %v13979_v5 = vpack.c.bf16 %v16305_v10, %v16305_v10  ;;  %v1313_v13 = vsel %vm948_vm1, %v1311_v1, %v1312_v6  ;;  %v1315_v29 = vsel %vm948_vm1, %v1312_v6, %v1314_v54  ;;  %v14621_v1 = vld [vmem:[#allocation2 + $0x32c] ss:$36 sps:$4 sm:$0xff]   ;;  %v14714_v6 = vld [vmem:[%s20810_s4 + $0x74] ss:$8 sps:$4 sm:$0xff]  }
  0xe9   : > { %v14623_v37 = vld [vmem:[#allocation2 + $0x320] ss:$36 sps:$4 sm:$0xff]   ;;  %v14624_v54 = vld [vmem:[#allocation2 + $0x328] ss:$36 sps:$4 sm:$0xff]  }
  0xea   : > { %1309 = vst [vmem:[#allocation2 + $0x448] sm:$0xf] %v13979_v5  ;;  %1444 = vst [vmem:[#allocation2 + $0x40c] sm:$0xf] %v13979_v5  ;;  %v14630_v5 = vld [vmem:[#allocation2 + $0x374] ss:$36 sps:$4 sm:$0xff]  }
  0xeb   : > { %3853 = vmatpush2.bf16.msra.mxu1 %v14604_v30  ;;  %v13980_v30 = vpack.c.bf16 %v16311_v2, %v16311_v2 }
  0xec   : > { %3854 = vmatprep.subr.bf16.mxu1 %v14615_v25  ;;  %v13981_v25 = vpack.c.bf16 %v1313_v13, %v1313_v13  ;;  %v14632_v13 = vld [vmem:[#allocation2 + $0x368] ss:$36 sps:$4 sm:$0xff]  }
  0xed   : > { %3724 = vmatmul.mubr.bf16.gmra.mxu0 %v14561_v62  ;;  %v14581_v62 = vld [vmem:[#allocation2 + $0x200] ss:$36 sps:$4 sm:$0xff]   ;;  %1310 = vst [vmem:[#allocation2 + $0x46c] sm:$0xf] %v13980_v30  ;;  %1445 = vst [vmem:[#allocation2 + $0x430] sm:$0xf] %v13980_v30 }
  0xee   : > { %3531 = vmatmul.mubr.bf16.gmra.mxu1 %v14560_v14  ;;  %3733 = vmatprep.mubr.bf16.mxu0 %v14567_v22  ;;  %v13982_v14 = vpack.c.bf16 %v1315_v29, %v1315_v29  ;;  %1356 = vst [vmem:[#allocation2 + $0x44c] sm:$0xf] %v13981_v25  ;;  %1491 = vst [vmem:[#allocation2 + $0x410] sm:$0xf] %v13981_v25  ;;  %v14657_v22 = vld [vmem:[%s20807_s1 + $0x394] ss:$8 sps:$4 sm:$0xff]  }
  0xef   : > { %3540 = vmatprep.mubr.bf16.mxu1 %v14565_v61  ;;  %3855 = vmatpush2.bf16.msra.mxu1 %v14613_v35  ;;  %v14646_v61 = vld [vmem:[%s20807_s1 + $0x3a0] ss:$8 sps:$4 sm:$0xff]   ;;  %v14633_v29 = vld [vmem:[#allocation2 + $0x370] ss:$36 sps:$4 sm:$0xff]  }
  0xf0   : > { %3856 = vmatprep.subr.bf16.mxu1 %v14627_v20  ;;  %1357 = vst [vmem:[#allocation2 + $0x470] sm:$0xf] %v13982_v14  ;;  %1492 = vst [vmem:[#allocation2 + $0x434] sm:$0xf] %v13982_v14  ;;  %v14582_v35 = vld [vmem:[#allocation2 + $0x208] ss:$36 sps:$4 sm:$0xff]  }
  0xf1   : > { %v14586_v20 = vld [vmem:[#allocation2 + $0x24c] ss:$36 sps:$4 sm:$0xff]   ;;  %v14640_v30 = vld [vmem:[#allocation2 + $0x3b4] ss:$36 sps:$4 sm:$0xff]   ;;  %v14642_v25 = vld [vmem:[#allocation2 + $0x3bc] ss:$36 sps:$4 sm:$0xff]  }
  0xf2   : > { %v14644_v14 = vld [vmem:[#allocation2 + $0x3b0] ss:$36 sps:$4 sm:$0xff]  }
  0xf3   : > { %3857 = vmatpush2.bf16.msra.mxu1 %v14625_v15  ;;  %v14588_v15 = vld [vmem:[#allocation2 + $0x254] ss:$36 sps:$4 sm:$0xff]  }
  0xf4   : > { %3858 = vmatprep.subr.bf16.mxu1 %v14636_v32  ;;  %v14655_v32 = vld [vmem:[%s20807_s1 + $0x390] ss:$8 sps:$4 sm:$0xff]  }
  0xf5   : > { %3734 = vmatmul.mubr.bf16.gmra.mxu0 %v14570_v55  ;;  %v14666_v55 = vld [vmem:[%s20807_s1 + $0x380] ss:$8 sps:$4 sm:$0xff]  }
  0xf6   : > { %3541 = vmatmul.mubr.bf16.gmra.mxu1 %v14569_v33  ;;  %3743 = vmatprep.mubr.bf16.mxu0 %v14579_v24  ;;  %v14668_v33 = vld [vmem:[%s20807_s1 + $0x384] ss:$8 sps:$4 sm:$0xff]  }
  0xf7   : > { %3550 = vmatprep.mubr.bf16.mxu1 %v14577_v17  ;;  %3859 = vmatpush2.bf16.msra.mxu1 %v14634_v7  ;;  %v14591_v17 = vld [vmem:[#allocation2 + $0x250] ss:$36 sps:$4 sm:$0xff]   ;;  %v14619_v24 = vld [vmem:[#allocation2 + $0x324] ss:$36 sps:$4 sm:$0xff]  }
  0xf8   : > { %3860 = vmatprep.subr.bf16.mxu1 %v14648_v12  ;;  %v14628_v7 = vld [vmem:[#allocation2 + $0x36c] ss:$36 sps:$4 sm:$0xff]   ;;  %v14718_v12 = vld [vmem:[%s20810_s4 + $0x174] ss:$8 sps:$4 sm:$0xff]  }
  0xf9   : > { %10023 = vmatprep.subr.bf16.mxu0 %v14718_v12 }
  0xfb   : > { %3861 = vmatpush2.bf16.msra.mxu1 %v14646_v61  ;;  %v14649_v61 = vld [vmem:[#allocation2 + $0x3fc] ss:$36 sps:$4 sm:$0xff]  }
  0xfc   : > { %3862 = vmatprep.subr.bf16.mxu1 %v14657_v22  ;;  %v14651_v22 = vld [vmem:[#allocation2 + $0x404] ss:$36 sps:$4 sm:$0xff]  }
  0xfd   : > { %3744 = vmatmul.mubr.bf16.gmra.mxu0 %v14582_v35  ;;  %v464_v35 = vld [vmem:[%s15416_s23 + $0x198] sm:$0xff] }
  0xfe   : > { %3551 = vmatmul.mubr.bf16.gmra.mxu1 %v14581_v62  ;;  %3753 = vmatprep.mubr.bf16.mxu0 %v14588_v15  ;;  %v14645_v62 = vld [vmem:[#allocation2 + $0x3b8] ss:$36 sps:$4 sm:$0xff]   ;;  %v466_v15 = vld [vmem:[%s15416_s23 + $0x1a8] sm:$0x3] }
  0xff   : > { %3560 = vmatprep.mubr.bf16.mxu1 %v14586_v20  ;;  %3863 = vmatpush2.bf16.msra.mxu1 %v14655_v32  ;;  %v465_v20 = vld [vmem:[%s15416_s23 + $0x1a0] sm:$0xff]  ;;  %v1401_v32 = vrot.slane %v464_v35, 1 }
 0x100   : > { %3864 = vmatprep.subr.bf16.mxu1 %v14668_v33  ;;  %v1402_v33 = vrot.slane %v465_v20, 1 }
 0x103   : > { %3865 = vmatpush2.bf16.msra.mxu1 %v14666_v55  ;;  %v14653_v55 = vld [vmem:[#allocation2 + $0x3f8] ss:$36 sps:$4 sm:$0xff]  }
 0x104   : > { %9830 = vmatprep.subr.bf16.mxu1 %v14714_v6  ;;  %v1451_v6 = vrot.slane %v466_v15, 2 }
 0x105   : > { %3754 = vmatmul.mubr.bf16.gmra.mxu0 %v14591_v17  ;;  %v14654_v17 = vld [vmem:[#allocation2 + $0x400] ss:$36 sps:$4 sm:$0xff]  }
 0x106   : > { %3561 = vmatmul.mubr.bf16.gmra.mxu1 %v14590_v46  ;;  %3763 = vmatprep.mubr.bf16.mxu0 %v14600_v51  ;;  %v1404_v46 = vrot.slane %v466_v15, 1  ;;  %v1403_v51 = vsel %vm675_vm0, %v1401_v32, %v1402_v33  ;;  %v14724_v15 = vld [vmem:[%s20810_s4 + $0x64] ss:$8 sps:$4 sm:$0xff]  }
 0x107   : > { %3570 = vmatprep.mubr.bf16.mxu1 %v14598_v41  ;;  %v14661_v41 = vld [vmem:[#allocation2 + $0x444] ss:$36 sps:$4 sm:$0xff]  }
 0x108   : > { %v14728_v32 = vld [vmem:[%s20810_s4 + $0x164] ss:$8 sps:$4 sm:$0xff]  }
 0x10d   : > { %3764 = vmatmul.mubr.bf16.gmra.mxu0 %v14603_v19  ;;  %v13984_v19 = vpack.c.bf16 %v465_v20, %v465_v20 }
 0x10e   : > { %3571 = vmatmul.mubr.bf16.gmra.mxu1 %v14602_v52  ;;  %3773 = vmatprep.mubr.bf16.mxu0 %v14609_v48  ;;  %v13983_v52 = vpack.c.bf16 %v464_v35, %v464_v35  ;;  %v13985_v48 = vpack.c.bf16 %v1403_v51, %v1403_v51 }
 0x10f   : > { %3580 = vmatprep.mubr.bf16.mxu1 %v14607_v16  ;;  %v1405_v16 = vsel %vm675_vm0, %v1402_v33, %v1404_v46  ;;  %1397 = vst [vmem:[#allocation2 + $0x474] sm:$0xf] %v13984_v19  ;;  %v14722_v46 = vld [vmem:[%s20810_s4 + $0x60] ss:$8 sps:$4 sm:$0xff]  }
 0x110   : > { %1396 = vst [vmem:[#allocation2 + $0x450] sm:$0xf] %v13983_v52  ;;  %1446 = vst [vmem:[#allocation2 + $0x454] sm:$0xf] %v13985_v48  ;;  %v14675_v52 = vld [vmem:[#allocation2 + $0x60] ss:$36 sps:$4 sm:$0xff]  }
 0x111   : > { %v14676_v19 = vld [vmem:[#allocation2 + $0x68] ss:$36 sps:$4 sm:$0xff]   ;;  %v14734_v48 = vld [vmem:[%s20810_s4 + $0x54] ss:$8 sps:$4 sm:$0xff]  }
 0x115   : > { %3774 = vmatmul.mubr.bf16.gmra.mxu0 %v14612_v57  ;;  %v13986_v57 = vpack.c.bf16 %v1405_v16, %v1405_v16  ;;  %v16360_v33 = vpop.f32.mrf.mxu0  ;;  %v14677_v16 = vld [vmem:[#allocation2 + $0xac] ss:$36 sps:$4 sm:$0xff]  }
 0x116   : > { %3581 = vmatmul.mubr.bf16.gmra.mxu1 %v14611_v50  ;;  %3783 = vmatprep.mubr.bf16.mxu0 %v14621_v1  ;;  %v14663_v50 = vld [vmem:[#allocation2 + $0x44c] ss:$36 sps:$4 sm:$0xff]   ;;  %v1449_v1 = vrot.slane %v465_v20, 2 }
 0x117   : > { %3590 = vmatprep.mubr.bf16.mxu1 %v14619_v24  ;;  %v1448_v24 = vrot.slane %v464_v35, 2  ;;  %1447 = vst [vmem:[#allocation2 + $0x478] sm:$0xf] %v13986_v57  ;;  %v14712_v35 = vld [vmem:[%s20810_s4 + $0x70] ss:$8 sps:$4 sm:$0xff]  }
 0x118   : > { %v14716_v20 = vld [vmem:[%s20810_s4 + $0x170] ss:$8 sps:$4 sm:$0xff]  }
 0x11d   : > { %3784 = vmatmul.mubr.bf16.gmra.mxu0 %v14624_v54  ;;  %v1452_v54 = vsel %vm948_vm1, %v1449_v1, %v1451_v6  ;;  %v14736_v6 = vld [vmem:[%s20810_s4 + $0x150] ss:$8 sps:$4 sm:$0xff]  }
 0x11e   : > { %3591 = vmatmul.mubr.bf16.gmra.mxu1 %v14623_v37  ;;  %3793 = vmatprep.mubr.bf16.mxu0 %v14630_v5  ;;  %v1450_v37 = vsel %vm948_vm1, %v1448_v24, %v1449_v1  ;;  %v13988_v12 = vpack.c.bf16 %v1452_v54, %v1452_v54  ;;  %v1646_v5 = vld [vmem:[#allocation2 + $0x440] sm:$0xff]  ;;  %v14732_v1 = vld [vmem:[%s20810_s4 + $0x50] ss:$8 sps:$4 sm:$0xff]  }
 0x11f   : > { %3600 = vmatprep.mubr.bf16.mxu1 %v14628_v7  ;;  %v13987_v7 = vpack.c.bf16 %v1450_v37, %v1450_v37  ;;  %v14744_v37 = vld [vmem:[%s20810_s4 + $0x44] ss:$8 sps:$4 sm:$0xff]  }
 0x120   : > { %1494 = vst [vmem:[#allocation2 + $0x47c] sm:$0xf] %v13988_v12  ;;  %v14748_v54 = vld [vmem:[%s20810_s4 + $0x144] ss:$8 sps:$4 sm:$0xff]  }
 0x121   : > { %1493 = vst [vmem:[#allocation2 + $0x458] sm:$0xf] %v13987_v7 }
 0x125   : > { %3794 = vmatmul.mubr.bf16.gmra.mxu0 %v14633_v29  ;;  %v14665_v29 = vld [vmem:[#allocation2 + $0x448] ss:$36 sps:$4 sm:$0xff]  }
 0x126   : > { %3601 = vmatmul.mubr.bf16.gmra.mxu1 %v14632_v13  ;;  %3803 = vmatprep.mubr.bf16.mxu0 %v14642_v25  ;;  %v1651_v13 = vld [vmem:[#allocation2 + $0x464] sm:$0xff] }
 0x127   : > { %3610 = vmatprep.mubr.bf16.mxu1 %v14640_v30  ;;  %v14671_v30 = vld [vmem:[#allocation2 + $0x1c] ss:$36 sps:$4 sm:$0xff]   ;;  %v13022_v25 = vcombine.low %v1646_v5, %v1651_v13 }
 0x12d   : > { %3804 = vmatmul.mubr.bf16.gmra.mxu0 %v14645_v62  ;;  %v14669_v62 = vld [vmem:[#allocation2 + $0x18] ss:$36 sps:$4 sm:$0xff]  }
 0x12e   : > { %3611 = vmatmul.mubr.bf16.gmra.mxu1 %v14644_v14  ;;  %3813 = vmatprep.mubr.bf16.mxu0 %v14651_v22  ;;  %v20820_v14 = vmov 0   ;;  %v14673_v22 = vld [vmem:[#allocation2 + $0x64] ss:$36 sps:$4 sm:$0xff]  }
 0x12f   : > { %3620 = vmatprep.mubr.bf16.mxu1 %v14649_v61  ;;  %v14672_v61 = vld [vmem:[#allocation2 + $0x20] ss:$36 sps:$4 sm:$0xff]  }
 0x135   : > { %3814 = vmatmul.mubr.bf16.gmra.mxu0 %v14654_v17  ;;  %v14726_v17 = vld [vmem:[%s20810_s4 + $0x160] ss:$8 sps:$4 sm:$0xff]  }
 0x136   : > { %3621 = vmatmul.mubr.bf16.gmra.mxu1 %v14653_v55  ;;  %3823 = vmatprep.mubr.bf16.mxu0 %v14663_v50  ;;  %v16362_v55 = vpop.f32.mrf.mxu1  ;;  %v14738_v50 = vld [vmem:[%s20810_s4 + $0x154] ss:$8 sps:$4 sm:$0xff]  }
 0x137   : > { %3630 = vmatprep.mubr.bf16.mxu1 %v14661_v41  ;;  %v16371_v41 = vpop.f32.mrf.mxu0 }
 0x138   : > { %v16373_v51 = vpop.f32.mrf.mxu1 }
 0x139   : > { %v16381_v57 = vpop.f32.mrf.mxu0 }
 0x13a   : > { %v16383_v24 = vpop.f32.mrf.mxu1 }
 0x13b   : > { %v16397_v7 = vpop.f32.mrf.mxu0 }
 0x13c   : > { %v16399_v12 = vpop.f32.mrf.mxu1 }
 0x13d   : > { %3824 = vmatmul.mubr.bf16.gmra.mxu0 %v14665_v29  ;;  %21131 = vst [vmem:[#allocation42_spill] sm:$0xff] %v16399_v12  ;;  %v16401_v5 = vpop.f32.mrf.mxu0  ;;  %v14742_v29 = vld [vmem:[%s20810_s4 + $0x40] ss:$8 sps:$4 sm:$0xff]  }
 0x13e   : > { %3631 = vmatmul.mubr.bf16.gmra.mxu1 %v13022_v25  ;;  %4059 = vmatprep.mubr.bf16.mxu0 %v20820_v14  ;;  %v16403_v13 = vpop.f32.mrf.mxu1 }
 0x13f   : > { %3866 = vmatprep.mubr.bf16.mxu1 %v14671_v30  ;;  %v14746_v30 = vld [vmem:[%s20810_s4 + $0x140] ss:$8 sps:$4 sm:$0xff]   ;;  %v16412_v25 = vpop.f32.mrf.mxu0 }
 0x145   : > { %4060 = vmatmul.mubr.bf16.vlgmr.msra.gmra.mxu0 %v14672_v61  ;;  %v14679_v61 = vld [vmem:[#allocation2 + $0xa8] ss:$36 sps:$4 sm:$0xff]  }
 0x146   : > { %3867 = vmatmul.mubr.bf16.vlgmr.msra.gmra.mxu1 %v14669_v62  ;;  %4069 = vmatprep.mubr.bf16.mxu0 %v20820_v14  ;;  %v16414_v62 = vpop.f32.mrf.mxu1 }
 0x147   : > { %3876 = vmatprep.mubr.bf16.mxu1 %v14673_v22  ;;  %9831 = vmatpush1.bf16.msra.mxu1 %v14712_v35  ;;  %v14680_v22 = vld [vmem:[#allocation2 + $0xb0] ss:$36 sps:$4 sm:$0xff]  }
 0x148   : > { %10024 = vmatpush1.bf16.msra.mxu0 %v14716_v20  ;;  %9832 = vmatprep.subr.bf16.mxu1 %v14724_v15  ;;  %v14681_v35 = vld [vmem:[#allocation2 + $0xf4] ss:$36 sps:$4 sm:$0xff]  }
 0x149   : > { %10025 = vmatprep.subr.bf16.mxu0 %v14728_v32  ;;  %v14754_v20 = vld [vmem:[%s20810_s4 + $0x34] ss:$8 sps:$4 sm:$0xff]   ;;  %v16422_v32 = vpop.f32.mrf.mxu0 }
 0x14a   : > { %v14758_v15 = vld [vmem:[%s20810_s4 + $0x134] ss:$8 sps:$4 sm:$0xff]  }
 0x14b   : > { %9833 = vmatpush1.bf16.msra.mxu1 %v14722_v46  ;;  %v16424_v46 = vpop.f32.mrf.mxu1 }
 0x14c   : > { %10026 = vmatpush1.bf16.msra.mxu0 %v14726_v17  ;;  %9834 = vmatprep.subr.bf16.mxu1 %v14734_v48  ;;  %v14752_v17 = vld [vmem:[%s20810_s4 + $0x30] ss:$8 sps:$4 sm:$0xff]   ;;  %v16438_v48 = vpop.f32.mrf.mxu0 }
 0x14d   : > { %10027 = vmatprep.subr.bf16.mxu0 %v14738_v50  ;;  %4070 = vmatmul.mubr.bf16.gmra.mxu0 %v14676_v19  ;;  %v14764_v19 = vld [vmem:[%s20810_s4 + $0x24] ss:$8 sps:$4 sm:$0xff]   ;;  %v16440_v50 = vpop.f32.mrf.mxu1 }
 0x14e   : > { %3877 = vmatmul.mubr.bf16.gmra.mxu1 %v14675_v52  ;;  %4079 = vmatprep.mubr.bf16.mxu0 %v20820_v14  ;;  %v14756_v52 = vld [vmem:[%s20810_s4 + $0x130] ss:$8 sps:$4 sm:$0xff]   ;;  %21132 = vst [vmem:[#allocation43_spill] sm:$0xff] %v16440_v50 }
 0x14f   : > { %3886 = vmatprep.mubr.bf16.mxu1 %v14677_v16  ;;  %9835 = vmatpush1.bf16.msra.mxu1 %v14732_v1  ;;  %v14767_v16 = vld [vmem:[%s20810_s4 + $0x124] ss:$8 sps:$4 sm:$0xff]   ;;  %v16442_v1 = vpop.f32.mrf.mxu0 }
 0x150   : > { %10028 = vmatpush1.bf16.msra.mxu0 %v14736_v6  ;;  %9836 = vmatprep.subr.bf16.mxu1 %v14744_v37  ;;  %v16444_v6 = vpop.f32.mrf.mxu1  ;;  %v14762_v37 = vld [vmem:[%s20810_s4 + $0x20] ss:$8 sps:$4 sm:$0xff]  }
 0x151   : > { %10029 = vmatprep.subr.bf16.mxu0 %v14748_v54  ;;  %v14765_v54 = vld [vmem:[%s20810_s4 + $0x120] ss:$8 sps:$4 sm:$0xff]  }
 0x153   : > { %9837 = vmatpush1.bf16.msra.mxu1 %v14742_v29  ;;  %v16453_v29 = vpop.f32.mrf.mxu0 }
 0x154   : > { %10030 = vmatpush1.bf16.msra.mxu0 %v14746_v30  ;;  %9838 = vmatprep.subr.bf16.mxu1 %v14754_v20  ;;  %v16455_v30 = vpop.f32.mrf.mxu1  ;;  %v14683_v20 = vld [vmem:[#allocation2 + $0xf0] ss:$36 sps:$4 sm:$0xff]  }
 0x155   : > { %10031 = vmatprep.subr.bf16.mxu0 %v14758_v15  ;;  %4080 = vmatmul.mubr.bf16.gmra.mxu0 %v14680_v22  ;;  %v14684_v15 = vld [vmem:[#allocation2 + $0xf8] ss:$36 sps:$4 sm:$0xff]  }
 0x156   : > { %3887 = vmatmul.mubr.bf16.gmra.mxu1 %v14679_v61  ;;  %4089 = vmatprep.mubr.bf16.mxu0 %v20820_v14  ;;  %v14687_v61 = vld [vmem:[#allocation2 + $0x13c] ss:$36 sps:$4 sm:$0xff]   ;;  %v16463_v14 = vpop.f32.mrf.mxu0  ;;  %v16465_v2 = vpop.f32.mrf.mxu1 }
 0x157   : > { %3896 = vmatprep.mubr.bf16.mxu1 %v14681_v35  ;;  %9839 = vmatpush1.bf16.msra.mxu1 %v14752_v17  ;;  %v14771_v22 = vld [vmem:[%s20810_s4 + $0x14] ss:$8 sps:$4 sm:$0xff]   ;;  %v14769_v17 = vld [vmem:[%s20810_s4 + $0x10] ss:$8 sps:$4 sm:$0xff]  }
 0x158   : > { %10032 = vmatpush1.bf16.msra.mxu0 %v14756_v52  ;;  %9840 = vmatprep.subr.bf16.mxu1 %v14764_v19  ;;  %v14774_v35 = vld [vmem:[%s20810_s4 + $0x114] ss:$8 sps:$4 sm:$0xff]   ;;  %v14772_v52 = vld [vmem:[%s20810_s4 + $0x110] ss:$8 sps:$4 sm:$0xff]   ;;  %v14777_v19 = vld [vmem:[%s20810_s4 + $0x4] ss:$8 sps:$4 sm:$0xff]   ;;  %v16479_v10 = vpop.f32.mrf.mxu0  ;;  %v16481_v9 = vpop.f32.mrf.mxu1 }
 0x159   : > { %10033 = vmatprep.subr.bf16.mxu0 %v14767_v16  ;;  %v14780_v16 = vld [vmem:[%s20810_s4 + $0x104] ss:$8 sps:$4 sm:$0xff]   ;;  %21133 = vst [vmem:[#allocation44_spill] sm:$0xff] %v16481_v9 }
 0x15a   : > { %v16483_v38 = vpop.f32.mrf.mxu0  ;;  %v16485_v18 = vpop.f32.mrf.mxu1  ;;  %v14707_v9 = vld [vmem:[#allocation2 + $0x2a4] ss:$36 sps:$4 sm:$0xff]  }
 0x15b   : > { %9841 = vmatpush1.bf16.msra.mxu1 %v14762_v37  ;;  %v14778_v37 = vld [vmem:[%s20810_s4 + $0x100] ss:$8 sps:$4 sm:$0xff]  }
 0x15c   : > { %10034 = vmatpush1.bf16.msra.mxu0 %v14765_v54  ;;  %9842 = vmatprep.subr.bf16.mxu1 %v14771_v22  ;;  %v16494_v54 = vpop.f32.mrf.mxu0  ;;  %v16496_v22 = vpop.f32.mrf.mxu1 }
 0x15d   : > { %10035 = vmatprep.subr.bf16.mxu0 %v14774_v35  ;;  %4090 = vmatmul.mubr.bf16.gmra.mxu0 %v14684_v15  ;;  %v14685_v35 = vld [vmem:[#allocation2 + $0x138] ss:$36 sps:$4 sm:$0xff]  }
 0x15e   : > { %3897 = vmatmul.mubr.bf16.gmra.mxu1 %v14683_v20  ;;  %4099 = vmatprep.mubr.bf16.mxu0 %v21134_v28  ;;  %v14691_v20 = vld [vmem:[#allocation2 + $0x184] ss:$36 sps:$4 sm:$0xff]   ;;  %v14783_v15 = vld [vmem:[%s20810_s4 + $0xf4] ss:$8 sps:$4 sm:$0xff]   ;;  %v16504_v59 = vpop.f32.mrf.mxu0  ;;  %v16506_v58 = vpop.f32.mrf.mxu1 }
 0x15f   : > { %3906 = vmatprep.mubr.bf16.mxu1 %v14687_v61  ;;  %9843 = vmatpush1.bf16.msra.mxu1 %v14769_v17  ;;  %v14786_v61 = vld [vmem:[%s20810_s4 + $0x1f4] ss:$8 sps:$4 sm:$0xff]   ;;  %v14781_v17 = vld [vmem:[%s20810_s4 + $0xf0] ss:$8 sps:$4 sm:$0xff]  }
 0x160   : > { %10036 = vmatpush1.bf16.msra.mxu0 %v14772_v52  ;;  %9844 = vmatprep.subr.bf16.mxu1 %v14777_v19  ;;  %v14784_v52 = vld [vmem:[%s20810_s4 + $0x1f0] ss:$8 sps:$4 sm:$0xff]   ;;  %v14789_v19 = vld [vmem:[%s20810_s4 + $0xe4] ss:$8 sps:$4 sm:$0xff]   ;;  %v16520_v47 = vpop.f32.mrf.mxu0  ;;  %v16522_v45 = vpop.f32.mrf.mxu1 }
 0x161   : > { %10037 = vmatprep.subr.bf16.mxu0 %v14780_v16  ;;  %v14792_v16 = vld [vmem:[%s20810_s4 + $0x1e4] ss:$8 sps:$4 sm:$0xff]   ;;  %21135 = vst [vmem:[#allocation45_spill] sm:$0xff] %v16522_v45 }
 0x162   : > { %v16524_v56 = vpop.f32.mrf.mxu0  ;;  %v16526_v53 = vpop.f32.mrf.mxu1  ;;  %v14704_v45 = vld [vmem:[#allocation2 + $0x260] ss:$36 sps:$4 sm:$0xff]  }
 0x163   : > { %9845 = vmatpush1.bf16.msra.mxu1 %v14775_v63  ;;  %v14790_v63 = vld [vmem:[%s20810_s4 + $0x1e0] ss:$8 sps:$4 sm:$0xff]  }
 0x164   : > { %10038 = vmatpush1.bf16.msra.mxu0 %v14778_v37  ;;  %9846 = vmatprep.subr.bf16.mxu1 %v14783_v15  ;;  %v16535_v37 = vpop.f32.mrf.mxu0  ;;  %v16537_v15 = vpop.f32.mrf.mxu1 }
 0x165   : > { %10039 = vmatprep.subr.bf16.mxu0 %v14786_v61  ;;  %4100 = vmatmul.mubr.bf16.gmra.mxu0 %v14688_v36  ;;  %v14689_v61 = vld [vmem:[#allocation2 + $0x180] ss:$36 sps:$4 sm:$0xff]   ;;  %v14695_v36 = vld [vmem:[#allocation2 + $0x1cc] ss:$36 sps:$4 sm:$0xff]  }
 0x166   : > { %3907 = vmatmul.mubr.bf16.gmra.mxu1 %v14685_v35  ;;  %4109 = vmatprep.mubr.bf16.mxu0 %v21134_v28  ;;  %v14795_v35 = vld [vmem:[%s20810_s4 + $0xd4] ss:$8 sps:$4 sm:$0xff]   ;;  %v16545_v40 = vpop.f32.mrf.mxu0  ;;  %v16547_v39 = vpop.f32.mrf.mxu1 }
 0x167   : > { %3916 = vmatprep.mubr.bf16.mxu1 %v14691_v20  ;;  %9847 = vmatpush2.bf16.msra.mxu1 %v14781_v17  ;;  %v14798_v20 = vld [vmem:[%s20810_s4 + $0x1d4] ss:$8 sps:$4 sm:$0xff]   ;;  %v14793_v17 = vld [vmem:[%s20810_s4 + $0xd0] ss:$8 sps:$4 sm:$0xff]  }
 0x168   : > { %10040 = vmatpush2.bf16.msra.mxu0 %v14784_v52  ;;  %9848 = vmatprep.subr.bf16.mxu1 %v14789_v19  ;;  %v14796_v52 = vld [vmem:[%s20810_s4 + $0x1d0] ss:$8 sps:$4 sm:$0xff]   ;;  %v16555_v19 = vpop.f32.mrf.mxu0 }
 0x169   : > { %10041 = vmatprep.subr.bf16.mxu0 %v14792_v16  ;;  %v16557_v16 = vpop.f32.mrf.mxu1 }
 0x16a   : > { %21136 = vst [vmem:[#allocation46_spill] sm:$0xff] %v16557_v16  ;;  %v16559_v42 = vpop.f32.mrf.mxu0  ;;  %v14811_v16 = vld [vmem:[%s20810_s4 + $0xa0] ss:$8 sps:$4 sm:$0xff]  }
 0x16b   : > { %9849 = vmatpush2.bf16.msra.mxu1 %v14787_v11  ;;  %v16561_v26 = vpop.f32.mrf.mxu1  ;;  %v14801_v11 = vld [vmem:[%s20810_s4 + $0xc4] ss:$8 sps:$4 sm:$0xff]  }
 0x16c   : > { %10042 = vmatpush2.bf16.msra.mxu0 %v14790_v63  ;;  %9850 = vmatprep.subr.bf16.mxu1 %v14795_v35  ;;  %v16570_v63 = vpop.f32.mrf.mxu0 }
 0x16d   : > { %10043 = vmatprep.subr.bf16.mxu0 %v14798_v20  ;;  %4110 = vmatmul.mubr.bf16.gmra.mxu0 %v14692_v8  ;;  %v16572_v35 = vpop.f32.mrf.mxu1  ;;  %v14693_v20 = vld [vmem:[#allocation2 + $0x1c8] ss:$36 sps:$4 sm:$0xff]   ;;  %v14699_v8 = vld [vmem:[#allocation2 + $0x214] ss:$36 sps:$4 sm:$0xff]  }
 0x16e   : > { %3917 = vmatmul.mubr.bf16.gmra.mxu1 %v14689_v61  ;;  %4119 = vmatprep.mubr.bf16.mxu0 %v21134_v28  ;;  %v14802_v61 = vld [vmem:[%s20810_s4 + $0x1c0] ss:$8 sps:$4 sm:$0xff]   ;;  %v16580_v0 = vpop.f32.mrf.mxu0 }
 0x16f   : > { %3926 = vmatprep.mubr.bf16.mxu1 %v14695_v36  ;;  %9851 = vmatpush2.bf16.msra.mxu1 %v14793_v17  ;;  %v14804_v36 = vld [vmem:[%s20810_s4 + $0x1c4] ss:$8 sps:$4 sm:$0xff]   ;;  %v16582_v23 = vpop.f32.mrf.mxu1 }
 0x170   : > { %10044 = vmatpush2.bf16.msra.mxu0 %v14796_v52  ;;  %9852 = vmatprep.subr.bf16.mxu1 %v14801_v11  ;;  %21137 = vst [vmem:[#allocation47_spill] sm:$0xff] %v16582_v23  ;;  %v16584_v43 = vpop.f32.mrf.mxu0  ;;  %v14805_v11 = vld [vmem:[%s20810_s4 + $0xb0] ss:$8 sps:$4 sm:$0xff]  }
 0x171   : > { %10045 = vmatprep.subr.bf16.mxu0 %v14804_v36  ;;  %21138 = vst [vmem:[#allocation48_spill] sm:$0xff] %v16584_v43  ;;  %v16586_v21 = vpop.f32.mrf.mxu1  ;;  %v14807_v36 = vld [vmem:[%s20810_s4 + $0xb4] ss:$8 sps:$4 sm:$0xff]   ;;  %v14711_v23 = vld [vmem:[#allocation2 + $0x2ec] ss:$36 sps:$4 sm:$0xff]  }
 0x172   : > { %21139 = vst [vmem:[#allocation49_spill] sm:$0xff] %v16586_v21  ;;  %v14822_v43 = vld [vmem:[%s20810_s4 + $0x194] ss:$8 sps:$4 sm:$0xff]  }
 0x173   : > { %9853 = vmatpush2.bf16.msra.mxu1 %v14799_v60 }
 0x174   : > { %10046 = vmatpush2.bf16.msra.mxu0 %v14802_v61  ;;  %v14697_v61 = vld [vmem:[#allocation2 + $0x210] ss:$36 sps:$4 sm:$0xff]   ;;  %9854 = vmatprep.subr.bf16.mxu1 %v14807_v36 }
 0x175   : > { %v16588_v17 = vpop.f32.mrf.mxu0  ;;  %4120 = vmatmul.mubr.bf16.gmra.mxu0 %v14696_v27  ;;  %v14808_v27 = vld [vmem:[%s20810_s4 + $0x1b0] ss:$8 sps:$4 sm:$0xff]  }
 0x176   : > { %v16590_v52 = vpop.f32.mrf.mxu1  ;;  %3927 = vmatmul.mubr.bf16.gmra.mxu1 %v14693_v20  ;;  %4129 = vmatprep.mubr.bf16.mxu0 %v21134_v28  ;;  %v14810_v20 = vld [vmem:[%s20810_s4 + $0x1b4] ss:$8 sps:$4 sm:$0xff]  }
 0x177   : > { %21140 = vst [vmem:[#allocation50_spill] sm:$0xff] %v16590_v52  ;;  %3936 = vmatprep.mubr.bf16.mxu1 %v14699_v8  ;;  %v16599_v34 = vpop.f32.mrf.mxu0  ;;  %9855 = vmatpush2.bf16.msra.mxu1 %v14805_v11  ;;  %v14813_v11 = vld [vmem:[%s20810_s4 + $0xa4] ss:$8 sps:$4 sm:$0xff]  }
 0x178   : > { %v16601_v60 = vpop.f32.mrf.mxu1  ;;  %10047 = vmatprep.subr.bf16.mxu0 %v14810_v20  ;;  %9856 = vmatprep.subr.bf16.mxu1 %v14813_v11  ;;  %v14819_v11 = vld [vmem:[%s20810_s4 + $0x94] ss:$8 sps:$4 sm:$0xff]  }
 0x179   : > { %21141 = vst [vmem:[#allocation51_spill] sm:$0xff] %v16601_v60  ;;  %v16609_v8 = vpop.f32.mrf.mxu0  ;;  %10048 = vmatpush2.bf16.msra.mxu0 %v14808_v27 }
 0x17a   : > { %v16611_v44 = vpop.f32.mrf.mxu1 }
 0x17b   : > { %21142 = vst [vmem:[#allocation52_spill] sm:$0xff] %v16611_v44  ;;  %v16613_v4 = vpop.f32.mrf.mxu0  ;;  %9857 = vmatpush2.bf16.msra.mxu1 %v14811_v16  ;;  %v14817_v16 = vld [vmem:[%s20810_s4 + $0x90] ss:$8 sps:$4 sm:$0xff]   ;;  %v14708_v44 = vld [vmem:[#allocation2 + $0x2a8] ss:$36 sps:$4 sm:$0xff]  }
 0x17c   : > { %21143 = vst [vmem:[#allocation53_spill] sm:$0xff] %v16613_v4  ;;  %v16615_v3 = vpop.f32.mrf.mxu1  ;;  %9858 = vmatprep.subr.bf16.mxu1 %v14819_v11 }
 0x17d   : > { %21144 = vst [vmem:[#allocation54_spill] sm:$0xff] %v16615_v3  ;;  %v16617_v36 = vpop.f32.mrf.mxu0  ;;  %4130 = vmatmul.mubr.bf16.gmra.mxu0 %v14700_v31  ;;  %v14701_v3 = vld [vmem:[#allocation2 + $0x258] ss:$36 sps:$4 sm:$0xff]   ;;  %v14816_v31 = vld [vmem:[%s20810_s4 + $0x1a4] ss:$8 sps:$4 sm:$0xff]  }
 0x17e   : > { %v16619_v21 = vpop.f32.mrf.mxu1  ;;  %3937 = vmatmul.mubr.bf16.gmra.mxu1 %v14697_v61  ;;  %4139 = vmatprep.mubr.bf16.mxu0 %v21134_v28 }
 0x17f   : > { %21145 = vst [vmem:[#allocation55_spill] sm:$0xff] %v16619_v21  ;;  %3946 = vmatprep.mubr.bf16.mxu1 %v14703_v49  ;;  %v16628_v20 = vpop.f32.mrf.mxu0  ;;  %v14814_v49 = vld [vmem:[%s20810_s4 + $0x1a0] ss:$8 sps:$4 sm:$0xff]   ;;  %10049 = vmatprep.subr.bf16.mxu0 %v14816_v31 }
 0x180   : > { %v16630_v27 = vpop.f32.mrf.mxu1  ;;  %10050 = vmatpush2.bf16.msra.mxu0 %v14814_v49  ;;  %v14820_v49 = vld [vmem:[%s20810_s4 + $0x190] ss:$8 sps:$4 sm:$0xff]   ;;  %9859 = vmatpush2.bf16.msra.mxu1 %v14817_v16 }
 0x181   : > { %21146 = vst [vmem:[#allocation56_spill] sm:$0xff] %v16630_v27  ;;  %v16638_v61 = vpop.f32.mrf.mxu0  ;;  %10051 = vmatprep.subr.bf16.mxu0 %v14822_v43  ;;  %v14826_v43 = vld [vmem:[%s20810_s4 + $0x180] ss:$8 sps:$4 sm:$0xff]  }
 0x182   : > { %v16640_v50 = vpop.f32.mrf.mxu1 }
 0x183   : > { %21147 = vst [vmem:[#allocation57_spill] sm:$0xff] %v16640_v50  ;;  %v16642_v12 = vpop.f32.mrf.mxu0  ;;  %v14705_v50 = vld [vmem:[#allocation2 + $0x2a0] ss:$36 sps:$4 sm:$0xff]  }
 0x184   : > { %21148 = vst [vmem:[#allocation58_spill] sm:$0xff] %v16642_v12  ;;  %v16644_v4 = vpop.f32.mrf.mxu1  ;;  %10052 = vmatpush2.bf16.msra.mxu0 %v14820_v49 }
 0x185   : > { %21149 = vst [vmem:[#allocation59_spill] sm:$0xff] %v16644_v4  ;;  %v3675_v21 = vpop.f32.mrf.mxu0  ;;  %4140 = vmatmul.mubr.bf16.gmra.mxu0 %v14704_v45 }
 0x186   : > { %v3482_v27 = vpop.f32.mrf.mxu1  ;;  %3947 = vmatmul.mubr.bf16.gmra.mxu1 %v14701_v3  ;;  %4149 = vmatprep.mubr.bf16.mxu0 %v21134_v28 }
 0x187   : > { %v3483_v31 = vadd.f32 %v3482_v27, %v16360_v33  ;;  %3956 = vmatprep.mubr.bf16.mxu1 %v14707_v9  ;;  %v3677_v12 = vpop.f32.mrf.mxu0  ;;  %v14825_v9 = vld [vmem:[%s20810_s4 + $0x84] ss:$8 sps:$4 sm:$0xff]  }
 0x188   : > { %v3484_v4 = vpop.f32.mrf.mxu1  ;;  %v14828_v33 = vld [vmem:[%s20810_s4 + $0x184] ss:$8 sps:$4 sm:$0xff]   ;;  %9860 = vmatprep.subr.bf16.mxu1 %v14825_v9 }
 0x189   : > { %v16660_v3 = vadd.f32 %v3675_v21, %v3483_v31  ;;  %v3485_v45 = vadd.f32 %v3484_v4, %v16371_v41  ;;  %v3679_v52 = vpop.f32.mrf.mxu0  ;;  %v14823_v4 = vld [vmem:[%s20810_s4 + $0x80] ss:$8 sps:$4 sm:$0xff]   ;;  %10053 = vmatprep.subr.bf16.mxu0 %v14828_v33 }
 0x18a   : > { %v3486_v60 = vpop.f32.mrf.mxu1  ;;  %9861 = vmatpush2.bf16.msra.mxu1 %v14823_v4  ;;  %10054 = vmatpush2.bf16.msra.mxu0 %v14826_v43  ;;  %v14709_v33 = vld [vmem:[#allocation2 + $0x2e8] ss:$36 sps:$4 sm:$0xff]   ;;  %v14721_v4 = vld [vmem:[#allocation2 + $0x334] ss:$36 sps:$4 sm:$0xff]  }
 0x18b   : > { %v16669_v27 = vadd.f32 %v3677_v12, %v3485_v45  ;;  %v3487_v21 = vadd.f32 %v3486_v60, %v16381_v57  ;;  %v3681_v11 = vpop.f32.mrf.mxu0 }
 0x18c   : > { %v3488_v41 = vpop.f32.mrf.mxu1 }
 0x18d   : > { %v16678_v16 = vadd.f32 %v3679_v52, %v3487_v21  ;;  %v3489_v49 = vadd.f32 %v3488_v41, %v16397_v7  ;;  %v3685_v57 = vpop.f32.mrf.mxu0  ;;  %4150 = vmatmul.mubr.bf16.gmra.mxu0 %v14708_v44  ;;  %v14715_v52 = vld [vmem:[#allocation2 + $0x2f0] ss:$36 sps:$4 sm:$0xff]  }
 0x18e   : > { %v3492_v12 = vpop.f32.mrf.mxu1  ;;  %3957 = vmatmul.mubr.bf16.gmra.mxu1 %v14705_v50  ;;  %4159 = vmatprep.mubr.bf16.mxu0 %v21134_v28 }
 0x18f   : > { %v16681_v60 = vadd.f32 %v3681_v11, %v3489_v49  ;;  %v3493_v31 = vadd.f32 %v3492_v12, %v16401_v5  ;;  %3966 = vmatprep.mubr.bf16.mxu1 %v14711_v23  ;;  %v3687_v9 = vpop.f32.mrf.mxu0 }
 0x190   : > { %v3494_v45 = vpop.f32.mrf.mxu1 }
 0x191   : > { %21150 = vst [vmem:[#allocation60_spill] sm:$0xff] %v16681_v60  ;;  %v16685_v21 = vadd.f32 %v3685_v57, %v3493_v31  ;;  %v3495_v7 = vadd.f32 %v3494_v45, %v16412_v25  ;;  %v3689_v41 = vpop.f32.mrf.mxu0 }
 0x192   : > { %v3496_v43 = vpop.f32.mrf.mxu1 }
 0x193   : > { %v16688_v50 = vadd.f32 %v3687_v9, %v3495_v7  ;;  %v3497_v44 = vadd.f32 %v3496_v43, %v16422_v32  ;;  %v3691_v5 = vpop.f32.mrf.mxu0 }
 0x194   : > { %v3498_v11 = vpop.f32.mrf.mxu1 }
 0x195   : > { %v16691_v23 = vadd.f32 %v3689_v41, %v3497_v44  ;;  %v3499_v49 = vadd.f32 %v3498_v11, %v16438_v48  ;;  %v3695_v60 = vpop.f32.mrf.mxu0  ;;  %4160 = vmatmul.mubr.bf16.gmra.mxu0 %v14715_v52  ;;  %v14719_v48 = vld [vmem:[#allocation2 + $0x330] ss:$36 sps:$4 sm:$0xff]   ;;  %v14725_v41 = vld [vmem:[#allocation2 + $0x338] ss:$36 sps:$4 sm:$0xff]  }
 0x196   : > { %v3502_v12 = vpop.f32.mrf.mxu1  ;;  %3967 = vmatmul.mubr.bf16.gmra.mxu1 %v14709_v33  ;;  %4169 = vmatprep.mubr.bf16.mxu0 %v21134_v28  ;;  %v14731_v52 = vld [vmem:[#allocation2 + $0x37c] ss:$36 sps:$4 sm:$0xff]  }
 0x197   : > { %v16694_v57 = vadd.f32 %v3691_v5, %v3499_v49  ;;  %v3503_v25 = vadd.f32 %v3502_v12, %v16442_v1  ;;  %3976 = vmatprep.mubr.bf16.mxu1 %v14721_v4  ;;  %v3697_v45 = vpop.f32.mrf.mxu0 }
 0x198   : > { %v3504_v31 = vpop.f32.mrf.mxu1 }
 0x199   : > { %v16698_v32 = vadd.f32 %v3695_v60, %v3503_v25  ;;  %v3505_v9 = vadd.f32 %v3504_v31, %v16453_v29  ;;  %v3699_v43 = vpop.f32.mrf.mxu0  ;;  %v14831_v60 = vld [vmem:[%s20810_s4 + $0x274] ss:$8 sps:$4 sm:$0xff]  }
 0x19a   : > { %v3506_v7 = vpop.f32.mrf.mxu1  ;;  %10216 = vmatprep.subr.bf16.mxu1 %v14831_v60 }
 0x19b   : > { %v16701_v44 = vadd.f32 %v3697_v45, %v3505_v9  ;;  %v3507_v33 = vadd.f32 %v3506_v7, %v16463_v14  ;;  %v3701_v1 = vpop.f32.mrf.mxu0  ;;  %v14834_v9 = vld [vmem:[%s20810_s4 + $0x374] ss:$8 sps:$4 sm:$0xff]  }
 0x19c   : > { %v3508_v11 = vpop.f32.mrf.mxu1  ;;  %10409 = vmatprep.subr.bf16.mxu0 %v14834_v9 }
 0x19d   : > { %v16704_v4 = vadd.f32 %v3699_v43, %v3507_v33  ;;  %v3509_v5 = vadd.f32 %v3508_v11, %v16479_v10  ;;  %v3705_v49 = vpop.f32.mrf.mxu0  ;;  %4170 = vmatmul.mubr.bf16.gmra.mxu0 %v14725_v41  ;;  %v14735_v41 = vld [vmem:[#allocation2 + $0x380] ss:$36 sps:$4 sm:$0xff]  }
 0x19e   : > { %v3512_v29 = vpop.f32.mrf.mxu1  ;;  %3977 = vmatmul.mubr.bf16.gmra.mxu1 %v14719_v48  ;;  %4179 = vmatprep.mubr.bf16.mxu0 %v21134_v28  ;;  %v14729_v48 = vld [vmem:[#allocation2 + $0x378] ss:$36 sps:$4 sm:$0xff]  }
 0x19f   : > { %v16710_v12 = vadd.f32 %v3701_v1, %v3509_v5  ;;  %v3513_v25 = vadd.f32 %v3512_v29, %v16483_v38  ;;  %3986 = vmatprep.mubr.bf16.mxu1 %v14731_v52  ;;  %v3707_v31 = vpop.f32.mrf.mxu0  ;;  %v14741_v52 = vld [vmem:[#allocation2 + $0x3c4] ss:$36 sps:$4 sm:$0xff]  }
 0x1a0   : > { %v3514_v14 = vpop.f32.mrf.mxu1 }
 0x1a1   : > { %v16714_v45 = vadd.f32 %v3705_v49, %v3513_v25  ;;  %v3515_v10 = vadd.f32 %v3514_v14, %v16494_v54  ;;  %v3709_v43 = vpop.f32.mrf.mxu0 }
 0x1a2   : > { %v3516_v7 = vpop.f32.mrf.mxu1 }
 0x1a3   : > { %v16720_v33 = vadd.f32 %v3707_v31, %v3515_v10  ;;  %v3517_v38 = vadd.f32 %v3516_v7, %v16504_v59  ;;  %v3711_v1 = vpop.f32.mrf.mxu0 }
 0x1a4   : > { %v3518_v11 = vpop.f32.mrf.mxu1 }
 0x1a5   : > { %v16723_v5 = vadd.f32 %v3709_v43, %v3517_v38  ;;  %v3519_v54 = vadd.f32 %v3518_v11, %v16520_v47  ;;  %v3715_v29 = vpop.f32.mrf.mxu0  ;;  %4180 = vmatmul.mubr.bf16.gmra.mxu0 %v14735_v41  ;;  %v14739_v47 = vld [vmem:[#allocation2 + $0x3c0] ss:$36 sps:$4 sm:$0xff]   ;;  %v14745_v43 = vld [vmem:[#allocation2 + $0x3c8] ss:$36 sps:$4 sm:$0xff]  }
 0x1a6   : > { %v3522_v60 = vpop.f32.mrf.mxu1  ;;  %3987 = vmatmul.mubr.bf16.gmra.mxu1 %v14729_v48  ;;  %4189 = vmatprep.mubr.bf16.mxu0 %v21134_v28  ;;  %v14751_v41 = vld [vmem:[#allocation2 + $0x40c] ss:$36 sps:$4 sm:$0xff]  }
 0x1a7   : > { %v16726_v49 = vadd.f32 %v3711_v1, %v3519_v54  ;;  %v3523_v25 = vadd.f32 %v3522_v60, %v16524_v56  ;;  %3996 = vmatprep.mubr.bf16.mxu1 %v14741_v52  ;;  %v3717_v14 = vpop.f32.mrf.mxu0 }
 0x1a8   : > { %v3524_v59 = vpop.f32.mrf.mxu1 }
 0x1a9   : > { %v16730_v31 = vadd.f32 %v3715_v29, %v3523_v25  ;;  %v3525_v10 = vadd.f32 %v3524_v59, %v16535_v37  ;;  %v3719_v7 = vpop.f32.mrf.mxu0 }
 0x1aa   : > { %v3526_v9 = vpop.f32.mrf.mxu1 }
 0x1ab   : > { %v16733_v38 = vadd.f32 %v3717_v14, %v3525_v10  ;;  %v3527_v48 = vadd.f32 %v3526_v9, %v16545_v40  ;;  %v3721_v56 = vpop.f32.mrf.mxu0 }
 0x1ac   : > { %v3528_v11 = vpop.f32.mrf.mxu1 }
 0x1ad   : > { %v16736_v52 = vadd.f32 %v3719_v7, %v3527_v48  ;;  %v3529_v1 = vadd.f32 %v3528_v11, %v16555_v19  ;;  %v3725_v60 = vpop.f32.mrf.mxu0  ;;  %4190 = vmatmul.mubr.bf16.gmra.mxu0 %v14745_v43  ;;  %v14749_v19 = vld [vmem:[#allocation2 + $0x408] ss:$36 sps:$4 sm:$0xff]   ;;  %v14755_v7 = vld [vmem:[#allocation2 + $0x410] ss:$36 sps:$4 sm:$0xff]  }
 0x1ae   : > { %v3532_v54 = vpop.f32.mrf.mxu1  ;;  %3997 = vmatmul.mubr.bf16.gmra.mxu1 %v14739_v47  ;;  %4199 = vmatprep.mubr.bf16.mxu0 %v21134_v28  ;;  %v14761_v43 = vld [vmem:[#allocation2 + $0x454] ss:$36 sps:$4 sm:$0xff]  }
 0x1af   : > { %v16739_v37 = vadd.f32 %v3721_v56, %v3529_v1  ;;  %v3533_v29 = vadd.f32 %v3532_v54, %v16559_v42  ;;  %4006 = vmatprep.mubr.bf16.mxu1 %v14751_v41  ;;  %v3727_v40 = vpop.f32.mrf.mxu0  ;;  %v20854_v54 = vmov 0.0  }
 0x1b0   : > { %v3534_v25 = vpop.f32.mrf.mxu1 }
 0x1b1   : > { %v16743_v59 = vadd.f32 %v3725_v60, %v3533_v29  ;;  %v3535_v14 = vadd.f32 %v3534_v25, %v16570_v63  ;;  %v3729_v9 = vpop.f32.mrf.mxu0  ;;  %v16758_v60 = vrot.slane %v20854_v54, 7 }
 0x1b2   : > { %v3536_v10 = vpop.f32.mrf.mxu1 }
 0x1b3   : > { %v16746_v48 = vadd.f32 %v3727_v40, %v3535_v14  ;;  %v3537_v47 = vadd.f32 %v3536_v10, %v16580_v0  ;;  %v16751_v42 = vpop.f32.mrf.mxu0 }
 0x1b4   : > { %v16749_v11 = vpop.f32.mrf.mxu1 }
 0x1b5   : > { %v16753_v41 = vadd.f32 %v3729_v9, %v3537_v47  ;;  %v3735_v1 = vpop.f32.mrf.mxu0  ;;  %4200 = vmatmul.mubr.bf16.gmra.mxu0 %v14755_v7  ;;  %v14759_v9 = vld [vmem:[#allocation2 + $0x450] ss:$36 sps:$4 sm:$0xff]   ;;  %v16768_v47 = vpack.c.bf16 %v16758_v60, %v16758_v60 }
 0x1b6   : > { %v3542_v56 = vpop.f32.mrf.mxu1  ;;  %4007 = vmatmul.mubr.bf16.gmra.mxu1 %v14749_v19  ;;  %4209 = vmatprep.mubr.bf16.mxu0 %v21134_v28  ;;  %v14768_v19 = vld [vmem:[#allocation2 + $0x458] ss:$36 sps:$4 sm:$0xff]  }
 0x1b7   : > { %v3543_v63 = vadd.f32 %v3542_v56, %v16588_v17  ;;  %4016 = vmatprep.mubr.bf16.mxu1 %v14761_v43  ;;  %v3737_v29 = vpop.f32.mrf.mxu0  ;;  %21153 = vst [vmem:[#allocation63_spill] sm:$0xff] %v16768_v47  ;;  %v15261_v43 = vmov 0.0|0.0  }
 0x1b8   : > { %v3544_v0 = vpop.f32.mrf.mxu1  ;;  %v16770_v56 = vcombine.high %v15261_v43, %v15261_v43 }
 0x1b9   : > { %v16760_v25 = vadd.f32 %v3735_v1, %v3543_v63  ;;  %v3545_v40 = vadd.f32 %v3544_v0, %v16599_v34  ;;  %v3739_v10 = vpop.f32.mrf.mxu0 }
 0x1ba   : > { %v3546_v14 = vpop.f32.mrf.mxu1  ;;  %21154 = vst [vmem:[#allocation64_spill] sm:$0xff] %v16770_v56 }
 0x1bb   : > { %21151 = vst [vmem:[#allocation61_spill] sm:$0xff] %v16760_v25  ;;  %v16763_v7 = vadd.f32 %v3737_v29, %v3545_v40  ;;  %v3547_v17 = vadd.f32 %v3546_v14, %v16609_v8  ;;  %v16774_v1 = vpop.f32.mrf.mxu0 }
 0x1bc   : > { %v16772_v54 = vpop.f32.mrf.mxu1 }
 0x1bd   : > { %21152 = vst [vmem:[#allocation62_spill] sm:$0xff] %v16763_v7  ;;  %v16776_v34 = vadd.f32 %v3739_v10, %v3547_v17  ;;  %v3745_v0 = vpop.f32.mrf.mxu0  ;;  %4210 = vmatmul.mubr.bf16.gmra.mxu0 %v14768_v19  ;;  %v16784_v10 = vcombine.low %v15261_v43, %v15261_v43  ;;  %v14832_v19 = vld [vmem:[%s20810_s4 + $0x370] ss:$8 sps:$4 sm:$0xff]  }
 0x1be   : > { %v3552_v63 = vpop.f32.mrf.mxu1  ;;  %4017 = vmatmul.mubr.bf16.gmra.mxu1 %v14759_v9  ;;  %10055 = vmatprep.mubr.bf16.mxu0 %v16770_v56 }
 0x1bf   : > { %v3553_v29 = vadd.f32 %v3552_v63, %v16617_v36  ;;  %9862 = vmatprep.mubr.bf16.mxu1 %v16768_v47  ;;  %v3747_v40 = vpop.f32.mrf.mxu0  ;;  %21155 = vst [vmem:[#allocation65_spill] sm:$0xff] %v16784_v10  ;;  %v14829_v36 = vld [vmem:[%s20810_s4 + $0x270] ss:$8 sps:$4 sm:$0xff]  }
 0x1c0   : > { %v3554_v8 = vpop.f32.mrf.mxu1 }
 0x1c1   : > { %v16781_v14 = vadd.f32 %v3745_v0, %v3553_v29  ;;  %v3555_v28 = vadd.f32 %v3554_v8, %v16628_v20  ;;  %v3749_v25 = vpop.f32.mrf.mxu0  ;;  %v14837_v20 = vld [vmem:[%s20810_s4 + $0x264] ss:$8 sps:$4 sm:$0xff]   ;;  %v14835_v8 = vld [vmem:[%s20810_s4 + $0x260] ss:$8 sps:$4 sm:$0xff]  }
 0x1c2   : > { %v3556_v7 = vpop.f32.mrf.mxu1 }
 0x1c3   : > { %v16786_v17 = vadd.f32 %v3747_v40, %v3555_v28  ;;  %v3557_v9 = vadd.f32 %v3556_v7, %v16638_v61  ;;  %v16797_v0 = vpop.f32.mrf.mxu0  ;;  %v14840_v28 = vld [vmem:[%s20810_s4 + $0x364] ss:$8 sps:$4 sm:$0xff]   ;;  %v14838_v40 = vld [vmem:[%s20810_s4 + $0x360] ss:$8 sps:$4 sm:$0xff]  }
 0x1c4   : > { %v16795_v63 = vpop.f32.mrf.mxu1 }
 0x1c5   : > { %v16805_v61 = vadd.f32 %v3749_v25, %v3557_v9  ;;  %v3755_v43 = vpop.f32.mrf.mxu0  ;;  %10056 = vmatmul.mubr.bf16.vlgmr.msra.gmra.mxu0 %v16784_v10  ;;  %v14843_v10 = vld [vmem:[%s20810_s4 + $0x254] ss:$8 sps:$4 sm:$0xff]  }
 0x1c6   : > { %v3562_v7 = vpop.f32.mrf.mxu1  ;;  %9863 = vmatmul.mubr.bf16.vlgmr.msra.gmra.mxu1 %v16768_v47  ;;  %10410 = vmatpush1.bf16.msra.mxu0 %v14832_v19 }
 0x1c7   : > { %21156 = vst [vmem:[#allocation66_spill] sm:$0xff] %v16805_v61  ;;  %v3563_v29 = vadd.f32 %v3562_v7, %v16362_v55  ;;  %10217 = vmatpush1.bf16.msra.mxu1 %v14829_v36  ;;  %v3757_v9 = vpop.f32.mrf.mxu0  ;;  %10411 = vmatprep.subr.bf16.mxu0 %v14840_v28  ;;  %v14846_v55 = vld [vmem:[%s20810_s4 + $0x354] ss:$8 sps:$4 sm:$0xff]   ;;  %v14844_v28 = vld [vmem:[%s20810_s4 + $0x350] ss:$8 sps:$4 sm:$0xff]  }
 0x1c8   : > { %v3564_v25 = vpop.f32.mrf.mxu1  ;;  %10218 = vmatprep.subr.bf16.mxu1 %v14837_v20  ;;  %v14841_v20 = vld [vmem:[%s20810_s4 + $0x250] ss:$8 sps:$4 sm:$0xff]  }
 0x1c9   : > { %v16822_v36 = vadd.f32 %v3755_v43, %v3563_v29  ;;  %v3565_v19 = vadd.f32 %v3564_v25, %v16373_v51  ;;  %v3759_v47 = vpop.f32.mrf.mxu0  ;;  %v14849_v51 = vld [vmem:[%s20810_s4 + $0x244] ss:$8 sps:$4 sm:$0xff]  }
 0x1ca   : > { %v3566_v7 = vpop.f32.mrf.mxu1  ;;  %10412 = vmatpush1.bf16.msra.mxu0 %v14838_v40 }
 0x1cb   : > { %v16825_v56 = vadd.f32 %v3757_v9, %v3565_v19  ;;  %v3567_v61 = vadd.f32 %v3566_v7, %v16383_v24  ;;  %10219 = vmatpush1.bf16.msra.mxu1 %v14835_v8  ;;  %v16836_v29 = vpop.f32.mrf.mxu0  ;;  %10413 = vmatprep.subr.bf16.mxu0 %v14846_v55  ;;  %v14852_v24 = vld [vmem:[%s20810_s4 + $0x344] ss:$8 sps:$4 sm:$0xff]   ;;  %v14850_v55 = vld [vmem:[%s20810_s4 + $0x340] ss:$8 sps:$4 sm:$0xff]  }
 0x1cc   : > { %v16834_v43 = vpop.f32.mrf.mxu1  ;;  %10220 = vmatprep.subr.bf16.mxu1 %v14843_v10  ;;  %v14847_v10 = vld [vmem:[%s20810_s4 + $0x240] ss:$8 sps:$4 sm:$0xff]  }
 0x1cd   : > { %21157 = vst [vmem:[#allocation67_spill] sm:$0xff] %v16825_v56  ;;  %v16844_v8 = vadd.f32 %v3759_v47, %v3567_v61  ;;  %v3765_v25 = vpop.f32.mrf.mxu0  ;;  %v14855_v47 = vld [vmem:[%s20810_s4 + $0x234] ss:$8 sps:$4 sm:$0xff]  }
 0x1ce   : > { %v3572_v40 = vpop.f32.mrf.mxu1  ;;  %10414 = vmatpush1.bf16.msra.mxu0 %v14844_v28 }
 0x1cf   : > { %21158 = vst [vmem:[#allocation68_spill] sm:$0xff] %v16844_v8  ;;  %v3573_v9 = vadd.f32 %v3572_v40, %v16403_v13  ;;  %10221 = vmatpush1.bf16.msra.mxu1 %v14841_v20  ;;  %v3767_v7 = vpop.f32.mrf.mxu0  ;;  %10415 = vmatprep.subr.bf16.mxu0 %v14852_v24  ;;  %v14858_v13 = vld [vmem:[%s20810_s4 + $0x334] ss:$8 sps:$4 sm:$0xff]   ;;  %v14856_v24 = vld [vmem:[%s20810_s4 + $0x330] ss:$8 sps:$4 sm:$0xff]  }
 0x1d0   : > { %v3574_v19 = vpop.f32.mrf.mxu1  ;;  %10222 = vmatprep.subr.bf16.mxu1 %v14849_v51  ;;  %v14853_v51 = vld [vmem:[%s20810_s4 + $0x230] ss:$8 sps:$4 sm:$0xff]  }
 0x1d1   : > { %v16859_v61 = vadd.f32 %v3765_v25, %v3573_v9  ;;  %v3575_v20 = vadd.f32 %v3574_v19, %v16414_v62  ;;  %v3769_v40 = vpop.f32.mrf.mxu0  ;;  %v14861_v62 = vld [vmem:[%s20810_s4 + $0x224] ss:$8 sps:$4 sm:$0xff]  }
 0x1d2   : > { %v3576_v28 = vpop.f32.mrf.mxu1  ;;  %10416 = vmatpush1.bf16.msra.mxu0 %v14850_v55 }
 0x1d3   : > { %v16862_v8 = vadd.f32 %v3767_v7, %v3575_v20  ;;  %v3577_v56 = vadd.f32 %v3576_v28, %v16424_v46  ;;  %10223 = vmatpush1.bf16.msra.mxu1 %v14847_v10  ;;  %v16873_v9 = vpop.f32.mrf.mxu0  ;;  %10417 = vmatprep.subr.bf16.mxu0 %v14858_v13  ;;  %v14864_v46 = vld [vmem:[%s20810_s4 + $0x324] ss:$8 sps:$4 sm:$0xff]   ;;  %v14862_v13 = vld [vmem:[%s20810_s4 + $0x320] ss:$8 sps:$4 sm:$0xff]  }
 0x1d4   : > { %v16871_v25 = vpop.f32.mrf.mxu1  ;;  %10224 = vmatprep.subr.bf16.mxu1 %v14855_v47  ;;  %v14859_v47 = vld [vmem:[%s20810_s4 + $0x220] ss:$8 sps:$4 sm:$0xff]  }
 0x1d5   : > { %21159 = vst [vmem:[#allocation69_spill] sm:$0xff] %v16862_v8  ;;  %v16881_v10 = vadd.f32 %v3769_v40, %v3577_v56  ;;  %v3775_v19 = vpop.f32.mrf.mxu0  ;;  %v14867_v56 = vld [vmem:[%s20810_s4 + $0x214] ss:$8 sps:$4 sm:$0xff]  }
 0x1d6   : > { %v3582_v55 = vpop.f32.mrf.mxu1  ;;  %10418 = vmatpush1.bf16.msra.mxu0 %v14856_v24 }
 0x1d7   : > { %21160 = vst [vmem:[#allocation70_spill] sm:$0xff] %v16881_v10  ;;  %v3583_v7 = vadd.f32 %v3582_v55, %v16444_v6  ;;  %10225 = vmatpush1.bf16.msra.mxu1 %v14853_v51  ;;  %v3777_v28 = vpop.f32.mrf.mxu0  ;;  %10419 = vmatprep.subr.bf16.mxu0 %v14864_v46  ;;  %v14870_v6 = vld [vmem:[%s20810_s4 + $0x314] ss:$8 sps:$4 sm:$0xff]   ;;  %v14868_v46 = vld [vmem:[%s20810_s4 + $0x310] ss:$8 sps:$4 sm:$0xff]  }
 0x1d8   : > { %v3584_v20 = vpop.f32.mrf.mxu1  ;;  %10226 = vmatprep.subr.bf16.mxu1 %v14861_v62  ;;  %v14865_v62 = vld [vmem:[%s20810_s4 + $0x210] ss:$8 sps:$4 sm:$0xff]  }
 0x1d9   : > { %v16896_v40 = vadd.f32 %v3775_v19, %v3583_v7  ;;  %v3585_v51 = vadd.f32 %v3584_v20, %v16455_v30  ;;  %v3779_v55 = vpop.f32.mrf.mxu0 }
 0x1da   : > { %v3586_v24 = vpop.f32.mrf.mxu1  ;;  %10420 = vmatpush1.bf16.msra.mxu0 %v14862_v13 }
 0x1db   : > { %21161 = vst [vmem:[#allocation71_spill] sm:$0xff] %v16896_v40  ;;  %v16899_v10 = vadd.f32 %v3777_v28, %v3585_v51  ;;  %v3587_v8 = vadd.f32 %v3586_v24, %v16465_v2  ;;  %10227 = vmatpush1.bf16.msra.mxu1 %v14859_v47  ;;  %v16910_v7 = vpop.f32.mrf.mxu0  ;;  %10421 = vmatprep.subr.bf16.mxu0 %v14870_v6  ;;  %v14873_v2 = vld [vmem:[%s20810_s4 + $0x204] ss:$8 sps:$4 sm:$0xff]   ;;  %v14874_v6 = vld [vmem:[%s20810_s4 + $0x300] ss:$8 sps:$4 sm:$0xff]  }
 0x1dc   : > { %v16908_v19 = vpop.f32.mrf.mxu1  ;;  %10228 = vmatprep.subr.bf16.mxu1 %v14867_v56  ;;  %v14876_v47 = vld [vmem:[%s20810_s4 + $0x304] ss:$8 sps:$4 sm:$0xff]   ;;  %v14871_v56 = vld [vmem:[%s20810_s4 + $0x200] ss:$8 sps:$4 sm:$0xff]   ;;  %v14879_v24 = vld [vmem:[%s20810_s4 + $0x2f4] ss:$8 sps:$4 sm:$0xff]  }
 0x1dd   : > { %21162 = vst [vmem:[#allocation72_spill] sm:$0xff] %v16899_v10  ;;  %v16915_v30 = vadd.f32 %v3779_v55, %v3587_v8  ;;  %v3785_v20 = vpop.f32.mrf.mxu0 }
 0x1de   : > { %v3592_v13 = vpop.f32.mrf.mxu1  ;;  %10422 = vmatpush1.bf16.msra.mxu0 %v14868_v46 }
 0x1df   : > { %21163 = vst [vmem:[#allocation73_spill] sm:$0xff] %v16915_v30  ;;  %v3593_v28 = vadd.f32 %v3592_v13, %v16485_v18  ;;  %10229 = vmatpush1.bf16.msra.mxu1 %v14865_v62  ;;  %v3787_v51 = vpop.f32.mrf.mxu0  ;;  %10423 = vmatprep.subr.bf16.mxu0 %v14876_v47 }
 0x1e0   : > { %v3594_v8 = vpop.f32.mrf.mxu1  ;;  %10230 = vmatprep.subr.bf16.mxu1 %v14873_v2  ;;  %v14877_v2 = vld [vmem:[%s20810_s4 + $0x2f0] ss:$8 sps:$4 sm:$0xff]  }
 0x1e1   : > { %v16930_v55 = vadd.f32 %v3785_v20, %v3593_v28  ;;  %v3595_v18 = vadd.f32 %v3594_v8, %v16496_v22  ;;  %v3789_v46 = vpop.f32.mrf.mxu0  ;;  %v14880_v8 = vld [vmem:[%s20810_s4 + $0x3f0] ss:$8 sps:$4 sm:$0xff]  }
 0x1e2   : > { %v3596_v62 = vpop.f32.mrf.mxu1  ;;  %10424 = vmatpush1.bf16.msra.mxu0 %v14874_v6  ;;  %v14883_v6 = vld [vmem:[%s20810_s4 + $0x2e0] ss:$8 sps:$4 sm:$0xff]  }
 0x1e3   : > { %21164 = vst [vmem:[#allocation74_spill] sm:$0xff] %v16930_v55  ;;  %v16933_v13 = vadd.f32 %v3787_v51, %v3595_v18  ;;  %v3597_v30 = vadd.f32 %v3596_v62, %v16506_v58  ;;  %10231 = vmatpush1.bf16.msra.mxu1 %v14871_v56  ;;  %v16941_v10 = vpop.f32.mrf.mxu0  ;;  %v14882_v58 = vld [vmem:[%s20810_s4 + $0x3f4] ss:$8 sps:$4 sm:$0xff]  }
 0x1e4   : > { %v16939_v47 = vpop.f32.mrf.mxu1  ;;  %21166 = vst [vmem:[#allocation76_spill] sm:$0xff] %v16941_v10  ;;  %10232 = vmatprep.subr.bf16.mxu1 %v14879_v24  ;;  %10425 = vmatprep.subr.bf16.mxu0 %v14882_v58 }
 0x1e5   : > { %21165 = vst [vmem:[#allocation75_spill] sm:$0xff] %v16933_v13  ;;  %v16943_v20 = vadd.f32 %v3789_v46, %v3597_v30  ;;  %v3795_v28 = vpop.f32.mrf.mxu0  ;;  %v14885_v30 = vld [vmem:[%s20810_s4 + $0x2e4] ss:$8 sps:$4 sm:$0xff]  }
 0x1e6   : > { %v3602_v22 = vpop.f32.mrf.mxu1  ;;  %10426 = vmatpush2.bf16.msra.mxu0 %v14880_v8  ;;  %v14888_v8 = vld [vmem:[%s20810_s4 + $0x3e4] ss:$8 sps:$4 sm:$0xff]  }
 0x1e7   : > { %21167 = vst [vmem:[#allocation77_spill] sm:$0xff] %v16943_v20  ;;  %v3603_v56 = vadd.f32 %v3602_v22, %v16526_v53  ;;  %10233 = vmatpush2.bf16.msra.mxu1 %v14877_v2  ;;  %v3797_v24 = vpop.f32.mrf.mxu0  ;;  %10427 = vmatprep.subr.bf16.mxu0 %v14888_v8 }
 0x1e8   : > { %v3604_v51 = vpop.f32.mrf.mxu1  ;;  %10234 = vmatprep.subr.bf16.mxu1 %v14885_v30  ;;  %v14889_v30 = vld [vmem:[%s20810_s4 + $0x2d0] ss:$8 sps:$4 sm:$0xff]  }
 0x1e9   : > { %v16958_v18 = vadd.f32 %v3795_v28, %v3603_v56  ;;  %v3605_v62 = vadd.f32 %v3604_v51, %v16537_v15  ;;  %v3799_v53 = vpop.f32.mrf.mxu0  ;;  %v14886_v15 = vld [vmem:[%s20810_s4 + $0x3e0] ss:$8 sps:$4 sm:$0xff]   ;;  %v14891_v51 = vld [vmem:[%s20810_s4 + $0x2d4] ss:$8 sps:$4 sm:$0xff]  }
 0x1ea   : > { %v3606_v46 = vpop.f32.mrf.mxu1  ;;  %10428 = vmatpush2.bf16.msra.mxu0 %v14886_v15  ;;  %v14894_v15 = vld [vmem:[%s20810_s4 + $0x3d4] ss:$8 sps:$4 sm:$0xff]  }
 0x1eb   : > { %21168 = vst [vmem:[#allocation78_spill] sm:$0xff] %v16958_v18  ;;  %v16961_v2 = vadd.f32 %v3797_v24, %v3605_v62  ;;  %v3607_v22 = vadd.f32 %v3606_v46, %v16547_v39  ;;  %10235 = vmatpush2.bf16.msra.mxu1 %v14883_v6  ;;  %v16966_v13 = vpop.f32.mrf.mxu0  ;;  %10429 = vmatprep.subr.bf16.mxu0 %v14894_v15 }
 0x1ec   : > { %v16964_v20 = vpop.f32.mrf.mxu1  ;;  %21171 = vst [vmem:[#allocation81_spill] sm:$0xff] %v16966_v13  ;;  %10236 = vmatprep.subr.bf16.mxu1 %v14891_v51  ;;  %v14897_v51 = vld [vmem:[%s20810_s4 + $0x2c4] ss:$8 sps:$4 sm:$0xff]  }
 0x1ed   : > { %21169 = vst [vmem:[#allocation79_spill] sm:$0xff] %v16961_v2  ;;  %21170 = vst [vmem:[#allocation80_spill] sm:$0xff] %v16964_v20  ;;  %v16968_v55 = vadd.f32 %v3799_v53, %v3607_v22  ;;  %v3805_v28 = vpop.f32.mrf.mxu0  ;;  %v21175_v22 = vld [vmem:[#allocation47_spill] sm:$0xff]  ;;  %v21197_v20 = vld [vmem:[#allocation60_spill] sm:$0xff] }
 0x1ee   : > { %v3612_v58 = vpop.f32.mrf.mxu1 }
 0x1ef   : > { %21172 = vst [vmem:[#allocation82_spill] sm:$0xff] %v16968_v55  ;;  %v3613_v56 = vadd.f32 %v3612_v58, %v16561_v26  ;;  %v3807_v6 = vpop.f32.mrf.mxu0  ;;  %10237 = vmatpush2.bf16.msra.mxu1 %v14889_v30  ;;  %v14895_v30 = vld [vmem:[%s20810_s4 + $0x2c0] ss:$8 sps:$4 sm:$0xff]  }
 0x1f0   : > { %v3614_v39 = vpop.f32.mrf.mxu1  ;;  %10238 = vmatprep.subr.bf16.mxu1 %v14897_v51 }
 0x1f1   : > { %v16983_v24 = vadd.f32 %v3805_v28, %v3613_v56  ;;  %v3615_v62 = vadd.f32 %v3614_v39, %v16572_v35  ;;  %v3809_v53 = vpop.f32.mrf.mxu0  ;;  %v21179_v56 = vld [vmem:[#allocation50_spill] sm:$0xff]  ;;  %v14892_v35 = vld [vmem:[%s20810_s4 + $0x3d0] ss:$8 sps:$4 sm:$0xff]  }
 0x1f2   : > { %v3616_v46 = vpop.f32.mrf.mxu1  ;;  %10430 = vmatpush2.bf16.msra.mxu0 %v14892_v35  ;;  %v14898_v35 = vld [vmem:[%s20810_s4 + $0x3c0] ss:$8 sps:$4 sm:$0xff]  }
 0x1f3   : > { %21173 = vst [vmem:[#allocation83_spill] sm:$0xff] %v16983_v24  ;;  %v16986_v26 = vadd.f32 %v3807_v6, %v3615_v62  ;;  %v3617_v58 = vadd.f32 %v3616_v46, %v21175_v22  ;;  %v16991_v55 = vpop.f32.mrf.mxu0  ;;  %10239 = vmatpush2.bf16.msra.mxu1 %v14895_v30 }
 0x1f4   : > { %v16989_v8 = vpop.f32.mrf.mxu1  ;;  %21177 = vst [vmem:[#allocation85_spill] sm:$0xff] %v16991_v55 }
 0x1f5   : > { %21174 = vst [vmem:[#allocation84_spill] sm:$0xff] %v16986_v26  ;;  %21176 = vst [vmem:[#allocation47_spill] sm:$0xff] %v16989_v8  ;;  %v16993_v2 = vadd.f32 %v3809_v53, %v3617_v58  ;;  %v3815_v28 = vpop.f32.mrf.mxu0  ;;  %v4222_v26 = vlaneseq }
 0x1f6   : > { %v3622_v18 = vpop.f32.mrf.mxu1 }
 0x1f7   : > { %21178 = vst [vmem:[#allocation86_spill] sm:$0xff] %v16993_v2  ;;  %v3623_v24 = vadd.f32 %v3622_v18, %v21179_v56  ;;  %v3817_v6 = vpop.f32.mrf.mxu0  ;;  %v21181_v18 = vld [vmem:[#allocation51_spill] sm:$0xff]  ;;  %v21183_v56 = vld [vmem:[#allocation52_spill] sm:$0xff] }
 0x1f8   : > { %v3624_v39 = vpop.f32.mrf.mxu1 }
 0x1f9   : > { %v17008_v62 = vadd.f32 %v3815_v28, %v3623_v24  ;;  %v3625_v46 = vadd.f32 %v3624_v39, %v21181_v18  ;;  %v3819_v22 = vpop.f32.mrf.mxu0  ;;  %v21187_v39 = vld [vmem:[#allocation55_spill] sm:$0xff]  ;;  %v4223_v18 = vshrl.u32 %v4222_v26, 7  ;;  %v14903_v26 = vld [vmem:[%s20810_s4 + $0x2b4] ss:$8 sps:$4 sm:$0xff]  }
 0x1fa   : > { %v3626_v53 = vpop.f32.mrf.mxu1  ;;  %10240 = vmatprep.subr.bf16.mxu1 %v14903_v26 }
 0x1fb   : > { %21180 = vst [vmem:[#allocation50_spill] sm:$0xff] %v17008_v62  ;;  %v17011_v58 = vadd.f32 %v3817_v6, %v3625_v46  ;;  %v3627_v2 = vadd.f32 %v3626_v53, %v21183_v56  ;;  %v17016_v8 = vpop.f32.mrf.mxu0  ;;  %v14900_v6 = vld [vmem:[%s20810_s4 + $0x3c4] ss:$8 sps:$4 sm:$0xff]   ;;  %v21189_v53 = vld [vmem:[#allocation56_spill] sm:$0xff] }
 0x1fc   : > { %v17014_v55 = vpop.f32.mrf.mxu1  ;;  %21185 = vst [vmem:[#allocation87_spill] sm:$0xff] %v17016_v8  ;;  %10431 = vmatprep.subr.bf16.mxu0 %v14900_v6  ;;  %v14909_v62 = vld [vmem:[%s20810_s4 + $0x2a4] ss:$8 sps:$4 sm:$0xff]   ;;  %v14910_v8 = vld [vmem:[%s20810_s4 + $0x3a0] ss:$8 sps:$4 sm:$0xff]  }
 0x1fd   : > { %21182 = vst [vmem:[#allocation51_spill] sm:$0xff] %v17011_v58  ;;  %21184 = vst [vmem:[#allocation52_spill] sm:$0xff] %v17014_v55  ;;  %v17018_v13 = vadd.f32 %v3819_v22, %v3627_v2  ;;  %v3825_v28 = vpop.f32.mrf.mxu0  ;;  %v14901_v22 = vld [vmem:[%s20810_s4 + $0x2b0] ss:$8 sps:$4 sm:$0xff]   ;;  %10432 = vmatpush2.bf16.msra.mxu0 %v14898_v35 }
 0x1fe   : > { %v3632_v24 = vpop.f32.mrf.mxu1  ;;  %10241 = vmatpush2.bf16.msra.mxu1 %v14901_v22 }
 0x1ff   : > { %21186 = vst [vmem:[#allocation88_spill] sm:$0xff] %v17018_v13  ;;  %v3633_v15 = vadd.f32 %v3632_v24, %v21187_v39  ;;  %v3827_v51 = vpop.f32.mrf.mxu0  ;;  %v21191_v13 = vld [vmem:[#allocation57_spill] sm:$0xff]  ;;  %10242 = vmatprep.subr.bf16.mxu1 %v14909_v62 }
 0x200   : > { %v3634_v30 = vpop.f32.mrf.mxu1 }
 0x201   : > { %v17027_v46 = vadd.f32 %v3825_v28, %v3633_v15  ;;  %v3635_v2 = vadd.f32 %v3634_v30, %v21189_v53  ;;  %v3829_v24 = vpop.f32.mrf.mxu0  ;;  %v17039_v28 = vsub.s32 0, %v4223_v18  ;;  %v4220_v30 = vld [vmem:[%s20808_s2] sm:$0x3] }
 0x202   : > { %v3636_v56 = vpop.f32.mrf.mxu1 }
 0x203   : > { %21188 = vst [vmem:[#allocation55_spill] sm:$0xff] %v17027_v46  ;;  %v17036_v39 = vadd.f32 %v3827_v51, %v3635_v2  ;;  %v3637_v58 = vadd.f32 %v3636_v56, %v21191_v13  ;;  %21192 = vst [vmem:[#allocation57_spill] sm:$0xff] %v17039_v28  ;;  %v17043_v6 = vpop.f32.mrf.mxu0  ;;  %v17050_v46 = vsub.s32 1, %v4223_v18  ;;  %v4296_v13 = vld [vmem:[%s20809_s3] sm:$0x3]  ;;  %v17057_v26 = vrot.slane %v4220_v30, %v17039_v28 }
 0x204   : > { %v17041_v15 = vpop.f32.mrf.mxu1  ;;  %21194 = vst [vmem:[#allocation90_spill] sm:$0xff] %v17043_v6  ;;  %v14906_v18 = vld [vmem:[%s20810_s4 + $0x3b4] ss:$8 sps:$4 sm:$0xff]  }
 0x205   : > { %21190 = vst [vmem:[#allocation56_spill] sm:$0xff] %v17036_v39  ;;  %21193 = vst [vmem:[#allocation89_spill] sm:$0xff] %v17041_v15  ;;  %v17048_v53 = vadd.f32 %v3829_v24, %v3637_v58  ;;  %v4061_v51 = vpop.f32.mrf.mxu0  ;;  %v14904_v58 = vld [vmem:[%s20810_s4 + $0x3b0] ss:$8 sps:$4 sm:$0xff]   ;;  %v17066_v24 = vrot.slane %v4296_v13, %v17039_v28  ;;  %v17079_v6 = vrot.slane %v4296_v13, %v17050_v46  ;;  %10433 = vmatprep.subr.bf16.mxu0 %v14906_v18 }
 0x206   : > { %21196 = vst [vmem:[#allocation92_spill] sm:$0xff] %v17050_v46  ;;  %v3868_v35 = vpop.f32.mrf.mxu1  ;;  %10434 = vmatpush2.bf16.msra.mxu0 %v14904_v58 }
 0x207   : > { %21195 = vst [vmem:[#allocation91_spill] sm:$0xff] %v17048_v53  ;;  %v3869_v2 = vadd.f32 %v3868_v35, %v16660_v3  ;;  %v4063_v39 = vpop.f32.mrf.mxu0  ;;  %v17070_v3 = vrot.slane %v4220_v30, %v17050_v46  ;;  %v14907_v35 = vld [vmem:[%s20810_s4 + $0x2a0] ss:$8 sps:$4 sm:$0xff]  }
 0x208   : > { %v3870_v56 = vpop.f32.mrf.mxu1  ;;  %10243 = vmatpush2.bf16.msra.mxu1 %v14907_v35 }
 0x209   : > { %v4062_v22 = vadd.f32 %v4061_v51, %v3869_v2  ;;  %v3871_v53 = vadd.f32 %v3870_v56, %v16669_v27  ;;  %v4065_v2 = vpop.f32.mrf.mxu0  ;;  %v14912_v27 = vld [vmem:[%s20810_s4 + $0x3a4] ss:$8 sps:$4 sm:$0xff]  }
 0x20a   : > { %v3872_v51 = vpop.f32.mrf.mxu1  ;;  %10435 = vmatprep.subr.bf16.mxu0 %v14912_v27 }
 0x20b   : > { %v4232_v30 = vmul.f32 %v17057_v26, %v4062_v22  ;;  %v4064_v56 = vadd.f32 %v4063_v39, %v3871_v53  ;;  %v3873_v28 = vadd.f32 %v3872_v51, %v16678_v16  ;;  %v4067_v46 = vpop.f32.mrf.mxu0  ;;  %10436 = vmatpush2.bf16.msra.mxu0 %v14910_v8 }
 0x20c   : > { %v3874_v13 = vpop.f32.mrf.mxu1 }
 0x20d   : > { %v4308_v18 = vadd.f32 %v17066_v24, %v4232_v30  ;;  %v4233_v15 = vmul.f32 %v17070_v3, %v4064_v56  ;;  %v4066_v55 = vadd.f32 %v4065_v2, %v3873_v28  ;;  %v3875_v22 = vadd.f32 %v3874_v13, %v21197_v20  ;;  %v4071_v53 = vpop.f32.mrf.mxu0 }
 0x20e   : > { %v3878_v39 = vpop.f32.mrf.mxu1 }
 0x20f   : > { %v4309_v16 = vadd.f32 %v17079_v6, %v4233_v15  ;;  %v4234_v62 = vmul.f32 %v17057_v26, %v4066_v55  ;;  %v4068_v58 = vadd.f32 %v4067_v46, %v3875_v22  ;;  %v3879_v51 = vadd.f32 %v3878_v39, %v16685_v21  ;;  %v4073_v35 = vpop.f32.mrf.mxu0  ;;  %v14913_v55 = vld [vmem:[%s20810_s4 + $0x290] ss:$8 sps:$4 sm:$0xff]   ;;  %v14915_v21 = vld [vmem:[%s20810_s4 + $0x294] ss:$8 sps:$4 sm:$0xff]  }
 0x210   : > { %v3880_v10 = vpop.f32.mrf.mxu1  ;;  %v17095_v27 = vmax.f32 %v4308_v18, 0.0  ;;  %v14916_v18 = vld [vmem:[%s20810_s4 + $0x390] ss:$8 sps:$4 sm:$0xff]   ;;  %10244 = vmatprep.subr.bf16.mxu1 %v14915_v21 }
 0x211   : > { %v4310_v30 = vadd.f32 %v17066_v24, %v4234_v62  ;;  %v17098_v56 = vmax.f32 %v4309_v16, 0.0  ;;  %v4235_v20 = vmul.f32 %v17070_v3, %v4068_v58  ;;  %v4072_v28 = vadd.f32 %v4071_v53, %v3879_v51  ;;  %v4075_v13 = vpop.f32.mrf.mxu0  ;;  %10245 = vmatpush2.bf16.msra.mxu1 %v14913_v55 }
 0x212   : > { %21198 = vst [vmem:[#allocation60_spill] sm:$0xff] %v17095_v27  ;;  %v3881_v2 = vadd.f32 %v3880_v10, %v16688_v50  ;;  %v3882_v15 = vpop.f32.mrf.mxu1  ;;  %v14918_v50 = vld [vmem:[%s20810_s4 + $0x394] ss:$8 sps:$4 sm:$0xff]   ;;  %v4897_v62 = vrot.slane %v17095_v27, 7 }
 0x213   : > { %21199 = vst [vmem:[#allocation93_spill] sm:$0xff] %v17098_v56  ;;  %v17108_v8 = vmax.f32 %v4310_v30, 0.0  ;;  %v3883_v46 = vadd.f32 %v3882_v15, %v16691_v23  ;;  %v4311_v10 = vadd.f32 %v17079_v6, %v4235_v20  ;;  %v4236_v22 = vmul.f32 %v17057_v26, %v4072_v28  ;;  %v4077_v16 = vpop.f32.mrf.mxu0  ;;  %10437 = vmatprep.subr.bf16.mxu0 %v14918_v50 }
 0x214   : > { %v4074_v39 = vadd.f32 %v4073_v35, %v3881_v2  ;;  %v3884_v53 = vpop.f32.mrf.mxu1  ;;  %v4900_v28 = vrot.slane %v17098_v56, 7  ;;  %10438 = vmatpush2.bf16.msra.mxu0 %v14916_v18 }
 0x215   : > { %21200 = vst [vmem:[#allocation94_spill] sm:$0xff] %v17108_v8  ;;  %v4076_v58 = vadd.f32 %v4075_v13, %v3883_v46  ;;  %v3885_v23 = vadd.f32 %v3884_v53, %v16694_v57  ;;  %v17121_v51 = vmax.f32 %v4311_v10, 0.0  ;;  %v4081_v20 = vpop.f32.mrf.mxu0  ;;  %v17126_v35 = vpack.c.bf16 %v17108_v8, %v17095_v27 }
 0x216   : > { %v4237_v30 = vmul.f32 %v17070_v3, %v4074_v39  ;;  %v3888_v15 = vpop.f32.mrf.mxu1  ;;  %v4902_v2 = vrot.slane %v17108_v8, 7  ;;  %v4312_v21 = vadd.f32 %v17066_v24, %v4236_v22  ;;  %v14921_v22 = vld [vmem:[%s20810_s4 + $0x284] ss:$8 sps:$4 sm:$0xff]  }
 0x217   : > { %21201 = vst [vmem:[#allocation95_spill] sm:$0xff] %v17121_v51  ;;  %21202 = vst [vmem:[#allocation96_spill] sm:$0xff] %v17126_v35  ;;  %v4238_v57 = vmul.f32 %v17057_v26, %v4076_v58  ;;  %v4078_v13 = vadd.f32 %v4077_v16, %v3885_v23  ;;  %v3889_v55 = vadd.f32 %v3888_v15, %v16698_v32  ;;  %v4083_v10 = vpop.f32.mrf.mxu0  ;;  %v4904_v53 = vrot.slane %v17121_v51, 7  ;;  %v14919_v32 = vld [vmem:[%s20810_s4 + $0x280] ss:$8 sps:$4 sm:$0xff]  }
 0x218   : > { %v4313_v46 = vadd.f32 %v17079_v6, %v4237_v30  ;;  %v3890_v50 = vpop.f32.mrf.mxu1  ;;  %v17136_v39 = vpack.c.bf16 %v17121_v51, %v17098_v56  ;;  %v14922_v23 = vld [vmem:[%s20810_s4 + $0x380] ss:$8 sps:$4 sm:$0xff]   ;;  %10246 = vmatprep.subr.bf16.mxu1 %v14921_v22 }
 0x219   : > { %v4314_v18 = vadd.f32 %v17066_v24, %v4238_v57  ;;  %v4239_v8 = vmul.f32 %v17070_v3, %v4078_v13  ;;  %v4082_v58 = vadd.f32 %v4081_v20, %v3889_v55  ;;  %v3891_v16 = vadd.f32 %v3890_v50, %v16701_v44  ;;  %v4085_v15 = vpop.f32.mrf.mxu0  ;;  %v14924_v57 = vld [vmem:[%s20810_s4 + $0x384] ss:$8 sps:$4 sm:$0xff]   ;;  %10247 = vmatpush2.bf16.msra.mxu1 %v14919_v32 }
 0x21a   : > { %21203 = vst [vmem:[#allocation97_spill] sm:$0xff] %v17136_v39  ;;  %10065 = vmatprep.mubr.bf16.mxu0 %v17136_v39  ;;  %v3892_v30 = vpop.f32.mrf.mxu1  ;;  %v4901_v20 = vsel %vm4885_vm2, %v16758_v60, %v4900_v28  ;;  %v4905_v44 = vsel %vm4885_vm2, %v4900_v28, %v4904_v53  ;;  %v4903_v28 = vsel %vm4885_vm2, %v4897_v62, %v4902_v2  ;;  %v17167_v53 = vmax.f32 %v4312_v21, 0.0 }
 0x21b   : > { %v17158_v13 = vmax.f32 %v4314_v18, 0.0  ;;  %v4315_v55 = vadd.f32 %v17079_v6, %v4239_v8  ;;  %v4240_v50 = vmul.f32 %v17057_v26, %v4082_v58  ;;  %v4084_v51 = vadd.f32 %v4083_v10, %v3891_v16  ;;  %10066 = vmatmul.mubr.bf16.gmra.mxu0 %v17126_v35  ;;  %v4087_v27 = vpop.f32.mrf.mxu0  ;;  %10439 = vmatprep.subr.bf16.mxu0 %v14924_v57 }
 0x21c   : > { %v3893_v39 = vadd.f32 %v3892_v30, %v16704_v4  ;;  %v3894_v56 = vpop.f32.mrf.mxu1  ;;  %v17164_v40 = vpack.c.bf16 %v4905_v44, %v4901_v20  ;;  %v17169_v18 = vmax.f32 %v4313_v46, 0.0  ;;  %v4898_v10 = vsel %vm4885_vm2, %v16758_v60, %v4897_v62  ;;  %10440 = vmatpush2.bf16.msra.mxu0 %v14922_v23 }
 0x21d   : > { %v17171_v8 = vmax.f32 %v4315_v55, 0.0  ;;  %v4241_v4 = vmul.f32 %v17070_v3, %v4084_v51  ;;  %v3895_v16 = vadd.f32 %v3894_v56, %v16710_v12  ;;  %v17178_v2 = vpack.c.bf16 %v4903_v28, %v4898_v10  ;;  %v4091_v21 = vpop.f32.mrf.mxu0 }
 0x21e   : > { %21204 = vst [vmem:[#allocation98_spill] sm:$0xff] %v17169_v18  ;;  %v4086_v58 = vadd.f32 %v4085_v15, %v3893_v39  ;;  %9872 = vmatprep.mubr.bf16.mxu1 %v17164_v40  ;;  %v3898_v32 = vpop.f32.mrf.mxu1  ;;  %v4316_v46 = vadd.f32 %v17066_v24, %v4240_v50  ;;  %v17188_v62 = vpack.c.bf16 %v17158_v13, %v17167_v53  ;;  %v4912_v12 = vrot.slane %v17158_v13, 7 }
 0x21f   : > { %21205 = vst [vmem:[#allocation99_spill] sm:$0xff] %v17171_v8  ;;  %v3899_v22 = vadd.f32 %v3898_v32, %v16714_v45  ;;  %v17184_v30 = vpack.c.bf16 %v17171_v8, %v17169_v18  ;;  %v4088_v51 = vadd.f32 %v4087_v27, %v3895_v16  ;;  %9873 = vmatmul.mubr.bf16.gmra.mxu1 %v17178_v2  ;;  %v4093_v23 = vpop.f32.mrf.mxu0  ;;  %v21208_v15 = vmov 0.0   ;;  %v14927_v27 = vld [vmem:[%s20810_s4 + $0x474] ss:$8 sps:$4 sm:$0xff]  }
 0x220   : > { %21207 = vst [vmem:[#allocation101_spill] sm:$0xff] %v17188_v62  ;;  %v4242_v56 = vmul.f32 %v17057_v26, %v4086_v58  ;;  %v3900_v39 = vpop.f32.mrf.mxu1  ;;  %v17194_v20 = vrot.slane %v21208_v15, 1  ;;  %v4907_v45 = vrot.slane %v17167_v53, 7  ;;  %v4910_v55 = vrot.slane %v17169_v18, 7  ;;  %10602 = vmatprep.subr.bf16.mxu1 %v14927_v27 }
 0x221   : > { %21206 = vst [vmem:[#allocation100_spill] sm:$0xff] %v17184_v30  ;;  %v4092_v44 = vadd.f32 %v4091_v21, %v3899_v22  ;;  %v3901_v57 = vadd.f32 %v3900_v39, %v16720_v33  ;;  %10075 = vmatprep.mubr.bf16.mxu0 %v17184_v30  ;;  %v4317_v50 = vadd.f32 %v17079_v6, %v4241_v4  ;;  %v4095_v16 = vpop.f32.mrf.mxu0  ;;  %v4914_v32 = vrot.slane %v17171_v8, 7  ;;  %v14930_v33 = vld [vmem:[%s20810_s4 + $0x574] ss:$8 sps:$4 sm:$0xff]  }
 0x222   : > { %v4318_v28 = vadd.f32 %v17066_v24, %v4242_v56  ;;  %v4243_v10 = vmul.f32 %v17070_v3, %v4088_v51  ;;  %v3902_v58 = vpop.f32.mrf.mxu1  ;;  %v17210_v21 = vmax.f32 %v4316_v46, 0.0  ;;  %v4913_v18 = vsel %vm4885_vm2, %v4907_v45, %v4912_v12  ;;  %10795 = vmatprep.subr.bf16.mxu0 %v14930_v33  ;;  %v21299_v8 = vld [vmem:[#allocation84_spill] sm:$0xff] }
 0x223   : > { %v4244_v22 = vmul.f32 %v17057_v26, %v4092_v44  ;;  %v4094_v39 = vadd.f32 %v4093_v23, %v3901_v57  ;;  %v3903_v15 = vadd.f32 %v3902_v58, %v16723_v5  ;;  %10076 = vmatmul.mubr.bf16.gmra.mxu0 %v17188_v62  ;;  %v4097_v30 = vpop.f32.mrf.mxu0  ;;  %v4915_v35 = vsel %vm4885_vm2, %v4910_v55, %v4914_v32  ;;  %v21209_v57 = vld [vmem:[#allocation48_spill] sm:$0xff] }
 0x224   : > { %v17215_v4 = vmax.f32 %v4318_v28, 0.0  ;;  %v4319_v56 = vadd.f32 %v17079_v6, %v4243_v10  ;;  %v3904_v51 = vpop.f32.mrf.mxu1  ;;  %v4911_v5 = vsel %vm4885_vm2, %v16758_v60, %v4910_v55  ;;  %v17226_v28 = vadd.f32 %v16749_v11, %v21209_v57 }
 0x225   : > { %v4245_v46 = vmul.f32 %v17070_v3, %v4094_v39  ;;  %v4096_v44 = vadd.f32 %v4095_v16, %v3903_v15  ;;  %v3905_v23 = vadd.f32 %v3904_v51, %v16726_v49  ;;  %v17228_v10 = vmax.f32 %v4317_v50, 0.0  ;;  %v4101_v27 = vpop.f32.mrf.mxu0 }
 0x226   : > { %v17230_v58 = vmax.f32 %v4319_v56, 0.0  ;;  %v17232_v32 = vpack.c.bf16 %v4915_v35, %v4911_v5  ;;  %v3908_v12 = vpop.f32.mrf.mxu1  ;;  %v4320_v33 = vadd.f32 %v17066_v24, %v4244_v22  ;;  %v4908_v55 = vsel %vm4885_vm2, %v16758_v60, %v4907_v45 }
 0x227   : > { %21210 = vst [vmem:[#allocation48_spill] sm:$0xff] %v17228_v10  ;;  %v4246_v15 = vmul.f32 %v17057_v26, %v4096_v44  ;;  %v4098_v49 = vadd.f32 %v4097_v30, %v3905_v23  ;;  %v17239_v11 = vpack.c.bf16 %v4913_v18, %v4908_v55  ;;  %v3909_v50 = vadd.f32 %v3908_v12, %v16730_v31  ;;  %v4103_v39 = vpop.f32.mrf.mxu0  ;;  %v21216_v30 = vld [vmem:[#allocation53_spill] sm:$0xff] }
 0x228   : > { %21211 = vst [vmem:[#allocation102_spill] sm:$0xff] %v17230_v58  ;;  %21212 = vst [vmem:[#allocation103_spill] sm:$0xff] %v17232_v32  ;;  %9882 = vmatprep.mubr.bf16.mxu1 %v17232_v32  ;;  %v3910_v16 = vpop.f32.mrf.mxu1  ;;  %v17244_v35 = vpack.c.bf16 %v17230_v58, %v17228_v10  ;;  %v17248_v22 = vpack.c.bf16 %v17215_v4, %v17210_v21  ;;  %v3549_v56 = vadd.f32 %v16772_v54, %v21216_v30  ;;  %v21217_v54 = vld [vmem:[#allocation58_spill] sm:$0xff] }
 0x229   : > { %21213 = vst [vmem:[#allocation104_spill] sm:$0xff] %v17239_v11  ;;  %v4917_v45 = vrot.slane %v17210_v21, 7  ;;  %v4321_v18 = vadd.f32 %v17079_v6, %v4245_v46  ;;  %v4322_v51 = vadd.f32 %v17066_v24, %v4246_v15  ;;  %v4247_v31 = vmul.f32 %v17070_v3, %v4098_v49  ;;  %9883 = vmatmul.mubr.bf16.gmra.mxu1 %v17239_v11  ;;  %v4105_v57 = vpop.f32.mrf.mxu0 }
 0x22a   : > { %21214 = vst [vmem:[#allocation105_spill] sm:$0xff] %v17244_v35  ;;  %21215 = vst [vmem:[#allocation106_spill] sm:$0xff] %v17248_v22  ;;  %v4102_v44 = vadd.f32 %v4101_v27, %v3909_v50  ;;  %v3911_v23 = vadd.f32 %v3910_v16, %v16733_v38  ;;  %10085 = vmatprep.mubr.bf16.mxu0 %v17244_v35  ;;  %v3912_v5 = vpop.f32.mrf.mxu1  ;;  %v4920_v12 = vrot.slane %v17228_v10, 7  ;;  %v4922_v46 = vrot.slane %v17215_v4, 7 }
 0x22b   : > { %v3559_v55 = vadd.f32 %v16795_v63, %v21217_v54  ;;  %v3913_v15 = vadd.f32 %v3912_v5, %v16736_v52  ;;  %10086 = vmatmul.mubr.bf16.gmra.mxu0 %v17248_v22  ;;  %v4924_v49 = vrot.slane %v17230_v58, 7  ;;  %v17266_v27 = vmax.f32 %v4320_v33, 0.0  ;;  %v4107_v35 = vpop.f32.mrf.mxu0 }
 0x22c   : > { %v4323_v38 = vadd.f32 %v17079_v6, %v4247_v31  ;;  %v4248_v50 = vmul.f32 %v17057_v26, %v4102_v44  ;;  %v4104_v16 = vadd.f32 %v4103_v39, %v3911_v23  ;;  %v3914_v30 = vpop.f32.mrf.mxu1  ;;  %v17270_v62 = vmax.f32 %v4321_v18, 0.0 }
 0x22d   : > { %v17272_v63 = vmax.f32 %v4322_v51, 0.0  ;;  %v4106_v54 = vadd.f32 %v4105_v57, %v3913_v15  ;;  %v3915_v52 = vadd.f32 %v3914_v30, %v16739_v37  ;;  %v4921_v33 = vsel %vm4885_vm2, %v16758_v60, %v4920_v12  ;;  %v4111_v44 = vpop.f32.mrf.mxu0 }
 0x22e   : > { %21218 = vst [vmem:[#allocation53_spill] sm:$0xff] %v17270_v62  ;;  %v17275_v5 = vmax.f32 %v4323_v38, 0.0  ;;  %v4925_v22 = vsel %vm4885_vm2, %v4920_v12, %v4924_v49  ;;  %v4918_v31 = vsel %vm4885_vm2, %v16758_v60, %v4917_v45  ;;  %v3918_v39 = vpop.f32.mrf.mxu1  ;;  %v4923_v57 = vsel %vm4885_vm2, %v4917_v45, %v4922_v46 }
 0x22f   : > { %v4250_v18 = vmul.f32 %v17057_v26, %v4106_v54  ;;  %v4108_v23 = vadd.f32 %v4107_v35, %v3915_v52  ;;  %v17283_v51 = vpack.c.bf16 %v4925_v22, %v4921_v33  ;;  %v4324_v37 = vadd.f32 %v17066_v24, %v4248_v50  ;;  %v4113_v30 = vpop.f32.mrf.mxu0 }
 0x230   : > { %21219 = vst [vmem:[#allocation58_spill] sm:$0xff] %v17275_v5  ;;  %v4249_v15 = vmul.f32 %v17070_v3, %v4104_v16  ;;  %v17288_v38 = vpack.c.bf16 %v4923_v57, %v4918_v31  ;;  %v3919_v12 = vadd.f32 %v3918_v39, %v16743_v59  ;;  %v3920_v49 = vpop.f32.mrf.mxu1  ;;  %v17297_v22 = vpack.c.bf16 %v17275_v5, %v17270_v62  ;;  %v21224_v39 = vld [vmem:[#allocation42_spill] sm:$0xff] }
 0x231   : > { %21220 = vst [vmem:[#allocation107_spill] sm:$0xff] %v17283_v51  ;;  %v4326_v10 = vadd.f32 %v17066_v24, %v4250_v18  ;;  %v4251_v11 = vmul.f32 %v17070_v3, %v4108_v23  ;;  %9892 = vmatprep.mubr.bf16.mxu1 %v17283_v51  ;;  %v3921_v35 = vadd.f32 %v3920_v49, %v16746_v48  ;;  %v4115_v54 = vpop.f32.mrf.mxu0  ;;  %v4932_v48 = vrot.slane %v17272_v63, 7  ;;  %v21288_v51 = vld [vmem:[#allocation79_spill] sm:$0xff] }
 0x232   : > { %21221 = vst [vmem:[#allocation108_spill] sm:$0xff] %v17288_v38  ;;  %21222 = vst [vmem:[#allocation109_spill] sm:$0xff] %v17297_v22  ;;  %v3732_v45 = vadd.f32 %v16751_v42, %v17226_v28  ;;  %v17302_v46 = vadd.f32 %v16774_v1, %v3549_v56  ;;  %v17305_v59 = vadd.f32 %v16797_v0, %v3559_v55  ;;  %9893 = vmatmul.mubr.bf16.gmra.mxu1 %v17288_v38  ;;  %v3922_v16 = vpop.f32.mrf.mxu1 }
 0x233   : > { %v4112_v50 = vadd.f32 %v4111_v44, %v3919_v12  ;;  %v4327_v52 = vadd.f32 %v17079_v6, %v4251_v11  ;;  %v4114_v33 = vadd.f32 %v4113_v30, %v3921_v35  ;;  %10095 = vmatprep.mubr.bf16.mxu0 %v17297_v22  ;;  %v3923_v42 = vadd.f32 %v3922_v16, %v16753_v41  ;;  %v4117_v56 = vpop.f32.mrf.mxu0  ;;  %v21230_v22 = vld [vmem:[#allocation62_spill] sm:$0xff] }
 0x234   : > { %v4927_v1 = vrot.slane %v17266_v27, 7  ;;  %v17315_v0 = vpack.c.bf16 %v17272_v63, %v17266_v27  ;;  %v3924_v28 = vpop.f32.mrf.mxu1  ;;  %v4930_v55 = vrot.slane %v17270_v62, 7  ;;  %v4934_v31 = vrot.slane %v17275_v5, 7  ;;  %v21284_v62 = vld [vmem:[#allocation49_spill] sm:$0xff] }
 0x235   : > { %v3569_v11 = vadd.f32 %v16834_v43, %v21224_v39  ;;  %v17321_v44 = vmax.f32 %v4324_v37, 0.0  ;;  %v4325_v18 = vadd.f32 %v17079_v6, %v4249_v15  ;;  %v17324_v41 = vmax.f32 %v4326_v10, 0.0  ;;  %v4121_v35 = vpop.f32.mrf.mxu0 }
 0x236   : > { %21223 = vst [vmem:[#allocation110_spill] sm:$0xff] %v17315_v0  ;;  %v4252_v23 = vmul.f32 %v17057_v26, %v4112_v50  ;;  %v4253_v57 = vmul.f32 %v17070_v3, %v4114_v33  ;;  %v4116_v12 = vadd.f32 %v4115_v54, %v3923_v42  ;;  %10096 = vmatmul.mubr.bf16.gmra.mxu0 %v17315_v0  ;;  %v3928_v30 = vpop.f32.mrf.mxu1  ;;  %v17329_v16 = vmax.f32 %v4327_v52, 0.0 }
 0x237   : > { %v3925_v49 = vadd.f32 %v3924_v28, %v3732_v45  ;;  %v4931_v43 = vsel %vm4885_vm2, %v16758_v60, %v4930_v55  ;;  %v4935_v37 = vsel %vm4885_vm2, %v4930_v55, %v4934_v31  ;;  %v4933_v10 = vsel %vm4885_vm2, %v4927_v1, %v4932_v48  ;;  %v4123_v33 = vpop.f32.mrf.mxu0  ;;  %v21229_v28 = vld [vmem:[#allocation61_spill] sm:$0xff] }
 0x238   : > { %21225 = vst [vmem:[#allocation42_spill] sm:$0xff] %v17329_v16  ;;  %v4254_v15 = vmul.f32 %v17057_v26, %v4116_v12  ;;  %v17336_v39 = vpack.c.bf16 %v4935_v37, %v4931_v43  ;;  %v4928_v54 = vsel %vm4885_vm2, %v16758_v60, %v4927_v1  ;;  %v3930_v45 = vpop.f32.mrf.mxu1  ;;  %v17340_v42 = vmax.f32 %v4325_v18, 0.0 }
 0x239   : > { %v4118_v50 = vadd.f32 %v4117_v56, %v3925_v49  ;;  %v17342_v52 = vpack.c.bf16 %v4933_v10, %v4928_v54  ;;  %v3929_v0 = vadd.f32 %v3928_v30, %v21229_v28  ;;  %v3931_v55 = vadd.f32 %v3930_v45, %v21230_v22  ;;  %v4125_v49 = vpop.f32.mrf.mxu0 }
 0x23a   : > { %21226 = vst [vmem:[#allocation111_spill] sm:$0xff] %v17336_v39  ;;  %21227 = vst [vmem:[#allocation112_spill] sm:$0xff] %v17340_v42  ;;  %v4328_v48 = vadd.f32 %v17066_v24, %v4252_v23  ;;  %v4329_v31 = vadd.f32 %v17079_v6, %v4253_v57  ;;  %v4330_v56 = vadd.f32 %v17066_v24, %v4254_v15  ;;  %9902 = vmatprep.mubr.bf16.mxu1 %v17336_v39  ;;  %v3932_v1 = vpop.f32.mrf.mxu1 }
 0x23b   : > { %21228 = vst [vmem:[#allocation113_spill] sm:$0xff] %v17342_v52  ;;  %v4255_v12 = vmul.f32 %v17070_v3, %v4118_v50  ;;  %9903 = vmatmul.mubr.bf16.gmra.mxu1 %v17342_v52  ;;  %v4122_v18 = vadd.f32 %v4121_v35, %v3929_v0  ;;  %v4124_v43 = vadd.f32 %v4123_v33, %v3931_v55  ;;  %v4937_v23 = vrot.slane %v17321_v44, 7  ;;  %v4127_v50 = vpop.f32.mrf.mxu0 }
 0x23c   : > { %v17354_v30 = vpack.c.bf16 %v17329_v16, %v17340_v42  ;;  %v3933_v22 = vadd.f32 %v3932_v1, %v16776_v34  ;;  %v4942_v57 = vrot.slane %v17324_v41, 7  ;;  %v17362_v10 = vpack.c.bf16 %v17324_v41, %v17321_v44  ;;  %v3934_v15 = vpop.f32.mrf.mxu1 }
 0x23d   : > { %v4331_v37 = vadd.f32 %v17079_v6, %v4255_v12  ;;  %v4256_v0 = vmul.f32 %v17057_v26, %v4122_v18  ;;  %v4257_v35 = vmul.f32 %v17070_v3, %v4124_v43  ;;  %v3935_v34 = vadd.f32 %v3934_v15, %v17302_v46  ;;  %v4131_v1 = vpop.f32.mrf.mxu0 }
 0x23e   : > { %21231 = vst [vmem:[#allocation61_spill] sm:$0xff] %v17354_v30  ;;  %21232 = vst [vmem:[#allocation62_spill] sm:$0xff] %v17362_v10  ;;  %10105 = vmatprep.mubr.bf16.mxu0 %v17354_v30  ;;  %v4126_v54 = vadd.f32 %v4125_v49, %v3933_v22  ;;  %v17369_v45 = vadd.f32 %v16836_v29, %v3569_v11  ;;  %v17371_v33 = vmax.f32 %v4328_v48, 0.0  ;;  %v17373_v28 = vmax.f32 %v4329_v31, 0.0  ;;  %v3938_v12 = vpop.f32.mrf.mxu1 }
 0x23f   : > { %v17375_v55 = vmax.f32 %v4330_v56, 0.0  ;;  %10106 = vmatmul.mubr.bf16.gmra.mxu0 %v17362_v10  ;;  %v17378_v18 = vmax.f32 %v4331_v37, 0.0  ;;  %v4128_v49 = vadd.f32 %v4127_v50, %v3935_v34  ;;  %v4940_v46 = vrot.slane %v17340_v42, 7  ;;  %v4133_v22 = vpop.f32.mrf.mxu0 }
 0x240   : > { %21233 = vst [vmem:[#allocation114_spill] sm:$0xff] %v17373_v28  ;;  %v4258_v43 = vmul.f32 %v17057_v26, %v4126_v54  ;;  %v4332_v29 = vadd.f32 %v17066_v24, %v4256_v0  ;;  %v4944_v11 = vrot.slane %v17329_v16, 7  ;;  %v4943_v48 = vsel %vm4885_vm2, %v4937_v23, %v4942_v57  ;;  %v3940_v56 = vpop.f32.mrf.mxu1 }
 0x241   : > { %21234 = vst [vmem:[#allocation115_spill] sm:$0xff] %v17378_v18  ;;  %v3939_v31 = vadd.f32 %v3938_v12, %v16781_v14  ;;  %v4333_v15 = vadd.f32 %v17079_v6, %v4257_v35  ;;  %v4259_v10 = vmul.f32 %v17070_v3, %v4128_v49  ;;  %v4938_v50 = vsel %vm4885_vm2, %v16758_v60, %v4937_v23  ;;  %v4135_v14 = vpop.f32.mrf.mxu0 }
 0x242   : > { %v4334_v37 = vadd.f32 %v17066_v24, %v4258_v43  ;;  %v4945_v54 = vsel %vm4885_vm2, %v4940_v46, %v4944_v11  ;;  %v17392_v0 = vpack.c.bf16 %v4943_v48, %v4938_v50  ;;  %v3941_v57 = vadd.f32 %v3940_v56, %v16786_v17  ;;  %v3942_v30 = vpop.f32.mrf.mxu1 }
 0x243   : > { %v4132_v34 = vadd.f32 %v4131_v1, %v3939_v31  ;;  %v4947_v12 = vrot.slane %v17371_v33, 7  ;;  %v4952_v35 = vrot.slane %v17375_v55, 7  ;;  %v4335_v43 = vadd.f32 %v17079_v6, %v4259_v10  ;;  %v4137_v48 = vpop.f32.mrf.mxu0  ;;  %v21238_v31 = vld [vmem:[#allocation43_spill] sm:$0xff] }
 0x244   : > { %21235 = vst [vmem:[#allocation116_spill] sm:$0xff] %v17392_v0  ;;  %v4941_v49 = vsel %vm4885_vm2, %v16758_v60, %v4940_v46  ;;  %v4134_v11 = vadd.f32 %v4133_v22, %v3941_v57  ;;  %v17405_v1 = vpack.c.bf16 %v17378_v18, %v17373_v28  ;;  %v3944_v17 = vpop.f32.mrf.mxu1  ;;  %v17409_v56 = vadd.f32 %v16871_v25, %v21238_v31  ;;  %v21240_v46 = vld [vmem:[#allocation66_spill] sm:$0xff] }
 0x245   : > { %v17400_v42 = vpack.c.bf16 %v4945_v54, %v4941_v49  ;;  %v4260_v23 = vmul.f32 %v17057_v26, %v4132_v34  ;;  %v17411_v50 = vmax.f32 %v4332_v29, 0.0  ;;  %v17413_v10 = vmax.f32 %v4333_v15, 0.0  ;;  %v4141_v57 = vpop.f32.mrf.mxu0 }
 0x246   : > { %21237 = vst [vmem:[#allocation118_spill] sm:$0xff] %v17405_v1  ;;  %v3943_v54 = vadd.f32 %v3942_v30, %v21240_v46  ;;  %v17416_v49 = vmax.f32 %v4334_v37, 0.0  ;;  %v4261_v22 = vmul.f32 %v17070_v3, %v4134_v11  ;;  %10115 = vmatprep.mubr.bf16.mxu0 %v17405_v1  ;;  %v17423_v34 = vpack.c.bf16 %v17375_v55, %v17371_v33  ;;  %v3948_v29 = vpop.f32.mrf.mxu1 }
 0x247   : > { %21236 = vst [vmem:[#allocation117_spill] sm:$0xff] %v17400_v42  ;;  %21239 = vst [vmem:[#allocation43_spill] sm:$0xff] %v17413_v10  ;;  %9912 = vmatprep.mubr.bf16.mxu1 %v17400_v42  ;;  %v4950_v25 = vrot.slane %v17373_v28, 7  ;;  %v17426_v15 = vmax.f32 %v4335_v43, 0.0  ;;  %v3945_v37 = vadd.f32 %v3944_v17, %v17305_v59  ;;  %v4954_v31 = vrot.slane %v17378_v18, 7  ;;  %v4143_v16 = vpop.f32.mrf.mxu0 }
 0x248   : > { %21241 = vst [vmem:[#allocation66_spill] sm:$0xff] %v17423_v34  ;;  %9913 = vmatmul.mubr.bf16.gmra.mxu1 %v17392_v0  ;;  %v4136_v30 = vadd.f32 %v4135_v14, %v3943_v54  ;;  %v4336_v11 = vadd.f32 %v17066_v24, %v4260_v23  ;;  %10116 = vmatmul.mubr.bf16.gmra.mxu0 %v17423_v34  ;;  %v3950_v28 = vpop.f32.mrf.mxu1  ;;  %v4957_v23 = vrot.slane %v17411_v50, 7  ;;  %v4962_v34 = vrot.slane %v17416_v49, 7 }
 0x249   : > { %21242 = vst [vmem:[#allocation119_spill] sm:$0xff] %v17426_v15  ;;  %v4951_v46 = vsel %vm4885_vm2, %v16758_v60, %v4950_v25  ;;  %v4948_v1 = vsel %vm4885_vm2, %v16758_v60, %v4947_v12  ;;  %v4953_v43 = vsel %vm4885_vm2, %v4947_v12, %v4952_v35  ;;  %v4138_v54 = vadd.f32 %v4137_v48, %v3945_v37  ;;  %v4145_v52 = vpop.f32.mrf.mxu0  ;;  %v21247_v37 = vld [vmem:[#allocation68_spill] sm:$0xff] }
 0x24a   : > { %v4262_v14 = vmul.f32 %v17057_v26, %v4136_v30  ;;  %v4955_v59 = vsel %vm4885_vm2, %v4950_v25, %v4954_v31  ;;  %v17440_v17 = vpack.c.bf16 %v4953_v43, %v4948_v1  ;;  %v4337_v18 = vadd.f32 %v17079_v6, %v4261_v22  ;;  %v3952_v42 = vpop.f32.mrf.mxu1  ;;  %v21245_v30 = vld [vmem:[#allocation67_spill] sm:$0xff] }
 0x24b   : > { %v17445_v0 = vpack.c.bf16 %v4955_v59, %v4951_v46  ;;  %v4263_v35 = vmul.f32 %v17070_v3, %v4138_v54  ;;  %v3949_v48 = vadd.f32 %v3948_v29, %v16822_v36  ;;  %v3951_v25 = vadd.f32 %v3950_v28, %v21245_v30  ;;  %v4147_v43 = vpop.f32.mrf.mxu0 }
 0x24c   : > { %21243 = vst [vmem:[#allocation120_spill] sm:$0xff] %v17440_v17  ;;  %v4338_v12 = vadd.f32 %v17066_v24, %v4262_v14  ;;  %v17454_v1 = vpack.c.bf16 %v17426_v15, %v17413_v10  ;;  %v3953_v22 = vadd.f32 %v3952_v42, %v21247_v37  ;;  %v17459_v31 = vpack.c.bf16 %v17416_v49, %v17411_v50  ;;  %v3954_v46 = vpop.f32.mrf.mxu1 }
 0x24d   : > { %21244 = vst [vmem:[#allocation121_spill] sm:$0xff] %v17445_v0  ;;  %9922 = vmatprep.mubr.bf16.mxu1 %v17445_v0  ;;  %v4960_v14 = vrot.slane %v17413_v10, 7  ;;  %v17462_v54 = vmax.f32 %v4336_v11, 0.0  ;;  %v4339_v36 = vadd.f32 %v17079_v6, %v4263_v35  ;;  %v4142_v28 = vadd.f32 %v4141_v57, %v3949_v48  ;;  %v4151_v5 = vpop.f32.mrf.mxu0 }
 0x24e   : > { %21246 = vst [vmem:[#allocation67_spill] sm:$0xff] %v17454_v1  ;;  %21248 = vst [vmem:[#allocation68_spill] sm:$0xff] %v17459_v31  ;;  %v4144_v29 = vadd.f32 %v4143_v16, %v3951_v25  ;;  %v17465_v59 = vmax.f32 %v4337_v18, 0.0  ;;  %10125 = vmatprep.mubr.bf16.mxu0 %v17454_v1  ;;  %v4146_v30 = vadd.f32 %v4145_v52, %v3953_v22  ;;  %v4964_v37 = vrot.slane %v17426_v15, 7  ;;  %v3958_v0 = vpop.f32.mrf.mxu1 }
 0x24f   : > { %v3955_v42 = vadd.f32 %v3954_v46, %v17369_v45  ;;  %v17470_v39 = vmax.f32 %v4338_v12, 0.0  ;;  %v17472_v10 = vmax.f32 %v4339_v36, 0.0  ;;  %v4264_v57 = vmul.f32 %v17057_v26, %v4142_v28  ;;  %v4153_v35 = vpop.f32.mrf.mxu0 }
 0x250   : > { %21249 = vst [vmem:[#allocation122_spill] sm:$0xff] %v17465_v59  ;;  %9923 = vmatmul.mubr.bf16.gmra.mxu1 %v17440_v17  ;;  %v4961_v16 = vsel %vm4885_vm2, %v16758_v60, %v4960_v14  ;;  %v4265_v18 = vmul.f32 %v17070_v3, %v4144_v29  ;;  %v4266_v52 = vmul.f32 %v17057_v26, %v4146_v30  ;;  %v3960_v12 = vpop.f32.mrf.mxu1 }
 0x251   : > { %21250 = vst [vmem:[#allocation123_spill] sm:$0xff] %v17472_v10  ;;  %10126 = vmatmul.mubr.bf16.gmra.mxu0 %v17459_v31  ;;  %v4148_v45 = vadd.f32 %v4147_v43, %v3955_v42  ;;  %v4965_v11 = vsel %vm4885_vm2, %v4960_v14, %v4964_v37  ;;  %v4340_v48 = vadd.f32 %v17066_v24, %v4264_v57  ;;  %v4155_v30 = vpop.f32.mrf.mxu0  ;;  %v21253_v57 = vld [vmem:[#allocation69_spill] sm:$0xff] }
 0x252   : > { %v17483_v25 = vpack.c.bf16 %v4965_v11, %v4961_v16  ;;  %v4958_v22 = vsel %vm4885_vm2, %v16758_v60, %v4957_v23  ;;  %v4963_v46 = vsel %vm4885_vm2, %v4957_v23, %v4962_v34  ;;  %v4341_v36 = vadd.f32 %v17079_v6, %v4265_v18  ;;  %v3962_v14 = vpop.f32.mrf.mxu1  ;;  %v21255_v23 = vld [vmem:[#allocation44_spill] sm:$0xff]  ;;  %v21256_v11 = vld [vmem:[#allocation70_spill] sm:$0xff] }
 0x253   : > { %v4342_v28 = vadd.f32 %v17066_v24, %v4266_v52  ;;  %v4267_v29 = vmul.f32 %v17070_v3, %v4148_v45  ;;  %v17491_v43 = vpack.c.bf16 %v4963_v46, %v4958_v22  ;;  %v3772_v42 = vadd.f32 %v16873_v9, %v17409_v56  ;;  %v4157_v56 = vpop.f32.mrf.mxu0 }
 0x254   : > { %21251 = vst [vmem:[#allocation124_spill] sm:$0xff] %v17483_v25  ;;  %9932 = vmatprep.mubr.bf16.mxu1 %v17483_v25  ;;  %v3959_v37 = vadd.f32 %v3958_v0, %v16859_v61  ;;  %v3961_v16 = vadd.f32 %v3960_v12, %v21253_v57  ;;  %v17500_v34 = vpack.c.bf16 %v17472_v10, %v17465_v59  ;;  %v4967_v52 = vrot.slane %v17462_v54, 7  ;;  %v3964_v9 = vpop.f32.mrf.mxu1  ;;  %v21276_v25 = vld [vmem:[#allocation75_spill] sm:$0xff] }
 0x255   : > { %21252 = vst [vmem:[#allocation125_spill] sm:$0xff] %v17491_v43  ;;  %v3589_v18 = vadd.f32 %v16908_v19, %v21255_v23  ;;  %v4343_v45 = vadd.f32 %v17079_v6, %v4267_v29  ;;  %v3963_v22 = vadd.f32 %v3962_v14, %v21256_v11  ;;  %v4972_v46 = vrot.slane %v17470_v39, 7  ;;  %v4161_v1 = vpop.f32.mrf.mxu0 }
 0x256   : > { %21254 = vst [vmem:[#allocation69_spill] sm:$0xff] %v17500_v34  ;;  %v17508_v61 = vmax.f32 %v4340_v48, 0.0  ;;  %v4152_v0 = vadd.f32 %v4151_v5, %v3959_v37  ;;  %v4154_v12 = vadd.f32 %v4153_v35, %v3961_v16  ;;  %10135 = vmatprep.mubr.bf16.mxu0 %v17500_v34  ;;  %v17511_v57 = vmax.f32 %v4341_v36, 0.0  ;;  %v3968_v29 = vpop.f32.mrf.mxu1 }
 0x257   : > { %v17513_v31 = vmax.f32 %v4342_v28, 0.0  ;;  %v17515_v19 = vmax.f32 %v4343_v45, 0.0  ;;  %v4156_v23 = vadd.f32 %v4155_v30, %v3963_v22  ;;  %v17522_v5 = vpack.c.bf16 %v17470_v39, %v17462_v54  ;;  %v4163_v45 = vpop.f32.mrf.mxu0 }
 0x258   : > { %21257 = vst [vmem:[#allocation44_spill] sm:$0xff] %v17511_v57  ;;  %9933 = vmatmul.mubr.bf16.gmra.mxu1 %v17491_v43  ;;  %v4268_v14 = vmul.f32 %v17057_v26, %v4152_v0  ;;  %v4269_v48 = vmul.f32 %v17070_v3, %v4154_v12  ;;  %v3965_v35 = vadd.f32 %v3964_v9, %v3772_v42  ;;  %v4970_v28 = vrot.slane %v17465_v59, 7  ;;  %v3970_v16 = vpop.f32.mrf.mxu1  ;;  %v21261_v43 = vld [vmem:[#allocation45_spill] sm:$0xff] }
 0x259   : > { %21258 = vst [vmem:[#allocation70_spill] sm:$0xff] %v17515_v19  ;;  %21259 = vst [vmem:[#allocation126_spill] sm:$0xff] %v17522_v5  ;;  %v4270_v36 = vmul.f32 %v17057_v26, %v4156_v23  ;;  %v4974_v37 = vrot.slane %v17472_v10, 7  ;;  %v4968_v30 = vsel %vm4885_vm2, %v16758_v60, %v4967_v52  ;;  %10136 = vmatmul.mubr.bf16.gmra.mxu0 %v17522_v5  ;;  %v4165_v10 = vpop.f32.mrf.mxu0  ;;  %v21264_v5 = vld [vmem:[#allocation72_spill] sm:$0xff] }
 0x25a   : > { %v4344_v11 = vadd.f32 %v17066_v24, %v4268_v14  ;;  %v4345_v22 = vadd.f32 %v17079_v6, %v4269_v48  ;;  %v4158_v0 = vadd.f32 %v4157_v56, %v3965_v35  ;;  %v4973_v42 = vsel %vm4885_vm2, %v4967_v52, %v4972_v46  ;;  %v3972_v59 = vpop.f32.mrf.mxu1  ;;  %v21263_v46 = vld [vmem:[#allocation71_spill] sm:$0xff] }
 0x25b   : > { %v4346_v9 = vadd.f32 %v17066_v24, %v4270_v36  ;;  %v4971_v12 = vsel %vm4885_vm2, %v16758_v60, %v4970_v28  ;;  %v4975_v23 = vsel %vm4885_vm2, %v4970_v28, %v4974_v37  ;;  %v17537_v34 = vpack.c.bf16 %v4973_v42, %v4968_v30  ;;  %v4167_v30 = vpop.f32.mrf.mxu0 }
 0x25c   : > { %v3782_v14 = vadd.f32 %v16910_v7, %v3589_v18  ;;  %v3599_v48 = vadd.f32 %v16939_v47, %v21261_v43  ;;  %v4271_v56 = vmul.f32 %v17070_v3, %v4158_v0  ;;  %v17543_v35 = vpack.c.bf16 %v4975_v23, %v4971_v12  ;;  %v3974_v37 = vpop.f32.mrf.mxu1  ;;  %v21266_v43 = vld [vmem:[#allocation73_spill] sm:$0xff] }
 0x25d   : > { %21260 = vst [vmem:[#allocation127_spill] sm:$0xff] %v17537_v34  ;;  %v4977_v52 = vrot.slane %v17508_v61, 7  ;;  %v3969_v36 = vadd.f32 %v3968_v29, %v21263_v46  ;;  %v3971_v15 = vadd.f32 %v3970_v16, %v21264_v5  ;;  %v17550_v28 = vpack.c.bf16 %v17515_v19, %v17511_v57  ;;  %v4171_v23 = vpop.f32.mrf.mxu0 }
 0x25e   : > { %21262 = vst [vmem:[#allocation45_spill] sm:$0xff] %v17543_v35  ;;  %v4982_v7 = vrot.slane %v17513_v31, 7  ;;  %v17553_v18 = vmax.f32 %v4344_v11, 0.0  ;;  %v4347_v47 = vadd.f32 %v17079_v6, %v4271_v56  ;;  %9942 = vmatprep.mubr.bf16.mxu1 %v17543_v35  ;;  %v3973_v0 = vadd.f32 %v3972_v59, %v21266_v43  ;;  %v3978_v12 = vpop.f32.mrf.mxu1 }
 0x25f   : > { %21265 = vst [vmem:[#allocation71_spill] sm:$0xff] %v17550_v28  ;;  %v17558_v42 = vmax.f32 %v4345_v22, 0.0  ;;  %v17560_v29 = vmax.f32 %v4346_v9, 0.0  ;;  %v4162_v5 = vadd.f32 %v4161_v1, %v3969_v36  ;;  %v4164_v16 = vadd.f32 %v4163_v45, %v3971_v15  ;;  %10145 = vmatprep.mubr.bf16.mxu0 %v17550_v28  ;;  %v4173_v36 = vpop.f32.mrf.mxu0 }
 0x260   : > { %v17563_v46 = vmax.f32 %v4347_v47, 0.0  ;;  %9943 = vmatmul.mubr.bf16.gmra.mxu1 %v17537_v34  ;;  %v4166_v11 = vadd.f32 %v4165_v10, %v3973_v0  ;;  %v17568_v56 = vpack.c.bf16 %v17513_v31, %v17508_v61  ;;  %v3975_v59 = vadd.f32 %v3974_v37, %v3782_v14  ;;  %v3980_v45 = vpop.f32.mrf.mxu1  ;;  %v21275_v34 = vld [vmem:[#allocation74_spill] sm:$0xff] }
 0x261   : > { %21267 = vst [vmem:[#allocation72_spill] sm:$0xff] %v17558_v42  ;;  %v4272_v22 = vmul.f32 %v17057_v26, %v4162_v5  ;;  %v4273_v9 = vmul.f32 %v17070_v3, %v4164_v16  ;;  %v4980_v15 = vrot.slane %v17511_v57, 7  ;;  %v4984_v1 = vrot.slane %v17515_v19, 7  ;;  %v4175_v57 = vpop.f32.mrf.mxu0  ;;  %v21274_v19 = vld [vmem:[#allocation80_spill] sm:$0xff] }
 0x262   : > { %21268 = vst [vmem:[#allocation73_spill] sm:$0xff] %v17563_v46  ;;  %21269 = vst [vmem:[#allocation128_spill] sm:$0xff] %v17568_v56  ;;  %v4274_v47 = vmul.f32 %v17057_v26, %v4166_v11  ;;  %10146 = vmatmul.mubr.bf16.gmra.mxu0 %v17568_v56  ;;  %v4168_v10 = vadd.f32 %v4167_v30, %v3975_v59  ;;  %v4978_v43 = vsel %vm4885_vm2, %v16758_v60, %v4977_v52  ;;  %v3982_v28 = vpop.f32.mrf.mxu1 }
 0x263   : > { %v4983_v14 = vsel %vm4885_vm2, %v4977_v52, %v4982_v7  ;;  %v4348_v37 = vadd.f32 %v17066_v24, %v4272_v22  ;;  %v4349_v0 = vadd.f32 %v17079_v6, %v4273_v9  ;;  %v4981_v5 = vsel %vm4885_vm2, %v16758_v60, %v4980_v15  ;;  %v21272_v52 = vld [vmem:[#allocation76_spill] sm:$0xff]  ;;  %v21273_v22 = vld [vmem:[#allocation46_spill] sm:$0xff] }
 0x264   : > { %v4985_v16 = vsel %vm4885_vm2, %v4980_v15, %v4984_v1  ;;  %v4350_v11 = vadd.f32 %v17066_v24, %v4274_v47  ;;  %v4275_v30 = vmul.f32 %v17070_v3, %v4168_v10  ;;  %v17588_v56 = vpack.c.bf16 %v4983_v14, %v4978_v43  ;;  %v3984_v15 = vpop.f32.mrf.mxu1  ;;  %v4177_v1 = vpop.f32.mrf.mxu0 }
 0x265   : > { %v17586_v59 = vpack.c.bf16 %v4985_v16, %v4981_v5  ;;  %v3792_v7 = vadd.f32 %v21272_v52, %v3599_v48  ;;  %v3609_v9 = vadd.f32 %v21274_v19, %v21273_v22  ;;  %v3979_v35 = vadd.f32 %v3978_v12, %v21275_v34  ;;  %v21278_v48 = vld [vmem:[#allocation77_spill] sm:$0xff] }
 0x266   : > { %21271 = vst [vmem:[#allocation130_spill] sm:$0xff] %v17588_v56  ;;  %v3981_v17 = vadd.f32 %v3980_v45, %v21276_v25  ;;  %v4987_v38 = vrot.slane %v17553_v18, 7  ;;  %v4351_v47 = vadd.f32 %v17079_v6, %v4275_v30  ;;  %v17600_v10 = vpack.c.bf16 %v17563_v46, %v17558_v42  ;;  %v3988_v12 = vpop.f32.mrf.mxu1  ;;  %v4181_v45 = vpop.f32.mrf.mxu0 }
 0x267   : > { %21270 = vst [vmem:[#allocation129_spill] sm:$0xff] %v17586_v59  ;;  %9952 = vmatprep.mubr.bf16.mxu1 %v17586_v59  ;;  %v3983_v43 = vadd.f32 %v3982_v28, %v21278_v48  ;;  %v4992_v19 = vrot.slane %v17560_v29, 7  ;;  %v17604_v14 = vmax.f32 %v4348_v37, 0.0  ;;  %v4172_v34 = vadd.f32 %v4171_v23, %v3979_v35  ;;  %v21283_v59 = vld [vmem:[#allocation81_spill] sm:$0xff] }
 0x268   : > { %21277 = vst [vmem:[#allocation76_spill] sm:$0xff] %v17600_v10  ;;  %v4174_v25 = vadd.f32 %v4173_v36, %v3981_v17  ;;  %v17606_v5 = vmax.f32 %v4349_v0, 0.0  ;;  %v17608_v16 = vmax.f32 %v4350_v11, 0.0  ;;  %v17610_v30 = vmax.f32 %v4351_v47, 0.0  ;;  %9953 = vmatmul.mubr.bf16.gmra.mxu1 %v17588_v56  ;;  %10155 = vmatprep.mubr.bf16.mxu0 %v17600_v10  ;;  %v3990_v23 = vpop.f32.mrf.mxu1  ;;  %v4183_v36 = vpop.f32.mrf.mxu0 }
 0x269   : > { %v4176_v52 = vadd.f32 %v4175_v57, %v3983_v43  ;;  %v4276_v28 = vmul.f32 %v17057_v26, %v4172_v34  ;;  %v17618_v17 = vpack.c.bf16 %v17560_v29, %v17553_v18  ;;  %v3985_v35 = vadd.f32 %v3984_v15, %v3792_v7 }
 0x26a   : > { %21279 = vst [vmem:[#allocation46_spill] sm:$0xff] %v17606_v5  ;;  %21280 = vst [vmem:[#allocation80_spill] sm:$0xff] %v17610_v30  ;;  %v4277_v37 = vmul.f32 %v17070_v3, %v4174_v25  ;;  %v4990_v11 = vrot.slane %v17558_v42, 7  ;;  %v4994_v22 = vrot.slane %v17563_v46, 7  ;;  %v4988_v57 = vsel %vm4885_vm2, %v16758_v60, %v4987_v38  ;;  %v3992_v15 = vpop.f32.mrf.mxu1  ;;  %v4185_v34 = vpop.f32.mrf.mxu0 }
 0x26b   : > { %21281 = vst [vmem:[#allocation74_spill] sm:$0xff] %v17618_v17  ;;  %v4278_v0 = vmul.f32 %v17057_v26, %v4176_v52  ;;  %v4352_v47 = vadd.f32 %v17066_v24, %v4276_v28  ;;  %10156 = vmatmul.mubr.bf16.gmra.mxu0 %v17618_v17  ;;  %v4178_v43 = vadd.f32 %v4177_v1, %v3985_v35  ;;  %v21287_v17 = vld [vmem:[#allocation78_spill] sm:$0xff] }
 0x26c   : > { %v4353_v48 = vadd.f32 %v17079_v6, %v4277_v37  ;;  %v4993_v7 = vsel %vm4885_vm2, %v4987_v38, %v4992_v19  ;;  %v4991_v52 = vsel %vm4885_vm2, %v16758_v60, %v4990_v11  ;;  %v4995_v10 = vsel %vm4885_vm2, %v4990_v11, %v4994_v22  ;;  %v21285_v37 = vld [vmem:[#allocation47_spill] sm:$0xff]  ;;  %v3994_v38 = vpop.f32.mrf.mxu1  ;;  %v4187_v19 = vpop.f32.mrf.mxu0 }
 0x26d   : > { %v4354_v25 = vadd.f32 %v17066_v24, %v4278_v0  ;;  %v17633_v56 = vpack.c.bf16 %v4993_v7, %v4988_v57  ;;  %v3802_v28 = vadd.f32 %v21283_v59, %v3609_v9  ;;  %v3619_v46 = vadd.f32 %v21285_v37, %v21284_v62 }
 0x26e   : > { %v4279_v1 = vmul.f32 %v17070_v3, %v4178_v43  ;;  %v17639_v35 = vpack.c.bf16 %v4995_v10, %v4991_v52  ;;  %v4997_v0 = vrot.slane %v17604_v14, 7  ;;  %v3989_v42 = vadd.f32 %v3988_v12, %v21287_v17  ;;  %v21290_v10 = vld [vmem:[#allocation82_spill] sm:$0xff]  ;;  %v3998_v57 = vpop.f32.mrf.mxu1  ;;  %v4191_v43 = vpop.f32.mrf.mxu0 }
 0x26f   : > { %21282 = vst [vmem:[#allocation75_spill] sm:$0xff] %v17633_v56  ;;  %v3991_v58 = vadd.f32 %v3990_v23, %v21288_v51  ;;  %v17646_v11 = vpack.c.bf16 %v17610_v30, %v17606_v5  ;;  %v5002_v59 = vrot.slane %v17608_v16, 7  ;;  %v17649_v9 = vmax.f32 %v4352_v47, 0.0 }
 0x270   : > { %21286 = vst [vmem:[#allocation77_spill] sm:$0xff] %v17639_v35  ;;  %v4355_v62 = vadd.f32 %v17079_v6, %v4279_v1  ;;  %9962 = vmatprep.mubr.bf16.mxu1 %v17639_v35  ;;  %v3993_v22 = vadd.f32 %v3992_v15, %v21290_v10  ;;  %v17654_v7 = vmax.f32 %v4353_v48, 0.0  ;;  %v17656_v12 = vmax.f32 %v4354_v25, 0.0  ;;  %v4000_v37 = vpop.f32.mrf.mxu1  ;;  %v4193_v1 = vpop.f32.mrf.mxu0  ;;  %v21297_v35 = vld [vmem:[#allocation52_spill] sm:$0xff] }
 0x271   : > { %21289 = vst [vmem:[#allocation81_spill] sm:$0xff] %v17646_v11  ;;  %9963 = vmatmul.mubr.bf16.gmra.mxu1 %v17633_v56  ;;  %v4182_v51 = vadd.f32 %v4181_v45, %v3989_v42  ;;  %v4184_v17 = vadd.f32 %v4183_v36, %v3991_v58  ;;  %10165 = vmatprep.mubr.bf16.mxu0 %v17646_v11  ;;  %v5000_v10 = vrot.slane %v17606_v5, 7  ;;  %v5004_v58 = vrot.slane %v17610_v30, 7  ;;  %v21295_v11 = vld [vmem:[#allocation85_spill] sm:$0xff]  ;;  %v21298_v30 = vld [vmem:[#allocation83_spill] sm:$0xff] }
 0x272   : > { %v17660_v23 = vmax.f32 %v4355_v62, 0.0  ;;  %v4186_v47 = vadd.f32 %v4185_v34, %v3993_v22  ;;  %v17664_v52 = vpack.c.bf16 %v17608_v16, %v17604_v14  ;;  %v3995_v15 = vadd.f32 %v3994_v38, %v3802_v28  ;;  %v4002_v28 = vpop.f32.mrf.mxu1  ;;  %v4195_v38 = vpop.f32.mrf.mxu0 }
 0x273   : > { %v4280_v48 = vmul.f32 %v17057_v26, %v4182_v51  ;;  %v4281_v25 = vmul.f32 %v17070_v3, %v4184_v17  ;;  %v4998_v36 = vsel %vm4885_vm2, %v16758_v60, %v4997_v0  ;;  %v5003_v34 = vsel %vm4885_vm2, %v4997_v0, %v5002_v59 }
 0x274   : > { %21291 = vst [vmem:[#allocation49_spill] sm:$0xff] %v17660_v23  ;;  %21292 = vst [vmem:[#allocation47_spill] sm:$0xff] %v17664_v52  ;;  %v4282_v42 = vmul.f32 %v17057_v26, %v4186_v47  ;;  %10166 = vmatmul.mubr.bf16.gmra.mxu0 %v17664_v52  ;;  %v4188_v45 = vadd.f32 %v4187_v19, %v3995_v15  ;;  %v5001_v51 = vsel %vm4885_vm2, %v16758_v60, %v5000_v10  ;;  %v4004_v0 = vpop.f32.mrf.mxu1  ;;  %v4197_v59 = vpop.f32.mrf.mxu0 }
 0x275   : > { %v4356_v62 = vadd.f32 %v17066_v24, %v4280_v48  ;;  %v4357_v22 = vadd.f32 %v17079_v6, %v4281_v25  ;;  %v5005_v17 = vsel %vm4885_vm2, %v5000_v10, %v5004_v58  ;;  %v17684_v52 = vpack.c.bf16 %v5003_v34, %v4998_v36  ;;  %v21296_v48 = vld [vmem:[#allocation54_spill] sm:$0xff]  ;;  %v21300_v10 = vld [vmem:[#allocation59_spill] sm:$0xff]  ;;  %v21301_v58 = vld [vmem:[#allocation89_spill] sm:$0xff] }
 0x276   : > { %v4358_v47 = vadd.f32 %v17066_v24, %v4282_v42  ;;  %v4283_v19 = vmul.f32 %v17070_v3, %v4188_v45  ;;  %v17682_v15 = vpack.c.bf16 %v5005_v17, %v5001_v51  ;;  %v3812_v56 = vadd.f32 %v21295_v11, %v3619_v46  ;;  %v21303_v34 = vld [vmem:[#allocation86_spill] sm:$0xff]  ;;  %v4008_v11 = vpop.f32.mrf.mxu1  ;;  %v4201_v51 = vpop.f32.mrf.mxu0 }
 0x277   : > { %21294 = vst [vmem:[#allocation79_spill] sm:$0xff] %v17684_v52  ;;  %v3629_v25 = vadd.f32 %v21297_v35, %v21296_v48  ;;  %v3999_v5 = vadd.f32 %v3998_v57, %v21298_v30  ;;  %v4001_v32 = vadd.f32 %v4000_v37, %v21299_v8  ;;  %v3639_v42 = vadd.f32 %v21301_v58, %v21300_v10 }
 0x278   : > { %21293 = vst [vmem:[#allocation78_spill] sm:$0xff] %v17682_v15  ;;  %v4359_v45 = vadd.f32 %v17079_v6, %v4283_v19  ;;  %9972 = vmatprep.mubr.bf16.mxu1 %v17682_v15  ;;  %v17697_v36 = vpack.c.bf16 %v17660_v23, %v17654_v7  ;;  %v4003_v46 = vadd.f32 %v4002_v28, %v21303_v34  ;;  %v5007_v35 = vrot.slane %v17649_v9, 7  ;;  %v4010_v28 = vpop.f32.mrf.mxu1 }
 0x279   : > { %v5012_v30 = vrot.slane %v17656_v12, 7  ;;  %9973 = vmatmul.mubr.bf16.gmra.mxu1 %v17684_v52  ;;  %v4192_v8 = vadd.f32 %v4191_v43, %v3999_v5  ;;  %v4194_v57 = vadd.f32 %v4193_v1, %v4001_v32  ;;  %v17703_v37 = vmax.f32 %v4356_v62, 0.0 }
 0x27a   : > { %21302 = vst [vmem:[#allocation82_spill] sm:$0xff] %v17697_v36  ;;  %v17705_v17 = vmax.f32 %v4357_v22, 0.0  ;;  %v17707_v19 = vmax.f32 %v4358_v47, 0.0  ;;  %10175 = vmatprep.mubr.bf16.mxu0 %v17697_v36  ;;  %v4196_v48 = vadd.f32 %v4195_v38, %v4003_v46  ;;  %v17714_v34 = vpack.c.bf16 %v17656_v12, %v17649_v9  ;;  %v4203_v22 = vpop.f32.mrf.mxu0  ;;  %v4012_v38 = vpop.f32.mrf.mxu1  ;;  %v21308_v36 = vld [vmem:[#allocation87_spill] sm:$0xff] }
 0x27b   : > { %v4284_v10 = vmul.f32 %v17057_v26, %v4192_v8  ;;  %v4285_v58 = vmul.f32 %v17070_v3, %v4194_v57  ;;  %v4005_v5 = vadd.f32 %v4004_v0, %v3812_v56  ;;  %v17716_v32 = vmax.f32 %v4359_v45, 0.0 }
 0x27c   : > { %21304 = vst [vmem:[#allocation85_spill] sm:$0xff] %v17705_v17  ;;  %21305 = vst [vmem:[#allocation54_spill] sm:$0xff] %v17714_v34  ;;  %v4286_v43 = vmul.f32 %v17057_v26, %v4196_v48  ;;  %v5010_v1 = vrot.slane %v17654_v7, 7  ;;  %v5014_v62 = vrot.slane %v17660_v23, 7  ;;  %10176 = vmatmul.mubr.bf16.gmra.mxu0 %v17714_v34  ;;  %v5008_v8 = vsel %vm4885_vm2, %v16758_v60, %v5007_v35  ;;  %v21310_v34 = vld [vmem:[#allocation90_spill] sm:$0xff] }
 0x27d   : > { %21306 = vst [vmem:[#allocation52_spill] sm:$0xff] %v17716_v32  ;;  %v4360_v47 = vadd.f32 %v17066_v24, %v4284_v10  ;;  %v4198_v46 = vadd.f32 %v4197_v59, %v4005_v5  ;;  %v5013_v56 = vsel %vm4885_vm2, %v5007_v35, %v5012_v30  ;;  %v4361_v0 = vadd.f32 %v17079_v6, %v4285_v58  ;;  %v21311_v35 = vld [vmem:[#allocation50_spill] sm:$0xff]  ;;  %v21312_v58 = vld [vmem:[#allocation51_spill] sm:$0xff] }
 0x27e   : > { %v5011_v45 = vsel %vm4885_vm2, %v16758_v60, %v5010_v1  ;;  %v5015_v57 = vsel %vm4885_vm2, %v5010_v1, %v5014_v62  ;;  %v17730_v48 = vpack.c.bf16 %v5013_v56, %v5008_v8  ;;  %v3822_v52 = vadd.f32 %v21308_v36, %v3629_v25  ;;  %v4205_v62 = vpop.f32.mrf.mxu0  ;;  %v4014_v8 = vpop.f32.mrf.mxu1 }
 0x27f   : > { %v4362_v10 = vadd.f32 %v17066_v24, %v4286_v43  ;;  %v4287_v59 = vmul.f32 %v17070_v3, %v4198_v46  ;;  %v17735_v5 = vpack.c.bf16 %v5015_v57, %v5011_v45  ;;  %v17738_v15 = vadd.f32 %v21310_v34, %v3639_v42  ;;  %v21314_v42 = vld [vmem:[#allocation88_spill] sm:$0xff] }
 0x280   : > { %21307 = vst [vmem:[#allocation83_spill] sm:$0xff] %v17730_v48  ;;  %v4009_v30 = vadd.f32 %v4008_v11, %v21311_v35  ;;  %v4011_v23 = vadd.f32 %v4010_v28, %v21312_v58  ;;  %v17744_v1 = vpack.c.bf16 %v17716_v32, %v17705_v17  ;;  %v5017_v25 = vrot.slane %v17703_v37, 7 }
 0x281   : > { %21309 = vst [vmem:[#allocation84_spill] sm:$0xff] %v17735_v5  ;;  %v5022_v36 = vrot.slane %v17707_v19, 7  ;;  %v4363_v43 = vadd.f32 %v17079_v6, %v4287_v59  ;;  %9982 = vmatprep.mubr.bf16.mxu1 %v17735_v5  ;;  %v4013_v34 = vadd.f32 %v4012_v38, %v21314_v42  ;;  %v17751_v46 = vmax.f32 %v4360_v47, 0.0 }
 0x282   : > { %21313 = vst [vmem:[#allocation59_spill] sm:$0xff] %v17744_v1  ;;  %v17753_v11 = vmax.f32 %v4361_v0, 0.0  ;;  %9983 = vmatmul.mubr.bf16.gmra.mxu1 %v17730_v48  ;;  %v4202_v28 = vadd.f32 %v4201_v51, %v4009_v30  ;;  %v4204_v56 = vadd.f32 %v4203_v22, %v4011_v23  ;;  %10185 = vmatprep.mubr.bf16.mxu0 %v17744_v1  ;;  %v17757_v45 = vmax.f32 %v4362_v10, 0.0  ;;  %v4207_v0 = vpop.f32.mrf.mxu0  ;;  %v21322_v1 = vld [vmem:[#allocation93_spill] sm:$0xff] }
 0x283   : > { %v4206_v57 = vadd.f32 %v4205_v62, %v4013_v34  ;;  %v17761_v59 = vpack.c.bf16 %v17707_v19, %v17703_v37  ;;  %v4015_v35 = vadd.f32 %v4014_v8, %v3822_v52  ;;  %v5020_v58 = vrot.slane %v17705_v17, 7  ;;  %v4018_v62 = vpop.f32.mrf.mxu1 }
 0x284   : > { %21315 = vst [vmem:[#allocation89_spill] sm:$0xff] %v17753_v11  ;;  %v4288_v38 = vmul.f32 %v17057_v26, %v4202_v28  ;;  %v4289_v47 = vmul.f32 %v17070_v3, %v4204_v56  ;;  %v5024_v51 = vrot.slane %v17716_v32, 7  ;;  %v17767_v23 = vmax.f32 %v4363_v43, 0.0 }
 0x285   : > { %21316 = vst [vmem:[#allocation86_spill] sm:$0xff] %v17761_v59  ;;  %v4290_v22 = vmul.f32 %v17057_v26, %v4206_v57  ;;  %10186 = vmatmul.mubr.bf16.gmra.mxu0 %v17761_v59  ;;  %v4208_v10 = vadd.f32 %v4207_v0, %v4015_v35  ;;  %v5023_v30 = vsel %vm4885_vm2, %v5017_v25, %v5022_v36  ;;  %v21320_v36 = vld [vmem:[#allocation60_spill] sm:$0xff]  ;;  %v21321_v0 = vld [vmem:[#allocation94_spill] sm:$0xff] }
 0x286   : > { %21317 = vst [vmem:[#allocation87_spill] sm:$0xff] %v17767_v23  ;;  %v4364_v52 = vadd.f32 %v17066_v24, %v4288_v38  ;;  %v5021_v8 = vsel %vm4885_vm2, %v16758_v60, %v5020_v58  ;;  %v5025_v42 = vsel %vm4885_vm2, %v5020_v58, %v5024_v51  ;;  %v5018_v34 = vsel %vm4885_vm2, %v16758_v60, %v5017_v25 }
 0x287   : > { %v4366_v43 = vadd.f32 %v17066_v24, %v4290_v22  ;;  %v4291_v28 = vmul.f32 %v17070_v3, %v4208_v10  ;;  %v17780_v56 = vpack.c.bf16 %v5025_v42, %v5021_v8  ;;  %v17782_v57 = vpack.c.bf16 %v5023_v30, %v5018_v34  ;;  %v4020_v22 = vpop.f32.mrf.mxu1  ;;  %v4211_v10 = vpop.f32.mrf.mxu0  ;;  %v21330_v8 = vld [vmem:[#allocation91_spill] sm:$0xff] }
 0x288   : > { %v4365_v59 = vadd.f32 %v17079_v6, %v4289_v47  ;;  %v5027_v58 = vrot.slane %v17751_v46, 7  ;;  %v5032_v25 = vrot.slane %v17757_v45, 7  ;;  %v17794_v30 = vpack.c.bf16 %v17767_v23, %v17753_v11 }
 0x289   : > { %21318 = vst [vmem:[#allocation90_spill] sm:$0xff] %v17780_v56  ;;  %21319 = vst [vmem:[#allocation50_spill] sm:$0xff] %v17782_v57  ;;  %v4367_v51 = vadd.f32 %v17079_v6, %v4291_v28  ;;  %9992 = vmatprep.mubr.bf16.mxu1 %v17780_v56  ;;  %v17799_v34 = vmax.f32 %v4364_v52, 0.0  ;;  %v17803_v48 = vmax.f32 %v4366_v43, 0.0  ;;  %v17810_v38 = vpack.c.bf16 %v17757_v45, %v17751_v46  ;;  %v4213_v28 = vpop.f32.mrf.mxu0  ;;  %v21327_v52 = vld [vmem:[#allocation55_spill] sm:$0xff] }
 0x28a   : > { %21323 = vst [vmem:[#allocation51_spill] sm:$0xff] %v17794_v30  ;;  %9993 = vmatmul.mubr.bf16.gmra.mxu1 %v17782_v57  ;;  %10195 = vmatprep.mubr.bf16.mxu0 %v17794_v30  ;;  %v17815_v47 = vmax.f32 %v4365_v59, 0.0  ;;  %v4022_v57 = vpop.f32.mrf.mxu1  ;;  %v5030_v43 = vrot.slane %v17753_v11, 7  ;;  %v5028_v30 = vsel %vm4885_vm2, %v16758_v60, %v5027_v58  ;;  %v5033_v56 = vsel %vm4885_vm2, %v5027_v58, %v5032_v25 }
 0x28b   : > { %v17805_v35 = vmax.f32 %v4367_v51, 0.0  ;;  %21325 = vst [vmem:[#allocation60_spill] sm:$0xff] %v17810_v38  ;;  %v5034_v51 = vrot.slane %v17767_v23, 7  ;;  %v5037_v42 = vrot.slane %v17799_v34, 7  ;;  %v4019_v59 = vadd.f32 %v4018_v62, %v21327_v52 }
 0x28c   : > { %21326 = vst [vmem:[#allocation94_spill] sm:$0xff] %v17815_v47  ;;  %v17826_v5 = vpack.c.bf16 %v5033_v56, %v5028_v30  ;;  %v5042_v32 = vrot.slane %v17803_v48, 7  ;;  %v4023_v17 = vadd.f32 %v4022_v57, %v21330_v8  ;;  %v4215_v30 = vpop.f32.mrf.mxu0  ;;  %v17845_v52 = vpack.c.bf16 %v17803_v48, %v17799_v34  ;;  %v21333_v57 = vld [vmem:[#allocation56_spill] sm:$0xff] }
 0x28d   : > { %21324 = vst [vmem:[#allocation88_spill] sm:$0xff] %v17805_v35  ;;  %10196 = vmatmul.mubr.bf16.gmra.mxu0 %v17810_v38  ;;  %v5031_v38 = vsel %vm4885_vm2, %v16758_v60, %v5030_v43  ;;  %v5035_v23 = vsel %vm4885_vm2, %v5030_v43, %v5034_v51  ;;  %v17834_v11 = vpack.c.bf16 %v17805_v35, %v17815_v47  ;;  %v5040_v43 = vrot.slane %v17815_v47, 7 }
 0x28e   : > { %21328 = vst [vmem:[#allocation93_spill] sm:$0xff] %v17826_v5  ;;  %v17839_v62 = vpack.c.bf16 %v5035_v23, %v5031_v38  ;;  %21332 = vst [vmem:[#allocation131_spill] sm:$0xff] %v17845_v52  ;;  %v5044_v51 = vrot.slane %v17805_v35, 7  ;;  %v4021_v23 = vadd.f32 %v4020_v22, %v21333_v57  ;;  %v4212_v38 = vadd.f32 %v4211_v10, %v4019_v59 }
 0x28f   : > { %21329 = vst [vmem:[#allocation55_spill] sm:$0xff] %v17834_v11  ;;  %10205 = vmatprep.mubr.bf16.mxu0 %v17834_v11  ;;  %v5041_v8 = vsel %vm4885_vm2, %v16758_v60, %v5040_v43  ;;  %v5038_v11 = vsel %vm4885_vm2, %v16758_v60, %v5037_v42  ;;  %v5043_v35 = vsel %vm4885_vm2, %v5037_v42, %v5042_v32  ;;  %v5671_v58 = vrot.slane %v17470_v39, 1 }
 0x290   : > { %21331 = vst [vmem:[#allocation91_spill] sm:$0xff] %v17839_v62  ;;  %10002 = vmatprep.mubr.bf16.mxu1 %v17839_v62  ;;  %v5045_v56 = vsel %vm4885_vm2, %v5040_v43, %v5044_v51  ;;  %v4216_v25 = vadd.f32 %v4215_v30, %v4023_v17  ;;  %v17863_v22 = vpack.c.bf16 %v5043_v35, %v5038_v11  ;;  %v5680_v10 = vrot.slane %v17508_v61, 1 }
 0x291   : > { %v17861_v47 = vpack.c.bf16 %v5045_v56, %v5041_v8  ;;  %v5681_v59 = vrot.slane %v17513_v31, 1  ;;  %v21336_v43 = vrot.slane %v21321_v0, 1  ;;  %v21337_v32 = vrot.slane %v21320_v36, 1 }
 0x292   : > { %10003 = vmatmul.mubr.bf16.gmra.mxu1 %v17826_v5  ;;  %21335 = vst [vmem:[#allocation132_spill] sm:$0xff] %v17863_v22  ;;  %v4024_v5 = vpop.f32.mrf.mxu1  ;;  %v5691_v17 = vrot.slane %v17560_v29, 1  ;;  %v21339_v30 = vrot.slane %v17158_v13, 1  ;;  %v21340_v51 = vrot.slane %v17167_v53, 1  ;;  %v4292_v8 = vmul.f32 %v17057_v26, %v4212_v38  ;;  %v14960_v29 = vld [vmem:[%s20810_s4 + $0x524] ss:$8 sps:$4 sm:$0xff]  }
 0x293   : > { %21334 = vst [vmem:[#allocation56_spill] sm:$0xff] %v17861_v47  ;;  %v5602_v42 = vsel %vm675_vm0, %v21337_v32, %v21336_v43  ;;  %10012 = vmatprep.mubr.bf16.mxu1 %v17861_v47  ;;  %v21338_v35 = vmov %v21336_v43  ;;  %v4214_v43 = vadd.f32 %v4213_v28, %v4021_v23  ;;  %v4025_v0 = vadd.f32 %v4024_v5, %v17738_v15  ;;  %v4217_v23 = vpop.f32.mrf.mxu0 }
 0x294   : > { %v5607_v56 = vsel %vm675_vm0, %v21338_v35, %v17194_v20  ;;  %v5612_v36 = vsel %vm675_vm0, %v21340_v51, %v21339_v30  ;;  %v4294_v35 = vmul.f32 %v17057_v26, %v4216_v25  ;;  %v17898_v57 = vpack.c.bf16 %v17194_v20, %v17194_v20  ;;  %v14928_v25 = vld [vmem:[%s20810_s4 + $0x570] ss:$8 sps:$4 sm:$0xff]  }
 0x295   : > { %10206 = vmatmul.mubr.bf16.gmra.mxu0 %v17845_v52  ;;  %v17888_v32 = vpack.c.bf16 %v5607_v56, %v5602_v42  ;;  %v5701_v38 = vrot.slane %v17608_v16, 1  ;;  %v21344_v42 = vld [vmem:[#allocation95_spill] sm:$0xff]  ;;  %v21345_v13 = vrot.slane %v17215_v4, 1  ;;  %v10057_v28 = vpop.f32.mrf.mxu0  ;;  %v5682_v39 = vsel %vm675_vm0, %v5680_v10, %v5681_v59 }
 0x296   : > { %10441 = vmatprep.mubr.bf16.mxu0 %v17164_v40  ;;  %v21341_v40 = vmov %v21339_v30  ;;  %21342 = vst [vmem:[#allocation133_spill] sm:$0xff] %v17898_v57  ;;  %v5604_v56 = vrot.slane %v21344_v42, 1  ;;  %v21346_v30 = vrot.slane %v17210_v21, 1  ;;  %v4368_v42 = vadd.f32 %v17066_v24, %v4292_v8  ;;  %v14945_v10 = vld [vmem:[%s20810_s4 + $0x444] ss:$8 sps:$4 sm:$0xff]  }
 0x297   : > { %v5617_v11 = vsel %vm675_vm0, %v21341_v40, %v17194_v20  ;;  %v21349_v40 = vrot.slane %v17266_v27, 1  ;;  %v4218_v8 = vadd.f32 %v4217_v23, %v4025_v0  ;;  %v21381_v31 = vrot.slane %v17553_v18, 1 }
 0x298   : > { %v17900_v53 = vpack.c.bf16 %v5617_v11, %v5612_v36  ;;  %v5622_v15 = vsel %vm675_vm0, %v21346_v30, %v21345_v13  ;;  %v21347_v11 = vmov %v21345_v13  ;;  %v21348_v36 = vrot.slane %v17272_v63, 1  ;;  %v14936_v30 = vld [vmem:[%s20810_s4 + $0x564] ss:$8 sps:$4 sm:$0xff]  }
 0x299   : > { %v5627_v51 = vsel %vm675_vm0, %v21347_v11, %v17194_v20  ;;  %v4293_v13 = vmul.f32 %v17070_v3, %v4214_v43  ;;  %v21353_v63 = vrot.slane %v21322_v1, 1  ;;  %v5609_v23 = vsel %vm675_vm0, %v5604_v56, %v17194_v20 }
 0x29a   : > { %21343 = vst [vmem:[#allocation134_spill] sm:$0xff] %v17900_v53  ;;  %v5632_v21 = vsel %vm675_vm0, %v21349_v40, %v21348_v36  ;;  %10013 = vmatmul.mubr.bf16.gmra.mxu1 %v17863_v22  ;;  %v17930_v5 = vpack.c.bf16 %v5627_v51, %v5622_v15  ;;  %v21351_v4 = vmov %v21348_v36  ;;  %v4370_v36 = vadd.f32 %v17066_v24, %v4294_v35  ;;  %v9864_v40 = vpop.f32.mrf.mxu1  ;;  %v21356_v35 = vld [vmem:[#allocation103_spill] sm:$0xff] }
 0x29b   : > { %v5637_v11 = vsel %vm675_vm0, %v21351_v4, %v17194_v20  ;;  %10248 = vmatprep.mubr.bf16.mxu1 %v17898_v57  ;;  %v5605_v51 = vsel %vm675_vm0, %v21353_v63, %v5604_v56  ;;  %v21354_v4 = vrot.slane %v17324_v41, 1  ;;  %v21355_v24 = vrot.slane %v17321_v44, 1 }
 0x29c   : > { %21350 = vst [vmem:[#allocation95_spill] sm:$0xff] %v17930_v5  ;;  %v17939_v43 = vpack.c.bf16 %v5637_v11, %v5632_v21  ;;  %v21357_v21 = vld [vmem:[#allocation99_spill] sm:$0xff]  ;;  %v21359_v44 = vrot.slane %v17375_v55, 1  ;;  %v17968_v26 = vmax.f32 %v4368_v42, 0.0  ;;  %v4369_v56 = vadd.f32 %v17079_v6, %v4293_v13  ;;  %v14925_v42 = vld [vmem:[%s20810_s4 + $0x470] ss:$8 sps:$4 sm:$0xff]  }
 0x29d   : > { %10442 = vmatmul.mubr.bf16.vlgmr.msra.gmra.mxu0 %v17178_v2  ;;  %v5642_v0 = vsel %vm675_vm0, %v21355_v24, %v21354_v4  ;;  %v5614_v11 = vrot.slane %v21357_v21, 1  ;;  %v14934_v2 = vld [vmem:[%s20810_s4 + $0x560] ss:$8 sps:$4 sm:$0xff]   ;;  %v21358_v1 = vmov %v21354_v4  ;;  %v21360_v4 = vrot.slane %v17371_v33, 1 }
 0x29e   : > { %21352 = vst [vmem:[#allocation135_spill] sm:$0xff] %v17939_v43  ;;  %10451 = vmatprep.mubr.bf16.mxu0 %v21356_v35  ;;  %10796 = vmatpush1.bf16.msra.mxu0 %v14928_v25  ;;  %v5647_v63 = vsel %vm675_vm0, %v21358_v1, %v17194_v20  ;;  %v14942_v25 = vld [vmem:[%s20810_s4 + $0x554] ss:$8 sps:$4 sm:$0xff]   ;;  %v21362_v41 = vmov %v21359_v44  ;;  %v17980_v15 = vmax.f32 %v4370_v36, 0.0  ;;  %v4295_v33 = vmul.f32 %v17070_v3, %v4218_v8  ;;  %v21363_v13 = vld [vmem:[#allocation98_spill] sm:$0xff]  ;;  %v21373_v55 = vld [vmem:[#allocation107_spill] sm:$0xff] }
 0x29f   : > { %v5652_v24 = vsel %vm675_vm0, %v21360_v4, %v21359_v44  ;;  %10797 = vmatprep.subr.bf16.mxu0 %v14936_v30  ;;  %v17974_v21 = vpack.c.bf16 %v5647_v63, %v5642_v0  ;;  %v5657_v1 = vsel %vm675_vm0, %v21362_v41, %v17194_v20  ;;  %v5613_v30 = vrot.slane %v21363_v13, 1  ;;  %v9866_v4 = vpop.f32.mrf.mxu1  ;;  %v10059_v0 = vpop.f32.mrf.mxu0  ;;  %v14933_v3 = vld [vmem:[%s20810_s4 + $0x464] ss:$8 sps:$4 sm:$0xff]  }
 0x2a0   : > { %v17987_v44 = vpack.c.bf16 %v5657_v1, %v5652_v24  ;;  %v17991_v27 = vpack.c.bf16 %v5609_v23, %v5605_v51  ;;  %v21365_v36 = vrot.slane %v17416_v49, 1  ;;  %v21366_v8 = vrot.slane %v17411_v50, 1  ;;  %v14940_v51 = vld [vmem:[%s20810_s4 + $0x550] ss:$8 sps:$4 sm:$0xff]   ;;  %v14939_v49 = vld [vmem:[%s20810_s4 + $0x454] ss:$8 sps:$4 sm:$0xff]  }
 0x2a1   : > { %21361 = vst [vmem:[#allocation99_spill] sm:$0xff] %v17974_v21  ;;  %v5615_v24 = vsel %vm675_vm0, %v5613_v30, %v5614_v11  ;;  %v5619_v1 = vsel %vm675_vm0, %v5614_v11, %v17194_v20  ;;  %v18011_v63 = vadd.f32 %v10057_v28, %v9864_v40  ;;  %v21368_v30 = vld [vmem:[#allocation102_spill] sm:$0xff]  ;;  %v18040_v40 = vadd.f32 %v10059_v0, %v9866_v4  ;;  %v21375_v0 = vld [vmem:[#allocation72_spill] sm:$0xff] }
 0x2a2   : > { %21364 = vst [vmem:[#allocation98_spill] sm:$0xff] %v17987_v44  ;;  %v5662_v41 = vsel %vm675_vm0, %v21366_v8, %v21365_v36  ;;  %10798 = vmatpush1.bf16.msra.mxu0 %v14934_v2  ;;  %v21367_v23 = vmov %v21365_v36  ;;  %v18014_v36 = vmax.f32 %v4369_v56, 0.0  ;;  %10249 = vmatmul.mubr.bf16.vlgmr.msra.gmra.mxu1 %v17898_v57  ;;  %v5624_v11 = vrot.slane %v21368_v30, 1  ;;  %v14948_v2 = vld [vmem:[%s20810_s4 + $0x544] ss:$8 sps:$4 sm:$0xff]   ;;  %v10061_v30 = vpop.f32.mrf.mxu0 }
 0x2a3   : > { %v5667_v13 = vsel %vm675_vm0, %v21367_v23, %v17194_v20  ;;  %10799 = vmatprep.subr.bf16.mxu0 %v14942_v25  ;;  %v18027_v56 = vadd.f32 %v17079_v6, %v4295_v33  ;;  %10258 = vmatprep.mubr.bf16.mxu1 %v17991_v27  ;;  %v14931_v25 = vld [vmem:[%s20810_s4 + $0x460] ss:$8 sps:$4 sm:$0xff]   ;;  %v9868_v23 = vpop.f32.mrf.mxu1  ;;  %v21372_v6 = vld [vmem:[#allocation48_spill] sm:$0xff]  ;;  %v5677_v4 = vsel %vm675_vm0, %v5671_v58, %v17194_v20  ;;  %v21385_v18 = vrot.slane %v17604_v14, 1 }
 0x2a4   : > { %v18021_v8 = vpack.c.bf16 %v5667_v13, %v5662_v41  ;;  %10603 = vmatpush1.bf16.msra.mxu1 %v14925_v42  ;;  %v21370_v41 = vld [vmem:[#allocation104_spill] sm:$0xff]  ;;  %v18034_v13 = vpack.c.bf16 %v5619_v1, %v5615_v24  ;;  %v5623_v33 = vrot.slane %v21372_v6, 1  ;;  %v18042_v42 = vadd.f32 %v10061_v30, %v9868_v23  ;;  %v14946_v28 = vld [vmem:[%s20810_s4 + $0x540] ss:$8 sps:$4 sm:$0xff]   ;;  %v21376_v23 = vld [vmem:[#allocation73_spill] sm:$0xff] }
 0x2a5   : > { %10452 = vmatmul.mubr.bf16.gmra.mxu0 %v21370_v41  ;;  %10604 = vmatprep.subr.bf16.mxu1 %v14933_v3  ;;  %v21374_v3 = vrot.slane %v17462_v54, 1  ;;  %v5693_v1 = vrot.slane %v21375_v0, 1  ;;  %v5694_v30 = vrot.slane %v21376_v23, 1  ;;  %v21377_v6 = vld [vmem:[#allocation53_spill] sm:$0xff]  ;;  %v21387_v14 = vrot.slane %v17656_v12, 1 }
 0x2a6   : > { %21369 = vst [vmem:[#allocation102_spill] sm:$0xff] %v18021_v8  ;;  %21371 = vst [vmem:[#allocation136_spill] sm:$0xff] %v18034_v13  ;;  %10461 = vmatprep.mubr.bf16.mxu0 %v21373_v55  ;;  %10800 = vmatpush1.bf16.msra.mxu0 %v14940_v51  ;;  %v18060_v51 = vsel %vm675_vm0, %v5623_v33, %v5624_v11  ;;  %v5633_v50 = vrot.slane %v21377_v6, 1  ;;  %v14954_v54 = vld [vmem:[%s20810_s4 + $0x534] ss:$8 sps:$4 sm:$0xff]   ;;  %v5687_v33 = vsel %vm675_vm0, %v5681_v59, %v17194_v20  ;;  %v21458_v55 = vld [vmem:[#allocation78_spill] sm:$0xff] }
 0x2a7   : > { %v5672_v24 = vsel %vm675_vm0, %v21374_v3, %v5671_v58  ;;  %10801 = vmatprep.subr.bf16.mxu0 %v14948_v2  ;;  %v14937_v58 = vld [vmem:[%s20810_s4 + $0x450] ss:$8 sps:$4 sm:$0xff]   ;;  %v5629_v2 = vsel %vm675_vm0, %v5624_v11, %v17194_v20  ;;  %v5699_v61 = vsel %vm675_vm0, %v5694_v30, %v17194_v20  ;;  %v5692_v59 = vsel %vm675_vm0, %v21381_v31, %v5691_v17 }
 0x2a8   : > { %v18066_v3 = vpack.c.bf16 %v5677_v4, %v5672_v24  ;;  %10605 = vmatpush1.bf16.msra.mxu1 %v14931_v25  ;;  %v5695_v24 = vsel %vm675_vm0, %v5693_v1, %v5694_v30  ;;  %v18088_v25 = vpack.c.bf16 %v5687_v33, %v5682_v39  ;;  %v5697_v11 = vsel %vm675_vm0, %v5691_v17, %v17194_v20  ;;  %v21383_v1 = vld [vmem:[#allocation46_spill] sm:$0xff]  ;;  %v21384_v30 = vld [vmem:[#allocation80_spill] sm:$0xff] }
 0x2a9   : > { %10606 = vmatprep.subr.bf16.mxu1 %v14939_v49  ;;  %v18090_v4 = vpack.c.bf16 %v5699_v61, %v5695_v24  ;;  %v14952_v49 = vld [vmem:[%s20810_s4 + $0x530] ss:$8 sps:$4 sm:$0xff]   ;;  %v18104_v0 = vpack.c.bf16 %v5697_v11, %v5692_v59  ;;  %v5703_v23 = vrot.slane %v21383_v1, 1  ;;  %v5704_v39 = vrot.slane %v21384_v30, 1 }
 0x2aa   : > { %21378 = vst [vmem:[#allocation48_spill] sm:$0xff] %v18066_v3  ;;  %21379 = vst [vmem:[#allocation72_spill] sm:$0xff] %v18088_v25  ;;  %10802 = vmatpush1.bf16.msra.mxu0 %v14946_v28  ;;  %v5702_v33 = vsel %vm675_vm0, %v21385_v18, %v5701_v38  ;;  %10259 = vmatmul.mubr.bf16.gmra.mxu1 %v17888_v32  ;;  %v5707_v17 = vsel %vm675_vm0, %v5701_v38, %v17194_v20  ;;  %v5713_v28 = vrot.slane %v17654_v7, 1  ;;  %v21386_v24 = vld [vmem:[#allocation49_spill] sm:$0xff]  ;;  %v21391_v30 = vld [vmem:[#allocation108_spill] sm:$0xff] }
 0x2ab   : > { %21380 = vst [vmem:[#allocation73_spill] sm:$0xff] %v18090_v4  ;;  %21382 = vst [vmem:[#allocation53_spill] sm:$0xff] %v18104_v0  ;;  %10803 = vmatprep.subr.bf16.mxu0 %v14954_v54  ;;  %v5714_v61 = vrot.slane %v21386_v24, 1  ;;  %v21388_v31 = vrot.slane %v17649_v9, 1  ;;  %10268 = vmatprep.mubr.bf16.mxu1 %v18034_v13  ;;  %v14943_v54 = vld [vmem:[%s20810_s4 + $0x440] ss:$8 sps:$4 sm:$0xff]   ;;  %v5705_v16 = vsel %vm675_vm0, %v5703_v23, %v5704_v39 }
 0x2ac   : > { %10607 = vmatpush1.bf16.msra.mxu1 %v14937_v58  ;;  %v5709_v7 = vsel %vm675_vm0, %v5704_v39, %v17194_v20  ;;  %v18135_v38 = vpack.c.bf16 %v5707_v17, %v5702_v33  ;;  %v21390_v11 = vld [vmem:[#allocation85_spill] sm:$0xff]  ;;  %v21393_v24 = vld [vmem:[#allocation52_spill] sm:$0xff]  ;;  %v21394_v33 = vld [vmem:[#allocation111_spill] sm:$0xff] }
 0x2ad   : > { %v5712_v59 = vsel %vm675_vm0, %v21388_v31, %v21387_v14  ;;  %v5723_v1 = vrot.slane %v21390_v11, 1  ;;  %10462 = vmatmul.mubr.bf16.gmra.mxu0 %v21391_v30  ;;  %10608 = vmatprep.subr.bf16.mxu1 %v14945_v10  ;;  %v14951_v9 = vld [vmem:[%s20810_s4 + $0x434] ss:$8 sps:$4 sm:$0xff]   ;;  %v18142_v58 = vpack.c.bf16 %v5709_v7, %v5705_v16  ;;  %v5715_v18 = vsel %vm675_vm0, %v5713_v28, %v5714_v61  ;;  %v21395_v17 = vld [vmem:[#allocation58_spill] sm:$0xff] }
 0x2ae   : > { %21389 = vst [vmem:[#allocation46_spill] sm:$0xff] %v18135_v38  ;;  %v5719_v23 = vsel %vm675_vm0, %v5714_v61, %v17194_v20  ;;  %v5724_v39 = vrot.slane %v21393_v24, 1  ;;  %10471 = vmatprep.mubr.bf16.mxu0 %v21394_v33  ;;  %v5634_v14 = vrot.slane %v21395_v17, 1  ;;  %10804 = vmatpush1.bf16.msra.mxu0 %v14952_v49  ;;  %v14958_v10 = vld [vmem:[%s20810_s4 + $0x520] ss:$8 sps:$4 sm:$0xff]   ;;  %v21397_v16 = vrot.slane %v17656_v12, 1 }
 0x2af   : > { %21392 = vst [vmem:[#allocation80_spill] sm:$0xff] %v18142_v58  ;;  %v18153_v31 = vpack.c.bf16 %v5719_v23, %v5715_v18  ;;  %v21398_v61 = vrot.slane %v17707_v19, 1  ;;  %v21399_v7 = vrot.slane %v17703_v37, 1  ;;  %10805 = vmatprep.subr.bf16.mxu0 %v14960_v29  ;;  %v14966_v49 = vld [vmem:[%s20810_s4 + $0x514] ss:$8 sps:$4 sm:$0xff]   ;;  %v18189_v19 = vpack.c.bf16 %v5629_v2, %v18060_v51 }
 0x2b0   : > { %v5717_v28 = vsel %vm675_vm0, %v21397_v16, %v17194_v20  ;;  %v5725_v18 = vsel %vm675_vm0, %v5723_v1, %v5724_v39  ;;  %v5729_v12 = vsel %vm675_vm0, %v5724_v39, %v17194_v20  ;;  %10609 = vmatpush1.bf16.msra.mxu1 %v14943_v54  ;;  %v14949_v37 = vld [vmem:[%s20810_s4 + $0x430] ss:$8 sps:$4 sm:$0xff]   ;;  %v21405_v1 = vld [vmem:[#allocation87_spill] sm:$0xff]  ;;  %v18186_v39 = vmax.f32 %v18027_v56, 0.0 }
 0x2b1   : > { %21396 = vst [vmem:[#allocation49_spill] sm:$0xff] %v18153_v31  ;;  %v5722_v11 = vsel %vm675_vm0, %v21399_v7, %v21398_v61  ;;  %v18167_v24 = vpack.c.bf16 %v5717_v28, %v5712_v59  ;;  %v21401_v23 = vmov %v21398_v61  ;;  %v18179_v29 = vpack.c.bf16 %v5729_v12, %v5725_v18  ;;  %v21404_v59 = vld [vmem:[#allocation89_spill] sm:$0xff]  ;;  %10610 = vmatprep.subr.bf16.mxu1 %v14951_v9  ;;  %v14957_v54 = vld [vmem:[%s20810_s4 + $0x424] ss:$8 sps:$4 sm:$0xff]  }
 0x2b2   : > { %v5727_v17 = vsel %vm675_vm0, %v21401_v23, %v17194_v20  ;;  %v5733_v28 = vrot.slane %v21404_v59, 1  ;;  %v5734_v61 = vrot.slane %v21405_v1, 1  ;;  %21406 = vst [vmem:[#allocation89_spill] sm:$0xff] %v18189_v19  ;;  %v21407_v7 = vrot.slane %v17757_v45, 1  ;;  %10806 = vmatpush1.bf16.msra.mxu0 %v14958_v10  ;;  %v14964_v2 = vld [vmem:[%s20810_s4 + $0x510] ss:$8 sps:$4 sm:$0xff]   ;;  %10269 = vmatmul.mubr.bf16.gmra.mxu1 %v17900_v53 }
 0x2b3   : > { %21400 = vst [vmem:[#allocation85_spill] sm:$0xff] %v18167_v24  ;;  %21402 = vst [vmem:[#allocation52_spill] sm:$0xff] %v18179_v29  ;;  %v18181_v16 = vpack.c.bf16 %v5727_v17, %v5722_v11  ;;  %v21408_v11 = vrot.slane %v17751_v46, 1  ;;  %v5635_v51 = vsel %vm675_vm0, %v5633_v50, %v5634_v14  ;;  %v5639_v45 = vsel %vm675_vm0, %v5634_v14, %v17194_v20  ;;  %v14972_v50 = vld [vmem:[%s20810_s4 + $0x504] ss:$8 sps:$4 sm:$0xff]   ;;  %v21413_v59 = vld [vmem:[#allocation88_spill] sm:$0xff] }
 0x2b4   : > { %v21409_v12 = vmov %v21407_v7  ;;  %v5735_v9 = vsel %vm675_vm0, %v5733_v28, %v5734_v61  ;;  %v5739_v46 = vsel %vm675_vm0, %v5734_v61, %v17194_v20  ;;  %10807 = vmatprep.subr.bf16.mxu0 %v14966_v49  ;;  %v21412_v10 = vld [vmem:[#allocation94_spill] sm:$0xff]  ;;  %v5744_v28 = vrot.slane %v21413_v59, 1  ;;  %10278 = vmatprep.mubr.bf16.mxu1 %v18189_v19 }
 0x2b5   : > { %21403 = vst [vmem:[#allocation58_spill] sm:$0xff] %v18181_v16  ;;  %v5732_v18 = vsel %vm675_vm0, %v21408_v11, %v21407_v7  ;;  %v5737_v56 = vsel %vm675_vm0, %v21409_v12, %v17194_v20  ;;  %v18220_v6 = vpack.c.bf16 %v5739_v46, %v5735_v9  ;;  %v5743_v17 = vrot.slane %v21412_v10, 1  ;;  %10611 = vmatpush1.bf16.msra.mxu1 %v14949_v37  ;;  %v14955_v1 = vld [vmem:[%s20810_s4 + $0x420] ss:$8 sps:$4 sm:$0xff]   ;;  %v21419_v9 = vld [vmem:[#allocation113_spill] sm:$0xff] }
 0x2b6   : > { %v18212_v23 = vpack.c.bf16 %v5737_v56, %v5732_v18  ;;  %v21414_v14 = vrot.slane %v17968_v26, 7  ;;  %v21415_v61 = vrot.slane %v17980_v15, 7  ;;  %v21417_v18 = vrot.slane %v17803_v48, 1  ;;  %10472 = vmatmul.mubr.bf16.gmra.mxu0 %v21419_v9  ;;  %10612 = vmatprep.subr.bf16.mxu1 %v14957_v54  ;;  %v14963_v46 = vld [vmem:[%s20810_s4 + $0x414] ss:$8 sps:$4 sm:$0xff]   ;;  %v18457_v9 = vpop.f32.mrf.mxu1 }
 0x2b7   : > { %21411 = vst [vmem:[#allocation137_spill] sm:$0xff] %v18220_v6  ;;  %v21418_v12 = vrot.slane %v17799_v34, 1  ;;  %v6151_v56 = vrot.slane %v18014_v36, 1  ;;  %v5745_v10 = vsel %vm675_vm0, %v5743_v17, %v5744_v28  ;;  %v5749_v59 = vsel %vm675_vm0, %v5744_v28, %v17194_v20  ;;  %10808 = vmatpush1.bf16.msra.mxu0 %v14964_v2  ;;  %v14970_v54 = vld [vmem:[%s20810_s4 + $0x500] ss:$8 sps:$4 sm:$0xff]  }
 0x2b8   : > { %21410 = vst [vmem:[#allocation87_spill] sm:$0xff] %v18212_v23  ;;  %v6046_v49 = vsel %vm4885_vm2, %v16758_v60, %v21414_v14  ;;  %v21416_v7 = vmov %v21414_v14  ;;  %v6152_v34 = vrot.slane %v18186_v39, 1  ;;  %v5747_v17 = vsel %vm675_vm0, %v21417_v18, %v17194_v20  ;;  %10809 = vmatprep.subr.bf16.mxu0 %v14972_v50  ;;  %v14978_v2 = vld [vmem:[%s20810_s4 + $0x5f4] ss:$8 sps:$4 sm:$0xff]   ;;  %v14961_v50 = vld [vmem:[%s20810_s4 + $0x410] ss:$8 sps:$4 sm:$0xff]  }
 0x2b9   : > { %v6051_v11 = vsel %vm4885_vm2, %v21416_v7, %v21415_v61  ;;  %v5742_v37 = vsel %vm675_vm0, %v21418_v12, %v21417_v18  ;;  %v21421_v61 = vld [vmem:[#allocation117_spill] sm:$0xff]  ;;  %v18257_v7 = vpack.c.bf16 %v5749_v59, %v5745_v10  ;;  %v18265_v28 = vpack.c.bf16 %v18186_v39, %v18014_v36  ;;  %10613 = vmatpush1.bf16.msra.mxu1 %v14955_v1  ;;  %v14969_v1 = vld [vmem:[%s20810_s4 + $0x404] ss:$8 sps:$4 sm:$0xff]  }
 0x2ba   : > { %v18250_v14 = vpack.c.bf16 %v6051_v11, %v6046_v49  ;;  %10481 = vmatprep.mubr.bf16.mxu0 %v21421_v61  ;;  %v18270_v49 = vpack.c.bf16 %v5747_v17, %v5742_v37  ;;  %v6153_v11 = vsel %vm675_vm0, %v6151_v56, %v6152_v34  ;;  %v6157_v12 = vsel %vm675_vm0, %v6152_v34, %v17194_v20  ;;  %v21455_v61 = vld [vmem:[#allocation77_spill] sm:$0xff] }
 0x2bb   : > { %21422 = vst [vmem:[#allocation88_spill] sm:$0xff] %v18257_v7  ;;  %21423 = vst [vmem:[#allocation138_spill] sm:$0xff] %v18265_v28  ;;  %v21425_v48 = vrot.slane %v17980_v15, 1  ;;  %v21426_v10 = vrot.slane %v17968_v26, 1  ;;  %v18283_v18 = vpack.c.bf16 %v6157_v12, %v6153_v11  ;;  %v18291_v34 = vpack.c.bf16 %v17980_v15, %v17968_v26  ;;  %10614 = vmatprep.subr.bf16.mxu1 %v14963_v46  ;;  %v14976_v11 = vld [vmem:[%s20810_s4 + $0x5f0] ss:$8 sps:$4 sm:$0xff]  }
 0x2bc   : > { %21420 = vst [vmem:[#allocation94_spill] sm:$0xff] %v18250_v14  ;;  %21424 = vst [vmem:[#allocation139_spill] sm:$0xff] %v18270_v49  ;;  %10810 = vmatpush1.bf16.msra.mxu0 %v14970_v54  ;;  %10279 = vmatmul.mubr.bf16.gmra.mxu1 %v17930_v5  ;;  %v21432_v12 = vld [vmem:[#allocation42_spill] sm:$0xff]  ;;  %v14975_v54 = vld [vmem:[%s20810_s4 + $0x4f4] ss:$8 sps:$4 sm:$0xff]  }
 0x2bd   : > { %v6150_v59 = vsel %vm675_vm0, %v21426_v10, %v21425_v48  ;;  %21427 = vst [vmem:[#allocation140_spill] sm:$0xff] %v18283_v18  ;;  %v21428_v37 = vmov %v21425_v48  ;;  %21429 = vst [vmem:[#allocation141_spill] sm:$0xff] %v18291_v34  ;;  %v18298_v48 = vpack.c.bf16 %v5639_v45, %v5635_v51  ;;  %v5644_v10 = vrot.slane %v21432_v12, 1  ;;  %10811 = vmatprep.subr.bf16.mxu0 %v14978_v2  ;;  %v14984_v26 = vld [vmem:[%s20810_s4 + $0x5e4] ss:$8 sps:$4 sm:$0xff]   ;;  %v21433_v51 = vld [vmem:[#allocation116_spill] sm:$0xff] }
 0x2be   : > { %v6155_v56 = vsel %vm675_vm0, %v21428_v37, %v17194_v20  ;;  %10615 = vmatpush1.bf16.msra.mxu1 %v14961_v50  ;;  %v14967_v15 = vld [vmem:[%s20810_s4 + $0x400] ss:$8 sps:$4 sm:$0xff]   ;;  %10482 = vmatmul.mubr.bf16.gmra.mxu0 %v21433_v51  ;;  %v21434_v45 = vld [vmem:[#allocation112_spill] sm:$0xff]  ;;  %v21435_v2 = vld [vmem:[#allocation121_spill] sm:$0xff] }
 0x2bf   : > { %v18296_v17 = vpack.c.bf16 %v6155_v56, %v6150_v59  ;;  %21431 = vst [vmem:[#allocation143_spill] sm:$0xff] %v18298_v48  ;;  %10288 = vmatprep.mubr.bf16.mxu1 %v18298_v48  ;;  %v5643_v46 = vrot.slane %v21434_v45, 1  ;;  %10616 = vmatprep.subr.bf16.mxu1 %v14969_v1  ;;  %v14982_v59 = vld [vmem:[%s20810_s4 + $0x5e0] ss:$8 sps:$4 sm:$0xff]   ;;  %v5649_v37 = vsel %vm675_vm0, %v5644_v10, %v17194_v20  ;;  %v14990_v56 = vld [vmem:[%s20810_s4 + $0x5d4] ss:$8 sps:$4 sm:$0xff]  }
 0x2c0   : > { %10491 = vmatprep.mubr.bf16.mxu0 %v21435_v2  ;;  %10812 = vmatpush2.bf16.msra.mxu0 %v14976_v11  ;;  %v14973_v1 = vld [vmem:[%s20810_s4 + $0x4f0] ss:$8 sps:$4 sm:$0xff]   ;;  %v14981_v11 = vld [vmem:[%s20810_s4 + $0x4e4] ss:$8 sps:$4 sm:$0xff]  }
 0x2c1   : > { %21430 = vst [vmem:[#allocation142_spill] sm:$0xff] %v18296_v17  ;;  %v5645_v50 = vsel %vm675_vm0, %v5643_v46, %v5644_v10  ;;  %10813 = vmatprep.subr.bf16.mxu0 %v14984_v26  ;;  %v14988_v10 = vld [vmem:[%s20810_s4 + $0x5d0] ss:$8 sps:$4 sm:$0xff]   ;;  %v21437_v26 = vld [vmem:[#allocation115_spill] sm:$0xff] }
 0x2c2   : > { %10617 = vmatpush1.bf16.msra.mxu1 %v14967_v15  ;;  %v18333_v12 = vpack.c.bf16 %v5649_v37, %v5645_v50  ;;  %v5654_v15 = vrot.slane %v21437_v26, 1  ;;  %v14996_v45 = vld [vmem:[%s20810_s4 + $0x5c4] ss:$8 sps:$4 sm:$0xff]   ;;  %v14979_v46 = vld [vmem:[%s20810_s4 + $0x4e0] ss:$8 sps:$4 sm:$0xff]  }
 0x2c3   : > { %10618 = vmatprep.subr.bf16.mxu1 %v14975_v54  ;;  %v21438_v54 = vld [vmem:[#allocation120_spill] sm:$0xff] }
 0x2c4   : > { %21436 = vst [vmem:[#allocation42_spill] sm:$0xff] %v18333_v12  ;;  %10814 = vmatpush2.bf16.msra.mxu0 %v14982_v59  ;;  %10289 = vmatmul.mubr.bf16.gmra.mxu1 %v17939_v43  ;;  %v21439_v59 = vld [vmem:[#allocation114_spill] sm:$0xff]  ;;  %v14987_v37 = vld [vmem:[%s20810_s4 + $0x4d4] ss:$8 sps:$4 sm:$0xff]   ;;  %v5659_v57 = vsel %vm675_vm0, %v5654_v15, %v17194_v20 }
 0x2c5   : > { %10815 = vmatprep.subr.bf16.mxu0 %v14990_v56  ;;  %10298 = vmatprep.mubr.bf16.mxu1 %v18333_v12  ;;  %v5653_v50 = vrot.slane %v21439_v59, 1  ;;  %v21440_v56 = vld [vmem:[#allocation124_spill] sm:$0xff] }
 0x2c6   : > { %10619 = vmatpush2.bf16.msra.mxu1 %v14973_v1  ;;  %10492 = vmatmul.mubr.bf16.gmra.mxu0 %v21438_v54  ;;  %v14994_v1 = vld [vmem:[%s20810_s4 + $0x5c0] ss:$8 sps:$4 sm:$0xff]   ;;  %v14985_v59 = vld [vmem:[%s20810_s4 + $0x4d0] ss:$8 sps:$4 sm:$0xff]  }
 0x2c7   : > { %10620 = vmatprep.subr.bf16.mxu1 %v14981_v11  ;;  %10501 = vmatprep.mubr.bf16.mxu0 %v21440_v56  ;;  %v5655_v26 = vsel %vm675_vm0, %v5653_v50, %v5654_v15  ;;  %v15002_v11 = vld [vmem:[%s20810_s4 + $0x5b4] ss:$8 sps:$4 sm:$0xff]   ;;  %v15000_v15 = vld [vmem:[%s20810_s4 + $0x5b0] ss:$8 sps:$4 sm:$0xff]   ;;  %v15008_v50 = vld [vmem:[%s20810_s4 + $0x5a4] ss:$8 sps:$4 sm:$0xff]  }
 0x2c8   : > { %10816 = vmatpush2.bf16.msra.mxu0 %v14988_v10  ;;  %v14993_v10 = vld [vmem:[%s20810_s4 + $0x4c4] ss:$8 sps:$4 sm:$0xff]   ;;  %v18368_v56 = vpack.c.bf16 %v5659_v57, %v5655_v26  ;;  %v14991_v57 = vld [vmem:[%s20810_s4 + $0x4c0] ss:$8 sps:$4 sm:$0xff]  }
 0x2c9   : > { %10817 = vmatprep.subr.bf16.mxu0 %v14996_v45  ;;  %v21442_v45 = vld [vmem:[#allocation119_spill] sm:$0xff] }
 0x2ca   : > { %10621 = vmatpush2.bf16.msra.mxu1 %v14979_v46  ;;  %21441 = vst [vmem:[#allocation112_spill] sm:$0xff] %v18368_v56  ;;  %v5664_v46 = vrot.slane %v21442_v45, 1  ;;  %v21445_v45 = vld [vmem:[#allocation45_spill] sm:$0xff] }
 0x2cb   : > { %10622 = vmatprep.subr.bf16.mxu1 %v14987_v37  ;;  %v21443_v37 = vld [vmem:[#allocation125_spill] sm:$0xff] }
 0x2cc   : > { %10818 = vmatpush2.bf16.msra.mxu0 %v14994_v1  ;;  %10299 = vmatmul.mubr.bf16.gmra.mxu1 %v17974_v21  ;;  %v21444_v1 = vld [vmem:[#allocation43_spill] sm:$0xff]  ;;  %v5669_v2 = vsel %vm675_vm0, %v5664_v46, %v17194_v20 }
 0x2cd   : > { %10819 = vmatprep.subr.bf16.mxu0 %v15002_v11  ;;  %10308 = vmatprep.mubr.bf16.mxu1 %v18368_v56  ;;  %v5663_v26 = vrot.slane %v21444_v1, 1  ;;  %v14999_v11 = vld [vmem:[%s20810_s4 + $0x4b4] ss:$8 sps:$4 sm:$0xff]   ;;  %v14997_v1 = vld [vmem:[%s20810_s4 + $0x4b0] ss:$8 sps:$4 sm:$0xff]  }
 0x2ce   : > { %10623 = vmatpush2.bf16.msra.mxu1 %v14985_v59  ;;  %10502 = vmatmul.mubr.bf16.gmra.mxu0 %v21443_v37  ;;  %v15006_v59 = vld [vmem:[%s20810_s4 + $0x5a0] ss:$8 sps:$4 sm:$0xff]  }
 0x2cf   : > { %10624 = vmatprep.subr.bf16.mxu1 %v14993_v10  ;;  %10511 = vmatprep.mubr.bf16.mxu0 %v21445_v45  ;;  %v5665_v54 = vsel %vm675_vm0, %v5663_v26, %v5664_v46  ;;  %v15014_v10 = vld [vmem:[%s20810_s4 + $0x594] ss:$8 sps:$4 sm:$0xff]   ;;  %v15012_v46 = vld [vmem:[%s20810_s4 + $0x590] ss:$8 sps:$4 sm:$0xff]   ;;  %v15020_v26 = vld [vmem:[%s20810_s4 + $0x584] ss:$8 sps:$4 sm:$0xff]  }
 0x2d0   : > { %10820 = vmatpush2.bf16.msra.mxu0 %v15000_v15  ;;  %v15005_v15 = vld [vmem:[%s20810_s4 + $0x4a4] ss:$8 sps:$4 sm:$0xff]   ;;  %v18403_v45 = vpack.c.bf16 %v5669_v2, %v5665_v54  ;;  %v15003_v2 = vld [vmem:[%s20810_s4 + $0x4a0] ss:$8 sps:$4 sm:$0xff]  }
 0x2d1   : > { %10821 = vmatprep.subr.bf16.mxu0 %v15008_v50  ;;  %v21447_v50 = vld [vmem:[#allocation123_spill] sm:$0xff] }
 0x2d2   : > { %10625 = vmatpush2.bf16.msra.mxu1 %v14991_v57  ;;  %21446 = vst [vmem:[#allocation115_spill] sm:$0xff] %v18403_v45  ;;  %v5674_v57 = vrot.slane %v21447_v50, 1  ;;  %v21448_v54 = vld [vmem:[#allocation127_spill] sm:$0xff]  ;;  %v21450_v50 = vld [vmem:[#allocation129_spill] sm:$0xff] }
 0x2d3   : > { %10626 = vmatprep.subr.bf16.mxu1 %v14999_v11  ;;  %v21449_v11 = vld [vmem:[#allocation122_spill] sm:$0xff] }
 0x2d4   : > { %10822 = vmatpush2.bf16.msra.mxu0 %v15006_v59  ;;  %10309 = vmatmul.mubr.bf16.gmra.mxu1 %v17987_v44  ;;  %v5673_v59 = vrot.slane %v21449_v11, 1  ;;  %v5679_v51 = vsel %vm675_vm0, %v5674_v57, %v17194_v20  ;;  %v15009_v11 = vld [vmem:[%s20810_s4 + $0x490] ss:$8 sps:$4 sm:$0xff]  }
 0x2d5   : > { %10823 = vmatprep.subr.bf16.mxu0 %v15014_v10  ;;  %10318 = vmatprep.mubr.bf16.mxu1 %v18403_v45  ;;  %v15011_v10 = vld [vmem:[%s20810_s4 + $0x494] ss:$8 sps:$4 sm:$0xff]  }
 0x2d6   : > { %10627 = vmatpush2.bf16.msra.mxu1 %v14997_v1  ;;  %10512 = vmatmul.mubr.bf16.gmra.mxu0 %v21448_v54  ;;  %v15018_v1 = vld [vmem:[%s20810_s4 + $0x580] ss:$8 sps:$4 sm:$0xff]   ;;  %v5675_v37 = vsel %vm675_vm0, %v5673_v59, %v5674_v57  ;;  %v18441_v57 = vpop.f32.mrf.mxu0  ;;  %v21454_v54 = vld [vmem:[#allocation44_spill] sm:$0xff] }
 0x2d7   : > { %10628 = vmatprep.subr.bf16.mxu1 %v15005_v15  ;;  %10521 = vmatprep.mubr.bf16.mxu0 %v21450_v50  ;;  %v15026_v15 = vld [vmem:[%s20810_s4 + $0x774] ss:$8 sps:$4 sm:$0xff]   ;;  %v18438_v50 = vpack.c.bf16 %v5679_v51, %v5675_v37  ;;  %v5683_v51 = vrot.slane %v21454_v54, 1 }
 0x2d8   : > { %10824 = vmatpush2.bf16.msra.mxu0 %v15012_v46  ;;  %v15017_v46 = vld [vmem:[%s20810_s4 + $0x484] ss:$8 sps:$4 sm:$0xff]  }
 0x2d9   : > { %10825 = vmatprep.subr.bf16.mxu0 %v15020_v26  ;;  %21451 = vst [vmem:[#allocation114_spill] sm:$0xff] %v18438_v50  ;;  %v21452_v26 = vld [vmem:[#allocation70_spill] sm:$0xff] }
 0x2da   : > { %10629 = vmatpush2.bf16.msra.mxu1 %v15003_v2  ;;  %v5684_v59 = vrot.slane %v21452_v26, 1  ;;  %v15015_v2 = vld [vmem:[%s20810_s4 + $0x480] ss:$8 sps:$4 sm:$0xff]  }
 0x2db   : > { %10630 = vmatprep.subr.bf16.mxu1 %v15011_v10  ;;  %v21453_v10 = vld [vmem:[#allocation130_spill] sm:$0xff]  ;;  %v10067_v37 = vpop.f32.mrf.mxu0 }
 0x2dc   : > { %10826 = vmatpush2.bf16.msra.mxu0 %v15018_v1  ;;  %10319 = vmatmul.mubr.bf16.gmra.mxu1 %v18021_v8  ;;  %v15023_v1 = vld [vmem:[%s20810_s4 + $0x674] ss:$8 sps:$4 sm:$0xff]  }
 0x2dd   : > { %11181 = vmatprep.subr.bf16.mxu0 %v15026_v15  ;;  %10328 = vmatprep.mubr.bf16.mxu1 %v18438_v50  ;;  %v5685_v15 = vsel %vm675_vm0, %v5683_v51, %v5684_v59  ;;  %v10069_v26 = vpop.f32.mrf.mxu0 }
 0x2de   : > { %10631 = vmatpush2.bf16.msra.mxu1 %v15009_v11  ;;  %10522 = vmatmul.mubr.bf16.gmra.mxu0 %v21453_v10  ;;  %v5689_v11 = vsel %vm675_vm0, %v5684_v59, %v17194_v20 }
 0x2df   : > { %10632 = vmatprep.subr.bf16.mxu1 %v15017_v46  ;;  %10531 = vmatprep.mubr.bf16.mxu0 %v21455_v61  ;;  %v10071_v10 = vpop.f32.mrf.mxu0  ;;  %v18459_v54 = vpack.c.bf16 %v5689_v11, %v5685_v15  ;;  %v9874_v46 = vpop.f32.mrf.mxu1  ;;  %v21457_v61 = vld [vmem:[#allocation75_spill] sm:$0xff] }
 0x2e0   : > { %v18462_v33 = vadd.f32 %v10067_v37, %v9874_v46 }
 0x2e1   : > { %21456 = vst [vmem:[#allocation119_spill] sm:$0xff] %v18459_v54  ;;  %v10073_v30 = vpop.f32.mrf.mxu0  ;;  %v9876_v51 = vpop.f32.mrf.mxu1 }
 0x2e2   : > { %10633 = vmatpush2.bf16.msra.mxu1 %v15015_v2  ;;  %v18466_v20 = vadd.f32 %v10069_v26, %v9876_v51 }
 0x2e3   : > { %10988 = vmatprep.subr.bf16.mxu1 %v15023_v1  ;;  %v10077_v59 = vpop.f32.mrf.mxu0  ;;  %v9878_v2 = vpop.f32.mrf.mxu1 }
 0x2e4   : > { %10329 = vmatmul.mubr.bf16.gmra.mxu1 %v18066_v3  ;;  %v18469_v1 = vadd.f32 %v10071_v10, %v9878_v2 }
 0x2e5   : > { %10338 = vmatprep.mubr.bf16.mxu1 %v18459_v54  ;;  %v10079_v15 = vpop.f32.mrf.mxu0  ;;  %v9880_v11 = vpop.f32.mrf.mxu1 }
 0x2e6   : > { %10532 = vmatmul.mubr.bf16.gmra.mxu0 %v21457_v61  ;;  %v18471_v41 = vadd.f32 %v10073_v30, %v9880_v11  ;;  %v21459_v61 = vld [vmem:[#allocation79_spill] sm:$0xff] }
 0x2e7   : > { %10541 = vmatprep.mubr.bf16.mxu0 %v21458_v55  ;;  %v10081_v37 = vpop.f32.mrf.mxu0  ;;  %v21460_v55 = vld [vmem:[#allocation84_spill] sm:$0xff] }
 0x2e9   : > { %v10083_v46 = vpop.f32.mrf.mxu0  ;;  %v9884_v35 = vpop.f32.mrf.mxu1 }
 0x2ea   : > { %v18476_v26 = vadd.f32 %v10077_v59, %v9884_v35 }
 0x2eb   : > { %v10087_v51 = vpop.f32.mrf.mxu0  ;;  %v9886_v10 = vpop.f32.mrf.mxu1 }
 0x2ec   : > { %10339 = vmatmul.mubr.bf16.gmra.mxu1 %v18088_v25  ;;  %v18479_v2 = vadd.f32 %v10079_v15, %v9886_v10  ;;  %v21464_v15 = vld [vmem:[#allocation90_spill] sm:$0xff] }
 0x2ed   : > { %10348 = vmatprep.mubr.bf16.mxu1 %v18090_v4  ;;  %v10089_v34 = vpop.f32.mrf.mxu0  ;;  %v9888_v30 = vpop.f32.mrf.mxu1 }
 0x2ee   : > { %10542 = vmatmul.mubr.bf16.gmra.mxu0 %v21459_v61  ;;  %21461 = vst [vmem:[#allocation43_spill] sm:$0xff] %v18479_v2  ;;  %v18481_v11 = vadd.f32 %v10081_v37, %v9888_v30  ;;  %v21463_v61 = vld [vmem:[#allocation83_spill] sm:$0xff] }
 0x2ef   : > { %10551 = vmatprep.mubr.bf16.mxu0 %v21460_v55  ;;  %v10091_v17 = vpop.f32.mrf.mxu0  ;;  %v9890_v28 = vpop.f32.mrf.mxu1 }
 0x2f0   : > { %21462 = vst [vmem:[#allocation123_spill] sm:$0xff] %v18481_v11  ;;  %v18484_v52 = vadd.f32 %v10083_v46, %v9890_v28 }
 0x2f1   : > { %v10093_v59 = vpop.f32.mrf.mxu0 }
 0x2f2   : > { %v9894_v35 = vpop.f32.mrf.mxu1 }
 0x2f3   : > { %v18488_v55 = vadd.f32 %v10087_v51, %v9894_v35  ;;  %v21468_v51 = vld [vmem:[#allocation50_spill] sm:$0xff] }
 0x2f4   : > { %10349 = vmatmul.mubr.bf16.gmra.mxu1 %v18104_v0  ;;  %v9896_v10 = vpop.f32.mrf.mxu1 }
 0x2f5   : > { %10358 = vmatprep.mubr.bf16.mxu1 %v18142_v58  ;;  %v18491_v18 = vadd.f32 %v10089_v34, %v9896_v10 }
 0x2f6   : > { %10552 = vmatmul.mubr.bf16.gmra.mxu0 %v21463_v61  ;;  %v9898_v37 = vpop.f32.mrf.mxu1  ;;  %v10097_v30 = vpop.f32.mrf.mxu0 }
 0x2f7   : > { %10561 = vmatprep.mubr.bf16.mxu0 %v21464_v15  ;;  %21465 = vst [vmem:[#allocation122_spill] sm:$0xff] %v18491_v18  ;;  %v18493_v11 = vadd.f32 %v10091_v17, %v9898_v37 }
 0x2f8   : > { %v9900_v2 = vpop.f32.mrf.mxu1  ;;  %v10099_v28 = vpop.f32.mrf.mxu0 }
 0x2f9   : > { %21466 = vst [vmem:[#allocation70_spill] sm:$0xff] %v18493_v11  ;;  %v18496_v46 = vadd.f32 %v10093_v59, %v9900_v2 }
 0x2fa   : > { %v10101_v61 = vpop.f32.mrf.mxu0 }
 0x2fb   : > { %21467 = vst [vmem:[#allocation44_spill] sm:$0xff] %v18496_v46  ;;  %v9904_v35 = vpop.f32.mrf.mxu1 }
 0x2fc   : > { %10359 = vmatmul.mubr.bf16.gmra.mxu1 %v18135_v38  ;;  %v18501_v34 = vadd.f32 %v10097_v30, %v9904_v35  ;;  %v10103_v10 = vpop.f32.mrf.mxu0  ;;  %v6052_v30 = vrot.slane %v18186_v39, 7 }
 0x2fd   : > { %10368 = vmatprep.mubr.bf16.mxu1 %v18153_v31  ;;  %v9906_v15 = vpop.f32.mrf.mxu1 }
 0x2fe   : > { %10562 = vmatmul.mubr.bf16.gmra.mxu0 %v21468_v51  ;;  %v18503_v17 = vadd.f32 %v10099_v28, %v9906_v15  ;;  %v6048_v28 = vrot.slane %v18014_v36, 7 }
 0x2ff   : > { %10571 = vmatprep.mubr.bf16.mxu0 %v17839_v62  ;;  %v10107_v37 = vpop.f32.mrf.mxu0  ;;  %v9908_v11 = vpop.f32.mrf.mxu1  ;;  %v21471_v62 = vld [vmem:[#allocation93_spill] sm:$0xff] }
 0x300   : > { %v18505_v18 = vadd.f32 %v10101_v61, %v9908_v11  ;;  %v6053_v11 = vsel %vm4885_vm2, %v6048_v28, %v6052_v30 }
 0x301   : > { %v10109_v2 = vpop.f32.mrf.mxu0  ;;  %v9910_v59 = vpop.f32.mrf.mxu1 }
 0x302   : > { %21469 = vst [vmem:[#allocation144_spill] sm:$0xff] %v18505_v18  ;;  %v18509_v51 = vadd.f32 %v10103_v10, %v9910_v59  ;;  %v6049_v59 = vsel %vm4885_vm2, %v16758_v60, %v6048_v28 }
 0x303   : > { %v10111_v46 = vpop.f32.mrf.mxu0 }
 0x304   : > { %10369 = vmatmul.mubr.bf16.gmra.mxu1 %v18167_v24  ;;  %21470 = vst [vmem:[#allocation145_spill] sm:$0xff] %v18509_v51 }
 0x305   : > { %10378 = vmatprep.mubr.bf16.mxu1 %v18179_v29  ;;  %v10113_v15 = vpop.f32.mrf.mxu0 }
 0x306   : > { %10572 = vmatmul.mubr.bf16.gmra.mxu0 %v21471_v62 }
 0x307   : > { %10581 = vmatprep.mubr.bf16.mxu0 %v17861_v47  ;;  %v18524_v47 = vpack.c.bf16 %v6053_v11, %v6049_v59 }
 0x308   : > { %v9914_v61 = vpop.f32.mrf.mxu1  ;;  %v10117_v18 = vpop.f32.mrf.mxu0 }
 0x309   : > { %v18516_v35 = vadd.f32 %v10107_v37, %v9914_v61  ;;  %21473 = vst [vmem:[#allocation147_spill] sm:$0xff] %v18524_v47 }
 0x30a   : > { %v9916_v10 = vpop.f32.mrf.mxu1  ;;  %v10119_v62 = vpop.f32.mrf.mxu0 }
 0x30b   : > { %21472 = vst [vmem:[#allocation146_spill] sm:$0xff] %v18516_v35  ;;  %v18522_v39 = vadd.f32 %v10109_v2, %v9916_v10 }
 0x30c   : > { %10379 = vmatmul.mubr.bf16.gmra.mxu1 %v18181_v16  ;;  %v9918_v36 = vpop.f32.mrf.mxu1  ;;  %v10121_v37 = vpop.f32.mrf.mxu0 }
 0x30d   : > { %10388 = vmatprep.mubr.bf16.mxu1 %v18220_v6  ;;  %v18527_v30 = vadd.f32 %v10111_v46, %v9918_v36 }
 0x30e   : > { %10582 = vmatmul.mubr.bf16.gmra.mxu0 %v17863_v22  ;;  %v9920_v61 = vpop.f32.mrf.mxu1  ;;  %v10123_v51 = vpop.f32.mrf.mxu0 }
 0x30f   : > { %10591 = vmatprep.mubr.bf16.mxu0 %v18524_v47  ;;  %v18530_v35 = vadd.f32 %v10113_v15, %v9920_v61 }
 0x310   : > { %v9924_v60 = vpop.f32.mrf.mxu1 }
 0x311   : > { %v18532_v28 = vadd.f32 %v10117_v18, %v9924_v60  ;;  %v10127_v2 = vpop.f32.mrf.mxu0 }
 0x312   : > { %v9926_v11 = vpop.f32.mrf.mxu1 }
 0x313   : > { %v18536_v10 = vadd.f32 %v10119_v62, %v9926_v11  ;;  %v10129_v46 = vpop.f32.mrf.mxu0  ;;  %v15024_v62 = vld [vmem:[%s20810_s4 + $0x770] ss:$8 sps:$4 sm:$0xff]  }
 0x314   : > { %10389 = vmatmul.mubr.bf16.gmra.mxu1 %v18212_v23  ;;  %v9928_v59 = vpop.f32.mrf.mxu1 }
 0x315   : > { %10398 = vmatprep.mubr.bf16.mxu1 %v18257_v7  ;;  %v18539_v36 = vadd.f32 %v10121_v37, %v9928_v59  ;;  %v10131_v15 = vpop.f32.mrf.mxu0  ;;  %v21476_v37 = vld [vmem:[#allocation97_spill] sm:$0xff] }
 0x316   : > { %10592 = vmatmul.mubr.bf16.gmra.mxu0 %v18250_v14  ;;  %v9930_v61 = vpop.f32.mrf.mxu1 }
 0x317   : > { %10827 = vmatprep.mubr.bf16.mxu0 %v17991_v27  ;;  %v18542_v18 = vadd.f32 %v10123_v51, %v9930_v61  ;;  %v10133_v60 = vpop.f32.mrf.mxu0  ;;  %v15032_v27 = vld [vmem:[%s20810_s4 + $0x764] ss:$8 sps:$4 sm:$0xff]   ;;  %v15030_v61 = vld [vmem:[%s20810_s4 + $0x760] ss:$8 sps:$4 sm:$0xff]  }
 0x318   : > { %v9934_v47 = vpop.f32.mrf.mxu1 }
 0x319   : > { %21474 = vst [vmem:[#allocation148_spill] sm:$0xff] %v18542_v18  ;;  %v18544_v22 = vadd.f32 %v10127_v2, %v9934_v47  ;;  %v10137_v14 = vpop.f32.mrf.mxu0 }
 0x31a   : > { %v9936_v11 = vpop.f32.mrf.mxu1 }
 0x31b   : > { %21475 = vst [vmem:[#allocation149_spill] sm:$0xff] %v18544_v22  ;;  %v18554_v51 = vadd.f32 %v10129_v46, %v9936_v11  ;;  %v10139_v47 = vpop.f32.mrf.mxu0  ;;  %v15038_v46 = vld [vmem:[%s20810_s4 + $0x754] ss:$8 sps:$4 sm:$0xff]  }
 0x31c   : > { %10399 = vmatmul.mubr.bf16.gmra.mxu1 %v18270_v49  ;;  %v9938_v59 = vpop.f32.mrf.mxu1 }
 0x31d   : > { %10634 = vmatprep.mubr.bf16.mxu1 %v21476_v37  ;;  %21477 = vst [vmem:[#allocation97_spill] sm:$0xff] %v18554_v51  ;;  %v18557_v2 = vadd.f32 %v10131_v15, %v9938_v59  ;;  %v10141_v18 = vpop.f32.mrf.mxu0 }
 0x31e   : > { %10828 = vmatmul.mubr.bf16.vlgmr.msra.gmra.mxu0 %v17888_v32  ;;  %v9940_v22 = vpop.f32.mrf.mxu1  ;;  %v15021_v32 = vld [vmem:[%s20810_s4 + $0x670] ss:$8 sps:$4 sm:$0xff]  }
 0x31f   : > { %21478 = vst [vmem:[#allocation150_spill] sm:$0xff] %v18557_v2  ;;  %10837 = vmatprep.mubr.bf16.mxu0 %v18034_v13  ;;  %11182 = vmatpush1.bf16.msra.mxu0 %v15024_v62  ;;  %v18566_v11 = vadd.f32 %v10133_v60, %v9940_v22  ;;  %v10143_v37 = vpop.f32.mrf.mxu0  ;;  %v15029_v62 = vld [vmem:[%s20810_s4 + $0x664] ss:$8 sps:$4 sm:$0xff]   ;;  %v21480_v13 = vld [vmem:[#allocation96_spill] sm:$0xff] }
 0x320   : > { %11183 = vmatprep.subr.bf16.mxu0 %v15032_v27  ;;  %v9944_v15 = vpop.f32.mrf.mxu1  ;;  %v15036_v27 = vld [vmem:[%s20810_s4 + $0x750] ss:$8 sps:$4 sm:$0xff]  }
 0x321   : > { %21479 = vst [vmem:[#allocation151_spill] sm:$0xff] %v18566_v11  ;;  %v18574_v59 = vadd.f32 %v10137_v14, %v9944_v15  ;;  %v15044_v11 = vld [vmem:[%s20810_s4 + $0x744] ss:$8 sps:$4 sm:$0xff]   ;;  %v21481_v2 = vld [vmem:[#allocation100_spill] sm:$0xff]  ;;  %v15027_v14 = vld [vmem:[%s20810_s4 + $0x660] ss:$8 sps:$4 sm:$0xff]  }
 0x322   : > { %v9946_v22 = vpop.f32.mrf.mxu1  ;;  %v10147_v60 = vpop.f32.mrf.mxu0 }
 0x323   : > { %11184 = vmatpush1.bf16.msra.mxu0 %v15030_v61  ;;  %v18584_v51 = vadd.f32 %v10139_v47, %v9946_v22  ;;  %v15042_v47 = vld [vmem:[%s20810_s4 + $0x740] ss:$8 sps:$4 sm:$0xff]  }
 0x324   : > { %10635 = vmatmul.mubr.bf16.vlgmr.msra.gmra.mxu1 %v21480_v13  ;;  %11185 = vmatprep.subr.bf16.mxu0 %v15038_v46  ;;  %v9948_v61 = vpop.f32.mrf.mxu1  ;;  %v10149_v13 = vpop.f32.mrf.mxu0  ;;  %v15035_v46 = vld [vmem:[%s20810_s4 + $0x654] ss:$8 sps:$4 sm:$0xff]  }
 0x325   : > { %10644 = vmatprep.mubr.bf16.mxu1 %v21481_v2  ;;  %10989 = vmatpush1.bf16.msra.mxu1 %v15021_v32  ;;  %21482 = vst [vmem:[#allocation96_spill] sm:$0xff] %v18584_v51  ;;  %v18593_v15 = vadd.f32 %v10141_v18, %v9948_v61  ;;  %v15033_v18 = vld [vmem:[%s20810_s4 + $0x650] ss:$8 sps:$4 sm:$0xff]  }
 0x326   : > { %10838 = vmatmul.mubr.bf16.gmra.mxu0 %v17900_v53  ;;  %10990 = vmatprep.subr.bf16.mxu1 %v15029_v62  ;;  %v9950_v32 = vpop.f32.mrf.mxu1  ;;  %v10151_v22 = vpop.f32.mrf.mxu0  ;;  %v15050_v62 = vld [vmem:[%s20810_s4 + $0x734] ss:$8 sps:$4 sm:$0xff]  }
 0x327   : > { %21483 = vst [vmem:[#allocation100_spill] sm:$0xff] %v18593_v15  ;;  %10847 = vmatprep.mubr.bf16.mxu0 %v18189_v19  ;;  %11186 = vmatpush1.bf16.msra.mxu0 %v15036_v27  ;;  %v18602_v53 = vadd.f32 %v10143_v37, %v9950_v32  ;;  %v15041_v19 = vld [vmem:[%s20810_s4 + $0x644] ss:$8 sps:$4 sm:$0xff]   ;;  %v21485_v37 = vld [vmem:[#allocation101_spill] sm:$0xff] }
 0x328   : > { %11187 = vmatprep.subr.bf16.mxu0 %v15044_v11  ;;  %v9954_v61 = vpop.f32.mrf.mxu1  ;;  %v10153_v27 = vpop.f32.mrf.mxu0  ;;  %v15048_v11 = vld [vmem:[%s20810_s4 + $0x730] ss:$8 sps:$4 sm:$0xff]   ;;  %v15056_v32 = vld [vmem:[%s20810_s4 + $0x724] ss:$8 sps:$4 sm:$0xff]  }
 0x329   : > { %21484 = vst [vmem:[#allocation152_spill] sm:$0xff] %v18602_v53  ;;  %10991 = vmatpush1.bf16.msra.mxu1 %v15027_v14  ;;  %v18610_v15 = vadd.f32 %v10147_v60, %v9954_v61  ;;  %v15039_v60 = vld [vmem:[%s20810_s4 + $0x640] ss:$8 sps:$4 sm:$0xff]  }
 0x32a   : > { %10992 = vmatprep.subr.bf16.mxu1 %v15035_v46  ;;  %v9956_v14 = vpop.f32.mrf.mxu1  ;;  %v21486_v46 = vld [vmem:[#allocation105_spill] sm:$0xff] }
 0x32b   : > { %11188 = vmatpush1.bf16.msra.mxu0 %v15042_v47  ;;  %v18620_v53 = vadd.f32 %v10149_v13, %v9956_v14  ;;  %v10157_v51 = vpop.f32.mrf.mxu0 }
 0x32c   : > { %10645 = vmatmul.mubr.bf16.gmra.mxu1 %v21485_v37  ;;  %11189 = vmatprep.subr.bf16.mxu0 %v15050_v62  ;;  %v9958_v47 = vpop.f32.mrf.mxu1  ;;  %v15047_v62 = vld [vmem:[%s20810_s4 + $0x634] ss:$8 sps:$4 sm:$0xff]  }
 0x32d   : > { %10654 = vmatprep.mubr.bf16.mxu1 %v21486_v46  ;;  %21487 = vst [vmem:[#allocation101_spill] sm:$0xff] %v18620_v53  ;;  %10993 = vmatpush1.bf16.msra.mxu1 %v15033_v18  ;;  %v18629_v61 = vadd.f32 %v10151_v22, %v9958_v47  ;;  %v10159_v13 = vpop.f32.mrf.mxu0  ;;  %v15054_v18 = vld [vmem:[%s20810_s4 + $0x720] ss:$8 sps:$4 sm:$0xff]   ;;  %v15045_v22 = vld [vmem:[%s20810_s4 + $0x630] ss:$8 sps:$4 sm:$0xff]  }
 0x32e   : > { %10848 = vmatmul.mubr.bf16.gmra.mxu0 %v17930_v5  ;;  %10994 = vmatprep.subr.bf16.mxu1 %v15041_v19  ;;  %v9960_v14 = vpop.f32.mrf.mxu1  ;;  %v15062_v19 = vld [vmem:[%s20810_s4 + $0x714] ss:$8 sps:$4 sm:$0xff]  }
 0x32f   : > { %21488 = vst [vmem:[#allocation105_spill] sm:$0xff] %v18629_v61  ;;  %10857 = vmatprep.mubr.bf16.mxu0 %v18298_v48  ;;  %11190 = vmatpush1.bf16.msra.mxu0 %v15048_v11  ;;  %v18638_v5 = vadd.f32 %v10153_v27, %v9960_v14  ;;  %v10161_v53 = vpop.f32.mrf.mxu0  ;;  %v15053_v11 = vld [vmem:[%s20810_s4 + $0x624] ss:$8 sps:$4 sm:$0xff]   ;;  %v15060_v27 = vld [vmem:[%s20810_s4 + $0x710] ss:$8 sps:$4 sm:$0xff]  }
 0x330   : > { %11191 = vmatprep.subr.bf16.mxu0 %v15056_v32  ;;  %v21491_v14 = vld [vmem:[#allocation106_spill] sm:$0xff] }
 0x331   : > { %21489 = vst [vmem:[#allocation153_spill] sm:$0xff] %v18638_v5  ;;  %10995 = vmatpush1.bf16.msra.mxu1 %v15039_v60  ;;  %v9964_v47 = vpop.f32.mrf.mxu1  ;;  %v10163_v32 = vpop.f32.mrf.mxu0  ;;  %v21492_v5 = vld [vmem:[#allocation109_spill] sm:$0xff] }
 0x332   : > { %10996 = vmatprep.subr.bf16.mxu1 %v15047_v62  ;;  %v18646_v48 = vadd.f32 %v10157_v51, %v9964_v47  ;;  %v15068_v62 = vld [vmem:[%s20810_s4 + $0x704] ss:$8 sps:$4 sm:$0xff]  }
 0x333   : > { %11192 = vmatpush1.bf16.msra.mxu0 %v15054_v18  ;;  %v9966_v60 = vpop.f32.mrf.mxu1  ;;  %v15051_v18 = vld [vmem:[%s20810_s4 + $0x620] ss:$8 sps:$4 sm:$0xff]  }
 0x334   : > { %21490 = vst [vmem:[#allocation154_spill] sm:$0xff] %v18646_v48  ;;  %10655 = vmatmul.mubr.bf16.gmra.mxu1 %v21491_v14  ;;  %11193 = vmatprep.subr.bf16.mxu0 %v15062_v19  ;;  %v18656_v61 = vadd.f32 %v10159_v13, %v9966_v60  ;;  %v10167_v51 = vpop.f32.mrf.mxu0  ;;  %v15059_v19 = vld [vmem:[%s20810_s4 + $0x614] ss:$8 sps:$4 sm:$0xff]  }
 0x335   : > { %10664 = vmatprep.mubr.bf16.mxu1 %v21492_v5  ;;  %10997 = vmatpush1.bf16.msra.mxu1 %v15045_v22  ;;  %v9968_v47 = vpop.f32.mrf.mxu1  ;;  %v15066_v22 = vld [vmem:[%s20810_s4 + $0x700] ss:$8 sps:$4 sm:$0xff]  }
 0x336   : > { %21493 = vst [vmem:[#allocation106_spill] sm:$0xff] %v18656_v61  ;;  %10858 = vmatmul.mubr.bf16.gmra.mxu0 %v17939_v43  ;;  %10998 = vmatprep.subr.bf16.mxu1 %v15053_v11  ;;  %v18665_v48 = vadd.f32 %v10161_v53, %v9968_v47  ;;  %v10169_v13 = vpop.f32.mrf.mxu0  ;;  %v15074_v11 = vld [vmem:[%s20810_s4 + $0x7f4] ss:$8 sps:$4 sm:$0xff]   ;;  %v15057_v53 = vld [vmem:[%s20810_s4 + $0x610] ss:$8 sps:$4 sm:$0xff]  }
 0x337   : > { %10867 = vmatprep.mubr.bf16.mxu0 %v18333_v12  ;;  %11194 = vmatpush1.bf16.msra.mxu0 %v15060_v27  ;;  %v9970_v60 = vpop.f32.mrf.mxu1  ;;  %v15065_v27 = vld [vmem:[%s20810_s4 + $0x604] ss:$8 sps:$4 sm:$0xff]  }
 0x338   : > { %21494 = vst [vmem:[#allocation109_spill] sm:$0xff] %v18665_v48  ;;  %11195 = vmatprep.subr.bf16.mxu0 %v15068_v62  ;;  %v18674_v43 = vadd.f32 %v10163_v32, %v9970_v60  ;;  %v10171_v61 = vpop.f32.mrf.mxu0  ;;  %v15072_v32 = vld [vmem:[%s20810_s4 + $0x7f0] ss:$8 sps:$4 sm:$0xff]   ;;  %v21497_v60 = vld [vmem:[#allocation110_spill] sm:$0xff] }
 0x339   : > { %10999 = vmatpush1.bf16.msra.mxu1 %v15051_v18  ;;  %v9974_v47 = vpop.f32.mrf.mxu1 }
 0x33a   : > { %21495 = vst [vmem:[#allocation155_spill] sm:$0xff] %v18674_v43  ;;  %11000 = vmatprep.subr.bf16.mxu1 %v15059_v19  ;;  %v18682_v12 = vadd.f32 %v10167_v51, %v9974_v47  ;;  %v10173_v62 = vpop.f32.mrf.mxu0  ;;  %v15080_v19 = vld [vmem:[%s20810_s4 + $0x7e4] ss:$8 sps:$4 sm:$0xff]   ;;  %v21498_v43 = vld [vmem:[#allocation61_spill] sm:$0xff]  ;;  %v15063_v51 = vld [vmem:[%s20810_s4 + $0x600] ss:$8 sps:$4 sm:$0xff]  }
 0x33b   : > { %11196 = vmatpush1.bf16.msra.mxu0 %v15066_v22  ;;  %v9976_v18 = vpop.f32.mrf.mxu1 }
 0x33c   : > { %21496 = vst [vmem:[#allocation156_spill] sm:$0xff] %v18682_v12  ;;  %10665 = vmatmul.mubr.bf16.gmra.mxu1 %v21497_v60  ;;  %11197 = vmatprep.subr.bf16.mxu0 %v15074_v11  ;;  %v18692_v48 = vadd.f32 %v10169_v13, %v9976_v18  ;;  %v10177_v47 = vpop.f32.mrf.mxu0  ;;  %v15071_v11 = vld [vmem:[%s20810_s4 + $0x6f4] ss:$8 sps:$4 sm:$0xff]   ;;  %v15078_v13 = vld [vmem:[%s20810_s4 + $0x7e0] ss:$8 sps:$4 sm:$0xff]  }
 0x33d   : > { %10674 = vmatprep.mubr.bf16.mxu1 %v21498_v43  ;;  %11001 = vmatpush1.bf16.msra.mxu1 %v15057_v53  ;;  %v9978_v22 = vpop.f32.mrf.mxu1 }
 0x33e   : > { %21499 = vst [vmem:[#allocation110_spill] sm:$0xff] %v18692_v48  ;;  %10868 = vmatmul.mubr.bf16.gmra.mxu0 %v17974_v21  ;;  %11002 = vmatprep.subr.bf16.mxu1 %v15065_v27  ;;  %v18701_v12 = vadd.f32 %v10171_v61, %v9978_v22  ;;  %v10179_v18 = vpop.f32.mrf.mxu0  ;;  %v15086_v27 = vld [vmem:[%s20810_s4 + $0x7d4] ss:$8 sps:$4 sm:$0xff]   ;;  %v15069_v61 = vld [vmem:[%s20810_s4 + $0x6f0] ss:$8 sps:$4 sm:$0xff]  }
 0x33f   : > { %10877 = vmatprep.mubr.bf16.mxu0 %v18368_v56  ;;  %11198 = vmatpush2.bf16.msra.mxu0 %v15072_v32  ;;  %v9980_v53 = vpop.f32.mrf.mxu1  ;;  %v15077_v32 = vld [vmem:[%s20810_s4 + $0x6e4] ss:$8 sps:$4 sm:$0xff]  }
 0x340   : > { %21500 = vst [vmem:[#allocation61_spill] sm:$0xff] %v18701_v12  ;;  %11199 = vmatprep.subr.bf16.mxu0 %v15080_v19  ;;  %v18710_v21 = vadd.f32 %v10173_v62, %v9980_v53  ;;  %v10181_v22 = vpop.f32.mrf.mxu0  ;;  %v15084_v19 = vld [vmem:[%s20810_s4 + $0x7d0] ss:$8 sps:$4 sm:$0xff]   ;;  %v21503_v62 = vld [vmem:[#allocation62_spill] sm:$0xff] }
 0x341   : > { %11003 = vmatpush1.bf16.msra.mxu1 %v15063_v51  ;;  %v21504_v53 = vld [vmem:[#allocation118_spill] sm:$0xff] }
 0x342   : > { %21501 = vst [vmem:[#allocation157_spill] sm:$0xff] %v18710_v21  ;;  %11004 = vmatprep.subr.bf16.mxu1 %v15071_v11  ;;  %v9984_v56 = vpop.f32.mrf.mxu1  ;;  %v10183_v51 = vpop.f32.mrf.mxu0  ;;  %v15092_v11 = vld [vmem:[%s20810_s4 + $0x7c4] ss:$8 sps:$4 sm:$0xff]  }
 0x343   : > { %11200 = vmatpush2.bf16.msra.mxu0 %v15078_v13  ;;  %v18721_v12 = vadd.f32 %v10177_v47, %v9984_v56  ;;  %v15075_v13 = vld [vmem:[%s20810_s4 + $0x6e0] ss:$8 sps:$4 sm:$0xff]   ;;  %v15083_v47 = vld [vmem:[%s20810_s4 + $0x6d4] ss:$8 sps:$4 sm:$0xff]  }
 0x344   : > { %10675 = vmatmul.mubr.bf16.gmra.mxu1 %v21503_v62  ;;  %11201 = vmatprep.subr.bf16.mxu0 %v15086_v27  ;;  %v9986_v21 = vpop.f32.mrf.mxu1 }
 0x345   : > { %21502 = vst [vmem:[#allocation158_spill] sm:$0xff] %v18721_v12  ;;  %10684 = vmatprep.mubr.bf16.mxu1 %v21504_v53  ;;  %11005 = vmatpush2.bf16.msra.mxu1 %v15069_v61  ;;  %v18731_v48 = vadd.f32 %v10179_v18, %v9986_v21  ;;  %v10187_v56 = vpop.f32.mrf.mxu0  ;;  %v15090_v61 = vld [vmem:[%s20810_s4 + $0x7c0] ss:$8 sps:$4 sm:$0xff]   ;;  %v15098_v18 = vld [vmem:[%s20810_s4 + $0x7b4] ss:$8 sps:$4 sm:$0xff]  }
 0x346   : > { %10878 = vmatmul.mubr.bf16.gmra.mxu0 %v17987_v44  ;;  %11006 = vmatprep.subr.bf16.mxu1 %v15077_v32  ;;  %v9988_v27 = vpop.f32.mrf.mxu1  ;;  %v15081_v44 = vld [vmem:[%s20810_s4 + $0x6d0] ss:$8 sps:$4 sm:$0xff]  }
 0x347   : > { %21505 = vst [vmem:[#allocation62_spill] sm:$0xff] %v18731_v48  ;;  %10887 = vmatprep.mubr.bf16.mxu0 %v18403_v45  ;;  %11202 = vmatpush2.bf16.msra.mxu0 %v15084_v19  ;;  %v18741_v12 = vadd.f32 %v10181_v22, %v9988_v27  ;;  %v10189_v21 = vpop.f32.mrf.mxu0  ;;  %v15089_v22 = vld [vmem:[%s20810_s4 + $0x6c4] ss:$8 sps:$4 sm:$0xff]  }
 0x348   : > { %11203 = vmatprep.subr.bf16.mxu0 %v15092_v11  ;;  %v9990_v32 = vpop.f32.mrf.mxu1  ;;  %v15096_v11 = vld [vmem:[%s20810_s4 + $0x7b0] ss:$8 sps:$4 sm:$0xff]  }
 0x349   : > { %21506 = vst [vmem:[#allocation118_spill] sm:$0xff] %v18741_v12  ;;  %11007 = vmatpush2.bf16.msra.mxu1 %v15075_v13  ;;  %v18749_v45 = vadd.f32 %v10183_v51, %v9990_v32  ;;  %v10191_v19 = vpop.f32.mrf.mxu0  ;;  %v21509_v13 = vld [vmem:[#allocation66_spill] sm:$0xff] }
 0x34a   : > { %11008 = vmatprep.subr.bf16.mxu1 %v15083_v47  ;;  %v9994_v27 = vpop.f32.mrf.mxu1  ;;  %v15104_v51 = vld [vmem:[%s20810_s4 + $0x7a4] ss:$8 sps:$4 sm:$0xff]  }
 0x34b   : > { %21507 = vst [vmem:[#allocation159_spill] sm:$0xff] %v18749_v45  ;;  %11204 = vmatpush2.bf16.msra.mxu0 %v15090_v61  ;;  %v18757_v12 = vadd.f32 %v10187_v56, %v9994_v27  ;;  %v10193_v48 = vpop.f32.mrf.mxu0  ;;  %v21510_v47 = vld [vmem:[#allocation67_spill] sm:$0xff] }
 0x34c   : > { %10685 = vmatmul.mubr.bf16.gmra.mxu1 %v21509_v13  ;;  %11205 = vmatprep.subr.bf16.mxu0 %v15098_v18  ;;  %v9996_v32 = vpop.f32.mrf.mxu1  ;;  %v15087_v61 = vld [vmem:[%s20810_s4 + $0x6c0] ss:$8 sps:$4 sm:$0xff]   ;;  %v15095_v18 = vld [vmem:[%s20810_s4 + $0x6b4] ss:$8 sps:$4 sm:$0xff]  }
 0x34d   : > { %21508 = vst [vmem:[#allocation160_spill] sm:$0xff] %v18757_v12  ;;  %10694 = vmatprep.mubr.bf16.mxu1 %v21510_v47  ;;  %11009 = vmatpush2.bf16.msra.mxu1 %v15081_v44  ;;  %v18767_v45 = vadd.f32 %v10189_v21, %v9996_v32  ;;  %v10197_v56 = vpop.f32.mrf.mxu0  ;;  %v15102_v44 = vld [vmem:[%s20810_s4 + $0x7a0] ss:$8 sps:$4 sm:$0xff]  }
 0x34e   : > { %10888 = vmatmul.mubr.bf16.gmra.mxu0 %v18021_v8  ;;  %11010 = vmatprep.subr.bf16.mxu1 %v15089_v22  ;;  %v9998_v27 = vpop.f32.mrf.mxu1  ;;  %v15110_v22 = vld [vmem:[%s20810_s4 + $0x794] ss:$8 sps:$4 sm:$0xff]   ;;  %v15093_v8 = vld [vmem:[%s20810_s4 + $0x6b0] ss:$8 sps:$4 sm:$0xff]  }
 0x34f   : > { %21511 = vst [vmem:[#allocation66_spill] sm:$0xff] %v18767_v45  ;;  %10897 = vmatprep.mubr.bf16.mxu0 %v18438_v50  ;;  %11206 = vmatpush2.bf16.msra.mxu0 %v15096_v11  ;;  %v18777_v12 = vadd.f32 %v10191_v19, %v9998_v27  ;;  %v10199_v21 = vpop.f32.mrf.mxu0  ;;  %v15101_v19 = vld [vmem:[%s20810_s4 + $0x6a4] ss:$8 sps:$4 sm:$0xff]  }
 0x350   : > { %11207 = vmatprep.subr.bf16.mxu0 %v15104_v51  ;;  %v10000_v32 = vpop.f32.mrf.mxu1  ;;  %v15108_v51 = vld [vmem:[%s20810_s4 + $0x790] ss:$8 sps:$4 sm:$0xff]  }
 0x351   : > { %21512 = vst [vmem:[#allocation67_spill] sm:$0xff] %v18777_v12  ;;  %11011 = vmatpush2.bf16.msra.mxu1 %v15087_v61  ;;  %v18785_v50 = vadd.f32 %v10193_v48, %v10000_v32  ;;  %v10201_v11 = vpop.f32.mrf.mxu0  ;;  %v21514_v12 = vld [vmem:[#allocation68_spill] sm:$0xff]  ;;  %v15116_v48 = vld [vmem:[%s20810_s4 + $0x784] ss:$8 sps:$4 sm:$0xff]  }
 0x352   : > { %11012 = vmatprep.subr.bf16.mxu1 %v15095_v18  ;;  %v10004_v27 = vpop.f32.mrf.mxu1  ;;  %v21516_v18 = vld [vmem:[#allocation69_spill] sm:$0xff] }
 0x353   : > { %21513 = vst [vmem:[#allocation161_spill] sm:$0xff] %v18785_v50  ;;  %11208 = vmatpush2.bf16.msra.mxu0 %v15102_v44  ;;  %v10203_v61 = vpop.f32.mrf.mxu0  ;;  %v18797_v32 = vadd.f32 %v10197_v56, %v10004_v27  ;;  %v15099_v44 = vld [vmem:[%s20810_s4 + $0x6a0] ss:$8 sps:$4 sm:$0xff]  }
 0x354   : > { %10695 = vmatmul.mubr.bf16.gmra.mxu1 %v21514_v12  ;;  %11209 = vmatprep.subr.bf16.mxu0 %v15110_v22  ;;  %v10006_v50 = vpop.f32.mrf.mxu1  ;;  %v15107_v22 = vld [vmem:[%s20810_s4 + $0x694] ss:$8 sps:$4 sm:$0xff]  }
 0x355   : > { %21515 = vst [vmem:[#allocation162_spill] sm:$0xff] %v18797_v32  ;;  %10704 = vmatprep.mubr.bf16.mxu1 %v21516_v18  ;;  %11013 = vmatpush2.bf16.msra.mxu1 %v15093_v8  ;;  %v10207_v45 = vpop.f32.mrf.mxu0  ;;  %v18807_v12 = vadd.f32 %v10199_v21, %v10006_v50  ;;  %v15114_v8 = vld [vmem:[%s20810_s4 + $0x780] ss:$8 sps:$4 sm:$0xff]   ;;  %v15105_v50 = vld [vmem:[%s20810_s4 + $0x690] ss:$8 sps:$4 sm:$0xff]  }
 0x356   : > { %10898 = vmatmul.mubr.bf16.gmra.mxu0 %v18066_v3  ;;  %11014 = vmatprep.subr.bf16.mxu1 %v15101_v19  ;;  %v10008_v56 = vpop.f32.mrf.mxu1  ;;  %v15122_v19 = vld [vmem:[%s20813_s7 + $0x74] ss:$8 sps:$4 sm:$0xff]   ;;  %v21520_v32 = vld [vmem:[#allocation126_spill] sm:$0xff] }
 0x357   : > { %21517 = vst [vmem:[#allocation163_spill] sm:$0xff] %v18807_v12  ;;  %10907 = vmatprep.mubr.bf16.mxu0 %v18459_v54  ;;  %11210 = vmatpush2.bf16.msra.mxu0 %v15108_v51  ;;  %v10209_v27 = vpop.f32.mrf.mxu0  ;;  %v18816_v3 = vadd.f32 %v10201_v11, %v10008_v56  ;;  %v15113_v54 = vld [vmem:[%s20810_s4 + $0x684] ss:$8 sps:$4 sm:$0xff]  }
 0x358   : > { %11211 = vmatprep.subr.bf16.mxu0 %v15116_v48  ;;  %v10010_v21 = vpop.f32.mrf.mxu1  ;;  %v21522_v56 = vld [vmem:[#allocation71_spill] sm:$0xff] }
 0x359   : > { %21518 = vst [vmem:[#allocation164_spill] sm:$0xff] %v18816_v3  ;;  %11015 = vmatpush2.bf16.msra.mxu1 %v15099_v44  ;;  %v10211_v51 = vpop.f32.mrf.mxu0  ;;  %v18824_v12 = vadd.f32 %v10203_v61, %v10010_v21  ;;  %v15119_v61 = vld [vmem:[%s20810_s4 + $0x874] ss:$8 sps:$4 sm:$0xff]  }
 0x35a   : > { %11016 = vmatprep.subr.bf16.mxu1 %v15107_v22  ;;  %v10014_v48 = vpop.f32.mrf.mxu1  ;;  %v15111_v22 = vld [vmem:[%s20810_s4 + $0x680] ss:$8 sps:$4 sm:$0xff]  }
 0x35b   : > { %21519 = vst [vmem:[#allocation165_spill] sm:$0xff] %v18824_v12  ;;  %11212 = vmatpush2.bf16.msra.mxu0 %v15114_v8  ;;  %v10213_v11 = vpop.f32.mrf.mxu0  ;;  %v18827_v44 = vadd.f32 %v10207_v45, %v10014_v48 }
 0x35c   : > { %10705 = vmatmul.mubr.bf16.gmra.mxu1 %v21520_v32  ;;  %11815 = vmatprep.subr.bf16.mxu0 %v15122_v19  ;;  %v10016_v3 = vpop.f32.mrf.mxu1 }
 0x35d   : > { %21521 = vst [vmem:[#allocation126_spill] sm:$0xff] %v18827_v44  ;;  %10714 = vmatprep.mubr.bf16.mxu1 %v21522_v56  ;;  %11017 = vmatpush2.bf16.msra.mxu1 %v15105_v50  ;;  %v10443_v18 = vpop.f32.mrf.mxu0  ;;  %v18837_v8 = vadd.f32 %v10209_v27, %v10016_v3  ;;  %v21527_v3 = vld [vmem:[#allocation76_spill] sm:$0xff] }
 0x35e   : > { %10908 = vmatmul.mubr.bf16.gmra.mxu0 %v18088_v25  ;;  %11018 = vmatprep.subr.bf16.mxu1 %v15113_v54  ;;  %v10018_v45 = vpop.f32.mrf.mxu1  ;;  %v21526_v54 = vld [vmem:[#allocation128_spill] sm:$0xff] }
 0x35f   : > { %21523 = vst [vmem:[#allocation166_spill] sm:$0xff] %v18837_v8  ;;  %10917 = vmatprep.mubr.bf16.mxu0 %v18090_v4  ;;  %v10445_v19 = vpop.f32.mrf.mxu0  ;;  %v18840_v50 = vadd.f32 %v10211_v51, %v10018_v45  ;;  %v10064_v45 = vadd.f32 %v18441_v57, %v18457_v9 }
 0x360   : > { %v10020_v21 = vpop.f32.mrf.mxu1 }
 0x361   : > { %21524 = vst [vmem:[#allocation167_spill] sm:$0xff] %v18840_v50  ;;  %11019 = vmatpush2.bf16.msra.mxu1 %v15111_v22  ;;  %v10447_v48 = vpop.f32.mrf.mxu0  ;;  %v18842_v44 = vadd.f32 %v10213_v11, %v10020_v21 }
 0x362   : > { %11374 = vmatprep.subr.bf16.mxu1 %v15119_v61  ;;  %v10250_v25 = vpop.f32.mrf.mxu1 }
 0x363   : > { %21525 = vst [vmem:[#allocation168_spill] sm:$0xff] %v18842_v44  ;;  %v10449_v12 = vpop.f32.mrf.mxu0  ;;  %v10251_v56 = vadd.f32 %v10250_v25, %v18011_v63 }
 0x364   : > { %10715 = vmatmul.mubr.bf16.gmra.mxu1 %v21526_v54  ;;  %v10252_v27 = vpop.f32.mrf.mxu1 }
 0x365   : > { %10724 = vmatprep.mubr.bf16.mxu1 %v21527_v3  ;;  %v10453_v4 = vpop.f32.mrf.mxu0  ;;  %v10253_v51 = vadd.f32 %v10252_v27, %v18040_v40  ;;  %v18850_v22 = vadd.f32 %v10443_v18, %v10251_v56  ;;  %v21528_v40 = vld [vmem:[#allocation74_spill] sm:$0xff]  ;;  %v21529_v56 = vld [vmem:[#allocation81_spill] sm:$0xff] }
 0x366   : > { %10918 = vmatmul.mubr.bf16.gmra.mxu0 %v18104_v0  ;;  %v10254_v11 = vpop.f32.mrf.mxu1 }
 0x367   : > { %10927 = vmatprep.mubr.bf16.mxu0 %v18142_v58  ;;  %v10455_v61 = vpop.f32.mrf.mxu0  ;;  %v10255_v21 = vadd.f32 %v10254_v11, %v18042_v42  ;;  %v18855_v63 = vadd.f32 %v10445_v19, %v10253_v51 }
 0x368   : > { %v10256_v25 = vpop.f32.mrf.mxu1 }
 0x369   : > { %v10457_v44 = vpop.f32.mrf.mxu0  ;;  %v10257_v50 = vadd.f32 %v10256_v25, %v10064_v45  ;;  %v18857_v8 = vadd.f32 %v10447_v48, %v10255_v21  ;;  %v21530_v25 = vld [vmem:[#allocation47_spill] sm:$0xff] }
 0x36a   : > { %v10260_v0 = vpop.f32.mrf.mxu1 }
 0x36b   : > { %v10459_v27 = vpop.f32.mrf.mxu0  ;;  %v10261_v18 = vadd.f32 %v10260_v0, %v18462_v33  ;;  %v18862_v58 = vadd.f32 %v10449_v12, %v10257_v50 }
 0x36c   : > { %10725 = vmatmul.mubr.bf16.gmra.mxu1 %v21528_v40  ;;  %v10262_v9 = vpop.f32.mrf.mxu1 }
 0x36d   : > { %10734 = vmatprep.mubr.bf16.mxu1 %v21529_v56  ;;  %v10463_v57 = vpop.f32.mrf.mxu0  ;;  %v10263_v42 = vadd.f32 %v10262_v9, %v18466_v20  ;;  %v18867_v19 = vadd.f32 %v10453_v4, %v10261_v18  ;;  %v21531_v4 = vld [vmem:[#allocation82_spill] sm:$0xff] }
 0x36e   : > { %10928 = vmatmul.mubr.bf16.gmra.mxu0 %v18135_v38  ;;  %v10264_v48 = vpop.f32.mrf.mxu1 }
 0x36f   : > { %10937 = vmatprep.mubr.bf16.mxu0 %v18153_v31  ;;  %v10465_v51 = vpop.f32.mrf.mxu0  ;;  %v10265_v11 = vadd.f32 %v10264_v48, %v18469_v1  ;;  %v18870_v45 = vadd.f32 %v10455_v61, %v10263_v42  ;;  %v21533_v61 = vld [vmem:[#allocation43_spill] sm:$0xff] }
 0x370   : > { %v10266_v0 = vpop.f32.mrf.mxu1 }
 0x371   : > { %v10467_v33 = vpop.f32.mrf.mxu0  ;;  %v10267_v12 = vadd.f32 %v10266_v0, %v18471_v41  ;;  %v18873_v50 = vadd.f32 %v10457_v44, %v10265_v11  ;;  %v21534_v11 = vld [vmem:[#allocation123_spill] sm:$0xff] }
 0x372   : > { %v10270_v21 = vpop.f32.mrf.mxu1 }
 0x373   : > { %v10469_v20 = vpop.f32.mrf.mxu0  ;;  %v10271_v9 = vadd.f32 %v10270_v21, %v18476_v26  ;;  %v18878_v18 = vadd.f32 %v10459_v27, %v10267_v12 }
 0x374   : > { %10735 = vmatmul.mubr.bf16.gmra.mxu1 %v21530_v25  ;;  %v10272_v31 = vpop.f32.mrf.mxu1 }
 0x375   : > { %10744 = vmatprep.mubr.bf16.mxu1 %v21531_v4  ;;  %21532 = vst [vmem:[#allocation128_spill] sm:$0xff] %v18878_v18  ;;  %v10273_v42 = vadd.f32 %v10272_v31, %v21533_v61  ;;  %v18883_v41 = vadd.f32 %v10463_v57, %v10271_v9  ;;  %v21538_v57 = vld [vmem:[#allocation59_spill] sm:$0xff] }
 0x376   : > { %v10473_v1 = vpop.f32.mrf.mxu0  ;;  %10938 = vmatmul.mubr.bf16.gmra.mxu0 %v18167_v24  ;;  %v10274_v44 = vpop.f32.mrf.mxu1  ;;  %v21537_v24 = vld [vmem:[#allocation54_spill] sm:$0xff] }
 0x377   : > { %10947 = vmatprep.mubr.bf16.mxu0 %v18179_v29  ;;  %v10275_v0 = vadd.f32 %v10274_v44, %v21534_v11  ;;  %v18886_v38 = vadd.f32 %v10465_v51, %v10273_v42  ;;  %v21540_v51 = vld [vmem:[#allocation122_spill] sm:$0xff] }
 0x378   : > { %v10475_v48 = vpop.f32.mrf.mxu0  ;;  %v10276_v26 = vpop.f32.mrf.mxu1 }
 0x379   : > { %21535 = vst [vmem:[#allocation76_spill] sm:$0xff] %v18886_v38  ;;  %v10277_v27 = vadd.f32 %v10276_v26, %v18484_v52  ;;  %v18889_v12 = vadd.f32 %v10467_v33, %v10275_v0  ;;  %v21541_v0 = vld [vmem:[#allocation70_spill] sm:$0xff] }
 0x37a   : > { %v10477_v21 = vpop.f32.mrf.mxu0 }
 0x37b   : > { %21536 = vst [vmem:[#allocation74_spill] sm:$0xff] %v18889_v12  ;;  %v18894_v9 = vadd.f32 %v10469_v20, %v10277_v27  ;;  %v21542_v20 = vld [vmem:[#allocation44_spill] sm:$0xff] }
 0x37c   : > { %v10280_v18 = vpop.f32.mrf.mxu1  ;;  %10745 = vmatmul.mubr.bf16.gmra.mxu1 %v21537_v24  ;;  %v10479_v31 = vpop.f32.mrf.mxu0 }
 0x37d   : > { %v10281_v61 = vadd.f32 %v10280_v18, %v18488_v55  ;;  %10754 = vmatprep.mubr.bf16.mxu1 %v21538_v57  ;;  %21539 = vst [vmem:[#allocation81_spill] sm:$0xff] %v18894_v9 }
 0x37e   : > { %v10282_v29 = vpop.f32.mrf.mxu1  ;;  %v10483_v44 = vpop.f32.mrf.mxu0  ;;  %10948 = vmatmul.mubr.bf16.gmra.mxu0 %v18181_v16  ;;  %v21544_v16 = vld [vmem:[#allocation86_spill] sm:$0xff] }
 0x37f   : > { %v10283_v42 = vadd.f32 %v10282_v29, %v21540_v51  ;;  %10957 = vmatprep.mubr.bf16.mxu0 %v18220_v6  ;;  %v18899_v52 = vadd.f32 %v10473_v1, %v10281_v61  ;;  %v21545_v1 = vld [vmem:[#allocation51_spill] sm:$0xff] }
 0x380   : > { %v10284_v33 = vpop.f32.mrf.mxu1  ;;  %v10485_v11 = vpop.f32.mrf.mxu0 }
 0x381   : > { %v10285_v26 = vadd.f32 %v10284_v33, %v21541_v0  ;;  %v18902_v12 = vadd.f32 %v10475_v48, %v10283_v42 }
 0x382   : > { %v10286_v55 = vpop.f32.mrf.mxu1  ;;  %v10487_v18 = vpop.f32.mrf.mxu0 }
 0x383   : > { %v10287_v27 = vadd.f32 %v10286_v55, %v21542_v20  ;;  %v18905_v9 = vadd.f32 %v10477_v21, %v10285_v26  ;;  %v21548_v26 = vld [vmem:[#allocation144_spill] sm:$0xff] }
 0x384   : > { %v10290_v38 = vpop.f32.mrf.mxu1  ;;  %10755 = vmatmul.mubr.bf16.gmra.mxu1 %v21544_v16  ;;  %v10489_v29 = vpop.f32.mrf.mxu0 }
 0x385   : > { %21543 = vst [vmem:[#allocation47_spill] sm:$0xff] %v18905_v9  ;;  %v10291_v51 = vadd.f32 %v10290_v38, %v18501_v34  ;;  %10764 = vmatprep.mubr.bf16.mxu1 %v21545_v1  ;;  %v18910_v61 = vadd.f32 %v10479_v31, %v10287_v27  ;;  %v21549_v31 = vld [vmem:[#allocation145_spill] sm:$0xff] }
 0x386   : > { %v10292_v6 = vpop.f32.mrf.mxu1  ;;  %v10493_v33 = vpop.f32.mrf.mxu0  ;;  %10958 = vmatmul.mubr.bf16.gmra.mxu0 %v18212_v23  ;;  %v21550_v23 = vld [vmem:[#allocation60_spill] sm:$0xff] }
 0x387   : > { %21546 = vst [vmem:[#allocation82_spill] sm:$0xff] %v18910_v61  ;;  %v10293_v48 = vadd.f32 %v10292_v6, %v18503_v17  ;;  %10967 = vmatprep.mubr.bf16.mxu0 %v18257_v7  ;;  %v18915_v21 = vadd.f32 %v10483_v44, %v10291_v51  ;;  %v21551_v17 = vld [vmem:[#allocation146_spill] sm:$0xff]  ;;  %v21552_v44 = vld [vmem:[#allocation55_spill] sm:$0xff] }
 0x388   : > { %v10294_v42 = vpop.f32.mrf.mxu1  ;;  %v10495_v0 = vpop.f32.mrf.mxu0 }
 0x389   : > { %21547 = vst [vmem:[#allocation43_spill] sm:$0xff] %v18915_v21  ;;  %v10295_v55 = vadd.f32 %v10294_v42, %v21548_v26  ;;  %v18918_v20 = vadd.f32 %v10485_v11, %v10293_v48  ;;  %v21554_v48 = vld [vmem:[#allocation140_spill] sm:$0xff] }
 0x38a   : > { %v10296_v38 = vpop.f32.mrf.mxu1  ;;  %v10497_v34 = vpop.f32.mrf.mxu0 }
 0x38b   : > { %v10297_v27 = vadd.f32 %v10296_v38, %v21549_v31  ;;  %v18921_v61 = vadd.f32 %v10487_v18, %v10295_v55 }
 0x38c   : > { %v10300_v9 = vpop.f32.mrf.mxu1  ;;  %10765 = vmatmul.mubr.bf16.gmra.mxu1 %v21550_v23  ;;  %v10499_v6 = vpop.f32.mrf.mxu0 }
 0x38d   : > { %v10301_v7 = vadd.f32 %v10300_v9, %v21551_v17  ;;  %10774 = vmatprep.mubr.bf16.mxu1 %v21552_v44  ;;  %v18926_v51 = vadd.f32 %v10489_v29, %v10297_v27 }
 0x38e   : > { %v10302_v21 = vpop.f32.mrf.mxu1  ;;  %v10503_v42 = vpop.f32.mrf.mxu0  ;;  %10968 = vmatmul.mubr.bf16.gmra.mxu0 %v18270_v49  ;;  %v21555_v49 = vld [vmem:[#allocation131_spill] sm:$0xff] }
 0x38f   : > { %21553 = vst [vmem:[#allocation123_spill] sm:$0xff] %v18926_v51  ;;  %v10303_v11 = vadd.f32 %v10302_v21, %v18522_v39  ;;  %10977 = vmatprep.mubr.bf16.mxu0 %v21554_v48  ;;  %v18931_v18 = vadd.f32 %v10493_v33, %v10301_v7  ;;  %v21556_v7 = vld [vmem:[#allocation138_spill] sm:$0xff] }
 0x390   : > { %v10304_v26 = vpop.f32.mrf.mxu1  ;;  %v10505_v55 = vpop.f32.mrf.mxu0 }
 0x391   : > { %v10305_v38 = vadd.f32 %v10304_v26, %v18527_v30  ;;  %v18934_v31 = vadd.f32 %v10495_v0, %v10303_v11  ;;  %v21558_v0 = vld [vmem:[#allocation142_spill] sm:$0xff] }
 0x392   : > { %v10306_v9 = vpop.f32.mrf.mxu1  ;;  %v10507_v17 = vpop.f32.mrf.mxu0 }
 0x393   : > { %v10307_v29 = vadd.f32 %v10306_v9, %v18530_v35  ;;  %v18937_v27 = vadd.f32 %v10497_v34, %v10305_v38 }
 0x394   : > { %v10310_v51 = vpop.f32.mrf.mxu1  ;;  %10775 = vmatmul.mubr.bf16.gmra.mxu1 %v21555_v49  ;;  %v10509_v39 = vpop.f32.mrf.mxu0 }
 0x395   : > { %v10311_v21 = vadd.f32 %v10310_v51, %v18532_v28  ;;  %10784 = vmatprep.mubr.bf16.mxu1 %v21556_v7  ;;  %v18942_v33 = vadd.f32 %v10499_v6, %v10307_v29  ;;  %v21559_v6 = vld [vmem:[#allocation148_spill] sm:$0xff] }
 0x396   : > { %v10312_v48 = vpop.f32.mrf.mxu1  ;;  %v10513_v30 = vpop.f32.mrf.mxu0  ;;  %10978 = vmatmul.mubr.bf16.gmra.mxu0 %v21558_v0  ;;  %v15120_v0 = vld [vmem:[%s20813_s7 + $0x70] ss:$8 sps:$4 sm:$0xff]  }
 0x397   : > { %21557 = vst [vmem:[#allocation54_spill] sm:$0xff] %v18942_v33  ;;  %v10313_v11 = vadd.f32 %v10312_v48, %v18536_v10  ;;  %11213 = vmatprep.mubr.bf16.mxu0 %v21481_v2  ;;  %v18947_v35 = vadd.f32 %v10503_v42, %v10311_v21  ;;  %v21561_v2 = vld [vmem:[#allocation141_spill] sm:$0xff]  ;;  %v21563_v21 = vld [vmem:[#allocation103_spill] sm:$0xff] }
 0x398   : > { %v10314_v34 = vpop.f32.mrf.mxu1  ;;  %v10515_v26 = vpop.f32.mrf.mxu0  ;;  %v21562_v48 = vld [vmem:[#allocation149_spill] sm:$0xff] }
 0x399   : > { %v10315_v38 = vadd.f32 %v10314_v34, %v18539_v36  ;;  %v18950_v9 = vadd.f32 %v10505_v55, %v10313_v11  ;;  %v15131_v36 = vld [vmem:[%s20813_s7 + $0x64] ss:$8 sps:$4 sm:$0xff]  }
 0x39a   : > { %v10316_v28 = vpop.f32.mrf.mxu1  ;;  %v10517_v51 = vpop.f32.mrf.mxu0 }
 0x39b   : > { %v10317_v29 = vadd.f32 %v10316_v28, %v21559_v6  ;;  %v18956_v33 = vadd.f32 %v10507_v17, %v10315_v38  ;;  %v21565_v17 = vld [vmem:[#allocation97_spill] sm:$0xff]  ;;  %v15129_v6 = vld [vmem:[%s20813_s7 + $0x60] ss:$8 sps:$4 sm:$0xff]  }
 0x39c   : > { %v10320_v10 = vpop.f32.mrf.mxu1  ;;  %10785 = vmatmul.mubr.bf16.gmra.mxu1 %v21561_v2  ;;  %v10519_v42 = vpop.f32.mrf.mxu0 }
 0x39d   : > { %21560 = vst [vmem:[#allocation59_spill] sm:$0xff] %v18956_v33  ;;  %v10321_v55 = vadd.f32 %v10320_v10, %v21562_v48  ;;  %11020 = vmatprep.mubr.bf16.mxu1 %v21563_v21  ;;  %v18964_v11 = vadd.f32 %v10509_v39, %v10317_v29  ;;  %v15140_v39 = vld [vmem:[%s20813_s7 + $0x54] ss:$8 sps:$4 sm:$0xff]   ;;  %v21567_v29 = vld [vmem:[#allocation150_spill] sm:$0xff] }
 0x39e   : > { %v10322_v34 = vpop.f32.mrf.mxu1  ;;  %v10523_v28 = vpop.f32.mrf.mxu0  ;;  %11214 = vmatmul.mubr.bf16.vlgmr.msra.gmra.mxu0 %v21485_v37 }
 0x39f   : > { %21564 = vst [vmem:[#allocation122_spill] sm:$0xff] %v18964_v11  ;;  %v10323_v38 = vadd.f32 %v10322_v34, %v21565_v17  ;;  %11223 = vmatprep.mubr.bf16.mxu0 %v21486_v46  ;;  %11816 = vmatpush1.bf16.msra.mxu0 %v15120_v0  ;;  %v18972_v33 = vadd.f32 %v10513_v30, %v10321_v55  ;;  %v15117_v46 = vld [vmem:[%s20810_s4 + $0x870] ss:$8 sps:$4 sm:$0xff]   ;;  %v15125_v30 = vld [vmem:[%s20810_s4 + $0x864] ss:$8 sps:$4 sm:$0xff]  }
 0x3a0   : > { %v10324_v10 = vpop.f32.mrf.mxu1  ;;  %v10525_v48 = vpop.f32.mrf.mxu0  ;;  %11817 = vmatprep.subr.bf16.mxu0 %v15131_v36  ;;  %v21569_v55 = vld [vmem:[#allocation151_spill] sm:$0xff]  ;;  %v15138_v17 = vld [vmem:[%s20813_s7 + $0x50] ss:$8 sps:$4 sm:$0xff]  }
 0x3a1   : > { %21566 = vst [vmem:[#allocation70_spill] sm:$0xff] %v18972_v33  ;;  %v10325_v37 = vadd.f32 %v10324_v10, %v21567_v29  ;;  %v18981_v0 = vadd.f32 %v10515_v26, %v10323_v38  ;;  %v21570_v33 = vld [vmem:[#allocation104_spill] sm:$0xff]  ;;  %v15149_v38 = vld [vmem:[%s20813_s7 + $0x44] ss:$8 sps:$4 sm:$0xff]  }
 0x3a2   : > { %v10326_v21 = vpop.f32.mrf.mxu1  ;;  %v10527_v34 = vpop.f32.mrf.mxu0  ;;  %v21571_v11 = vld [vmem:[#allocation107_spill] sm:$0xff] }
 0x3a3   : > { %21568 = vst [vmem:[#allocation44_spill] sm:$0xff] %v18981_v0  ;;  %v10327_v36 = vadd.f32 %v10326_v21, %v21569_v55  ;;  %11818 = vmatpush1.bf16.msra.mxu0 %v15129_v6  ;;  %v18990_v10 = vadd.f32 %v10517_v51, %v10325_v37  ;;  %v15123_v6 = vld [vmem:[%s20810_s4 + $0x860] ss:$8 sps:$4 sm:$0xff]  }
 0x3a4   : > { %v10330_v29 = vpop.f32.mrf.mxu1  ;;  %11021 = vmatmul.mubr.bf16.vlgmr.msra.gmra.mxu1 %v21570_v33  ;;  %v10529_v26 = vpop.f32.mrf.mxu0  ;;  %11819 = vmatprep.subr.bf16.mxu0 %v15140_v39  ;;  %v15128_v33 = vld [vmem:[%s20810_s4 + $0x854] ss:$8 sps:$4 sm:$0xff]  }
 0x3a5   : > { %v10331_v0 = vadd.f32 %v10330_v29, %v18574_v59  ;;  %11030 = vmatprep.mubr.bf16.mxu1 %v21571_v11  ;;  %11375 = vmatpush1.bf16.msra.mxu1 %v15117_v46  ;;  %v19001_v51 = vadd.f32 %v10519_v42, %v10327_v36  ;;  %v21572_v39 = vld [vmem:[#allocation96_spill] sm:$0xff]  ;;  %v15147_v11 = vld [vmem:[%s20813_s7 + $0x40] ss:$8 sps:$4 sm:$0xff]  }
 0x3a6   : > { %v10332_v37 = vpop.f32.mrf.mxu1  ;;  %v10533_v21 = vpop.f32.mrf.mxu0  ;;  %11224 = vmatmul.mubr.bf16.gmra.mxu0 %v21491_v14  ;;  %11376 = vmatprep.subr.bf16.mxu1 %v15125_v30  ;;  %v15158_v14 = vld [vmem:[%s20813_s7 + $0x34] ss:$8 sps:$4 sm:$0xff]  }
 0x3a7   : > { %v10333_v59 = vadd.f32 %v10332_v37, %v21572_v39  ;;  %11233 = vmatprep.mubr.bf16.mxu0 %v21492_v5  ;;  %11820 = vmatpush1.bf16.msra.mxu0 %v15138_v17  ;;  %v19012_v42 = vadd.f32 %v10523_v28, %v10331_v0  ;;  %v21573_v30 = vld [vmem:[#allocation100_spill] sm:$0xff]  ;;  %v15134_v28 = vld [vmem:[%s20810_s4 + $0x844] ss:$8 sps:$4 sm:$0xff]  }
 0x3a8   : > { %v10334_v46 = vpop.f32.mrf.mxu1  ;;  %v10535_v55 = vpop.f32.mrf.mxu0  ;;  %11821 = vmatprep.subr.bf16.mxu0 %v15149_v38  ;;  %v15126_v5 = vld [vmem:[%s20810_s4 + $0x850] ss:$8 sps:$4 sm:$0xff]  }
 0x3a9   : > { %v10335_v36 = vadd.f32 %v10334_v46, %v21573_v30  ;;  %11377 = vmatpush1.bf16.msra.mxu1 %v15123_v6  ;;  %v19021_v17 = vadd.f32 %v10525_v48, %v10333_v59  ;;  %v21575_v0 = vld [vmem:[#allocation152_spill] sm:$0xff] }
 0x3aa   : > { %v10336_v29 = vpop.f32.mrf.mxu1  ;;  %v10537_v37 = vpop.f32.mrf.mxu0  ;;  %11378 = vmatprep.subr.bf16.mxu1 %v15128_v33  ;;  %v15156_v6 = vld [vmem:[%s20813_s7 + $0x30] ss:$8 sps:$4 sm:$0xff]   ;;  %v15167_v33 = vld [vmem:[%s20813_s7 + $0x24] ss:$8 sps:$4 sm:$0xff]  }
 0x3ab   : > { %21574 = vst [vmem:[#allocation86_spill] sm:$0xff] %v19021_v17  ;;  %v10337_v38 = vadd.f32 %v10336_v29, %v21575_v0  ;;  %11822 = vmatpush1.bf16.msra.mxu0 %v15147_v11  ;;  %v19030_v39 = vadd.f32 %v10527_v34, %v10335_v36  ;;  %v21576_v30 = vld [vmem:[#allocation108_spill] sm:$0xff]  ;;  %v21577_v17 = vld [vmem:[#allocation111_spill] sm:$0xff]  ;;  %v21578_v0 = vld [vmem:[#allocation101_spill] sm:$0xff] }
 0x3ac   : > { %v10340_v46 = vpop.f32.mrf.mxu1  ;;  %11031 = vmatmul.mubr.bf16.gmra.mxu1 %v21576_v30  ;;  %v10539_v48 = vpop.f32.mrf.mxu0  ;;  %11823 = vmatprep.subr.bf16.mxu0 %v15158_v14  ;;  %v15132_v11 = vld [vmem:[%s20810_s4 + $0x840] ss:$8 sps:$4 sm:$0xff]   ;;  %v15137_v14 = vld [vmem:[%s20810_s4 + $0x834] ss:$8 sps:$4 sm:$0xff]  }
 0x3ad   : > { %v10341_v59 = vadd.f32 %v10340_v46, %v18610_v15  ;;  %11040 = vmatprep.mubr.bf16.mxu1 %v21577_v17  ;;  %11379 = vmatpush1.bf16.msra.mxu1 %v15126_v5  ;;  %v19041_v34 = vadd.f32 %v10529_v26, %v10337_v38  ;;  %v15165_v5 = vld [vmem:[%s20813_s7 + $0x20] ss:$8 sps:$4 sm:$0xff]  }
 0x3ae   : > { %v10342_v36 = vpop.f32.mrf.mxu1  ;;  %v10543_v29 = vpop.f32.mrf.mxu0  ;;  %11234 = vmatmul.mubr.bf16.gmra.mxu0 %v21497_v60  ;;  %11380 = vmatprep.subr.bf16.mxu1 %v15134_v28  ;;  %v15176_v60 = vld [vmem:[%s20813_s7 + $0x14] ss:$8 sps:$4 sm:$0xff]  }
 0x3af   : > { %v10343_v15 = vadd.f32 %v10342_v36, %v21578_v0  ;;  %11243 = vmatprep.mubr.bf16.mxu0 %v21498_v43  ;;  %11824 = vmatpush1.bf16.msra.mxu0 %v15156_v6  ;;  %v19052_v26 = vadd.f32 %v10533_v21, %v10341_v59  ;;  %v21580_v28 = vld [vmem:[#allocation105_spill] sm:$0xff]  ;;  %v15143_v21 = vld [vmem:[%s20810_s4 + $0x824] ss:$8 sps:$4 sm:$0xff]  }
 0x3b0   : > { %v10344_v17 = vpop.f32.mrf.mxu1  ;;  %v10545_v38 = vpop.f32.mrf.mxu0  ;;  %11825 = vmatprep.subr.bf16.mxu0 %v15167_v33  ;;  %v15135_v43 = vld [vmem:[%s20810_s4 + $0x830] ss:$8 sps:$4 sm:$0xff]  }
 0x3b1   : > { %21579 = vst [vmem:[#allocation51_spill] sm:$0xff] %v19052_v26  ;;  %v10345_v46 = vadd.f32 %v10344_v17, %v21580_v28  ;;  %11381 = vmatpush1.bf16.msra.mxu1 %v15132_v11  ;;  %v19061_v6 = vadd.f32 %v10535_v55, %v10343_v15  ;;  %v21582_v33 = vld [vmem:[#allocation153_spill] sm:$0xff]  ;;  %v21584_v15 = vld [vmem:[#allocation154_spill] sm:$0xff] }
 0x3b2   : > { %v10346_v30 = vpop.f32.mrf.mxu1  ;;  %v10547_v36 = vpop.f32.mrf.mxu0  ;;  %11382 = vmatprep.subr.bf16.mxu1 %v15137_v14  ;;  %v15174_v11 = vld [vmem:[%s20813_s7 + $0x10] ss:$8 sps:$4 sm:$0xff]   ;;  %v15185_v14 = vld [vmem:[%s20813_s7 + $0x4] ss:$8 sps:$4 sm:$0xff]  }
 0x3b3   : > { %21581 = vst [vmem:[#allocation144_spill] sm:$0xff] %v19061_v6  ;;  %v10347_v59 = vadd.f32 %v10346_v30, %v21582_v33  ;;  %11826 = vmatpush1.bf16.msra.mxu0 %v15165_v5  ;;  %v19070_v0 = vadd.f32 %v10537_v37, %v10345_v46  ;;  %v21583_v28 = vld [vmem:[#allocation113_spill] sm:$0xff]  ;;  %v15141_v5 = vld [vmem:[%s20810_s4 + $0x820] ss:$8 sps:$4 sm:$0xff]  }
 0x3b4   : > { %v10350_v17 = vpop.f32.mrf.mxu1  ;;  %11041 = vmatmul.mubr.bf16.gmra.mxu1 %v21583_v28  ;;  %v10549_v55 = vpop.f32.mrf.mxu0  ;;  %11827 = vmatprep.subr.bf16.mxu0 %v15176_v60  ;;  %v21585_v26 = vld [vmem:[#allocation117_spill] sm:$0xff]  ;;  %v21586_v33 = vld [vmem:[#allocation106_spill] sm:$0xff] }
 0x3b5   : > { %v10351_v6 = vadd.f32 %v10350_v17, %v21584_v15  ;;  %11050 = vmatprep.mubr.bf16.mxu1 %v21585_v26  ;;  %11383 = vmatpush1.bf16.msra.mxu1 %v15135_v43  ;;  %v19081_v37 = vadd.f32 %v10539_v48, %v10347_v59  ;;  %v15146_v60 = vld [vmem:[%s20810_s4 + $0x814] ss:$8 sps:$4 sm:$0xff]   ;;  %v15183_v26 = vld [vmem:[%s20813_s7] ss:$8 sps:$4 sm:$0xff]   ;;  %v15144_v28 = vld [vmem:[%s20810_s4 + $0x810] ss:$8 sps:$4 sm:$0xff]  }
 0x3b6   : > { %v10352_v46 = vpop.f32.mrf.mxu1  ;;  %v10553_v30 = vpop.f32.mrf.mxu0  ;;  %11244 = vmatmul.mubr.bf16.gmra.mxu0 %v21503_v62  ;;  %11384 = vmatprep.subr.bf16.mxu1 %v15143_v21  ;;  %v21588_v62 = vld [vmem:[#allocation109_spill] sm:$0xff] }
 0x3b7   : > { %v10353_v17 = vadd.f32 %v10352_v46, %v21586_v33  ;;  %11253 = vmatprep.mubr.bf16.mxu0 %v21504_v53  ;;  %11828 = vmatpush1.bf16.msra.mxu0 %v15174_v11  ;;  %v19092_v48 = vadd.f32 %v10543_v29, %v10351_v6  ;;  %v15152_v29 = vld [vmem:[%s20810_s4 + $0x804] ss:$8 sps:$4 sm:$0xff]  }
 0x3b8   : > { %v10354_v43 = vpop.f32.mrf.mxu1  ;;  %v10555_v59 = vpop.f32.mrf.mxu0  ;;  %11829 = vmatprep.subr.bf16.mxu0 %v15185_v14  ;;  %v21590_v6 = vld [vmem:[#allocation155_spill] sm:$0xff] }
 0x3b9   : > { %21587 = vst [vmem:[#allocation145_spill] sm:$0xff] %v19092_v48  ;;  %v10355_v21 = vadd.f32 %v10354_v43, %v21588_v62  ;;  %11385 = vmatpush1.bf16.msra.mxu1 %v15141_v5  ;;  %v19098_v15 = vadd.f32 %v10545_v38, %v10353_v17  ;;  %v21591_v5 = vld [vmem:[#allocation116_spill] sm:$0xff]  ;;  %v21593_v38 = vld [vmem:[#allocation121_spill] sm:$0xff] }
 0x3ba   : > { %v10356_v53 = vpop.f32.mrf.mxu1  ;;  %v10557_v11 = vpop.f32.mrf.mxu0  ;;  %11386 = vmatprep.subr.bf16.mxu1 %v15146_v60  ;;  %v21592_v62 = vld [vmem:[#allocation156_spill] sm:$0xff]  ;;  %v15150_v60 = vld [vmem:[%s20810_s4 + $0x800] ss:$8 sps:$4 sm:$0xff]  }
 0x3bb   : > { %21589 = vst [vmem:[#allocation60_spill] sm:$0xff] %v19098_v15  ;;  %v10357_v46 = vadd.f32 %v10356_v53, %v21590_v6  ;;  %11830 = vmatpush1.bf16.msra.mxu0 %v15183_v26  ;;  %v19104_v14 = vadd.f32 %v10547_v36, %v10355_v21  ;;  %v15155_v36 = vld [vmem:[%s20810_s4 + $0x8f4] ss:$8 sps:$4 sm:$0xff]   ;;  %v21594_v26 = vld [vmem:[#allocation110_spill] sm:$0xff] }
 0x3bc   : > { %v10360_v33 = vpop.f32.mrf.mxu1  ;;  %11051 = vmatmul.mubr.bf16.gmra.mxu1 %v21591_v5  ;;  %v10559_v43 = vpop.f32.mrf.mxu0  ;;  %v21596_v5 = vld [vmem:[#allocation61_spill] sm:$0xff] }
 0x3bd   : > { %v10361_v48 = vadd.f32 %v10360_v33, %v21592_v62  ;;  %11060 = vmatprep.mubr.bf16.mxu1 %v21593_v38  ;;  %11387 = vmatpush1.bf16.msra.mxu1 %v15144_v28  ;;  %v19112_v17 = vadd.f32 %v10549_v55, %v10357_v46 }
 0x3be   : > { %v10362_v15 = vpop.f32.mrf.mxu1  ;;  %v10563_v53 = vpop.f32.mrf.mxu0  ;;  %11254 = vmatmul.mubr.bf16.gmra.mxu0 %v21509_v13  ;;  %11388 = vmatprep.subr.bf16.mxu1 %v15152_v29  ;;  %v15153_v13 = vld [vmem:[%s20810_s4 + $0x8f0] ss:$8 sps:$4 sm:$0xff]  }
 0x3bf   : > { %v10363_v21 = vadd.f32 %v10362_v15, %v21594_v26  ;;  %11263 = vmatprep.mubr.bf16.mxu0 %v21510_v47  ;;  %v19120_v28 = vadd.f32 %v10553_v30, %v10361_v48  ;;  %v15161_v47 = vld [vmem:[%s20810_s4 + $0x8e4] ss:$8 sps:$4 sm:$0xff]   ;;  %v21598_v30 = vld [vmem:[#allocation157_spill] sm:$0xff]  ;;  %v21600_v26 = vld [vmem:[#allocation120_spill] sm:$0xff] }
 0x3c0   : > { %v10364_v6 = vpop.f32.mrf.mxu1  ;;  %v10565_v33 = vpop.f32.mrf.mxu0 }
 0x3c1   : > { %21595 = vst [vmem:[#allocation146_spill] sm:$0xff] %v19120_v28  ;;  %v10365_v55 = vadd.f32 %v10364_v6, %v21596_v5  ;;  %11389 = vmatpush1.bf16.msra.mxu1 %v15150_v60  ;;  %v19126_v29 = vadd.f32 %v10555_v59, %v10363_v21  ;;  %v21601_v6 = vld [vmem:[#allocation158_spill] sm:$0xff]  ;;  %v21602_v28 = vld [vmem:[#allocation124_spill] sm:$0xff] }
 0x3c2   : > { %v10366_v46 = vpop.f32.mrf.mxu1  ;;  %v10567_v62 = vpop.f32.mrf.mxu0  ;;  %11390 = vmatprep.subr.bf16.mxu1 %v15155_v36  ;;  %v15159_v59 = vld [vmem:[%s20810_s4 + $0x8e0] ss:$8 sps:$4 sm:$0xff]  }
 0x3c3   : > { %21597 = vst [vmem:[#allocation55_spill] sm:$0xff] %v19126_v29  ;;  %v10367_v48 = vadd.f32 %v10366_v46, %v21598_v30  ;;  %v19132_v15 = vadd.f32 %v10557_v11, %v10365_v55  ;;  %v21604_v46 = vld [vmem:[#allocation68_spill] sm:$0xff]  ;;  %v21605_v55 = vld [vmem:[#allocation62_spill] sm:$0xff] }
 0x3c4   : > { %v10370_v38 = vpop.f32.mrf.mxu1  ;;  %11061 = vmatmul.mubr.bf16.gmra.mxu1 %v21600_v26  ;;  %v10569_v60 = vpop.f32.mrf.mxu0  ;;  %v15164_v11 = vld [vmem:[%s20810_s4 + $0x8d4] ss:$8 sps:$4 sm:$0xff]  }
 0x3c5   : > { %21599 = vst [vmem:[#allocation131_spill] sm:$0xff] %v19132_v15  ;;  %v10371_v5 = vadd.f32 %v10370_v38, %v21601_v6  ;;  %11070 = vmatprep.mubr.bf16.mxu1 %v21602_v28  ;;  %11391 = vmatpush2.bf16.msra.mxu1 %v15153_v13  ;;  %v19140_v36 = vadd.f32 %v10559_v43, %v10367_v48  ;;  %v21606_v38 = vld [vmem:[#allocation69_spill] sm:$0xff]  ;;  %v21608_v6 = vld [vmem:[#allocation118_spill] sm:$0xff] }
 0x3c6   : > { %v10372_v21 = vpop.f32.mrf.mxu1  ;;  %v10573_v29 = vpop.f32.mrf.mxu0  ;;  %11264 = vmatmul.mubr.bf16.gmra.mxu0 %v21604_v46  ;;  %11392 = vmatprep.subr.bf16.mxu1 %v15161_v47  ;;  %v15162_v48 = vld [vmem:[%s20810_s4 + $0x8d0] ss:$8 sps:$4 sm:$0xff]  }
 0x3c7   : > { %21603 = vst [vmem:[#allocation138_spill] sm:$0xff] %v19140_v36  ;;  %v10373_v30 = vadd.f32 %v10372_v21, %v21605_v55  ;;  %11273 = vmatprep.mubr.bf16.mxu0 %v21606_v38  ;;  %v19148_v28 = vadd.f32 %v10563_v53, %v10371_v5  ;;  %v15170_v21 = vld [vmem:[%s20810_s4 + $0x8c4] ss:$8 sps:$4 sm:$0xff]   ;;  %v21613_v15 = vld [vmem:[#allocation45_spill] sm:$0xff] }
 0x3c8   : > { %v10374_v13 = vpop.f32.mrf.mxu1  ;;  %v10575_v26 = vpop.f32.mrf.mxu0  ;;  %v21610_v53 = vld [vmem:[#allocation159_spill] sm:$0xff] }
 0x3c9   : > { %21607 = vst [vmem:[#allocation148_spill] sm:$0xff] %v19148_v28  ;;  %v10375_v43 = vadd.f32 %v10374_v13, %v21608_v6  ;;  %11393 = vmatpush2.bf16.msra.mxu1 %v15159_v59  ;;  %v19154_v47 = vadd.f32 %v10565_v33, %v10373_v30  ;;  %v21611_v13 = vld [vmem:[#allocation125_spill] sm:$0xff]  ;;  %v21612_v6 = vld [vmem:[#allocation160_spill] sm:$0xff]  ;;  %v15168_v33 = vld [vmem:[%s20810_s4 + $0x8c0] ss:$8 sps:$4 sm:$0xff]  }
 0x3ca   : > { %v10376_v46 = vpop.f32.mrf.mxu1  ;;  %v10577_v36 = vpop.f32.mrf.mxu0  ;;  %11394 = vmatprep.subr.bf16.mxu1 %v15164_v11 }
 0x3cb   : > { %21609 = vst [vmem:[#allocation141_spill] sm:$0xff] %v19154_v47  ;;  %v10377_v5 = vadd.f32 %v10376_v46, %v21610_v53  ;;  %v19160_v55 = vadd.f32 %v10567_v62, %v10375_v43  ;;  %v15173_v62 = vld [vmem:[%s20810_s4 + $0x8b4] ss:$8 sps:$4 sm:$0xff]   ;;  %v21615_v43 = vld [vmem:[#allocation66_spill] sm:$0xff]  ;;  %v21616_v53 = vld [vmem:[#allocation71_spill] sm:$0xff] }
 0x3cc   : > { %v10380_v38 = vpop.f32.mrf.mxu1  ;;  %11071 = vmatmul.mubr.bf16.gmra.mxu1 %v21611_v13  ;;  %v10579_v59 = vpop.f32.mrf.mxu0  ;;  %v21618_v13 = vld [vmem:[#allocation67_spill] sm:$0xff] }
 0x3cd   : > { %v10381_v28 = vadd.f32 %v10380_v38, %v21612_v6  ;;  %11080 = vmatprep.mubr.bf16.mxu1 %v21613_v15  ;;  %11395 = vmatpush2.bf16.msra.mxu1 %v15162_v48  ;;  %v19168_v11 = vadd.f32 %v10569_v60, %v10377_v5 }
 0x3ce   : > { %v10382_v30 = vpop.f32.mrf.mxu1  ;;  %v10583_v47 = vpop.f32.mrf.mxu0  ;;  %11274 = vmatmul.mubr.bf16.gmra.mxu0 %v21520_v32  ;;  %11396 = vmatprep.subr.bf16.mxu1 %v15170_v21  ;;  %v15171_v32 = vld [vmem:[%s20810_s4 + $0x8b0] ss:$8 sps:$4 sm:$0xff]  }
 0x3cf   : > { %21614 = vst [vmem:[#allocation149_spill] sm:$0xff] %v19168_v11  ;;  %v10383_v46 = vadd.f32 %v10382_v30, %v21615_v43  ;;  %11283 = vmatprep.mubr.bf16.mxu0 %v21616_v53  ;;  %v19176_v15 = vadd.f32 %v10573_v29, %v10381_v28  ;;  %v15179_v30 = vld [vmem:[%s20810_s4 + $0x8a4] ss:$8 sps:$4 sm:$0xff]   ;;  %v21620_v29 = vld [vmem:[#allocation161_spill] sm:$0xff] }
 0x3d0   : > { %v10384_v48 = vpop.f32.mrf.mxu1  ;;  %v10585_v38 = vpop.f32.mrf.mxu0  ;;  %v21623_v11 = vld [vmem:[#allocation129_spill] sm:$0xff] }
 0x3d1   : > { %21617 = vst [vmem:[#allocation103_spill] sm:$0xff] %v19176_v15  ;;  %v10385_v60 = vadd.f32 %v10384_v48, %v21618_v13  ;;  %11397 = vmatpush2.bf16.msra.mxu1 %v15168_v33  ;;  %v19182_v21 = vadd.f32 %v10575_v26, %v10383_v46  ;;  %v21621_v48 = vld [vmem:[#allocation127_spill] sm:$0xff]  ;;  %v21622_v13 = vld [vmem:[#allocation162_spill] sm:$0xff] }
 0x3d2   : > { %v10386_v5 = vpop.f32.mrf.mxu1  ;;  %v10587_v6 = vpop.f32.mrf.mxu0  ;;  %11398 = vmatprep.subr.bf16.mxu1 %v15173_v62  ;;  %v15177_v26 = vld [vmem:[%s20810_s4 + $0x8a0] ss:$8 sps:$4 sm:$0xff]  }
 0x3d3   : > { %21619 = vst [vmem:[#allocation97_spill] sm:$0xff] %v19182_v21  ;;  %v10387_v28 = vadd.f32 %v10386_v5, %v21620_v29  ;;  %v19188_v43 = vadd.f32 %v10577_v36, %v10385_v60  ;;  %v15182_v36 = vld [vmem:[%s20810_s4 + $0x894] ss:$8 sps:$4 sm:$0xff]   ;;  %v21624_v60 = vld [vmem:[#allocation163_spill] sm:$0xff] }
 0x3d4   : > { %v10390_v53 = vpop.f32.mrf.mxu1  ;;  %11081 = vmatmul.mubr.bf16.gmra.mxu1 %v21621_v48  ;;  %v10589_v33 = vpop.f32.mrf.mxu0 }
 0x3d5   : > { %v10391_v15 = vadd.f32 %v10390_v53, %v21622_v13  ;;  %11090 = vmatprep.mubr.bf16.mxu1 %v21623_v11  ;;  %11399 = vmatpush2.bf16.msra.mxu1 %v15171_v32  ;;  %v19196_v62 = vadd.f32 %v10579_v59, %v10387_v28  ;;  %v21626_v53 = vld [vmem:[#allocation164_spill] sm:$0xff] }
 0x3d6   : > { %v10392_v46 = vpop.f32.mrf.mxu1  ;;  %v10593_v21 = vpop.f32.mrf.mxu0  ;;  %11284 = vmatmul.mubr.bf16.gmra.mxu0 %v21526_v54  ;;  %11400 = vmatprep.subr.bf16.mxu1 %v15179_v30  ;;  %v15180_v54 = vld [vmem:[%s20810_s4 + $0x890] ss:$8 sps:$4 sm:$0xff]  }
 0x3d7   : > { %v10393_v5 = vadd.f32 %v10392_v46, %v21624_v60  ;;  %11293 = vmatprep.mubr.bf16.mxu0 %v21527_v3  ;;  %v19204_v11 = vadd.f32 %v10583_v47, %v10391_v15  ;;  %v15188_v3 = vld [vmem:[%s20810_s4 + $0x884] ss:$8 sps:$4 sm:$0xff]   ;;  %v21628_v47 = vld [vmem:[#allocation165_spill] sm:$0xff] }
 0x3d8   : > { %v10394_v32 = vpop.f32.mrf.mxu1  ;;  %v10595_v29 = vpop.f32.mrf.mxu0  ;;  %v21630_v60 = vld [vmem:[#allocation130_spill] sm:$0xff] }
 0x3d9   : > { %21625 = vst [vmem:[#allocation150_spill] sm:$0xff] %v19204_v11  ;;  %v10395_v59 = vadd.f32 %v10394_v32, %v21626_v53  ;;  %11401 = vmatpush2.bf16.msra.mxu1 %v15177_v26  ;;  %v19210_v30 = vadd.f32 %v10585_v38, %v10393_v5  ;;  %v21631_v32 = vld [vmem:[#allocation126_spill] sm:$0xff]  ;;  %v21632_v11 = vld [vmem:[#allocation77_spill] sm:$0xff] }
 0x3da   : > { %v10396_v28 = vpop.f32.mrf.mxu1  ;;  %v10597_v48 = vpop.f32.mrf.mxu0  ;;  %11402 = vmatprep.subr.bf16.mxu1 %v15182_v36  ;;  %v15186_v38 = vld [vmem:[%s20810_s4 + $0x880] ss:$8 sps:$4 sm:$0xff]  }
 0x3db   : > { %21627 = vst [vmem:[#allocation151_spill] sm:$0xff] %v19210_v30  ;;  %v10397_v15 = vadd.f32 %v10396_v28, %v21628_v47  ;;  %v19216_v13 = vadd.f32 %v10587_v6, %v10395_v59  ;;  %v21634_v6 = vld [vmem:[#allocation166_spill] sm:$0xff] }
 0x3dc   : > { %v10400_v46 = vpop.f32.mrf.mxu1  ;;  %11091 = vmatmul.mubr.bf16.gmra.mxu1 %v21630_v60  ;;  %v10599_v26 = vpop.f32.mrf.mxu0 }
 0x3dd   : > { %21629 = vst [vmem:[#allocation104_spill] sm:$0xff] %v19216_v13  ;;  %v10401_v53 = vadd.f32 %v10400_v46, %v21631_v32  ;;  %11100 = vmatprep.mubr.bf16.mxu1 %v21632_v11  ;;  %11403 = vmatpush2.bf16.msra.mxu1 %v15180_v54  ;;  %v19224_v36 = vadd.f32 %v10589_v33, %v10397_v15  ;;  %v21635_v54 = vld [vmem:[#allocation167_spill] sm:$0xff]  ;;  %v21636_v32 = vld [vmem:[#allocation168_spill] sm:$0xff] }
 0x3de   : > { %v10402_v5 = vpop.f32.mrf.mxu1  ;;  %v10829_v30 = vpop.f32.mrf.mxu0  ;;  %11294 = vmatmul.mubr.bf16.gmra.mxu0 %v21528_v40  ;;  %11404 = vmatprep.subr.bf16.mxu1 %v15188_v3  ;;  %v21637_v3 = vld [vmem:[#allocation75_spill] sm:$0xff] }
 0x3df   : > { %21633 = vst [vmem:[#allocation107_spill] sm:$0xff] %v19224_v36  ;;  %v10403_v59 = vadd.f32 %v10402_v5, %v21634_v6  ;;  %11303 = vmatprep.mubr.bf16.mxu0 %v21529_v56  ;;  %v19229_v28 = vadd.f32 %v10593_v21, %v10401_v53  ;;  %v21638_v21 = vld [vmem:[#allocation78_spill] sm:$0xff] }
 0x3e0   : > { %v10404_v47 = vpop.f32.mrf.mxu1  ;;  %v10831_v11 = vpop.f32.mrf.mxu0 }
 0x3e1   : > { %v10405_v46 = vadd.f32 %v10404_v47, %v21635_v54  ;;  %11405 = vmatpush2.bf16.msra.mxu1 %v15186_v38  ;;  %v19232_v60 = vadd.f32 %v10595_v29, %v10403_v59 }
 0x3e2   : > { %v10406_v33 = vpop.f32.mrf.mxu1  ;;  %v10833_v15 = vpop.f32.mrf.mxu0 }
 0x3e3   : > { %v10407_v36 = vadd.f32 %v10406_v33, %v21636_v32  ;;  %v19235_v13 = vadd.f32 %v10597_v48, %v10405_v46 }
 0x3e4   : > { %v10636_v40 = vpop.f32.mrf.mxu1  ;;  %11101 = vmatmul.mubr.bf16.gmra.mxu1 %v21637_v3  ;;  %v10835_v5 = vpop.f32.mrf.mxu0 }
 0x3e5   : > { %v10637_v56 = vadd.f32 %v10636_v40, %v18850_v22  ;;  %11110 = vmatprep.mubr.bf16.mxu1 %v21638_v21  ;;  %v19240_v53 = vadd.f32 %v10599_v26, %v10407_v36 }
 0x3e6   : > { %v10638_v6 = vpop.f32.mrf.mxu1  ;;  %v10839_v38 = vpop.f32.mrf.mxu0  ;;  %11304 = vmatmul.mubr.bf16.gmra.mxu0 %v21530_v25  ;;  %v21639_v25 = vld [vmem:[#allocation79_spill] sm:$0xff] }
 0x3e7   : > { %v10639_v29 = vadd.f32 %v10638_v6, %v18855_v63  ;;  %11313 = vmatprep.mubr.bf16.mxu0 %v21531_v4  ;;  %v19245_v48 = vadd.f32 %v10829_v30, %v10637_v56  ;;  %v21640_v30 = vld [vmem:[#allocation84_spill] sm:$0xff] }
 0x3e8   : > { %v10640_v59 = vpop.f32.mrf.mxu1  ;;  %v10841_v47 = vpop.f32.mrf.mxu0 }
 0x3e9   : > { %v10641_v54 = vadd.f32 %v10640_v59, %v18857_v8  ;;  %v19248_v46 = vadd.f32 %v10831_v11, %v10639_v29 }
 0x3ea   : > { %v10642_v22 = vpop.f32.mrf.mxu1  ;;  %v10843_v33 = vpop.f32.mrf.mxu0 }
 0x3eb   : > { %v10643_v26 = vadd.f32 %v10642_v22, %v18862_v58  ;;  %v19251_v36 = vadd.f32 %v10833_v15, %v10641_v54 }
 0x3ec   : > { %v10646_v32 = vpop.f32.mrf.mxu1  ;;  %11111 = vmatmul.mubr.bf16.gmra.mxu1 %v21639_v25  ;;  %v10845_v63 = vpop.f32.mrf.mxu0 }
 0x3ed   : > { %v10647_v4 = vadd.f32 %v10646_v32, %v18867_v19  ;;  %11120 = vmatprep.mubr.bf16.mxu1 %v21640_v30  ;;  %v19256_v40 = vadd.f32 %v10835_v5, %v10643_v26  ;;  %v21641_v5 = vld [vmem:[#allocation128_spill] sm:$0xff] }
 0x3ee   : > { %v10648_v3 = vpop.f32.mrf.mxu1  ;;  %v10849_v8 = vpop.f32.mrf.mxu0  ;;  %11314 = vmatmul.mubr.bf16.gmra.mxu0 %v21537_v24  ;;  %v21642_v24 = vld [vmem:[#allocation83_spill] sm:$0xff] }
 0x3ef   : > { %v10649_v11 = vadd.f32 %v10648_v3, %v18870_v45  ;;  %11323 = vmatprep.mubr.bf16.mxu0 %v21538_v57  ;;  %v19261_v58 = vadd.f32 %v10839_v38, %v10647_v4  ;;  %v21643_v38 = vld [vmem:[#allocation90_spill] sm:$0xff] }
 0x3f0   : > { %v10650_v15 = vpop.f32.mrf.mxu1  ;;  %v10851_v56 = vpop.f32.mrf.mxu0  ;;  %v21645_v3 = vld [vmem:[#allocation74_spill] sm:$0xff] }
 0x3f1   : > { %v10651_v21 = vadd.f32 %v10650_v15, %v18873_v50  ;;  %v19264_v6 = vadd.f32 %v10841_v47, %v10649_v11  ;;  %v21644_v47 = vld [vmem:[#allocation76_spill] sm:$0xff] }
 0x3f2   : > { %v10652_v19 = vpop.f32.mrf.mxu1  ;;  %v10853_v29 = vpop.f32.mrf.mxu0 }
 0x3f3   : > { %v10653_v59 = vadd.f32 %v10652_v19, %v21641_v5  ;;  %v19267_v54 = vadd.f32 %v10843_v33, %v10651_v21 }
 0x3f4   : > { %v10656_v22 = vpop.f32.mrf.mxu1  ;;  %11121 = vmatmul.mubr.bf16.gmra.mxu1 %v21642_v24  ;;  %v10855_v45 = vpop.f32.mrf.mxu0 }
 0x3f5   : > { %v10657_v57 = vadd.f32 %v10656_v22, %v18883_v41  ;;  %11130 = vmatprep.mubr.bf16.mxu1 %v21643_v38  ;;  %v19272_v26 = vadd.f32 %v10845_v63, %v10653_v59  ;;  %v21646_v63 = vld [vmem:[#allocation81_spill] sm:$0xff] }
 0x3f6   : > { %v10658_v32 = vpop.f32.mrf.mxu1  ;;  %v10859_v50 = vpop.f32.mrf.mxu0  ;;  %11324 = vmatmul.mubr.bf16.gmra.mxu0 %v21544_v16  ;;  %v21647_v16 = vld [vmem:[#allocation50_spill] sm:$0xff] }
 0x3f7   : > { %v10659_v25 = vadd.f32 %v10658_v32, %v21644_v47  ;;  %11333 = vmatprep.mubr.bf16.mxu0 %v21545_v1  ;;  %v19277_v33 = vadd.f32 %v10849_v8, %v10657_v57  ;;  %v21648_v8 = vld [vmem:[#allocation91_spill] sm:$0xff] }
 0x3f8   : > { %v10660_v4 = vpop.f32.mrf.mxu1  ;;  %v10861_v30 = vpop.f32.mrf.mxu0 }
 0x3f9   : > { %v10661_v11 = vadd.f32 %v10660_v4, %v21645_v3  ;;  %v19280_v15 = vadd.f32 %v10851_v56, %v10659_v25  ;;  %v21649_v25 = vld [vmem:[#allocation47_spill] sm:$0xff] }
 0x3fa   : > { %v10662_v41 = vpop.f32.mrf.mxu1  ;;  %v10863_v21 = vpop.f32.mrf.mxu0 }
 0x3fb   : > { %v10663_v19 = vadd.f32 %v10662_v41, %v21646_v63  ;;  %v19283_v5 = vadd.f32 %v10853_v29, %v10661_v11 }
 0x3fc   : > { %v10666_v59 = vpop.f32.mrf.mxu1  ;;  %11131 = vmatmul.mubr.bf16.gmra.mxu1 %v21647_v16  ;;  %v10865_v22 = vpop.f32.mrf.mxu0 }
 0x3fd   : > { %v10667_v1 = vadd.f32 %v10666_v59, %v18899_v52  ;;  %11140 = vmatprep.mubr.bf16.mxu1 %v21648_v8  ;;  %v19288_v24 = vadd.f32 %v10855_v45, %v10663_v19  ;;  %v21650_v45 = vld [vmem:[#allocation82_spill] sm:$0xff]  ;;  %v21652_v59 = vld [vmem:[#allocation43_spill] sm:$0xff] }
 0x3fe   : > { %v10668_v57 = vpop.f32.mrf.mxu1  ;;  %v10869_v38 = vpop.f32.mrf.mxu0  ;;  %11334 = vmatmul.mubr.bf16.gmra.mxu0 %v21550_v23  ;;  %v21651_v23 = vld [vmem:[#allocation93_spill] sm:$0xff] }
 0x3ff   : > { %v10669_v56 = vadd.f32 %v10668_v57, %v18902_v12  ;;  %11343 = vmatprep.mubr.bf16.mxu0 %v21552_v44  ;;  %v19293_v29 = vadd.f32 %v10859_v50, %v10667_v1  ;;  %v21653_v50 = vld [vmem:[#allocation56_spill] sm:$0xff] }
 0x400   : > { %v10670_v32 = vpop.f32.mrf.mxu1  ;;  %v10871_v47 = vpop.f32.mrf.mxu0 }
 0x401   : > { %v10671_v4 = vadd.f32 %v10670_v32, %v21649_v25  ;;  %v19296_v3 = vadd.f32 %v10861_v30, %v10669_v56 }
 0x402   : > { %v10672_v52 = vpop.f32.mrf.mxu1  ;;  %v10873_v11 = vpop.f32.mrf.mxu0 }
 0x403   : > { %v10673_v41 = vadd.f32 %v10672_v52, %v21650_v45  ;;  %v19299_v63 = vadd.f32 %v10863_v21, %v10671_v4 }
 0x404   : > { %v10676_v19 = vpop.f32.mrf.mxu1  ;;  %11141 = vmatmul.mubr.bf16.gmra.mxu1 %v21651_v23  ;;  %v10875_v12 = vpop.f32.mrf.mxu0 }
 0x405   : > { %v10677_v44 = vadd.f32 %v10676_v19, %v21652_v59  ;;  %11150 = vmatprep.mubr.bf16.mxu1 %v21653_v50  ;;  %v19304_v16 = vadd.f32 %v10865_v22, %v10673_v41  ;;  %v21655_v22 = vld [vmem:[#allocation123_spill] sm:$0xff] }
 0x406   : > { %v10678_v1 = vpop.f32.mrf.mxu1  ;;  %v10879_v8 = vpop.f32.mrf.mxu0  ;;  %11344 = vmatmul.mubr.bf16.gmra.mxu0 %v21555_v49  ;;  %v21656_v49 = vld [vmem:[#allocation132_spill] sm:$0xff] }
 0x407   : > { %v10679_v30 = vadd.f32 %v10678_v1, %v18918_v20  ;;  %11353 = vmatprep.mubr.bf16.mxu0 %v21556_v7  ;;  %v19309_v21 = vadd.f32 %v10869_v38, %v10677_v44  ;;  %v21657_v38 = vld [vmem:[#allocation147_spill] sm:$0xff]  ;;  %v21658_v44 = vld [vmem:[#allocation64_spill] sm:$0xff] }
 0x408   : > { %v10680_v57 = vpop.f32.mrf.mxu1  ;;  %v10881_v56 = vpop.f32.mrf.mxu0 }
 0x409   : > { %v19311_v32 = vadd.f32 %v10871_v47, %v10679_v30  ;;  %v10681_v25 = vadd.f32 %v10680_v57, %v18921_v61 }
 0x40a   : > { %v10682_v4 = vpop.f32.mrf.mxu1  ;;  %v10883_v52 = vpop.f32.mrf.mxu0 }
 0x40b   : > { %21654 = vst [vmem:[#allocation96_spill] sm:$0xff] %v19311_v32  ;;  %v10683_v45 = vadd.f32 %v10682_v4, %v21655_v22  ;;  %v19315_v41 = vadd.f32 %v10873_v11, %v10681_v25 }
 0x40c   : > { %v10686_v19 = vpop.f32.mrf.mxu1  ;;  %11151 = vmatmul.mubr.bf16.gmra.mxu1 %v21656_v49  ;;  %v10885_v20 = vpop.f32.mrf.mxu0 }
 0x40d   : > { %v10687_v7 = vadd.f32 %v10686_v19, %v18931_v18  ;;  %11160 = vmatprep.mubr.bf16.mxu1 %v21657_v38  ;;  %v19320_v23 = vadd.f32 %v10875_v12, %v10683_v45  ;;  %v21659_v12 = vld [vmem:[#allocation54_spill] sm:$0xff] }
 0x40e   : > { %v10688_v47 = vpop.f32.mrf.mxu1  ;;  %v10889_v59 = vpop.f32.mrf.mxu0  ;;  %11354 = vmatmul.mubr.bf16.gmra.mxu0 %v21561_v2  ;;  %v21660_v2 = vld [vmem:[#allocation94_spill] sm:$0xff] }
 0x40f   : > { %v10689_v61 = vadd.f32 %v10688_v47, %v18934_v31  ;;  %11363 = vmatprep.mubr.bf16.mxu0 %v21658_v44  ;;  %v19325_v11 = vadd.f32 %v10879_v8, %v10687_v7  ;;  %v21661_v8 = vld [vmem:[#allocation63_spill] sm:$0xff]  ;;  %v21663_v47 = vmov 0  }
 0x410   : > { %v10690_v50 = vpop.f32.mrf.mxu1  ;;  %v10891_v1 = vpop.f32.mrf.mxu0 }
 0x411   : > { %v10691_v30 = vadd.f32 %v10690_v50, %v18937_v27  ;;  %v19328_v57 = vadd.f32 %v10881_v56, %v10689_v61  ;;  %v21662_v56 = vld [vmem:[#allocation65_spill] sm:$0xff]  ;;  %v21665_v50 = vld [vmem:[#allocation59_spill] sm:$0xff] }
 0x412   : > { %v10692_v18 = vpop.f32.mrf.mxu1  ;;  %v10893_v25 = vpop.f32.mrf.mxu0 }
 0x413   : > { %v10693_v4 = vadd.f32 %v10692_v18, %v21659_v12  ;;  %v19331_v22 = vadd.f32 %v10883_v52, %v10691_v30 }
 0x414   : > { %v10696_v45 = vpop.f32.mrf.mxu1  ;;  %11161 = vmatmul.mubr.bf16.gmra.mxu1 %v21660_v2  ;;  %v10895_v31 = vpop.f32.mrf.mxu0  ;;  %v21669_v2 = vld [vmem:[#allocation122_spill] sm:$0xff] }
 0x415   : > { %v10697_v19 = vadd.f32 %v10696_v45, %v18947_v35  ;;  %11170 = vmatprep.mubr.bf16.mxu1 %v21661_v8  ;;  %v19336_v49 = vadd.f32 %v10885_v20, %v10693_v4  ;;  %v21667_v20 = vld [vmem:[#allocation12_spill] sm:$0xff]  ;;  %v21668_v4 = vld [vmem:[#allocation13_spill] sm:$0xff] }
 0x416   : > { %v10698_v7 = vpop.f32.mrf.mxu1  ;;  %v10899_v27 = vpop.f32.mrf.mxu0  ;;  %11364 = vmatmul.mubr.bf16.gmra.mxu0 %v21662_v56  ;;  %v789_v45 = vpack.c.bf16 %v21668_v4, %v21667_v20 }
 0x417   : > { %v10699_v38 = vadd.f32 %v10698_v7, %v18950_v9  ;;  %11847 = vmatprep.mubr.bf16.mxu0 %v21663_v47  ;;  %v19341_v52 = vadd.f32 %v10889_v59, %v10697_v19  ;;  %v21670_v19 = vld [vmem:[#allocation70_spill] sm:$0xff] }
 0x418   : > { %v10700_v61 = vpop.f32.mrf.mxu1  ;;  %v10901_v44 = vpop.f32.mrf.mxu0 }
 0x419   : > { %21664 = vst [vmem:[#allocation100_spill] sm:$0xff] %v19341_v52  ;;  %v10701_v30 = vadd.f32 %v10700_v61, %v21665_v50  ;;  %v19344_v18 = vadd.f32 %v10891_v1, %v10699_v38  ;;  %v21671_v52 = vld [vmem:[#allocation136_spill] sm:$0xff] }
 0x41a   : > { %v10702_v35 = vpop.f32.mrf.mxu1  ;;  %v10903_v12 = vpop.f32.mrf.mxu0  ;;  %v21672_v50 = vld [vmem:[#allocation44_spill] sm:$0xff] }
 0x41b   : > { %21666 = vst [vmem:[#allocation152_spill] sm:$0xff] %v19344_v18  ;;  %v10703_v32 = vadd.f32 %v10702_v35, %v21669_v2  ;;  %v19349_v56 = vadd.f32 %v10893_v25, %v10701_v30 }
 0x41c   : > { %v10706_v9 = vpop.f32.mrf.mxu1  ;;  %11171 = vmatmul.mubr.bf16.gmra.mxu1 %v21661_v8  ;;  %v10905_v59 = vpop.f32.mrf.mxu0 }
 0x41d   : > { %v10707_v7 = vadd.f32 %v10706_v9, %v21670_v19  ;;  %11406 = vmatprep.mubr.bf16.mxu1 %v21671_v52  ;;  %v19354_v61 = vadd.f32 %v10895_v31, %v10703_v32  ;;  %v21674_v52 = vld [vmem:[#allocation16_spill] sm:$0xff]  ;;  %v21675_v32 = vld [vmem:[#allocation17_spill] sm:$0xff] }
 0x41e   : > { %v10708_v1 = vpop.f32.mrf.mxu1  ;;  %v10909_v38 = vpop.f32.mrf.mxu0  ;;  %11848 = vmatmul.mubr.bf16.vlgmr.msra.gmra.mxu0 %v789_v45  ;;  %v790_v31 = vpack.c.bf16 %v21675_v32, %v21674_v52 }
 0x41f   : > { %v10709_v18 = vadd.f32 %v10708_v1, %v21672_v50  ;;  %11857 = vmatprep.mubr.bf16.mxu0 %v21663_v47  ;;  %v19358_v35 = vadd.f32 %v10899_v27, %v10707_v7  ;;  %v21676_v1 = vld [vmem:[#allocation134_spill] sm:$0xff]  ;;  %v21677_v50 = vld [vmem:[#allocation89_spill] sm:$0xff] }
 0x420   : > { %v10710_v25 = vpop.f32.mrf.mxu1  ;;  %v10911_v30 = vpop.f32.mrf.mxu0 }
 0x421   : > { %v10711_v8 = vadd.f32 %v10710_v25, %v18990_v10  ;;  %v19361_v20 = vadd.f32 %v10901_v44, %v10709_v18  ;;  %v21678_v25 = vld [vmem:[#allocation86_spill] sm:$0xff] }
 0x422   : > { %v10712_v4 = vpop.f32.mrf.mxu1  ;;  %v10913_v2 = vpop.f32.mrf.mxu0 }
 0x423   : > { %21673 = vst [vmem:[#allocation108_spill] sm:$0xff] %v19361_v20  ;;  %v10713_v9 = vadd.f32 %v10712_v4, %v19001_v51  ;;  %v19366_v45 = vadd.f32 %v10903_v12, %v10711_v8 }
 0x424   : > { %v10716_v19 = vpop.f32.mrf.mxu1  ;;  %11407 = vmatmul.mubr.bf16.vlgmr.msra.gmra.mxu1 %v21676_v1  ;;  %v10915_v27 = vpop.f32.mrf.mxu0 }
 0x425   : > { %v10717_v7 = vadd.f32 %v10716_v19, %v19012_v42  ;;  %11416 = vmatprep.mubr.bf16.mxu1 %v21677_v50  ;;  %v19371_v10 = vadd.f32 %v10905_v59, %v10713_v9  ;;  %v21681_v19 = vld [vmem:[#allocation20_spill] sm:$0xff]  ;;  %v21682_v59 = vld [vmem:[#allocation21_spill] sm:$0xff] }
 0x426   : > { %v10718_v44 = vpop.f32.mrf.mxu1  ;;  %v10919_v18 = vpop.f32.mrf.mxu0  ;;  %11858 = vmatmul.mubr.bf16.gmra.mxu0 %v790_v31  ;;  %v791_v9 = vpack.c.bf16 %v21682_v59, %v21681_v19 }
 0x427   : > { %v10719_v20 = vadd.f32 %v10718_v44, %v21678_v25  ;;  %11867 = vmatprep.mubr.bf16.mxu0 %v21663_v47  ;;  %v19375_v51 = vadd.f32 %v10909_v38, %v10717_v7  ;;  %v21683_v44 = vld [vmem:[#allocation95_spill] sm:$0xff] }
 0x428   : > { %v10720_v12 = vpop.f32.mrf.mxu1  ;;  %v10921_v8 = vpop.f32.mrf.mxu0  ;;  %v21684_v7 = vld [vmem:[#allocation51_spill] sm:$0xff] }
 0x429   : > { %21679 = vst [vmem:[#allocation111_spill] sm:$0xff] %v19375_v51  ;;  %v10721_v4 = vadd.f32 %v10720_v12, %v19030_v39  ;;  %v19378_v52 = vadd.f32 %v10911_v30, %v10719_v20  ;;  %v21685_v51 = vld [vmem:[#allocation143_spill] sm:$0xff]  ;;  %v21686_v12 = vld [vmem:[#allocation144_spill] sm:$0xff] }
 0x42a   : > { %v10722_v42 = vpop.f32.mrf.mxu1  ;;  %v10923_v32 = vpop.f32.mrf.mxu0 }
 0x42b   : > { %21680 = vst [vmem:[#allocation101_spill] sm:$0xff] %v19378_v52  ;;  %v10723_v1 = vadd.f32 %v10722_v42, %v19041_v34  ;;  %v19383_v31 = vadd.f32 %v10913_v2, %v10721_v4 }
 0x42c   : > { %v10726_v50 = vpop.f32.mrf.mxu1  ;;  %11417 = vmatmul.mubr.bf16.gmra.mxu1 %v21683_v44  ;;  %v10925_v38 = vpop.f32.mrf.mxu0 }
 0x42d   : > { %v10727_v25 = vadd.f32 %v10726_v50, %v21684_v7  ;;  %11426 = vmatprep.mubr.bf16.mxu1 %v21685_v51  ;;  %v19388_v39 = vadd.f32 %v10915_v27, %v10723_v1  ;;  %v21689_v51 = vld [vmem:[#allocation24_spill] sm:$0xff]  ;;  %v21690_v27 = vld [vmem:[#allocation25_spill] sm:$0xff] }
 0x42e   : > { %v10728_v30 = vpop.f32.mrf.mxu1  ;;  %v10929_v20 = vpop.f32.mrf.mxu0  ;;  %11868 = vmatmul.mubr.bf16.gmra.mxu0 %v791_v9  ;;  %v792_v1 = vpack.c.bf16 %v21690_v27, %v21689_v51 }
 0x42f   : > { %v10729_v52 = vadd.f32 %v10728_v30, %v21686_v12  ;;  %11877 = vmatprep.mubr.bf16.mxu0 %v21663_v47  ;;  %v19392_v34 = vadd.f32 %v10919_v18, %v10727_v25  ;;  %v21691_v30 = vld [vmem:[#allocation135_spill] sm:$0xff]  ;;  %v21692_v25 = vld [vmem:[#allocation145_spill] sm:$0xff] }
 0x430   : > { %v10730_v2 = vpop.f32.mrf.mxu1  ;;  %v10931_v4 = vpop.f32.mrf.mxu0 }
 0x431   : > { %21687 = vst [vmem:[#allocation105_spill] sm:$0xff] %v19392_v34  ;;  %v10731_v42 = vadd.f32 %v10730_v2, %v19070_v0  ;;  %v19395_v19 = vadd.f32 %v10921_v8, %v10729_v52  ;;  %v21693_v34 = vld [vmem:[#allocation42_spill] sm:$0xff]  ;;  %v21694_v2 = vld [vmem:[#allocation60_spill] sm:$0xff] }
 0x432   : > { %v10732_v59 = vpop.f32.mrf.mxu1  ;;  %v10933_v50 = vpop.f32.mrf.mxu0 }
 0x433   : > { %21688 = vst [vmem:[#allocation153_spill] sm:$0xff] %v19395_v19  ;;  %v10733_v44 = vadd.f32 %v10732_v59, %v19081_v37  ;;  %v19400_v9 = vadd.f32 %v10923_v32, %v10731_v42 }
 0x434   : > { %v10736_v7 = vpop.f32.mrf.mxu1  ;;  %11427 = vmatmul.mubr.bf16.gmra.mxu1 %v21691_v30  ;;  %v10935_v18 = vpop.f32.mrf.mxu0 }
 0x435   : > { %v10737_v12 = vadd.f32 %v10736_v7, %v21692_v25  ;;  %11436 = vmatprep.mubr.bf16.mxu1 %v21693_v34  ;;  %v19405_v0 = vadd.f32 %v10925_v38, %v10733_v44  ;;  %v21697_v34 = vld [vmem:[#allocation28_spill] sm:$0xff]  ;;  %v21698_v38 = vld [vmem:[#allocation29_spill] sm:$0xff] }
 0x436   : > { %v10738_v8 = vpop.f32.mrf.mxu1  ;;  %v10939_v52 = vpop.f32.mrf.mxu0  ;;  %11878 = vmatmul.mubr.bf16.gmra.mxu0 %v792_v1  ;;  %v793_v44 = vpack.c.bf16 %v21698_v38, %v21697_v34 }
 0x437   : > { %v10739_v19 = vadd.f32 %v10738_v8, %v21694_v2  ;;  %11887 = vmatprep.mubr.bf16.mxu0 %v21663_v47  ;;  %v19409_v37 = vadd.f32 %v10929_v20, %v10737_v12  ;;  %v21700_v8 = vld [vmem:[#allocation99_spill] sm:$0xff]  ;;  %v21701_v12 = vld [vmem:[#allocation146_spill] sm:$0xff] }
 0x438   : > { %v10740_v32 = vpop.f32.mrf.mxu1  ;;  %v10941_v42 = vpop.f32.mrf.mxu0 }
 0x439   : > { %21695 = vst [vmem:[#allocation113_spill] sm:$0xff] %v19409_v37  ;;  %v10741_v59 = vadd.f32 %v10740_v32, %v19104_v14  ;;  %v19412_v51 = vadd.f32 %v10931_v4, %v10739_v19  ;;  %v21702_v37 = vld [vmem:[#allocation112_spill] sm:$0xff]  ;;  %v21704_v32 = vld [vmem:[#allocation55_spill] sm:$0xff] }
 0x43a   : > { %v10742_v27 = vpop.f32.mrf.mxu1  ;;  %v10943_v7 = vpop.f32.mrf.mxu0 }
 0x43b   : > { %21696 = vst [vmem:[#allocation154_spill] sm:$0xff] %v19412_v51  ;;  %v10743_v30 = vadd.f32 %v10742_v27, %v19112_v17  ;;  %v19417_v1 = vadd.f32 %v10933_v50, %v10741_v59  ;;  %v21706_v27 = vld [vmem:[#allocation131_spill] sm:$0xff] }
 0x43c   : > { %v10746_v25 = vpop.f32.mrf.mxu1  ;;  %11437 = vmatmul.mubr.bf16.gmra.mxu1 %v21700_v8  ;;  %v10945_v20 = vpop.f32.mrf.mxu0 }
 0x43d   : > { %21699 = vst [vmem:[#allocation117_spill] sm:$0xff] %v19417_v1  ;;  %v10747_v2 = vadd.f32 %v10746_v25, %v21701_v12  ;;  %11446 = vmatprep.mubr.bf16.mxu1 %v21702_v37  ;;  %v19422_v14 = vadd.f32 %v10935_v18, %v10743_v30  ;;  %v21708_v37 = vld [vmem:[#allocation32_spill] sm:$0xff]  ;;  %v21709_v18 = vld [vmem:[#allocation33_spill] sm:$0xff]  ;;  %v21710_v12 = vld [vmem:[#allocation138_spill] sm:$0xff] }
 0x43e   : > { %v10748_v4 = vpop.f32.mrf.mxu1  ;;  %v10949_v19 = vpop.f32.mrf.mxu0  ;;  %11888 = vmatmul.mubr.bf16.gmra.mxu0 %v793_v44  ;;  %v794_v30 = vpack.c.bf16 %v21709_v18, %v21708_v37  ;;  %v21713_v1 = vld [vmem:[#allocation115_spill] sm:$0xff] }
 0x43f   : > { %21703 = vst [vmem:[#allocation106_spill] sm:$0xff] %v19422_v14  ;;  %v10749_v51 = vadd.f32 %v10748_v4, %v21704_v32  ;;  %11897 = vmatprep.mubr.bf16.mxu0 %v21663_v47  ;;  %v19426_v17 = vadd.f32 %v10939_v52, %v10747_v2  ;;  %v21711_v32 = vld [vmem:[#allocation98_spill] sm:$0xff]  ;;  %v21712_v2 = vld [vmem:[#allocation148_spill] sm:$0xff] }
 0x440   : > { %v10750_v50 = vpop.f32.mrf.mxu1  ;;  %v10951_v59 = vpop.f32.mrf.mxu0 }
 0x441   : > { %21705 = vst [vmem:[#allocation109_spill] sm:$0xff] %v19426_v17  ;;  %v10751_v34 = vadd.f32 %v10750_v50, %v21706_v27  ;;  %v19429_v38 = vadd.f32 %v10941_v42, %v10749_v51  ;;  %v21715_v27 = vld [vmem:[#allocation141_spill] sm:$0xff] }
 0x442   : > { %v10752_v25 = vpop.f32.mrf.mxu1  ;;  %v10953_v8 = vpop.f32.mrf.mxu0 }
 0x443   : > { %21707 = vst [vmem:[#allocation155_spill] sm:$0xff] %v19429_v38  ;;  %v10753_v14 = vadd.f32 %v10752_v25, %v21710_v12  ;;  %v19434_v44 = vadd.f32 %v10943_v7, %v10751_v34 }
 0x444   : > { %v10756_v4 = vpop.f32.mrf.mxu1  ;;  %11447 = vmatmul.mubr.bf16.gmra.mxu1 %v21711_v32  ;;  %v10955_v52 = vpop.f32.mrf.mxu0  ;;  %v21720_v32 = vld [vmem:[#allocation149_spill] sm:$0xff] }
 0x445   : > { %v10757_v17 = vadd.f32 %v10756_v4, %v21712_v2  ;;  %11456 = vmatprep.mubr.bf16.mxu1 %v21713_v1  ;;  %v19439_v50 = vadd.f32 %v10945_v20, %v10753_v14  ;;  %v21718_v1 = vld [vmem:[#allocation36_spill] sm:$0xff]  ;;  %v21719_v20 = vld [vmem:[#allocation37_spill] sm:$0xff] }
 0x446   : > { %v10758_v42 = vpop.f32.mrf.mxu1  ;;  %v10959_v51 = vpop.f32.mrf.mxu0  ;;  %11898 = vmatmul.mubr.bf16.gmra.mxu0 %v794_v30  ;;  %v795_v14 = vpack.c.bf16 %v21719_v20, %v21718_v1 }
 0x447   : > { %21714 = vst [vmem:[#allocation116_spill] sm:$0xff] %v19439_v50  ;;  %v10759_v38 = vadd.f32 %v10758_v42, %v21715_v27  ;;  %11907 = vmatprep.mubr.bf16.mxu0 %v21663_v47  ;;  %v19443_v25 = vadd.f32 %v10949_v19, %v10757_v17  ;;  %v21721_v27 = vld [vmem:[#allocation102_spill] sm:$0xff]  ;;  %v21722_v17 = vld [vmem:[#allocation103_spill] sm:$0xff] }
 0x448   : > { %v10760_v7 = vpop.f32.mrf.mxu1  ;;  %v10961_v34 = vpop.f32.mrf.mxu0  ;;  %v21723_v50 = vld [vmem:[#allocation114_spill] sm:$0xff] }
 0x449   : > { %21716 = vst [vmem:[#allocation156_spill] sm:$0xff] %v19443_v25  ;;  %v10761_v37 = vadd.f32 %v10760_v7, %v19160_v55  ;;  %v19446_v18 = vadd.f32 %v10951_v59, %v10759_v38  ;;  %v21724_v7 = vld [vmem:[#allocation97_spill] sm:$0xff] }
 0x44a   : > { %v10762_v12 = vpop.f32.mrf.mxu1  ;;  %v10963_v4 = vpop.f32.mrf.mxu0 }
 0x44b   : > { %21717 = vst [vmem:[#allocation121_spill] sm:$0xff] %v19446_v18  ;;  %v10763_v2 = vadd.f32 %v10762_v12, %v21720_v32  ;;  %v19451_v30 = vadd.f32 %v10953_v8, %v10761_v37 }
 0x44c   : > { %v10766_v42 = vpop.f32.mrf.mxu1  ;;  %11457 = vmatmul.mubr.bf16.gmra.mxu1 %v21721_v27  ;;  %v10965_v19 = vpop.f32.mrf.mxu0 }
 0x44d   : > { %v10767_v25 = vadd.f32 %v10766_v42, %v21722_v17  ;;  %11466 = vmatprep.mubr.bf16.mxu1 %v21723_v50  ;;  %v19456_v55 = vadd.f32 %v10955_v52, %v10763_v2  ;;  %v21727_v50 = vld [vmem:[#allocation10_spill] sm:$0xff]  ;;  %v21728_v52 = vld [vmem:[#allocation11_spill] sm:$0xff] }
 0x44e   : > { %v10768_v59 = vpop.f32.mrf.mxu1  ;;  %v10969_v38 = vpop.f32.mrf.mxu0  ;;  %11908 = vmatmul.mubr.bf16.gmra.mxu0 %v795_v14  ;;  %v796_v2 = vpack.c.bf16 %v21728_v52, %v21727_v50 }
 0x44f   : > { %v10769_v18 = vadd.f32 %v10768_v59, %v21724_v7  ;;  %11917 = vmatprep.mubr.bf16.mxu0 %v21663_v47  ;;  %v19460_v12 = vadd.f32 %v10959_v51, %v10767_v25  ;;  %v21729_v59 = vld [vmem:[#allocation48_spill] sm:$0xff]  ;;  %v21730_v25 = vld [vmem:[#allocation150_spill] sm:$0xff] }
 0x450   : > { %v10770_v8 = vpop.f32.mrf.mxu1  ;;  %v10971_v37 = vpop.f32.mrf.mxu0 }
 0x451   : > { %21725 = vst [vmem:[#allocation110_spill] sm:$0xff] %v19460_v12  ;;  %v10771_v1 = vadd.f32 %v10770_v8, %v19188_v43  ;;  %v19463_v20 = vadd.f32 %v10961_v34, %v10769_v18  ;;  %v21731_v12 = vld [vmem:[#allocation119_spill] sm:$0xff] }
 0x452   : > { %v10772_v32 = vpop.f32.mrf.mxu1  ;;  %v10973_v42 = vpop.f32.mrf.mxu0  ;;  %v21733_v8 = vld [vmem:[#allocation151_spill] sm:$0xff] }
 0x453   : > { %21726 = vst [vmem:[#allocation61_spill] sm:$0xff] %v19463_v20  ;;  %v10773_v27 = vadd.f32 %v10772_v32, %v19196_v62  ;;  %v19468_v14 = vadd.f32 %v10963_v4, %v10771_v1  ;;  %v21735_v32 = vld [vmem:[#allocation104_spill] sm:$0xff] }
 0x454   : > { %v10776_v17 = vpop.f32.mrf.mxu1  ;;  %11467 = vmatmul.mubr.bf16.gmra.mxu1 %v21729_v59  ;;  %v10975_v51 = vpop.f32.mrf.mxu0 }
 0x455   : > { %v10777_v7 = vadd.f32 %v10776_v17, %v21730_v25  ;;  %11476 = vmatprep.mubr.bf16.mxu1 %v21731_v12  ;;  %v19473_v43 = vadd.f32 %v10965_v19, %v10773_v27  ;;  %v21736_v12 = vld [vmem:[#allocation14_spill] sm:$0xff]  ;;  %v21737_v19 = vld [vmem:[#allocation15_spill] sm:$0xff] }
 0x456   : > { %v10778_v34 = vpop.f32.mrf.mxu1  ;;  %v10979_v18 = vpop.f32.mrf.mxu0  ;;  %11918 = vmatmul.mubr.bf16.gmra.mxu0 %v796_v2  ;;  %v797_v27 = vpack.c.bf16 %v21737_v19, %v21736_v12  ;;  %v21738_v25 = vld [vmem:[#allocation107_spill] sm:$0xff] }
 0x457   : > { %21732 = vst [vmem:[#allocation157_spill] sm:$0xff] %v19473_v43  ;;  %v10779_v20 = vadd.f32 %v10778_v34, %v21733_v8  ;;  %11927 = vmatprep.mubr.bf16.mxu0 %v21663_v47  ;;  %v19477_v62 = vadd.f32 %v10969_v38, %v10777_v7  ;;  %v21739_v8 = vld [vmem:[#allocation72_spill] sm:$0xff] }
 0x458   : > { %v10780_v4 = vpop.f32.mrf.mxu1  ;;  %v10981_v1 = vpop.f32.mrf.mxu0 }
 0x459   : > { %21734 = vst [vmem:[#allocation120_spill] sm:$0xff] %v19477_v62  ;;  %v10781_v50 = vadd.f32 %v10780_v4, %v21735_v32  ;;  %v19480_v52 = vadd.f32 %v10971_v37, %v10779_v20  ;;  %v21740_v62 = vld [vmem:[#allocation73_spill] sm:$0xff] }
 0x45a   : > { %v10782_v17 = vpop.f32.mrf.mxu1  ;;  %v10983_v59 = vpop.f32.mrf.mxu0 }
 0x45b   : > { %v10783_v43 = vadd.f32 %v10782_v17, %v21738_v25  ;;  %v19485_v2 = vadd.f32 %v10973_v42, %v10781_v50 }
 0x45c   : > { %v10786_v34 = vpop.f32.mrf.mxu1  ;;  %11477 = vmatmul.mubr.bf16.gmra.mxu1 %v21739_v8  ;;  %v10985_v38 = vpop.f32.mrf.mxu0  ;;  %v21743_v8 = vld [vmem:[#allocation53_spill] sm:$0xff] }
 0x45d   : > { %v10787_v7 = vadd.f32 %v10786_v34, %v19229_v28  ;;  %11486 = vmatprep.mubr.bf16.mxu1 %v21740_v62  ;;  %v19490_v4 = vadd.f32 %v10975_v51, %v10783_v43  ;;  %v21741_v62 = vld [vmem:[#allocation18_spill] sm:$0xff]  ;;  %v21742_v51 = vld [vmem:[#allocation19_spill] sm:$0xff] }
 0x45e   : > { %v10788_v37 = vpop.f32.mrf.mxu1  ;;  %v11215_v20 = vpop.f32.mrf.mxu0  ;;  %11928 = vmatmul.mubr.bf16.gmra.mxu0 %v797_v27  ;;  %v798_v43 = vpack.c.bf16 %v21742_v51, %v21741_v62 }
 0x45f   : > { %v10789_v32 = vadd.f32 %v10788_v37, %v19232_v60  ;;  %11937 = vmatprep.mubr.bf16.mxu0 %v21663_v47  ;;  %v19494_v17 = vadd.f32 %v10979_v18, %v10787_v7  ;;  %v21744_v37 = vld [vmem:[#allocation80_spill] sm:$0xff] }
 0x460   : > { %v10790_v42 = vpop.f32.mrf.mxu1  ;;  %v11217_v50 = vpop.f32.mrf.mxu0 }
 0x461   : > { %v10791_v12 = vadd.f32 %v10790_v42, %v19235_v13  ;;  %v19497_v19 = vadd.f32 %v10981_v1, %v10789_v32 }
 0x462   : > { %v10792_v28 = vpop.f32.mrf.mxu1  ;;  %v11219_v25 = vpop.f32.mrf.mxu0 }
 0x463   : > { %v10793_v34 = vadd.f32 %v10792_v28, %v19240_v53  ;;  %v19502_v27 = vadd.f32 %v10983_v59, %v10791_v12 }
 0x464   : > { %v11022_v60 = vpop.f32.mrf.mxu1  ;;  %11487 = vmatmul.mubr.bf16.gmra.mxu1 %v21743_v8  ;;  %v11221_v18 = vpop.f32.mrf.mxu0 }
 0x465   : > { %v11023_v7 = vadd.f32 %v11022_v60, %v19245_v48  ;;  %11496 = vmatprep.mubr.bf16.mxu1 %v21744_v37  ;;  %v19507_v13 = vadd.f32 %v10985_v38, %v10793_v34  ;;  %v21745_v60 = vld [vmem:[#allocation22_spill] sm:$0xff]  ;;  %v21746_v38 = vld [vmem:[#allocation23_spill] sm:$0xff] }
 0x466   : > { %v11024_v1 = vpop.f32.mrf.mxu1  ;;  %v11225_v32 = vpop.f32.mrf.mxu0  ;;  %11938 = vmatmul.mubr.bf16.gmra.mxu0 %v798_v43  ;;  %v799_v34 = vpack.c.bf16 %v21746_v38, %v21745_v60  ;;  %v21747_v37 = vld [vmem:[#allocation46_spill] sm:$0xff] }
 0x467   : > { %v11025_v42 = vadd.f32 %v11024_v1, %v19248_v46  ;;  %11947 = vmatprep.mubr.bf16.mxu0 %v21663_v47  ;;  %v19511_v53 = vadd.f32 %v11215_v20, %v11023_v7  ;;  %v21748_v1 = vld [vmem:[#allocation49_spill] sm:$0xff] }
 0x468   : > { %v11026_v59 = vpop.f32.mrf.mxu1  ;;  %v11227_v12 = vpop.f32.mrf.mxu0 }
 0x469   : > { %v11027_v28 = vadd.f32 %v11026_v59, %v19251_v36  ;;  %v19514_v62 = vadd.f32 %v11217_v50, %v11025_v42 }
 0x46a   : > { %v11028_v48 = vpop.f32.mrf.mxu1  ;;  %v11229_v51 = vpop.f32.mrf.mxu0 }
 0x46b   : > { %v11029_v8 = vadd.f32 %v11028_v48, %v19256_v40  ;;  %v19519_v43 = vadd.f32 %v11219_v25, %v11027_v28 }
 0x46c   : > { %v11032_v46 = vpop.f32.mrf.mxu1  ;;  %11497 = vmatmul.mubr.bf16.gmra.mxu1 %v21747_v37  ;;  %v11231_v20 = vpop.f32.mrf.mxu0 }
 0x46d   : > { %v11033_v7 = vadd.f32 %v11032_v46, %v19261_v58  ;;  %11506 = vmatprep.mubr.bf16.mxu1 %v21748_v1  ;;  %v19524_v36 = vadd.f32 %v11221_v18, %v11029_v8  ;;  %v21749_v46 = vld [vmem:[#allocation26_spill] sm:$0xff]  ;;  %v21750_v18 = vld [vmem:[#allocation27_spill] sm:$0xff]  ;;  %v21751_v1 = vld [vmem:[#allocation85_spill] sm:$0xff] }
 0x46e   : > { %v11034_v50 = vpop.f32.mrf.mxu1  ;;  %v11235_v42 = vpop.f32.mrf.mxu0  ;;  %11948 = vmatmul.mubr.bf16.gmra.mxu0 %v799_v34  ;;  %v800_v8 = vpack.c.bf16 %v21750_v18, %v21749_v46 }
 0x46f   : > { %v11035_v59 = vadd.f32 %v11034_v50, %v19264_v6  ;;  %11957 = vmatprep.mubr.bf16.mxu0 %v21663_v47  ;;  %v19528_v40 = vadd.f32 %v11225_v32, %v11033_v7  ;;  %v21752_v50 = vld [vmem:[#allocation52_spill] sm:$0xff] }
 0x470   : > { %v11036_v25 = vpop.f32.mrf.mxu1  ;;  %v11237_v28 = vpop.f32.mrf.mxu0 }
 0x471   : > { %v11037_v48 = vadd.f32 %v11036_v25, %v19267_v54  ;;  %v19531_v60 = vadd.f32 %v11227_v12, %v11035_v59 }
 0x472   : > { %v11038_v58 = vpop.f32.mrf.mxu1  ;;  %v11239_v38 = vpop.f32.mrf.mxu0 }
 0x473   : > { %v11039_v37 = vadd.f32 %v11038_v58, %v19272_v26  ;;  %v19536_v34 = vadd.f32 %v11229_v51, %v11037_v48 }
 0x474   : > { %v11042_v6 = vpop.f32.mrf.mxu1  ;;  %11507 = vmatmul.mubr.bf16.gmra.mxu1 %v21751_v1  ;;  %v11241_v32 = vpop.f32.mrf.mxu0 }
 0x475   : > { %v11043_v7 = vadd.f32 %v11042_v6, %v19277_v33  ;;  %11516 = vmatprep.mubr.bf16.mxu1 %v21752_v50  ;;  %v19541_v54 = vadd.f32 %v11231_v20, %v11039_v37  ;;  %v21753_v6 = vld [vmem:[#allocation30_spill] sm:$0xff]  ;;  %v21754_v20 = vld [vmem:[#allocation31_spill] sm:$0xff] }
 0x476   : > { %v11044_v12 = vpop.f32.mrf.mxu1  ;;  %v11245_v59 = vpop.f32.mrf.mxu0  ;;  %11958 = vmatmul.mubr.bf16.gmra.mxu0 %v800_v8  ;;  %v801_v37 = vpack.c.bf16 %v21754_v20, %v21753_v6  ;;  %v21755_v50 = vld [vmem:[#allocation58_spill] sm:$0xff] }
 0x477   : > { %v11045_v25 = vadd.f32 %v11044_v12, %v19280_v15  ;;  %11967 = vmatprep.mubr.bf16.mxu0 %v21663_v47  ;;  %v19545_v26 = vadd.f32 %v11235_v42, %v11043_v7  ;;  %v21756_v12 = vld [vmem:[#allocation137_spill] sm:$0xff] }
 0x478   : > { %v11046_v51 = vpop.f32.mrf.mxu1  ;;  %v11247_v48 = vpop.f32.mrf.mxu0 }
 0x479   : > { %v11047_v58 = vadd.f32 %v11046_v51, %v19283_v5  ;;  %v19548_v46 = vadd.f32 %v11237_v28, %v11045_v25 }
 0x47a   : > { %v11048_v33 = vpop.f32.mrf.mxu1  ;;  %v11249_v18 = vpop.f32.mrf.mxu0 }
 0x47b   : > { %v11049_v1 = vadd.f32 %v11048_v33, %v19288_v24  ;;  %v19553_v8 = vadd.f32 %v11239_v38, %v11047_v58 }
 0x47c   : > { %v11052_v15 = vpop.f32.mrf.mxu1  ;;  %11517 = vmatmul.mubr.bf16.gmra.mxu1 %v21755_v50  ;;  %v11251_v42 = vpop.f32.mrf.mxu0 }
 0x47d   : > { %v11053_v7 = vadd.f32 %v11052_v15, %v19293_v29  ;;  %11526 = vmatprep.mubr.bf16.mxu1 %v21756_v12  ;;  %v19558_v5 = vadd.f32 %v11241_v32, %v11049_v1  ;;  %v21757_v32 = vld [vmem:[#allocation34_spill] sm:$0xff]  ;;  %v21758_v1 = vld [vmem:[#allocation35_spill] sm:$0xff] }
 0x47e   : > { %v11054_v28 = vpop.f32.mrf.mxu1  ;;  %v11255_v25 = vpop.f32.mrf.mxu0  ;;  %11968 = vmatmul.mubr.bf16.gmra.mxu0 %v801_v37  ;;  %v802_v15 = vpack.c.bf16 %v21758_v1, %v21757_v32  ;;  %v21759_v12 = vld [vmem:[#allocation87_spill] sm:$0xff]  ;;  %v21763_v1 = vld [vmem:[#allocation38_spill] sm:$0xff] }
 0x47f   : > { %v11055_v51 = vadd.f32 %v11054_v28, %v19296_v3  ;;  %11977 = vmatprep.mubr.bf16.mxu0 %v21663_v47  ;;  %v19562_v24 = vadd.f32 %v11245_v59, %v11053_v7  ;;  %v21760_v28 = vld [vmem:[#allocation88_spill] sm:$0xff] }
 0x480   : > { %v11056_v38 = vpop.f32.mrf.mxu1  ;;  %v19564_v58 = vpop.f32.mrf.mxu0 }
 0x481   : > { %v11057_v33 = vadd.f32 %v11056_v38, %v19299_v63  ;;  %v19567_v6 = vadd.f32 %v11247_v48, %v11055_v51 }
 0x482   : > { %v11058_v29 = vpop.f32.mrf.mxu1  ;;  %v11259_v20 = vpop.f32.mrf.mxu0 }
 0x483   : > { %v11059_v37 = vadd.f32 %v11058_v29, %v19304_v16  ;;  %v19572_v50 = vadd.f32 %v11249_v18, %v11057_v33 }
 0x484   : > { %v11062_v3 = vpop.f32.mrf.mxu1  ;;  %11527 = vmatmul.mubr.bf16.gmra.mxu1 %v21759_v12  ;;  %v11261_v59 = vpop.f32.mrf.mxu0 }
 0x485   : > { %v11063_v7 = vadd.f32 %v11062_v3, %v19309_v21  ;;  %11536 = vmatprep.mubr.bf16.mxu1 %v21760_v28  ;;  %v19577_v63 = vadd.f32 %v11251_v42, %v11059_v37  ;;  %v21764_v21 = vld [vmem:[#allocation39_spill] sm:$0xff]  ;;  %v12396_v42 = vld [vmem:[%s20816_s10 + $0xf8] sm:$0xff] }
 0x486   : > { %v19579_v48 = vpop.f32.mrf.mxu1  ;;  %v11265_v51 = vpop.f32.mrf.mxu0  ;;  %11978 = vmatmul.mubr.bf16.gmra.mxu0 %v802_v15  ;;  %v803_v3 = vpack.c.bf16 %v21764_v21, %v21763_v1  ;;  %v12380_v15 = vld [vmem:[%s20816_s10 + $0x78] sm:$0xff]  ;;  %14198 = vmatprep.subr.mxu0 %v12396_v42 }
 0x487   : > { %21761 = vst [vmem:[#allocation158_spill] sm:$0xff] %v19577_v63  ;;  %11987 = vmatprep.mubr.bf16.mxu0 %v21663_v47  ;;  %v19582_v38 = vadd.f32 %v11255_v25, %v11063_v7  ;;  %14199 = vmatpush3.msra.mxu0 %v12380_v15  ;;  %v21768_v15 = vld [vmem:[#allocation40_spill] sm:$0xff] }
 0x488   : > { %v11066_v16 = vpop.f32.mrf.mxu1  ;;  %v11267_v18 = vpop.f32.mrf.mxu0 }
 0x489   : > { %21762 = vst [vmem:[#allocation124_spill] sm:$0xff] %v19582_v38  ;;  %v11067_v33 = vadd.f32 %v11066_v16, %v19315_v41  ;;  %v21765_v41 = vld [vmem:[#allocation139_spill] sm:$0xff]  ;;  %v21766_v16 = vld [vmem:[#allocation140_spill] sm:$0xff] }
 0x48a   : > { %v11068_v29 = vpop.f32.mrf.mxu1  ;;  %v11269_v32 = vpop.f32.mrf.mxu0 }
 0x48b   : > { %v11069_v25 = vadd.f32 %v11068_v29, %v19320_v23  ;;  %v19594_v37 = vadd.f32 %v11259_v20, %v11067_v33 }
 0x48c   : > { %v11072_v12 = vpop.f32.mrf.mxu1  ;;  %11537 = vmatmul.mubr.bf16.gmra.mxu1 %v21765_v41  ;;  %v11271_v7 = vpop.f32.mrf.mxu0  ;;  %v21770_v41 = vld [vmem:[#allocation142_spill] sm:$0xff] }
 0x48d   : > { %v11073_v28 = vadd.f32 %v11072_v12, %v19325_v11  ;;  %11546 = vmatprep.mubr.bf16.mxu1 %v21766_v16  ;;  %v19599_v1 = vadd.f32 %v11261_v59, %v11069_v25  ;;  %v12395_v11 = vld [vmem:[%s20816_s10 + $0xf0] sm:$0xff] }
 0x48e   : > { %v11074_v21 = vpop.f32.mrf.mxu1  ;;  %v11275_v38 = vpop.f32.mrf.mxu0  ;;  %11988 = vmatmul.mubr.bf16.gmra.mxu0 %v803_v3  ;;  %v12379_v59 = vld [vmem:[%s20816_s10 + $0x70] sm:$0xff]  ;;  %14200 = vmatprep.subr.mxu0 %v12395_v11 }
 0x48f   : > { %v11075_v63 = vadd.f32 %v11074_v21, %v19328_v57  ;;  %11997 = vmatprep.mubr.bf16.mxu0 %v21663_v47  ;;  %v19603_v23 = vadd.f32 %v11265_v51, %v11073_v28  ;;  %v21769_v47 = vld [vmem:[#allocation41_spill] sm:$0xff]  ;;  %14201 = vmatpush3.msra.mxu0 %v12379_v59  ;;  %v21771_v16 = vld [vmem:[#allocation100_spill] sm:$0xff]  ;;  %v12394_v59 = vld [vmem:[%s20816_s10 + $0xe8] sm:$0xff] }
 0x490   : > { %v11076_v20 = vpop.f32.mrf.mxu1  ;;  %v11277_v33 = vpop.f32.mrf.mxu0  ;;  %v1271_v51 = vpack.c.bf16 %v21769_v47, %v21768_v15  ;;  %v21773_v15 = vld [vmem:[#allocation152_spill] sm:$0xff]  ;;  %14202 = vmatprep.subr.mxu0 %v12394_v59 }
 0x491   : > { %v11077_v29 = vadd.f32 %v11076_v20, %v19331_v22  ;;  %v19612_v42 = vadd.f32 %v11267_v18, %v11075_v63  ;;  %v21772_v20 = vld [vmem:[#allocation133_spill] sm:$0xff] }
 0x492   : > { %v11078_v3 = vpop.f32.mrf.mxu1  ;;  %v11279_v57 = vpop.f32.mrf.mxu0 }
 0x493   : > { %21767 = vst [vmem:[#allocation68_spill] sm:$0xff] %v19612_v42  ;;  %v11079_v25 = vadd.f32 %v11078_v3, %v19336_v49  ;;  %v19617_v22 = vadd.f32 %v11269_v32, %v11077_v29 }
 0x494   : > { %v11082_v12 = vpop.f32.mrf.mxu1  ;;  %11547 = vmatmul.mubr.bf16.gmra.mxu1 %v21770_v41  ;;  %v11281_v28 = vpop.f32.mrf.mxu0 }
 0x495   : > { %v11083_v21 = vadd.f32 %v11082_v12, %v21771_v16  ;;  %11556 = vmatprep.mubr.bf16.mxu1 %v21772_v20  ;;  %v19622_v63 = vadd.f32 %v11271_v7, %v11079_v25  ;;  %v12378_v7 = vld [vmem:[%s20816_s10 + $0x68] sm:$0xff] }
 0x496   : > { %v11084_v18 = vpop.f32.mrf.mxu1  ;;  %v11285_v42 = vpop.f32.mrf.mxu0  ;;  %11998 = vmatmul.mubr.bf16.gmra.mxu0 %v1271_v51 }
 0x497   : > { %v11085_v11 = vadd.f32 %v11084_v18, %v21773_v15  ;;  %v19625_v47 = vadd.f32 %v11275_v38, %v11083_v21  ;;  %14203 = vmatpush3.msra.mxu0 %v12378_v7  ;;  %v21775_v18 = vmov 0.0  }
 0x498   : > { %v11086_v49 = vpop.f32.mrf.mxu1  ;;  %v11287_v32 = vpop.f32.mrf.mxu0 }
 0x499   : > { %v11087_v29 = vadd.f32 %v11086_v49, %v19349_v56  ;;  %v19634_v3 = vadd.f32 %v11277_v33, %v11085_v11  ;;  %v21776_v11 = vld [vmem:[#allocation108_spill] sm:$0xff] }
 0x49a   : > { %v11088_v25 = vpop.f32.mrf.mxu1  ;;  %v11289_v51 = vpop.f32.mrf.mxu0 }
 0x49b   : > { %v11089_v38 = vadd.f32 %v11088_v25, %v19354_v61  ;;  %v19637_v12 = vadd.f32 %v11279_v57, %v11087_v29 }
 0x49c   : > { %v11092_v41 = vpop.f32.mrf.mxu1  ;;  %11557 = vmatmul.mubr.bf16.gmra.mxu1 %v21772_v20  ;;  %v11291_v56 = vpop.f32.mrf.mxu0 }
 0x49d   : > { %v11093_v16 = vadd.f32 %v11092_v41, %v19358_v35  ;;  %v19641_v21 = vadd.f32 %v11281_v28, %v11089_v38  ;;  %12540 = vmatprep.mubr.f32.mxu1 %v21775_v18  ;;  %v12393_v35 = vld [vmem:[%s20816_s10 + $0xe0] sm:$0xff] }
 0x49e   : > { %v11094_v33 = vpop.f32.mrf.mxu1  ;;  %v11295_v15 = vpop.f32.mrf.mxu0  ;;  %v12377_v28 = vld [vmem:[%s20816_s10 + $0x60] sm:$0xff]  ;;  %14204 = vmatprep.subr.mxu0 %v12393_v35 }
 0x49f   : > { %21774 = vst [vmem:[#allocation62_spill] sm:$0xff] %v19641_v21  ;;  %v11095_v49 = vadd.f32 %v11094_v33, %v21776_v11  ;;  %v19645_v59 = vadd.f32 %v11285_v42, %v11093_v16  ;;  %14205 = vmatpush3.msra.mxu0 %v12377_v28 }
 0x4a0   : > { %v11096_v61 = vpop.f32.mrf.mxu1  ;;  %v11297_v7 = vpop.f32.mrf.mxu0 }
 0x4a1   : > { %21777 = vst [vmem:[#allocation69_spill] sm:$0xff] %v19645_v59  ;;  %v11097_v57 = vadd.f32 %v11096_v61, %v19366_v45  ;;  %v19648_v29 = vadd.f32 %v11287_v32, %v11095_v49  ;;  %v21779_v45 = vld [vmem:[#allocation111_spill] sm:$0xff]  ;;  %v21780_v49 = vld [vmem:[#allocation101_spill] sm:$0xff] }
 0x4a2   : > { %v11098_v20 = vpop.f32.mrf.mxu1  ;;  %v11299_v25 = vpop.f32.mrf.mxu0 }
 0x4a3   : > { %21778 = vst [vmem:[#allocation118_spill] sm:$0xff] %v19648_v29  ;;  %v11099_v38 = vadd.f32 %v11098_v20, %v19371_v10  ;;  %v19657_v42 = vadd.f32 %v11289_v51, %v11097_v57  ;;  %v12392_v51 = vld [vmem:[%s20816_s10 + $0xd8] sm:$0xff] }
 0x4a4   : > { %v11102_v41 = vpop.f32.mrf.mxu1  ;;  %v11301_v16 = vpop.f32.mrf.mxu0  ;;  %v12376_v57 = vld [vmem:[%s20816_s10 + $0x58] sm:$0xff]  ;;  %14206 = vmatprep.subr.mxu0 %v12392_v51 }
 0x4a5   : > { %v11103_v32 = vadd.f32 %v11102_v41, %v21779_v45  ;;  %v19660_v18 = vadd.f32 %v11291_v56, %v11099_v38  ;;  %14207 = vmatpush3.msra.mxu0 %v12376_v57 }
 0x4a6   : > { %v11104_v33 = vpop.f32.mrf.mxu1  ;;  %v11305_v11 = vpop.f32.mrf.mxu0 }
 0x4a7   : > { %v11105_v61 = vadd.f32 %v11104_v33, %v21780_v49  ;;  %v19663_v29 = vadd.f32 %v11295_v15, %v11103_v32  ;;  %v21785_v49 = vld [vmem:[#allocation153_spill] sm:$0xff] }
 0x4a8   : > { %v11106_v59 = vpop.f32.mrf.mxu1  ;;  %v11307_v21 = vpop.f32.mrf.mxu0 }
 0x4a9   : > { %21781 = vst [vmem:[#allocation159_spill] sm:$0xff] %v19663_v29  ;;  %v11107_v10 = vadd.f32 %v11106_v59, %v19383_v31  ;;  %v19672_v56 = vadd.f32 %v11297_v7, %v11105_v61  ;;  %v21783_v59 = vld [vmem:[#allocation105_spill] sm:$0xff] }
 0x4aa   : > { %v11108_v20 = vpop.f32.mrf.mxu1  ;;  %v11309_v35 = vpop.f32.mrf.mxu0 }
 0x4ab   : > { %21782 = vst [vmem:[#allocation125_spill] sm:$0xff] %v19672_v56  ;;  %v11109_v15 = vadd.f32 %v11108_v20, %v19388_v39  ;;  %v19675_v28 = vadd.f32 %v11299_v25, %v11107_v10  ;;  %v12391_v39 = vld [vmem:[%s20816_s10 + $0xd0] sm:$0xff] }
 0x4ac   : > { %v11112_v38 = vpop.f32.mrf.mxu1  ;;  %v11311_v31 = vpop.f32.mrf.mxu0  ;;  %v12375_v25 = vld [vmem:[%s20816_s10 + $0x50] sm:$0xff]  ;;  %14208 = vmatprep.subr.mxu0 %v12391_v39  ;;  %v21792_v39 = vld [vmem:[#allocation117_spill] sm:$0xff] }
 0x4ad   : > { %v11113_v41 = vadd.f32 %v11112_v38, %v21783_v59  ;;  %v19678_v45 = vadd.f32 %v11301_v16, %v11109_v15  ;;  %14209 = vmatpush3.msra.mxu0 %v12375_v25  ;;  %v21788_v38 = vld [vmem:[#allocation113_spill] sm:$0xff]  ;;  %v12390_v25 = vld [vmem:[%s20816_s10 + $0xc8] sm:$0xff] }
 0x4ae   : > { %v11114_v32 = vpop.f32.mrf.mxu1  ;;  %v11315_v33 = vpop.f32.mrf.mxu0  ;;  %14210 = vmatprep.subr.mxu0 %v12390_v25 }
 0x4af   : > { %21784 = vst [vmem:[#allocation160_spill] sm:$0xff] %v19678_v45  ;;  %v11115_v29 = vadd.f32 %v11114_v32, %v21785_v49  ;;  %v19681_v7 = vadd.f32 %v11305_v11, %v11113_v41 }
 0x4b0   : > { %v11116_v61 = vpop.f32.mrf.mxu1  ;;  %v11317_v56 = vpop.f32.mrf.mxu0 }
 0x4b1   : > { %21786 = vst [vmem:[#allocation45_spill] sm:$0xff] %v19681_v7  ;;  %v11117_v51 = vadd.f32 %v11116_v61, %v19400_v9  ;;  %v19690_v16 = vadd.f32 %v11307_v21, %v11115_v29  ;;  %v21790_v61 = vld [vmem:[#allocation154_spill] sm:$0xff] }
 0x4b2   : > { %v11118_v10 = vpop.f32.mrf.mxu1  ;;  %v11319_v57 = vpop.f32.mrf.mxu0 }
 0x4b3   : > { %21787 = vst [vmem:[#allocation66_spill] sm:$0xff] %v19690_v16  ;;  %v11119_v11 = vadd.f32 %v11118_v10, %v19405_v0  ;;  %v19693_v20 = vadd.f32 %v11309_v35, %v11117_v51  ;;  %v21794_v10 = vld [vmem:[#allocation106_spill] sm:$0xff] }
 0x4b4   : > { %v11122_v15 = vpop.f32.mrf.mxu1  ;;  %v11321_v9 = vpop.f32.mrf.mxu0 }
 0x4b5   : > { %v11123_v59 = vadd.f32 %v11122_v15, %v21788_v38  ;;  %v19696_v41 = vadd.f32 %v11311_v31, %v11119_v11  ;;  %v12374_v31 = vld [vmem:[%s20816_s10 + $0x48] sm:$0xff] }
 0x4b6   : > { %v11124_v32 = vpop.f32.mrf.mxu1  ;;  %v11325_v49 = vpop.f32.mrf.mxu0  ;;  %14211 = vmatpush3.msra.mxu0 %v12374_v31 }
 0x4b7   : > { %21789 = vst [vmem:[#allocation71_spill] sm:$0xff] %v19696_v41  ;;  %v11125_v7 = vadd.f32 %v11124_v32, %v21790_v61  ;;  %v19699_v21 = vadd.f32 %v11315_v33, %v11123_v59 }
 0x4b8   : > { %v11126_v29 = vpop.f32.mrf.mxu1  ;;  %v11327_v16 = vpop.f32.mrf.mxu0 }
 0x4b9   : > { %21791 = vst [vmem:[#allocation67_spill] sm:$0xff] %v19699_v21  ;;  %v11127_v45 = vadd.f32 %v11126_v29, %v21792_v39  ;;  %v19702_v0 = vadd.f32 %v11317_v56, %v11125_v7  ;;  %v21795_v56 = vld [vmem:[#allocation109_spill] sm:$0xff]  ;;  %v21797_v29 = vld [vmem:[#allocation155_spill] sm:$0xff] }
 0x4ba   : > { %v11128_v35 = vpop.f32.mrf.mxu1  ;;  %v11329_v51 = vpop.f32.mrf.mxu0 }
 0x4bb   : > { %21793 = vst [vmem:[#allocation161_spill] sm:$0xff] %v19702_v0  ;;  %v11129_v11 = vadd.f32 %v11128_v35, %v21794_v10  ;;  %v19711_v33 = vadd.f32 %v11319_v57, %v11127_v45  ;;  %v12389_v45 = vld [vmem:[%s20816_s10 + $0xc0] sm:$0xff]  ;;  %v21800_v10 = vld [vmem:[#allocation116_spill] sm:$0xff] }
 0x4bc   : > { %v11132_v15 = vpop.f32.mrf.mxu1  ;;  %v11331_v38 = vpop.f32.mrf.mxu0  ;;  %v12373_v57 = vld [vmem:[%s20816_s10 + $0x40] sm:$0xff]  ;;  %14212 = vmatprep.subr.mxu0 %v12389_v45 }
 0x4bd   : > { %v11133_v7 = vadd.f32 %v11132_v15, %v21795_v56  ;;  %v19714_v59 = vadd.f32 %v11321_v9, %v11129_v11  ;;  %14213 = vmatpush3.msra.mxu0 %v12373_v57 }
 0x4be   : > { %v11134_v32 = vpop.f32.mrf.mxu1  ;;  %v11335_v61 = vpop.f32.mrf.mxu0 }
 0x4bf   : > { %21796 = vst [vmem:[#allocation127_spill] sm:$0xff] %v19714_v59  ;;  %v11135_v39 = vadd.f32 %v11134_v32, %v21797_v29  ;;  %v19717_v0 = vadd.f32 %v11325_v49, %v11133_v7 }
 0x4c0   : > { %v11136_v21 = vpop.f32.mrf.mxu1  ;;  %v11337_v41 = vpop.f32.mrf.mxu0 }
 0x4c1   : > { %21798 = vst [vmem:[#allocation162_spill] sm:$0xff] %v19717_v0  ;;  %v11137_v35 = vadd.f32 %v11136_v21, %v19434_v44  ;;  %v19726_v9 = vadd.f32 %v11327_v16, %v11135_v39  ;;  %v21801_v21 = vld [vmem:[#allocation156_spill] sm:$0xff]  ;;  %v21802_v0 = vld [vmem:[#allocation121_spill] sm:$0xff] }
 0x4c2   : > { %v11138_v25 = vpop.f32.mrf.mxu1  ;;  %v11339_v31 = vpop.f32.mrf.mxu0 }
 0x4c3   : > { %21799 = vst [vmem:[#allocation129_spill] sm:$0xff] %v19726_v9  ;;  %v11139_v49 = vadd.f32 %v11138_v25, %v21800_v10  ;;  %v19729_v11 = vadd.f32 %v11329_v51, %v11137_v35  ;;  %v12388_v51 = vld [vmem:[%s20816_s10 + $0xb8] sm:$0xff] }
 0x4c4   : > { %v11142_v15 = vpop.f32.mrf.mxu1  ;;  %v11341_v44 = vpop.f32.mrf.mxu0  ;;  %v12372_v35 = vld [vmem:[%s20816_s10 + $0x38] sm:$0xff]  ;;  %14214 = vmatprep.subr.mxu0 %v12388_v51 }
 0x4c5   : > { %v11143_v56 = vadd.f32 %v11142_v15, %v21801_v21  ;;  %v19732_v7 = vadd.f32 %v11331_v38, %v11139_v49  ;;  %14215 = vmatpush3.msra.mxu0 %v12372_v35  ;;  %v21805_v49 = vld [vmem:[#allocation110_spill] sm:$0xff]  ;;  %v12387_v35 = vld [vmem:[%s20816_s10 + $0xb0] sm:$0xff] }
 0x4c6   : > { %v11144_v32 = vpop.f32.mrf.mxu1  ;;  %v11345_v29 = vpop.f32.mrf.mxu0  ;;  %14216 = vmatprep.subr.mxu0 %v12387_v35 }
 0x4c7   : > { %v11145_v59 = vadd.f32 %v11144_v32, %v21802_v0  ;;  %v19735_v16 = vadd.f32 %v11335_v61, %v11143_v56 }
 0x4c8   : > { %v11146_v39 = vpop.f32.mrf.mxu1  ;;  %v11347_v9 = vpop.f32.mrf.mxu0 }
 0x4c9   : > { %21803 = vst [vmem:[#allocation163_spill] sm:$0xff] %v19735_v16  ;;  %v11147_v45 = vadd.f32 %v11146_v39, %v19451_v30  ;;  %v19744_v38 = vadd.f32 %v11337_v41, %v11145_v59  ;;  %v21806_v39 = vld [vmem:[#allocation61_spill] sm:$0xff] }
 0x4ca   : > { %v11148_v57 = vpop.f32.mrf.mxu1  ;;  %v11349_v25 = vpop.f32.mrf.mxu0 }
 0x4cb   : > { %21804 = vst [vmem:[#allocation164_spill] sm:$0xff] %v19744_v38  ;;  %v11149_v0 = vadd.f32 %v11148_v57, %v19456_v55  ;;  %v19747_v61 = vadd.f32 %v11339_v31, %v11147_v45  ;;  %v21809_v57 = vld [vmem:[#allocation157_spill] sm:$0xff] }
 0x4cc   : > { %v11152_v10 = vpop.f32.mrf.mxu1  ;;  %v11351_v30 = vpop.f32.mrf.mxu0 }
 0x4cd   : > { %v11153_v15 = vadd.f32 %v11152_v10, %v21805_v49  ;;  %v19750_v21 = vadd.f32 %v11341_v44, %v11149_v0  ;;  %v12371_v44 = vld [vmem:[%s20816_s10 + $0x30] sm:$0xff] }
 0x4ce   : > { %v11154_v56 = vpop.f32.mrf.mxu1  ;;  %v11355_v32 = vpop.f32.mrf.mxu0  ;;  %14217 = vmatpush3.msra.mxu0 %v12371_v44 }
 0x4cf   : > { %v11155_v16 = vadd.f32 %v11154_v56, %v21806_v39  ;;  %v19753_v41 = vadd.f32 %v11345_v29, %v11153_v15 }
 0x4d0   : > { %v11156_v59 = vpop.f32.mrf.mxu1  ;;  %v11357_v38 = vpop.f32.mrf.mxu0 }
 0x4d1   : > { %21807 = vst [vmem:[#allocation165_spill] sm:$0xff] %v19753_v41  ;;  %v11157_v51 = vadd.f32 %v11156_v59, %v19468_v14  ;;  %v19756_v55 = vadd.f32 %v11347_v9, %v11155_v16  ;;  %v21810_v14 = vld [vmem:[#allocation120_spill] sm:$0xff] }
 0x4d2   : > { %v11158_v31 = vpop.f32.mrf.mxu1  ;;  %v11359_v45 = vpop.f32.mrf.mxu0 }
 0x4d3   : > { %21808 = vst [vmem:[#allocation130_spill] sm:$0xff] %v19756_v55  ;;  %v11159_v0 = vadd.f32 %v11158_v31, %v21809_v57  ;;  %v19765_v29 = vadd.f32 %v11349_v25, %v11157_v51  ;;  %v12386_v25 = vld [vmem:[%s20816_s10 + $0xa8] sm:$0xff] }
 0x4d4   : > { %v11162_v10 = vpop.f32.mrf.mxu1  ;;  %v11361_v49 = vpop.f32.mrf.mxu0  ;;  %v12370_v51 = vld [vmem:[%s20816_s10 + $0x28] sm:$0xff]  ;;  %14218 = vmatprep.subr.mxu0 %v12386_v25 }
 0x4d5   : > { %v11163_v9 = vadd.f32 %v11162_v10, %v21810_v14  ;;  %v19768_v16 = vadd.f32 %v11351_v30, %v11159_v0  ;;  %14219 = vmatpush3.msra.mxu0 %v12370_v51  ;;  %v12369_v51 = vld [vmem:[%s20816_s10 + $0x20] sm:$0xff] }
 0x4d6   : > { %v11164_v15 = vpop.f32.mrf.mxu1  ;;  %v11365_v56 = vpop.f32.mrf.mxu0 }
 0x4d7   : > { %v11165_v39 = vadd.f32 %v11164_v15, %v19480_v52  ;;  %v19771_v59 = vadd.f32 %v11355_v32, %v11163_v9  ;;  %v21815_v15 = vld [vmem:[#allocation57_spill] sm:$0xff] }
 0x4d8   : > { %v11166_v55 = vpop.f32.mrf.mxu1  ;;  %v11367_v41 = vpop.f32.mrf.mxu0 }
 0x4d9   : > { %21811 = vst [vmem:[#allocation126_spill] sm:$0xff] %v19771_v59  ;;  %v11167_v31 = vadd.f32 %v11166_v55, %v19485_v2  ;;  %v19780_v30 = vadd.f32 %v11357_v38, %v11165_v39  ;;  %v12008_v55 = vld [vmem:[%s20814_s8] sm:$0x3] }
 0x4da   : > { %v11168_v35 = vpop.f32.mrf.mxu1  ;;  %v11369_v44 = vpop.f32.mrf.mxu0  ;;  %v19793_v39 = vrot.slane %v12008_v55, %v21815_v15 }
 0x4db   : > { %21812 = vst [vmem:[#allocation77_spill] sm:$0xff] %v19780_v30  ;;  %v11169_v52 = vadd.f32 %v11168_v35, %v19490_v4  ;;  %v19783_v32 = vadd.f32 %v11359_v45, %v11167_v31  ;;  %v12084_v4 = vld [vmem:[%s20815_s9] sm:$0x3] }
 0x4dc   : > { %v11172_v57 = vpop.f32.mrf.mxu1  ;;  %v11371_v2 = vpop.f32.mrf.mxu0 }
 0x4dd   : > { %21813 = vst [vmem:[#allocation166_spill] sm:$0xff] %v19783_v32  ;;  %v11173_v0 = vadd.f32 %v11172_v57, %v19494_v17  ;;  %v19789_v10 = vadd.f32 %v11361_v49, %v11169_v52  ;;  %v11567_v17 = vld [vmem:[%s20811_s5] sm:$0x3]  ;;  %v21818_v57 = vld [vmem:[#allocation92_spill] sm:$0xff] }
 0x4de   : > { %v11174_v38 = vpop.f32.mrf.mxu1  ;;  %v11849_v14 = vpop.f32.mrf.mxu0  ;;  %v19833_v30 = vrot.slane %v11567_v17, %v21818_v57 }
 0x4df   : > { %21814 = vst [vmem:[#allocation167_spill] sm:$0xff] %v19789_v10  ;;  %v11175_v9 = vadd.f32 %v11174_v38, %v19497_v19  ;;  %v19798_v45 = vadd.f32 %v11365_v56, %v11173_v0  ;;  %v12385_v19 = vld [vmem:[%s20816_s10 + $0xa0] sm:$0xff]  ;;  %v19813_v56 = vrot.slane %v12084_v4, %v21815_v15  ;;  %v19816_v0 = vrot.slane %v12008_v55, %v21818_v57 }
 0x4e0   : > { %v11176_v31 = vpop.f32.mrf.mxu1  ;;  %v11851_v25 = vpop.f32.mrf.mxu0  ;;  %14220 = vmatprep.subr.mxu0 %v12385_v19 }
 0x4e1   : > { %21816 = vst [vmem:[#allocation168_spill] sm:$0xff] %v19798_v45  ;;  %v11177_v49 = vadd.f32 %v11176_v31, %v19502_v27  ;;  %v19810_v35 = vadd.f32 %v11367_v41, %v11175_v9  ;;  %v11643_v27 = vld [vmem:[%s20812_s6] sm:$0x3]  ;;  %v12020_v31 = vmul.f32 %v19793_v39, %v11849_v14  ;;  %v19824_v41 = vrot.slane %v11567_v17, %v21815_v15 }
 0x4e2   : > { %v11178_v52 = vpop.f32.mrf.mxu1  ;;  %v11853_v38 = vpop.f32.mrf.mxu0  ;;  %14221 = vmatpush3.msra.mxu0 %v12369_v51  ;;  %v19830_v32 = vrot.slane %v11643_v27, %v21815_v15  ;;  %v19839_v14 = vrot.slane %v12084_v4, %v21818_v57 }
 0x4e3   : > { %21817 = vst [vmem:[#allocation75_spill] sm:$0xff] %v19810_v35  ;;  %v11179_v45 = vadd.f32 %v11178_v52, %v19507_v13  ;;  %v19826_v9 = vadd.f32 %v11369_v44, %v11177_v49  ;;  %v12021_v13 = vmul.f32 %v19816_v0, %v11851_v25  ;;  %v12096_v49 = vadd.f32 %v19813_v56, %v12020_v31 }
 0x4e4   : > { %v11408_v35 = vpop.f32.mrf.mxu1  ;;  %v11855_v10 = vpop.f32.mrf.mxu0 }
 0x4e5   : > { %21819 = vst [vmem:[#allocation78_spill] sm:$0xff] %v19826_v9  ;;  %v11409_v55 = vadd.f32 %v11408_v35, %v19511_v53  ;;  %v19835_v19 = vadd.f32 %v11371_v2, %v11179_v45  ;;  %v19845_v35 = vrot.slane %v11643_v27, %v21818_v57  ;;  %v12097_v25 = vadd.f32 %v19839_v14, %v12021_v13  ;;  %v12368_v57 = vld [vmem:[%s20816_s10 + $0x18] sm:$0xff] }
 0x4e6   : > { %v11410_v51 = vpop.f32.mrf.mxu1  ;;  %v11859_v44 = vpop.f32.mrf.mxu0 }
 0x4e7   : > { %21820 = vst [vmem:[#allocation79_spill] sm:$0xff] %v19835_v19  ;;  %v11579_v52 = vmul.f32 %v19824_v41, %v11409_v55  ;;  %v11411_v53 = vadd.f32 %v11410_v51, %v19514_v62  ;;  %v12022_v19 = vmul.f32 %v19793_v39, %v11853_v38  ;;  %v12384_v62 = vld [vmem:[%s20816_s10 + $0x98] sm:$0xff]  ;;  %v12023_v38 = vmul.f32 %v19816_v0, %v11855_v10 }
 0x4e8   : > { %v11412_v17 = vpop.f32.mrf.mxu1  ;;  %v11861_v15 = vpop.f32.mrf.mxu0  ;;  %14222 = vmatprep.subr.mxu0 %v12384_v62  ;;  %v12024_v51 = vmul.f32 %v19793_v39, %v11859_v44 }
 0x4e9   : > { %v11655_v2 = vadd.f32 %v19830_v32, %v11579_v52  ;;  %v11580_v45 = vmul.f32 %v19833_v30, %v11411_v53  ;;  %v11413_v4 = vadd.f32 %v11412_v17, %v19519_v43  ;;  %14223 = vmatpush3.msra.mxu0 %v12368_v57  ;;  %v12099_v57 = vadd.f32 %v19839_v14, %v12023_v38 }
 0x4ea   : > { %v11414_v31 = vpop.f32.mrf.mxu1  ;;  %v11863_v9 = vpop.f32.mrf.mxu0 }
 0x4eb   : > { %v19858_v27 = vadd.f32 %v12096_v49, %v11655_v2  ;;  %v11656_v55 = vadd.f32 %v19845_v35, %v11580_v45  ;;  %v11581_v43 = vmul.f32 %v19824_v41, %v11413_v4  ;;  %v11415_v13 = vadd.f32 %v11414_v31, %v19524_v36  ;;  %v21822_v2 = vld [vmem:[#allocation96_spill] sm:$0xff] }
 0x4ec   : > { %v11418_v52 = vpop.f32.mrf.mxu1  ;;  %v11865_v53 = vpop.f32.mrf.mxu0  ;;  %v11065_v45 = vadd.f32 %v19579_v48, %v21822_v2  ;;  %v12098_v4 = vadd.f32 %v19813_v56, %v12022_v19  ;;  %v12025_v36 = vmul.f32 %v19816_v0, %v11861_v15  ;;  %v12026_v15 = vmul.f32 %v19793_v39, %v11863_v9 }
 0x4ed   : > { %v19865_v17 = vadd.f32 %v12097_v25, %v11656_v55  ;;  %v11657_v59 = vadd.f32 %v19830_v32, %v11581_v43  ;;  %v11582_v49 = vmul.f32 %v19833_v30, %v11415_v13  ;;  %v11419_v10 = vadd.f32 %v11418_v52, %v19528_v40 }
 0x4ee   : > { %v11420_v31 = vpop.f32.mrf.mxu1  ;;  %v11869_v44 = vpop.f32.mrf.mxu0  ;;  %v12100_v43 = vadd.f32 %v19813_v56, %v12024_v51  ;;  %v19889_v51 = vadd.f32 %v19564_v58, %v11065_v45  ;;  %v12102_v45 = vadd.f32 %v19813_v56, %v12026_v15 }
 0x4ef   : > { %21821 = vst [vmem:[#allocation84_spill] sm:$0xff] %v19865_v17  ;;  %v11658_v62 = vadd.f32 %v19845_v35, %v11582_v49  ;;  %v11421_v25 = vadd.f32 %v11420_v31, %v19531_v60  ;;  %v19877_v55 = vadd.f32 %v12098_v4, %v11657_v59  ;;  %v11583_v48 = vmul.f32 %v19824_v41, %v11419_v10 }
 0x4f0   : > { %v11422_v13 = vpop.f32.mrf.mxu1  ;;  %v11871_v19 = vpop.f32.mrf.mxu0  ;;  %v12101_v60 = vadd.f32 %v19839_v14, %v12025_v36  ;;  %v12027_v10 = vmul.f32 %v19816_v0, %v11865_v53  ;;  %v12028_v31 = vmul.f32 %v19793_v39, %v11869_v44 }
 0x4f1   : > { %21823 = vst [vmem:[#allocation128_spill] sm:$0xff] %v19877_v55  ;;  %v11584_v40 = vmul.f32 %v19833_v30, %v11421_v25  ;;  %v11423_v52 = vadd.f32 %v11422_v13, %v19536_v34  ;;  %v19884_v2 = vadd.f32 %v12099_v57, %v11658_v62  ;;  %v11659_v38 = vadd.f32 %v19830_v32, %v11583_v48 }
 0x4f2   : > { %v11424_v59 = vpop.f32.mrf.mxu1  ;;  %v11873_v49 = vpop.f32.mrf.mxu0  ;;  %v21049_v34 = vmax.f32 %v19858_v27, 0.0  ;;  %v21048_v62 = vmax.f32 %v19877_v55, 0.0  ;;  %v12104_v58 = vadd.f32 %v19813_v56, %v12028_v31 }
 0x4f3   : > { %21824 = vst [vmem:[#allocation83_spill] sm:$0xff] %v19884_v2  ;;  %v11660_v4 = vadd.f32 %v19845_v35, %v11584_v40  ;;  %v11585_v9 = vmul.f32 %v19824_v41, %v11423_v52  ;;  %v19897_v36 = vadd.f32 %v12100_v43, %v11659_v38  ;;  %v11425_v25 = vadd.f32 %v11424_v59, %v19541_v54 }
 0x4f4   : > { %v11428_v57 = vpop.f32.mrf.mxu1  ;;  %v11875_v48 = vpop.f32.mrf.mxu0  ;;  %v21053_v44 = vmax.f32 %v19884_v2, 0.0  ;;  %v12029_v43 = vmul.f32 %v19816_v0, %v11871_v19  ;;  %v12103_v59 = vadd.f32 %v19839_v14, %v12027_v10  ;;  %v12030_v19 = vmul.f32 %v19793_v39, %v11873_v49  ;;  %v12382_v49 = vld [vmem:[%s20816_s10 + $0x88] sm:$0xff] }
 0x4f5   : > { %v11661_v53 = vadd.f32 %v19830_v32, %v11585_v9  ;;  %v11429_v13 = vadd.f32 %v11428_v57, %v19545_v26  ;;  %v19905_v40 = vadd.f32 %v12101_v60, %v11660_v4  ;;  %v11586_v52 = vmul.f32 %v19833_v30, %v11425_v25  ;;  %v12366_v60 = vld [vmem:[%s20816_s10 + $0x8] sm:$0xff] }
 0x4f6   : > { %v11430_v38 = vpop.f32.mrf.mxu1  ;;  %v11879_v54 = vpop.f32.mrf.mxu0  ;;  %v12288_v26 = vadd.f32 %v21048_v62, %v21049_v34 }
 0x4f7   : > { %21825 = vst [vmem:[#allocation90_spill] sm:$0xff] %v19905_v40  ;;  %v11587_v15 = vmul.f32 %v19824_v41, %v11429_v13  ;;  %v11431_v9 = vadd.f32 %v11430_v38, %v19548_v46  ;;  %v11662_v4 = vadd.f32 %v19845_v35, %v11586_v52  ;;  %v19920_v10 = vadd.f32 %v12102_v45, %v11661_v53  ;;  %v12383_v38 = vld [vmem:[%s20816_s10 + $0x90] sm:$0xff] }
 0x4f8   : > { %v11432_v25 = vpop.f32.mrf.mxu1  ;;  %v11881_v57 = vpop.f32.mrf.mxu0  ;;  %v12031_v46 = vmul.f32 %v19816_v0, %v11875_v48  ;;  %v12367_v52 = vld [vmem:[%s20816_s10 + $0x10] sm:$0xff]  ;;  %v21826_v45 = vmax.f32 %v19865_v17, 0.0  ;;  %v12105_v48 = vadd.f32 %v19839_v14, %v12029_v43  ;;  %14224 = vmatprep.subr.mxu0 %v12383_v38  ;;  %v12032_v2 = vmul.f32 %v19793_v39, %v11879_v54 }
 0x4f9   : > { %v11663_v31 = vadd.f32 %v19830_v32, %v11587_v15  ;;  %v11588_v13 = vmul.f32 %v19833_v30, %v11431_v9  ;;  %v21054_v15 = vmax.f32 %v19905_v40, 0.0  ;;  %v11433_v9 = vadd.f32 %v11432_v25, %v19553_v8  ;;  %14225 = vmatpush3.msra.mxu0 %v12367_v52  ;;  %v12381_v8 = vld [vmem:[%s20816_s10 + $0x80] sm:$0xff] }
 0x4fa   : > { %v12325_v53 = vadd.f32 %v21053_v44, %v21826_v45  ;;  %v11434_v62 = vpop.f32.mrf.mxu1  ;;  %v11883_v34 = vpop.f32.mrf.mxu0  ;;  %v19944_v55 = vadd.f32 %v12103_v59, %v11662_v4  ;;  %v21828_v43 = vmax.f32 %v19897_v36, 0.0  ;;  %v12106_v44 = vadd.f32 %v19813_v56, %v12030_v19  ;;  %14226 = vmatprep.subr.mxu0 %v12382_v49 }
 0x4fb   : > { %v11664_v17 = vadd.f32 %v19845_v35, %v11588_v13  ;;  %v11435_v45 = vadd.f32 %v11434_v62, %v19558_v5  ;;  %v19954_v38 = vadd.f32 %v12104_v58, %v11663_v31  ;;  %v11589_v59 = vmul.f32 %v19824_v41, %v11433_v9  ;;  %v12365_v5 = vld [vmem:[%s20816_s10] sm:$0xff]  ;;  %14227 = vmatpush3.msra.mxu0 %v12366_v60 }
 0x4fc   : > { %21827 = vst [vmem:[#allocation76_spill] sm:$0xff] %v19944_v55  ;;  %v12289_v25 = vadd.f32 %v12288_v26, %v21828_v43  ;;  %v11438_v4 = vpop.f32.mrf.mxu1  ;;  %v11885_v13 = vpop.f32.mrf.mxu0  ;;  %v21055_v62 = vmax.f32 %v19920_v10, 0.0  ;;  %v12107_v54 = vadd.f32 %v19839_v14, %v12031_v46  ;;  %v12326_v26 = vadd.f32 %v12325_v53, %v21054_v15  ;;  %14228 = vmatprep.subr.mxu0 %v12381_v8  ;;  %v12471_v46 = vld [vmem:[%s20817_s11 + $0x18] sm:$0xff] }
 0x4fd   : > { %v11590_v52 = vmul.f32 %v19833_v30, %v11435_v45  ;;  %v11439_v58 = vadd.f32 %v11438_v4, %v19562_v24  ;;  %v19967_v19 = vadd.f32 %v12105_v48, %v11664_v17  ;;  %v11665_v31 = vadd.f32 %v19830_v32, %v11589_v59  ;;  %v12470_v24 = vld [vmem:[%s20817_s11 + $0x10] sm:$0xff]  ;;  %v12469_v17 = vld [vmem:[%s20817_s11 + $0x8] sm:$0xff]  ;;  %14229 = vmatpush3.msra.mxu0 %v12365_v5  ;;  %v12468_v45 = vld [vmem:[%s20817_s11] sm:$0xff] }
 0x4fe   : > { %v12033_v49 = vmul.f32 %v19816_v0, %v11881_v57  ;;  %v11440_v9 = vpop.f32.mrf.mxu1  ;;  %v11889_v43 = vpop.f32.mrf.mxu0  ;;  %v12108_v53 = vadd.f32 %v19813_v56, %v12032_v2  ;;  %12504 = vmatprep.subr.mxu1 %v12471_v46  ;;  %v21056_v8 = vmax.f32 %v19954_v38, 0.0  ;;  %v12034_v4 = vmul.f32 %v19793_v39, %v11883_v34 }
 0x4ff   : > { %21829 = vst [vmem:[#allocation74_spill] sm:$0xff] %v19967_v19  ;;  %v11666_v57 = vadd.f32 %v19845_v35, %v11590_v52  ;;  %v11591_v48 = vmul.f32 %v19824_v41, %v11439_v58  ;;  %v19988_v59 = vadd.f32 %v12106_v44, %v11665_v31  ;;  %v11441_v15 = vadd.f32 %v11440_v9, %v19567_v6 }
 0x500   : > { %v11442_v60 = vpop.f32.mrf.mxu1  ;;  %v11891_v2 = vpop.f32.mrf.mxu0  ;;  %12505 = vmatpush1.msra.mxu1 %v12470_v24  ;;  %v12290_v52 = vadd.f32 %v12289_v25, %v21055_v62  ;;  %v12035_v58 = vmul.f32 %v19816_v0, %v11885_v13  ;;  %v12109_v34 = vadd.f32 %v19839_v14, %v12033_v49  ;;  %v21831_v25 = vmax.f32 %v19944_v55, 0.0 }
 0x501   : > { %v11667_v5 = vadd.f32 %v19830_v32, %v11591_v48  ;;  %v11443_v46 = vadd.f32 %v11442_v60, %v19572_v50  ;;  %12506 = vmatprep.subr.mxu1 %v12469_v17  ;;  %v19998_v31 = vadd.f32 %v12107_v54, %v11666_v57  ;;  %v11592_v6 = vmul.f32 %v19833_v30, %v11441_v15  ;;  %v21832_v50 = vld [vmem:[#allocation158_spill] sm:$0xff] }
 0x502   : > { %v11444_v9 = vpop.f32.mrf.mxu1  ;;  %v11893_v24 = vpop.f32.mrf.mxu0  ;;  %12507 = vmatpush1.msra.mxu1 %v12468_v45  ;;  %v12327_v62 = vadd.f32 %v12326_v26, %v21831_v25  ;;  %v12036_v13 = vmul.f32 %v19793_v39, %v11889_v43  ;;  %v12291_v54 = vadd.f32 %v12290_v52, %v21056_v8  ;;  %v12110_v49 = vadd.f32 %v19813_v56, %v12034_v4  ;;  %v21834_v4 = vld [vmem:[#allocation124_spill] sm:$0xff] }
 0x503   : > { %21830 = vst [vmem:[#allocation81_spill] sm:$0xff] %v19998_v31  ;;  %v11593_v48 = vmul.f32 %v19824_v41, %v11443_v46  ;;  %v11445_v17 = vadd.f32 %v11444_v9, %v21832_v50  ;;  %v11668_v15 = vadd.f32 %v19845_v35, %v11592_v6  ;;  %v20012_v44 = vadd.f32 %v12108_v53, %v11667_v5 }
 0x504   : > { %v11448_v57 = vpop.f32.mrf.mxu1  ;;  %v11895_v45 = vpop.f32.mrf.mxu0  ;;  %v12111_v26 = vadd.f32 %v19839_v14, %v12035_v58  ;;  %v21833_v9 = vmax.f32 %v19967_v19, 0.0  ;;  %v21058_v52 = vmax.f32 %v19998_v31, 0.0  ;;  %v12037_v50 = vmul.f32 %v19816_v0, %v11891_v2 }
 0x505   : > { %v11669_v46 = vadd.f32 %v19830_v32, %v11593_v48  ;;  %v11594_v43 = vmul.f32 %v19833_v30, %v11445_v17  ;;  %v11449_v8 = vadd.f32 %v11448_v57, %v21834_v4  ;;  %v20022_v55 = vadd.f32 %v12109_v34, %v11668_v15 }
 0x506   : > { %v12328_v25 = vadd.f32 %v12327_v62, %v21833_v9  ;;  %v11450_v6 = vpop.f32.mrf.mxu1  ;;  %v11899_v60 = vpop.f32.mrf.mxu0  ;;  %v12112_v53 = vadd.f32 %v19813_v56, %v12036_v13  ;;  %v21836_v48 = vmax.f32 %v19988_v59, 0.0  ;;  %v12038_v2 = vmul.f32 %v19793_v39, %v11893_v24 }
 0x507   : > { %21835 = vst [vmem:[#allocation50_spill] sm:$0xff] %v20022_v55  ;;  %v11670_v5 = vadd.f32 %v19845_v35, %v11594_v43  ;;  %v11451_v58 = vadd.f32 %v11450_v6, %v19889_v51  ;;  %v20029_v62 = vadd.f32 %v12110_v49, %v11669_v46  ;;  %v11595_v9 = vmul.f32 %v19824_v41, %v11449_v8 }
 0x508   : > { %v12292_v17 = vadd.f32 %v12291_v54, %v21836_v48  ;;  %v11452_v57 = vpop.f32.mrf.mxu1  ;;  %v11901_v4 = vpop.f32.mrf.mxu0  ;;  %v21059_v34 = vmax.f32 %v20012_v44, 0.0  ;;  %v12039_v13 = vmul.f32 %v19816_v0, %v11895_v45  ;;  %v12329_v51 = vadd.f32 %v12328_v25, %v21058_v52 }
 0x509   : > { %v11596_v15 = vmul.f32 %v19833_v30, %v11451_v58  ;;  %v11453_v43 = vadd.f32 %v11452_v57, %v19594_v37  ;;  %v20039_v54 = vadd.f32 %v12111_v26, %v11670_v5  ;;  %v12113_v49 = vadd.f32 %v19839_v14, %v12037_v50 }
 0x50a   : > { %v11671_v8 = vadd.f32 %v19830_v32, %v11595_v9  ;;  %v11454_v24 = vpop.f32.mrf.mxu1  ;;  %v11903_v46 = vpop.f32.mrf.mxu0  ;;  %v21061_v6 = vmax.f32 %v20022_v55, 0.0  ;;  %v12040_v45 = vmul.f32 %v19793_v39, %v11899_v60  ;;  %v12114_v26 = vadd.f32 %v19813_v56, %v12038_v2 }
 0x50b   : > { %21837 = vst [vmem:[#allocation91_spill] sm:$0xff] %v20039_v54  ;;  %v11672_v48 = vadd.f32 %v19845_v35, %v11596_v15  ;;  %v11597_v58 = vmul.f32 %v19824_v41, %v11453_v43  ;;  %v11455_v25 = vadd.f32 %v11454_v24, %v19599_v1  ;;  %v12293_v9 = vadd.f32 %v12292_v17, %v21059_v34 }
 0x50c   : > { %v20048_v57 = vadd.f32 %v12112_v53, %v11671_v8  ;;  %v11458_v50 = vpop.f32.mrf.mxu1  ;;  %v11905_v5 = vpop.f32.mrf.mxu0  ;;  %v12115_v52 = vadd.f32 %v19839_v14, %v12039_v13  ;;  %v12041_v2 = vmul.f32 %v19816_v0, %v11901_v4  ;;  %v12330_v24 = vadd.f32 %v12329_v51, %v21061_v6 }
 0x50d   : > { %v11673_v15 = vadd.f32 %v19830_v32, %v11597_v58  ;;  %v11459_v43 = vadd.f32 %v11458_v50, %v19603_v23  ;;  %v20058_v37 = vadd.f32 %v12113_v49, %v11672_v48  ;;  %v11598_v53 = vmul.f32 %v19833_v30, %v11455_v25  ;;  %v21839_v58 = vld [vmem:[#allocation68_spill] sm:$0xff] }
 0x50e   : > { %v11460_v1 = vpop.f32.mrf.mxu1  ;;  %v11909_v8 = vpop.f32.mrf.mxu0  ;;  %v12116_v17 = vadd.f32 %v19813_v56, %v12040_v45  ;;  %v21840_v23 = vmax.f32 %v20029_v62, 0.0  ;;  %v12042_v4 = vmul.f32 %v19793_v39, %v11903_v46 }
 0x50f   : > { %21838 = vst [vmem:[#allocation47_spill] sm:$0xff] %v20058_v37  ;;  %v11599_v13 = vmul.f32 %v19824_v41, %v11459_v43  ;;  %v11461_v34 = vadd.f32 %v11460_v1, %v21839_v58  ;;  %v11674_v48 = vadd.f32 %v19845_v35, %v11598_v53  ;;  %v20072_v31 = vadd.f32 %v12114_v26, %v11673_v15 }
 0x510   : > { %v12294_v50 = vadd.f32 %v12293_v9, %v21840_v23  ;;  %v11462_v25 = vpop.f32.mrf.mxu1  ;;  %v11911_v60 = vpop.f32.mrf.mxu0  ;;  %v12043_v43 = vmul.f32 %v19816_v0, %v11905_v5  ;;  %v21841_v1 = vmax.f32 %v20039_v54, 0.0  ;;  %v21062_v9 = vmax.f32 %v20058_v37, 0.0 }
 0x511   : > { %v11675_v51 = vadd.f32 %v19830_v32, %v11599_v13  ;;  %v11600_v45 = vmul.f32 %v19833_v30, %v11461_v34  ;;  %v12117_v23 = vadd.f32 %v19839_v14, %v12041_v2  ;;  %v11463_v53 = vadd.f32 %v11462_v25, %v19617_v22 }
 0x512   : > { %v12331_v58 = vadd.f32 %v12330_v24, %v21841_v1  ;;  %v11464_v46 = vpop.f32.mrf.mxu1  ;;  %v11913_v6 = vpop.f32.mrf.mxu0  ;;  %v20082_v49 = vadd.f32 %v12115_v52, %v11674_v48  ;;  %v12044_v15 = vmul.f32 %v19793_v39, %v11909_v8  ;;  %v21843_v5 = vmax.f32 %v20048_v57, 0.0 }
 0x513   : > { %v11676_v26 = vadd.f32 %v19845_v35, %v11600_v45  ;;  %v11465_v34 = vadd.f32 %v11464_v46, %v19622_v63  ;;  %v20089_v24 = vadd.f32 %v12116_v17, %v11675_v51  ;;  %v12118_v1 = vadd.f32 %v19813_v56, %v12042_v4 }
 0x514   : > { %21842 = vst [vmem:[#allocation82_spill] sm:$0xff] %v20082_v49  ;;  %v12295_v13 = vadd.f32 %v12294_v50, %v21843_v5  ;;  %v11601_v2 = vmul.f32 %v19824_v41, %v11463_v53  ;;  %v11468_v22 = vpop.f32.mrf.mxu1  ;;  %v11915_v25 = vpop.f32.mrf.mxu0  ;;  %v21063_v52 = vmax.f32 %v20072_v31, 0.0  ;;  %v12119_v48 = vadd.f32 %v19839_v14, %v12043_v43 }
 0x515   : > { %v11602_v45 = vmul.f32 %v19833_v30, %v11465_v34  ;;  %v11469_v8 = vadd.f32 %v11468_v22, %v19625_v47  ;;  %v12332_v63 = vadd.f32 %v12331_v58, %v21062_v9  ;;  %v20099_v50 = vadd.f32 %v12117_v23, %v11676_v26 }
 0x516   : > { %v11677_v17 = vadd.f32 %v19830_v32, %v11601_v2  ;;  %v12045_v4 = vmul.f32 %v19816_v0, %v11911_v60  ;;  %v11470_v51 = vpop.f32.mrf.mxu1  ;;  %v11919_v53 = vpop.f32.mrf.mxu0  ;;  %v21065_v46 = vmax.f32 %v20082_v49, 0.0  ;;  %v12120_v5 = vadd.f32 %v19813_v56, %v12044_v15 }
 0x517   : > { %21844 = vst [vmem:[#allocation93_spill] sm:$0xff] %v20099_v50  ;;  %v11678_v43 = vadd.f32 %v19845_v35, %v11602_v45  ;;  %v11603_v34 = vmul.f32 %v19824_v41, %v11469_v8  ;;  %v12046_v58 = vmul.f32 %v19793_v39, %v11913_v6  ;;  %v11471_v23 = vadd.f32 %v11470_v51, %v19634_v3 }
 0x518   : > { %v20108_v22 = vadd.f32 %v12118_v1, %v11677_v17  ;;  %v11472_v26 = vpop.f32.mrf.mxu1  ;;  %v11921_v60 = vpop.f32.mrf.mxu0  ;;  %v12296_v2 = vadd.f32 %v12295_v13, %v21063_v52  ;;  %v12047_v15 = vmul.f32 %v19816_v0, %v11915_v25  ;;  %v12121_v1 = vadd.f32 %v19839_v14, %v12045_v4  ;;  %v21846_v25 = vld [vmem:[#allocation62_spill] sm:$0xff] }
 0x519   : > { %v11679_v9 = vadd.f32 %v19830_v32, %v11603_v34  ;;  %v11473_v45 = vadd.f32 %v11472_v26, %v19637_v12  ;;  %v20118_v47 = vadd.f32 %v12119_v48, %v11678_v43  ;;  %v11604_v6 = vmul.f32 %v19833_v30, %v11471_v23 }
 0x51a   : > { %v11474_v3 = vpop.f32.mrf.mxu1  ;;  %v11923_v17 = vpop.f32.mrf.mxu0  ;;  %v12333_v51 = vadd.f32 %v12332_v63, %v21065_v46  ;;  %v12048_v34 = vmul.f32 %v19793_v39, %v11919_v53  ;;  %v21847_v12 = vmax.f32 %v20089_v24, 0.0  ;;  %v12122_v4 = vadd.f32 %v19813_v56, %v12046_v58  ;;  %v21849_v58 = vld [vmem:[#allocation69_spill] sm:$0xff] }
 0x51b   : > { %21845 = vst [vmem:[#allocation43_spill] sm:$0xff] %v20118_v47  ;;  %v11605_v13 = vmul.f32 %v19824_v41, %v11473_v45  ;;  %v11475_v52 = vadd.f32 %v11474_v3, %v21846_v25  ;;  %v11680_v43 = vadd.f32 %v19845_v35, %v11604_v6  ;;  %v20132_v37 = vadd.f32 %v12120_v5, %v11679_v9 }
 0x51c   : > { %v12297_v26 = vadd.f32 %v12296_v2, %v21847_v12  ;;  %v11478_v23 = vpop.f32.mrf.mxu1  ;;  %v11925_v8 = vpop.f32.mrf.mxu0  ;;  %v12123_v63 = vadd.f32 %v19839_v14, %v12047_v15  ;;  %v21848_v3 = vmax.f32 %v20099_v50, 0.0  ;;  %v21068_v2 = vmax.f32 %v20118_v47, 0.0  ;;  %v21851_v15 = vld [vmem:[#allocation118_spill] sm:$0xff] }
 0x51d   : > { %v11681_v45 = vadd.f32 %v19830_v32, %v11605_v13  ;;  %v11606_v53 = vmul.f32 %v19833_v30, %v11475_v52  ;;  %v12049_v12 = vmul.f32 %v19816_v0, %v11921_v60  ;;  %v11479_v46 = vadd.f32 %v11478_v23, %v21849_v58 }
 0x51e   : > { %v12334_v25 = vadd.f32 %v12333_v51, %v21848_v3  ;;  %v11480_v6 = vpop.f32.mrf.mxu1  ;;  %v11929_v48 = vpop.f32.mrf.mxu0  ;;  %v20142_v49 = vadd.f32 %v12121_v1, %v11680_v43  ;;  %v12124_v9 = vadd.f32 %v19813_v56, %v12048_v34  ;;  %v21852_v52 = vmax.f32 %v20108_v22, 0.0 }
 0x51f   : > { %v11682_v5 = vadd.f32 %v19845_v35, %v11606_v53  ;;  %v11481_v13 = vadd.f32 %v11480_v6, %v21851_v15  ;;  %v20149_v51 = vadd.f32 %v12122_v4, %v11681_v45  ;;  %v11607_v3 = vmul.f32 %v19824_v41, %v11479_v46 }
 0x520   : > { %21850 = vst [vmem:[#allocation56_spill] sm:$0xff] %v20142_v49  ;;  %v12298_v50 = vadd.f32 %v12297_v26, %v21852_v52  ;;  %v12050_v60 = vmul.f32 %v19793_v39, %v11923_v17  ;;  %v11482_v23 = vpop.f32.mrf.mxu1  ;;  %v11931_v58 = vpop.f32.mrf.mxu0  ;;  %v21070_v1 = vmax.f32 %v20132_v37, 0.0  ;;  %v12051_v34 = vmul.f32 %v19816_v0, %v11925_v8 }
 0x521   : > { %v11608_v43 = vmul.f32 %v19833_v30, %v11481_v13  ;;  %v11483_v53 = vadd.f32 %v11482_v23, %v19657_v42  ;;  %v12335_v6 = vadd.f32 %v12334_v25, %v21068_v2  ;;  %v20159_v26 = vadd.f32 %v12123_v63, %v11682_v5 }
 0x522   : > { %v12125_v4 = vadd.f32 %v19839_v14, %v12049_v12  ;;  %v11683_v46 = vadd.f32 %v19830_v32, %v11607_v3  ;;  %v11484_v17 = vpop.f32.mrf.mxu1  ;;  %v11933_v45 = vpop.f32.mrf.mxu0  ;;  %v12052_v8 = vmul.f32 %v19793_v39, %v11929_v48  ;;  %v12126_v63 = vadd.f32 %v19813_v56, %v12050_v60 }
 0x523   : > { %21853 = vst [vmem:[#allocation123_spill] sm:$0xff] %v20159_v26  ;;  %v11684_v52 = vadd.f32 %v19845_v35, %v11608_v43  ;;  %v11609_v13 = vmul.f32 %v19824_v41, %v11483_v53  ;;  %v11485_v25 = vadd.f32 %v11484_v17, %v19660_v18  ;;  %v12299_v3 = vadd.f32 %v12298_v50, %v21070_v1  ;;  %v21854_v53 = vld [vmem:[#allocation159_spill] sm:$0xff] }
 0x524   : > { %v20168_v23 = vadd.f32 %v12124_v9, %v11683_v46  ;;  %v11488_v12 = vpop.f32.mrf.mxu1  ;;  %v11935_v5 = vpop.f32.mrf.mxu0  ;;  %v12127_v2 = vadd.f32 %v19839_v14, %v12051_v34  ;;  %v12053_v60 = vmul.f32 %v19816_v0, %v11931_v58  ;;  %v21856_v17 = vmax.f32 %v20142_v49, 0.0 }
 0x525   : > { %v11685_v43 = vadd.f32 %v19830_v32, %v11609_v13  ;;  %v11489_v15 = vadd.f32 %v11488_v12, %v21854_v53  ;;  %v20178_v42 = vadd.f32 %v12125_v4, %v11684_v52  ;;  %v11610_v9 = vmul.f32 %v19833_v30, %v11485_v25  ;;  %v21857_v13 = vld [vmem:[#allocation125_spill] sm:$0xff] }
 0x526   : > { %v11490_v18 = vpop.f32.mrf.mxu1  ;;  %v11939_v46 = vpop.f32.mrf.mxu0  ;;  %v12336_v47 = vadd.f32 %v12335_v6, %v21856_v17  ;;  %v12128_v50 = vadd.f32 %v19813_v56, %v12052_v8  ;;  %v21858_v12 = vmax.f32 %v20149_v51, 0.0  ;;  %v12054_v58 = vmul.f32 %v19793_v39, %v11933_v45 }
 0x527   : > { %21855 = vst [vmem:[#allocation132_spill] sm:$0xff] %v20178_v42  ;;  %v11611_v34 = vmul.f32 %v19824_v41, %v11489_v15  ;;  %v11491_v1 = vadd.f32 %v11490_v18, %v21857_v13  ;;  %v11686_v52 = vadd.f32 %v19845_v35, %v11610_v9  ;;  %v20192_v54 = vadd.f32 %v12126_v63, %v11685_v43 }
 0x528   : > { %v12300_v53 = vadd.f32 %v12299_v3, %v21858_v12  ;;  %v11492_v25 = vpop.f32.mrf.mxu1  ;;  %v11941_v48 = vpop.f32.mrf.mxu0  ;;  %v12055_v15 = vmul.f32 %v19816_v0, %v11935_v5  ;;  %v21859_v18 = vmax.f32 %v20159_v26, 0.0  ;;  %v12129_v13 = vadd.f32 %v19839_v14, %v12053_v60 }
 0x529   : > { %v11687_v6 = vadd.f32 %v19830_v32, %v11611_v34  ;;  %v11612_v8 = vmul.f32 %v19833_v30, %v11491_v1  ;;  %v11493_v9 = vadd.f32 %v11492_v25, %v19675_v28  ;;  %v20202_v4 = vadd.f32 %v12127_v2, %v11686_v52  ;;  %v21861_v1 = vld [vmem:[#allocation160_spill] sm:$0xff] }
 0x52a   : > { %v12337_v17 = vadd.f32 %v12336_v47, %v21859_v18  ;;  %v11494_v45 = vpop.f32.mrf.mxu1  ;;  %v11943_v12 = vpop.f32.mrf.mxu0  ;;  %v12056_v43 = vmul.f32 %v19793_v39, %v11939_v46  ;;  %v21862_v5 = vmax.f32 %v20168_v23, 0.0  ;;  %v12130_v18 = vadd.f32 %v19813_v56, %v12054_v58  ;;  %v21863_v46 = vld [vmem:[#allocation45_spill] sm:$0xff] }
 0x52b   : > { %21860 = vst [vmem:[#allocation147_spill] sm:$0xff] %v20202_v4  ;;  %v11688_v63 = vadd.f32 %v19845_v35, %v11612_v8  ;;  %v11495_v34 = vadd.f32 %v11494_v45, %v21861_v1  ;;  %v20209_v47 = vadd.f32 %v12128_v50, %v11687_v6  ;;  %v11613_v60 = vmul.f32 %v19824_v41, %v11493_v9 }
 0x52c   : > { %v12301_v26 = vadd.f32 %v12300_v53, %v21862_v5  ;;  %v11498_v28 = vpop.f32.mrf.mxu1  ;;  %v11945_v25 = vpop.f32.mrf.mxu0  ;;  %v12131_v52 = vadd.f32 %v19839_v14, %v12055_v15  ;;  %v21864_v45 = vmax.f32 %v20178_v42, 0.0  ;;  %v12057_v58 = vmul.f32 %v19816_v0, %v11941_v48 }
 0x52d   : > { %v11614_v8 = vmul.f32 %v19833_v30, %v11495_v34  ;;  %v11499_v3 = vadd.f32 %v11498_v28, %v21863_v46  ;;  %v20219_v53 = vadd.f32 %v12129_v13, %v11688_v63  ;;  %v11689_v50 = vadd.f32 %v19830_v32, %v11613_v60  ;;  %v21866_v13 = vld [vmem:[#allocation66_spill] sm:$0xff] }
 0x52e   : > { %v12338_v1 = vadd.f32 %v12337_v17, %v21864_v45  ;;  %v11500_v6 = vpop.f32.mrf.mxu1  ;;  %v11949_v9 = vpop.f32.mrf.mxu0  ;;  %v12132_v2 = vadd.f32 %v19813_v56, %v12056_v43  ;;  %v12058_v17 = vmul.f32 %v19793_v39, %v11943_v12  ;;  %v21867_v45 = vmax.f32 %v20192_v54, 0.0 }
 0x52f   : > { %21865 = vst [vmem:[#allocation64_spill] sm:$0xff] %v20219_v53  ;;  %v11690_v15 = vadd.f32 %v19845_v35, %v11614_v8  ;;  %v11615_v34 = vmul.f32 %v19824_v41, %v11499_v3  ;;  %v20228_v46 = vadd.f32 %v12130_v18, %v11689_v50  ;;  %v11501_v63 = vadd.f32 %v11500_v6, %v21866_v13 }
 0x530   : > { %v11502_v60 = vpop.f32.mrf.mxu1  ;;  %v11951_v48 = vpop.f32.mrf.mxu0  ;;  %v12302_v42 = vadd.f32 %v12301_v26, %v21867_v45  ;;  %v12059_v43 = vmul.f32 %v19816_v0, %v11945_v25  ;;  %v12133_v18 = vadd.f32 %v19839_v14, %v12057_v58  ;;  %v21869_v13 = vmax.f32 %v20202_v4, 0.0  ;;  %v21870_v25 = vld [vmem:[#allocation71_spill] sm:$0xff] }
 0x531   : > { %v11691_v5 = vadd.f32 %v19830_v32, %v11615_v34  ;;  %v11503_v8 = vadd.f32 %v11502_v60, %v19693_v20  ;;  %v20238_v28 = vadd.f32 %v12131_v52, %v11690_v15  ;;  %v11616_v12 = vmul.f32 %v19833_v30, %v11501_v63 }
 0x532   : > { %v11504_v50 = vpop.f32.mrf.mxu1  ;;  %v11953_v6 = vpop.f32.mrf.mxu0  ;;  %v12339_v49 = vadd.f32 %v12338_v1, %v21869_v13  ;;  %v12060_v34 = vmul.f32 %v19793_v39, %v11949_v9  ;;  %v21871_v20 = vmax.f32 %v20209_v47, 0.0  ;;  %v12134_v58 = vadd.f32 %v19813_v56, %v12058_v17  ;;  %v21873_v17 = vld [vmem:[#allocation67_spill] sm:$0xff] }
 0x533   : > { %21868 = vst [vmem:[#allocation54_spill] sm:$0xff] %v20238_v28  ;;  %v11617_v26 = vmul.f32 %v19824_v41, %v11503_v8  ;;  %v11505_v45 = vadd.f32 %v11504_v50, %v21870_v25  ;;  %v11692_v15 = vadd.f32 %v19845_v35, %v11616_v12  ;;  %v20252_v55 = vadd.f32 %v12132_v2, %v11691_v5 }
 0x534   : > { %v12303_v60 = vadd.f32 %v12302_v42, %v21871_v20  ;;  %v11508_v63 = vpop.f32.mrf.mxu1  ;;  %v11955_v3 = vpop.f32.mrf.mxu0  ;;  %v12135_v1 = vadd.f32 %v19839_v14, %v12059_v43  ;;  %v21872_v50 = vmax.f32 %v20219_v53, 0.0  ;;  %v21078_v42 = vmax.f32 %v20238_v28, 0.0  ;;  %v21875_v43 = vld [vmem:[#allocation161_spill] sm:$0xff] }
 0x535   : > { %v11693_v8 = vadd.f32 %v19830_v32, %v11617_v26  ;;  %v11618_v9 = vmul.f32 %v19833_v30, %v11505_v45  ;;  %v12061_v25 = vmul.f32 %v19816_v0, %v11951_v48  ;;  %v11509_v20 = vadd.f32 %v11508_v63, %v21873_v17 }
 0x536   : > { %v12340_v13 = vadd.f32 %v12339_v49, %v21872_v50  ;;  %v11510_v12 = vpop.f32.mrf.mxu1  ;;  %v11959_v52 = vpop.f32.mrf.mxu0  ;;  %v20262_v4 = vadd.f32 %v12133_v18, %v11692_v15  ;;  %v12136_v2 = vadd.f32 %v19813_v56, %v12060_v34  ;;  %v21876_v45 = vmax.f32 %v20228_v46, 0.0 }
 0x537   : > { %v11694_v5 = vadd.f32 %v19845_v35, %v11618_v9  ;;  %v11511_v26 = vadd.f32 %v11510_v12, %v21875_v43  ;;  %v20269_v49 = vadd.f32 %v12134_v58, %v11693_v8  ;;  %v11619_v50 = vmul.f32 %v19824_v41, %v11509_v20 }
 0x538   : > { %21874 = vst [vmem:[#allocation94_spill] sm:$0xff] %v20262_v4  ;;  %v12304_v53 = vadd.f32 %v12303_v60, %v21876_v45  ;;  %v12062_v48 = vmul.f32 %v19793_v39, %v11953_v6  ;;  %v11512_v63 = vpop.f32.mrf.mxu1  ;;  %v11961_v17 = vpop.f32.mrf.mxu0  ;;  %v21081_v18 = vmax.f32 %v20252_v55, 0.0  ;;  %v12063_v34 = vmul.f32 %v19816_v0, %v11955_v3 }
 0x539   : > { %v11620_v15 = vmul.f32 %v19833_v30, %v11511_v26  ;;  %v11513_v9 = vadd.f32 %v11512_v63, %v19711_v33  ;;  %v12341_v12 = vadd.f32 %v12340_v13, %v21078_v42  ;;  %v20279_v60 = vadd.f32 %v12135_v1, %v11694_v5  ;;  %v21878_v13 = vld [vmem:[#allocation127_spill] sm:$0xff] }
 0x53a   : > { %v12137_v58 = vadd.f32 %v19839_v14, %v12061_v25  ;;  %v11695_v8 = vadd.f32 %v19830_v32, %v11619_v50  ;;  %v11514_v6 = vpop.f32.mrf.mxu1  ;;  %v11963_v20 = vpop.f32.mrf.mxu0  ;;  %v12064_v3 = vmul.f32 %v19793_v39, %v11959_v52  ;;  %v12138_v1 = vadd.f32 %v19813_v56, %v12062_v48 }
 0x53b   : > { %21877 = vst [vmem:[#allocation63_spill] sm:$0xff] %v20279_v60  ;;  %v11696_v45 = vadd.f32 %v19845_v35, %v11620_v15  ;;  %v11621_v26 = vmul.f32 %v19824_v41, %v11513_v9  ;;  %v11515_v25 = vadd.f32 %v11514_v6, %v21878_v13  ;;  %v12305_v42 = vadd.f32 %v12304_v53, %v21081_v18  ;;  %v21879_v9 = vld [vmem:[#allocation162_spill] sm:$0xff] }
 0x53c   : > { %v20288_v63 = vadd.f32 %v12136_v2, %v11695_v8  ;;  %v11518_v5 = vpop.f32.mrf.mxu1  ;;  %v11965_v50 = vpop.f32.mrf.mxu0  ;;  %v12139_v43 = vadd.f32 %v19839_v14, %v12063_v34  ;;  %v12065_v48 = vmul.f32 %v19816_v0, %v11961_v17  ;;  %v21881_v13 = vmax.f32 %v20262_v4, 0.0 }
 0x53d   : > { %v11697_v15 = vadd.f32 %v19830_v32, %v11621_v26  ;;  %v11519_v28 = vadd.f32 %v11518_v5, %v21879_v9  ;;  %v20298_v33 = vadd.f32 %v12137_v58, %v11696_v45  ;;  %v11622_v2 = vmul.f32 %v19833_v30, %v11515_v25  ;;  %v21882_v26 = vld [vmem:[#allocation129_spill] sm:$0xff] }
 0x53e   : > { %v11520_v8 = vpop.f32.mrf.mxu1  ;;  %v11969_v6 = vpop.f32.mrf.mxu0  ;;  %v12342_v19 = vadd.f32 %v12341_v12, %v21881_v13  ;;  %v12140_v53 = vadd.f32 %v19813_v56, %v12064_v3  ;;  %v21883_v5 = vmax.f32 %v20269_v49, 0.0  ;;  %v12066_v17 = vmul.f32 %v19793_v39, %v11963_v20 }
 0x53f   : > { %21880 = vst [vmem:[#allocation65_spill] sm:$0xff] %v20298_v33  ;;  %v11623_v34 = vmul.f32 %v19824_v41, %v11519_v28  ;;  %v11521_v18 = vadd.f32 %v11520_v8, %v21882_v26  ;;  %v11698_v45 = vadd.f32 %v19845_v35, %v11622_v2  ;;  %v20312_v40 = vadd.f32 %v12138_v1, %v11697_v15 }
 0x540   : > { %v12306_v9 = vadd.f32 %v12305_v42, %v21883_v5  ;;  %v11522_v25 = vpop.f32.mrf.mxu1  ;;  %v11971_v52 = vpop.f32.mrf.mxu0  ;;  %v12067_v28 = vmul.f32 %v19816_v0, %v11965_v50  ;;  %v21884_v8 = vmax.f32 %v20279_v60, 0.0  ;;  %v12141_v26 = vadd.f32 %v19839_v14, %v12065_v48 }
 0x541   : > { %v11699_v12 = vadd.f32 %v19830_v32, %v11623_v34  ;;  %v11624_v3 = vmul.f32 %v19833_v30, %v11521_v18  ;;  %v11523_v2 = vadd.f32 %v11522_v25, %v19729_v11  ;;  %v20322_v58 = vadd.f32 %v12139_v43, %v11698_v45 }
 0x542   : > { %v12343_v13 = vadd.f32 %v12342_v19, %v21884_v8  ;;  %v11524_v20 = vpop.f32.mrf.mxu1  ;;  %v11973_v5 = vpop.f32.mrf.mxu0  ;;  %v12068_v15 = vmul.f32 %v19793_v39, %v11969_v6  ;;  %v21886_v50 = vmax.f32 %v20288_v63, 0.0  ;;  %v12142_v8 = vadd.f32 %v19813_v56, %v12066_v17  ;;  %v21887_v6 = vld [vmem:[#allocation163_spill] sm:$0xff] }
 0x543   : > { %21885 = vst [vmem:[#allocation59_spill] sm:$0xff] %v20322_v58  ;;  %v11700_v1 = vadd.f32 %v19845_v35, %v11624_v3  ;;  %v11525_v18 = vadd.f32 %v11524_v20, %v19732_v7  ;;  %v20329_v19 = vadd.f32 %v12140_v53, %v11699_v12  ;;  %v11625_v48 = vmul.f32 %v19824_v41, %v11523_v2 }
 0x544   : > { %v12307_v34 = vadd.f32 %v12306_v9, %v21886_v50  ;;  %v11528_v11 = vpop.f32.mrf.mxu1  ;;  %v11975_v25 = vpop.f32.mrf.mxu0  ;;  %v12143_v45 = vadd.f32 %v19839_v14, %v12067_v28  ;;  %v21888_v7 = vmax.f32 %v20298_v33, 0.0  ;;  %v12069_v17 = vmul.f32 %v19816_v0, %v11971_v52 }
 0x545   : > { %v11626_v3 = vmul.f32 %v19833_v30, %v11525_v18  ;;  %v11529_v42 = vadd.f32 %v11528_v11, %v21887_v6  ;;  %v20339_v9 = vadd.f32 %v12141_v26, %v11700_v1  ;;  %v11701_v53 = vadd.f32 %v19830_v32, %v11625_v48  ;;  %v21890_v26 = vld [vmem:[#allocation164_spill] sm:$0xff] }
 0x546   : > { %v12344_v20 = vadd.f32 %v12343_v13, %v21888_v7  ;;  %v11530_v12 = vpop.f32.mrf.mxu1  ;;  %v11979_v2 = vpop.f32.mrf.mxu0  ;;  %v12144_v43 = vadd.f32 %v19813_v56, %v12068_v15  ;;  %v12070_v13 = vmul.f32 %v19793_v39, %v11973_v5  ;;  %v21891_v7 = vmax.f32 %v20312_v40, 0.0 }
 0x547   : > { %21889 = vst [vmem:[#allocation12_spill] sm:$0xff] %v20339_v9  ;;  %v11702_v28 = vadd.f32 %v19845_v35, %v11626_v3  ;;  %v11627_v18 = vmul.f32 %v19824_v41, %v11529_v42  ;;  %v20348_v6 = vadd.f32 %v12142_v8, %v11701_v53  ;;  %v11531_v1 = vadd.f32 %v11530_v12, %v21890_v26 }
 0x548   : > { %v11532_v48 = vpop.f32.mrf.mxu1  ;;  %v11981_v52 = vpop.f32.mrf.mxu0  ;;  %v12308_v33 = vadd.f32 %v12307_v34, %v21891_v7  ;;  %v12071_v15 = vmul.f32 %v19816_v0, %v11975_v25  ;;  %v12145_v8 = vadd.f32 %v19839_v14, %v12069_v17  ;;  %v21893_v26 = vmax.f32 %v20322_v58, 0.0 }
 0x549   : > { %v11703_v50 = vadd.f32 %v19830_v32, %v11627_v18  ;;  %v11533_v3 = vadd.f32 %v11532_v48, %v19747_v61  ;;  %v20358_v11 = vadd.f32 %v12143_v45, %v11702_v28  ;;  %v11628_v5 = vmul.f32 %v19833_v30, %v11531_v1 }
 0x54a   : > { %v11534_v53 = vpop.f32.mrf.mxu1  ;;  %v11983_v12 = vpop.f32.mrf.mxu0  ;;  %v12345_v60 = vadd.f32 %v12344_v20, %v21893_v26  ;;  %v12072_v18 = vmul.f32 %v19793_v39, %v11979_v2  ;;  %v21894_v61 = vmax.f32 %v20329_v19, 0.0  ;;  %v12146_v17 = vadd.f32 %v19813_v56, %v12070_v13  ;;  %v21896_v13 = vld [vmem:[#allocation165_spill] sm:$0xff] }
 0x54b   : > { %21892 = vst [vmem:[#allocation13_spill] sm:$0xff] %v20358_v11  ;;  %v11629_v34 = vmul.f32 %v19824_v41, %v11533_v3  ;;  %v11535_v25 = vadd.f32 %v11534_v53, %v19750_v21  ;;  %v11704_v28 = vadd.f32 %v19845_v35, %v11628_v5  ;;  %v20372_v42 = vadd.f32 %v12144_v43, %v11703_v50 }
 0x54c   : > { %v12309_v48 = vadd.f32 %v12308_v33, %v21894_v61  ;;  %v11538_v1 = vpop.f32.mrf.mxu1  ;;  %v11985_v7 = vpop.f32.mrf.mxu0  ;;  %v12147_v20 = vadd.f32 %v19839_v14, %v12071_v15  ;;  %v21895_v21 = vmax.f32 %v20339_v9, 0.0  ;;  %v21087_v33 = vmax.f32 %v20358_v11, 0.0  ;;  %v21898_v15 = vld [vmem:[#allocation130_spill] sm:$0xff] }
 0x54d   : > { %v11705_v3 = vadd.f32 %v19830_v32, %v11629_v34  ;;  %v11630_v2 = vmul.f32 %v19833_v30, %v11535_v25  ;;  %v12073_v26 = vmul.f32 %v19816_v0, %v11981_v52  ;;  %v11539_v61 = vadd.f32 %v11538_v1, %v21896_v13 }
 0x54e   : > { %v12346_v53 = vadd.f32 %v12345_v60, %v21895_v21  ;;  %v11540_v5 = vpop.f32.mrf.mxu1  ;;  %v11989_v45 = vpop.f32.mrf.mxu0  ;;  %v20382_v58 = vadd.f32 %v12145_v8, %v11704_v28  ;;  %v12148_v43 = vadd.f32 %v19813_v56, %v12072_v18  ;;  %v21899_v25 = vmax.f32 %v20348_v6, 0.0 }
 0x54f   : > { %v11706_v50 = vadd.f32 %v19845_v35, %v11630_v2  ;;  %v11541_v34 = vadd.f32 %v11540_v5, %v21898_v15  ;;  %v20389_v60 = vadd.f32 %v12146_v17, %v11705_v3  ;;  %v11631_v21 = vmul.f32 %v19824_v41, %v11539_v61 }
 0x550   : > { %21897 = vst [vmem:[#allocation122_spill] sm:$0xff] %v20382_v58  ;;  %v12310_v9 = vadd.f32 %v12309_v48, %v21899_v25  ;;  %v12074_v52 = vmul.f32 %v19793_v39, %v11983_v12  ;;  %v11542_v1 = vpop.f32.mrf.mxu1  ;;  %v11991_v13 = vpop.f32.mrf.mxu0  ;;  %v21089_v8 = vmax.f32 %v20372_v42, 0.0  ;;  %v12075_v18 = vmul.f32 %v19816_v0, %v11985_v7 }
 0x551   : > { %v11632_v28 = vmul.f32 %v19833_v30, %v11541_v34  ;;  %v11543_v2 = vadd.f32 %v11542_v1, %v19765_v29  ;;  %v12347_v5 = vadd.f32 %v12346_v53, %v21087_v33  ;;  %v20399_v48 = vadd.f32 %v12147_v20, %v11706_v50 }
 0x552   : > { %v12149_v17 = vadd.f32 %v19839_v14, %v12073_v26  ;;  %v11707_v3 = vadd.f32 %v19830_v32, %v11631_v21  ;;  %v11544_v12 = vpop.f32.mrf.mxu1  ;;  %v11993_v61 = vpop.f32.mrf.mxu0  ;;  %v12076_v7 = vmul.f32 %v19793_v39, %v11989_v45  ;;  %v12150_v20 = vadd.f32 %v19813_v56, %v12074_v52 }
 0x553   : > { %21900 = vst [vmem:[#allocation70_spill] sm:$0xff] %v20399_v48  ;;  %v11708_v25 = vadd.f32 %v19845_v35, %v11632_v28  ;;  %v11633_v34 = vmul.f32 %v19824_v41, %v11543_v2  ;;  %v11545_v53 = vadd.f32 %v11544_v12, %v19768_v16  ;;  %v12311_v21 = vadd.f32 %v12310_v9, %v21089_v8  ;;  %v21901_v2 = vld [vmem:[#allocation126_spill] sm:$0xff] }
 0x554   : > { %v20408_v1 = vadd.f32 %v12148_v43, %v11707_v3  ;;  %v11548_v26 = vpop.f32.mrf.mxu1  ;;  %v11995_v50 = vpop.f32.mrf.mxu0  ;;  %v12151_v33 = vadd.f32 %v19839_v14, %v12075_v18  ;;  %v12077_v52 = vmul.f32 %v19816_v0, %v11991_v13  ;;  %v21902_v12 = vmax.f32 %v20382_v58, 0.0 }
 0x555   : > { %v11709_v28 = vadd.f32 %v19830_v32, %v11633_v34  ;;  %v11549_v15 = vadd.f32 %v11548_v26, %v21901_v2  ;;  %v20418_v29 = vadd.f32 %v12149_v17, %v11708_v25  ;;  %v11634_v43 = vmul.f32 %v19833_v30, %v11545_v53  ;;  %v21903_v34 = vld [vmem:[#allocation77_spill] sm:$0xff] }
 0x556   : > { %v11550_v16 = vpop.f32.mrf.mxu1  ;;  %v11999_v3 = vpop.f32.mrf.mxu0  ;;  %v12348_v11 = vadd.f32 %v12347_v5, %v21902_v12  ;;  %v12152_v9 = vadd.f32 %v19813_v56, %v12076_v7  ;;  %v21904_v26 = vmax.f32 %v20389_v60, 0.0  ;;  %v12078_v13 = vmul.f32 %v19793_v39, %v11993_v61 }
 0x557   : > { %v11635_v18 = vmul.f32 %v19824_v41, %v11549_v15  ;;  %v11551_v8 = vadd.f32 %v11550_v16, %v21903_v34  ;;  %v11710_v25 = vadd.f32 %v19845_v35, %v11634_v43  ;;  %v20432_v4 = vadd.f32 %v12150_v20, %v11709_v28  ;;  %v21906_v43 = vld [vmem:[#allocation166_spill] sm:$0xff] }
 0x558   : > { %v12312_v2 = vadd.f32 %v12311_v21, %v21904_v26  ;;  %v11552_v53 = vpop.f32.mrf.mxu1  ;;  %v12001_v45 = vpop.f32.mrf.mxu0  ;;  %v12079_v15 = vmul.f32 %v19816_v0, %v11995_v50  ;;  %v21905_v16 = vmax.f32 %v20399_v48, 0.0  ;;  %v21093_v21 = vmax.f32 %v20418_v29, 0.0 }
 0x559   : > { %v11711_v5 = vadd.f32 %v19830_v32, %v11635_v18  ;;  %v11636_v7 = vmul.f32 %v19833_v30, %v11551_v8  ;;  %v12153_v34 = vadd.f32 %v19839_v14, %v12077_v52  ;;  %v11553_v26 = vadd.f32 %v11552_v53, %v21906_v43  ;;  %v21907_v18 = vld [vmem:[#allocation167_spill] sm:$0xff] }
 0x55a   : > { %v12349_v12 = vadd.f32 %v12348_v11, %v21905_v16  ;;  %v11554_v61 = vpop.f32.mrf.mxu1  ;;  %v20442_v17 = vadd.f32 %v12151_v33, %v11710_v25  ;;  %v12080_v28 = vmul.f32 %v19793_v39, %v11999_v3  ;;  %v12003_v58 = vpop.f32.mrf.mxu0  ;;  %v21908_v50 = vmax.f32 %v20408_v1, 0.0  ;;  %v21909_v3 = vld [vmem:[#allocation168_spill] sm:$0xff] }
 0x55b   : > { %v11712_v20 = vadd.f32 %v19845_v35, %v11636_v7  ;;  %v11555_v8 = vadd.f32 %v11554_v61, %v21907_v18  ;;  %v20449_v11 = vadd.f32 %v12152_v9, %v11711_v5  ;;  %v12154_v16 = vadd.f32 %v19813_v56, %v12078_v13 }
 0x55c   : > { %v12313_v48 = vadd.f32 %v12312_v2, %v21908_v50  ;;  %v11637_v52 = vmul.f32 %v19824_v41, %v11553_v26  ;;  %v11558_v53 = vpop.f32.mrf.mxu1  ;;  %v12278_v33 = vmax.f32 %v20432_v4, 0.0  ;;  %v12155_v25 = vadd.f32 %v19839_v14, %v12079_v15  ;;  %v12005_v50 = vpop.f32.mrf.mxu0 }
 0x55d   : > { %v11638_v7 = vmul.f32 %v19833_v30, %v11555_v8  ;;  %v11559_v43 = vadd.f32 %v11558_v53, %v21909_v3  ;;  %v12350_v61 = vadd.f32 %v12349_v12, %v21093_v21  ;;  %v20459_v18 = vadd.f32 %v12153_v34, %v11712_v20  ;;  %v21910_v34 = vld [vmem:[#allocation75_spill] sm:$0xff] }
 0x55e   : > { %v11713_v9 = vadd.f32 %v19830_v32, %v11637_v52  ;;  %v12081_v2 = vmul.f32 %v19816_v0, %v12001_v45  ;;  %v11560_v13 = vpop.f32.mrf.mxu1  ;;  %v12156_v26 = vadd.f32 %v19813_v56, %v12080_v28  ;;  %v12082_v12 = vmul.f32 %v19793_v39, %v12003_v58 }
 0x55f   : > { %v11714_v15 = vadd.f32 %v19845_v35, %v11638_v7  ;;  %v11639_v8 = vmul.f32 %v19824_v41, %v11559_v43  ;;  %v11561_v20 = vadd.f32 %v11560_v13, %v21910_v34  ;;  %v12314_v45 = vadd.f32 %v12313_v48, %v12278_v33  ;;  %v21911_v7 = vld [vmem:[#allocation78_spill] sm:$0xff] }
 0x560   : > { %v20468_v3 = vadd.f32 %v12154_v16, %v11713_v9  ;;  %v11562_v52 = vpop.f32.mrf.mxu1  ;;  %v12281_v43 = vmax.f32 %v20459_v18, 0.0  ;;  %v12157_v53 = vadd.f32 %v19839_v14, %v12081_v2  ;;  %v12083_v39 = vmul.f32 %v19816_v0, %v12005_v50 }
 0x561   : > { %v20474_v21 = vadd.f32 %v12155_v25, %v11714_v15  ;;  %v11715_v28 = vadd.f32 %v19830_v32, %v11639_v8  ;;  %v11563_v5 = vadd.f32 %v11562_v52, %v21911_v7  ;;  %v11640_v16 = vmul.f32 %v19833_v30, %v11561_v20  ;;  %v21912_v25 = vld [vmem:[#allocation79_spill] sm:$0xff] }
 0x562   : > { %v11564_v58 = vpop.f32.mrf.mxu1  ;;  %v12282_v9 = vmax.f32 %v20468_v3, 0.0  ;;  %v21913_v8 = vmax.f32 %v20442_v17, 0.0  ;;  %v21914_v52 = vmax.f32 %v20449_v11, 0.0  ;;  %v12158_v2 = vadd.f32 %v19813_v56, %v12082_v12 }
 0x563   : > { %v20483_v13 = vadd.f32 %v12156_v26, %v11715_v28  ;;  %v11641_v48 = vmul.f32 %v19824_v41, %v11563_v5  ;;  %v11565_v15 = vadd.f32 %v11564_v58, %v21912_v25  ;;  %v11716_v20 = vadd.f32 %v19845_v35, %v11640_v16 }
 0x564   : > { %v12351_v34 = vadd.f32 %v12350_v61, %v21913_v8  ;;  %v12315_v7 = vadd.f32 %v12314_v45, %v21914_v52  ;;  %v12283_v0 = vmax.f32 %v20474_v21, 0.0  ;;  %v12159_v28 = vadd.f32 %v19839_v14, %v12083_v39 }
 0x565   : > { %v12284_v50 = vmax.f32 %v20483_v13, 0.0  ;;  %v11717_v26 = vadd.f32 %v19830_v32, %v11641_v48  ;;  %v11642_v41 = vmul.f32 %v19833_v30, %v11565_v15  ;;  %v20497_v5 = vadd.f32 %v12157_v53, %v11716_v20  ;;  %v21947_v13 = vld [vmem:[#allocation83_spill] sm:$0xff] }
 0x566   : > { %v12352_v61 = vadd.f32 %v12351_v34, %v12281_v43  ;;  %v12316_v56 = vadd.f32 %v12315_v7, %v12282_v9 }
 0x567   : > { %v20504_v12 = vadd.f32 %v12158_v2, %v11717_v26  ;;  %v11718_v45 = vadd.f32 %v19845_v35, %v11642_v41  ;;  %v21094_v16 = vmax.f32 %v20497_v5, 0.0 }
 0x568   : > { %v12353_v32 = vadd.f32 %v12352_v61, %v12283_v0  ;;  %v12317_v30 = vadd.f32 %v12316_v56, %v12284_v50 }
 0x569   : > { %v12286_v14 = vmax.f32 %v20504_v12, 0.0  ;;  %v20513_v53 = vadd.f32 %v12159_v28, %v11718_v45 }
 0x56a   : > { %v12354_v39 = vadd.f32 %v12353_v32, %v21094_v16 }
 0x56b   : > { %v12318_v58 = vadd.f32 %v12317_v30, %v12286_v14  ;;  %v12287_v35 = vmax.f32 %v20513_v53, 0.0 }
 0x56d   : > { %v12319_v48 = vrot.slane %v12318_v58, 4  ;;  %v12355_v25 = vadd.f32 %v12354_v39, %v12287_v35 }
 0x56f   : > { %v12320_v15 = vadd.f32 %v12319_v48, %v12318_v58  ;;  %v12356_v8 = vrot.slane %v12355_v25, 4 }
 0x571   : > { %v12321_v34 = vrot.slane %v12320_v15, 2  ;;  %v12357_v52 = vadd.f32 %v12356_v8, %v12355_v25 }
 0x573   : > { %v12322_v7 = vadd.f32 %v12321_v34, %v12320_v15  ;;  %v12358_v2 = vrot.slane %v12357_v52, 2 }
 0x575   : > { %v12323_v20 = vrot.slane %v12322_v7, 1  ;;  %v12359_v26 = vadd.f32 %v12358_v2, %v12357_v52 }
 0x577   : > { %v12360_v41 = vrot.slane %v12359_v26, 1  ;;  %v12324_v28 = vadd.f32 %v12323_v20, %v12322_v7  ;;  %v21915_v20 = vld [vmem:[#allocation57_spill] sm:$0xff] }
 0x579   : > { %v12361_v61 = vadd.f32 %v12360_v41, %v12359_v26  ;;  %v12363_v45 = vmul.f32 0.00390625, %v12324_v28  ;;  %v21917_v28 = vld [vmem:[#allocation128_spill] sm:$0xff] }
 0x57b   : > { %v12364_v56 = vmul.f32 0.00390625, %v12361_v61  ;;  %v21918_v61 = vmax.f32 %v21917_v28, 0.0 }
 0x57d   : > { %12461 = vmatprep.mubr.f32.mxu0 %v12364_v56 }
 0x57e   : > { %12462 = vmatmul.mubr.f32.vlgmr.msra.gmra.mxu0 %v12363_v45  ;;  %v21919_v45 = vmax.f32 %v19897_v36, 0.0  ;;  %v21926_v36 = vmax.f32 %v20072_v31, 0.0  ;;  %v21930_v31 = vmax.f32 %v20149_v51, 0.0 }
 0x63e   : > { %v14230_v32 = vpop.f32.mrf.mxu0 }
 0x640   : > { %v14231_v30 = vpop.f32.mrf.mxu0 }
 0x641   : > { %v14232_v16 = vadd.f32 %v14231_v30, %v14230_v32  ;;  %v21920_v30 = vmax.f32 %v19920_v10, 0.0  ;;  %v21927_v10 = vmax.f32 %v20089_v24, 0.0 }
 0x643   : > { %v12467_v39 = vmax.f32 %v14232_v16, 0.0  ;;  %v21916_v16 = vmax.f32 %v19858_v27, 0.0  ;;  %v21924_v27 = vmax.f32 %v20029_v62, 0.0 }
 0x645   : > { %13873 = vmatmul.mubr.msk.f32.vlgmr.msra.gmra.mxu1 %vm12472_vm3, %v12467_v39 }
 0x705   : > { %v12542_v58 = vpop.f32.mrf.mxu1 }
 0x706   : > { %v13874_v48 = vmul.f32 -1.442695, %v12542_v58  ;;  %v21921_v58 = vmax.f32 %v19954_v38, 0.0  ;;  %v21928_v38 = vmax.f32 %v20108_v22, 0.0  ;;  %v21932_v22 = vmax.f32 %v20192_v54, 0.0 }
 0x707   : > { %v12544_v25 = vpop.f32.mrf.mxu1  ;;  %v21936_v54 = vmax.f32 %v20269_v49, 0.0  ;;  %v21940_v49 = vmax.f32 %v20348_v6, 0.0 }
 0x708   : > { %15189 = vpow2.f32 %v13874_v48  ;;  %v13875_v15 = vmul.f32 -1.442695, %v12544_v25  ;;  %v21922_v25 = vmax.f32 %v19988_v59, 0.0  ;;  %v21929_v59 = vmax.f32 %v20132_v37, 0.0 }
 0x70a   : > { %15191 = vpow2.f32 %v13875_v15 }
 0x715   : > { %v15190_v8 = vpop.eup %15189 }
 0x716   : > { %v12553_v34 = vadd.f32 1.0, %v15190_v8  ;;  %v21923_v8 = vmax.f32 %v20012_v44, 0.0 }
 0x717   : > { %v15192_v52 = vpop.eup %15191 }
 0x718   : > { %15193 = vrcp.f32 %v12553_v34  ;;  %v12554_v7 = vadd.f32 1.0, %v15192_v52 }
 0x71a   : > { %15195 = vrcp.f32 %v12554_v7  ;;  %v21925_v7 = vmax.f32 %v20048_v57, 0.0  ;;  %v21931_v57 = vmax.f32 %v20168_v23, 0.0  ;;  %v21935_v23 = vmax.f32 %v20252_v55, 0.0 }
 0x71b   : > { %v21939_v55 = vmax.f32 %v20329_v19, 0.0  ;;  %v21943_v19 = vmax.f32 %v20408_v1, 0.0 }
 0x725   : > { %v15194_v2 = vpop.eup %15193 }
 0x726   : > { %v12562_v26 = vrot.slane %v15194_v2, %v21915_v20 }
 0x728   : > { %v12567_v41 = vmul.f32 %v12562_v26, %v21916_v16  ;;  %v12569_v56 = vmul.f32 %v12562_v26, %v21918_v61  ;;  %v12571_v32 = vmul.f32 %v12562_v26, %v21919_v45  ;;  %v12573_v39 = vmul.f32 %v12562_v26, %v21920_v30 }
 0x729   : > { %v12575_v48 = vmul.f32 %v12562_v26, %v21921_v58  ;;  %v12577_v15 = vmul.f32 %v12562_v26, %v21922_v25  ;;  %v12579_v34 = vmul.f32 %v12562_v26, %v21923_v8  ;;  %v12581_v52 = vmul.f32 %v12562_v26, %v21924_v27 }
 0x72a   : > { %v12583_v2 = vmul.f32 %v12562_v26, %v21925_v7  ;;  %v12585_v16 = vmul.f32 %v12562_v26, %v21926_v36  ;;  %v12587_v28 = vmul.f32 %v12562_v26, %v21927_v10  ;;  %v12589_v61 = vmul.f32 %v12562_v26, %v21928_v38  ;;  %12631 = vst [vmem:[%s20550_s19] sm:$0xff] %v12567_v41  ;;  %v21951_v7 = vld [vmem:[#allocation76_spill] sm:$0xff]  ;;  %v21955_v38 = vld [vmem:[#allocation81_spill] sm:$0xff] }
 0x72b   : > { %12633 = vst [vmem:[%s20550_s19 + $0x10] sm:$0xff] %v12569_v56  ;;  %12635 = vst [vmem:[%s20550_s19 + $0x20] sm:$0xff] %v12571_v32  ;;  %v12591_v44 = vmul.f32 %v12562_v26, %v21929_v59  ;;  %v12593_v62 = vmul.f32 %v12562_v26, %v21930_v31  ;;  %v12595_v24 = vmul.f32 %v12562_v26, %v21931_v57  ;;  %v21933_v41 = vmax.f32 %v20209_v47, 0.0  ;;  %v15196_v47 = vpop.eup %15195  ;;  %v21959_v57 = vld [vmem:[#allocation91_spill] sm:$0xff] }
 0x72c   : > { %12637 = vst [vmem:[%s20550_s19 + $0x30] sm:$0xff] %v12573_v39  ;;  %v12597_v45 = vmul.f32 %v12562_v26, %v21932_v22  ;;  %12639 = vst [vmem:[%s20550_s19 + $0x40] sm:$0xff] %v12575_v48  ;;  %v21934_v56 = vmax.f32 %v20228_v46, 0.0  ;;  %v12603_v32 = vmul.f32 %v12562_v26, %v21935_v23  ;;  %v12605_v30 = vmul.f32 %v12562_v26, %v21936_v54 }
 0x72d   : > { %12641 = vst [vmem:[%s20550_s19 + $0x50] sm:$0xff] %v12577_v15  ;;  %12643 = vst [vmem:[%s20550_s19 + $0x60] sm:$0xff] %v12579_v34  ;;  %v12599_v37 = vmul.f32 %v12562_v26, %v21933_v41  ;;  %v21937_v39 = vmax.f32 %v20288_v63, 0.0  ;;  %v21938_v58 = vmax.f32 %v20312_v40, 0.0  ;;  %v12611_v25 = vmul.f32 %v12562_v26, %v21939_v55 }
 0x72e   : > { %12645 = vst [vmem:[%s20550_s19 + $0x70] sm:$0xff] %v12581_v52  ;;  %v12601_v51 = vmul.f32 %v12562_v26, %v21934_v56  ;;  %12647 = vst [vmem:[%s20550_s19 + $0x80] sm:$0xff] %v12583_v2  ;;  %v12613_v15 = vmul.f32 %v12562_v26, %v21940_v49  ;;  %v21941_v63 = vmax.f32 %v20372_v42, 0.0  ;;  %v21942_v40 = vmax.f32 %v20389_v60, 0.0  ;;  %v21963_v56 = vld [vmem:[#allocation82_spill] sm:$0xff] }
 0x72f   : > { %12649 = vst [vmem:[%s20550_s19 + $0x90] sm:$0xff] %v12585_v16  ;;  %12651 = vst [vmem:[%s20550_s19 + $0xa0] sm:$0xff] %v12587_v28  ;;  %v12607_v46 = vmul.f32 %v12562_v26, %v21937_v39  ;;  %v12609_v48 = vmul.f32 %v12562_v26, %v21938_v58  ;;  %v12619_v27 = vmul.f32 %v12562_v26, %v21943_v19  ;;  %v21944_v42 = vmax.f32 %v20449_v11, 0.0  ;;  %v21945_v11 = vld [vmem:[#allocation84_spill] sm:$0xff]  ;;  %v21953_v16 = vld [vmem:[#allocation74_spill] sm:$0xff] }
 0x730   : > { %12653 = vst [vmem:[%s20550_s19 + $0xb0] sm:$0xff] %v12589_v61  ;;  %12655 = vst [vmem:[%s20550_s19 + $0xc0] sm:$0xff] %v12591_v44  ;;  %v12615_v8 = vmul.f32 %v12562_v26, %v21941_v63  ;;  %v12617_v34 = vmul.f32 %v12562_v26, %v21942_v40  ;;  %v12621_v6 = vmul.f32 %v12562_v26, %v12278_v33  ;;  %v21946_v3 = vmax.f32 %v21945_v11, 0.0  ;;  %v21957_v44 = vld [vmem:[#allocation50_spill] sm:$0xff]  ;;  %v21969_v58 = vld [vmem:[#allocation56_spill] sm:$0xff] }
 0x731   : > { %12657 = vst [vmem:[%s20550_s19 + $0xd0] sm:$0xff] %v12593_v62  ;;  %12659 = vst [vmem:[%s20550_s19 + $0xe0] sm:$0xff] %v12595_v24  ;;  %v12623_v60 = vmul.f32 %v12562_v26, %v21944_v42  ;;  %v12625_v1 = vmul.f32 %v12562_v26, %v12282_v9  ;;  %v12627_v4 = vmul.f32 %v12562_v26, %v12284_v50  ;;  %v21948_v50 = vmax.f32 %v21947_v13, 0.0  ;;  %v21973_v63 = vld [vmem:[#allocation132_spill] sm:$0xff]  ;;  %v21981_v11 = vld [vmem:[#allocation94_spill] sm:$0xff] }
 0x732   : > { %12661 = vst [vmem:[%s20550_s19 + $0xf0] sm:$0xff] %v12597_v45  ;;  %12663 = vst [vmem:[%s20550_s19 + $0x100] sm:$0xff] %v12599_v37  ;;  %v12629_v33 = vmul.f32 %v12562_v26, %v12286_v14  ;;  %v20617_v52 = vrot.slane %v15196_v47, %v21915_v20  ;;  %v21949_v14 = vld [vmem:[#allocation90_spill] sm:$0xff]  ;;  %v21952_v2 = vmax.f32 %v21951_v7, 0.0  ;;  %v21954_v10 = vmax.f32 %v21953_v16, 0.0  ;;  %v21961_v45 = vld [vmem:[#allocation47_spill] sm:$0xff] }
 0x733   : > { %12665 = vst [vmem:[%s20550_s19 + $0x110] sm:$0xff] %v12601_v51  ;;  %12667 = vst [vmem:[%s20550_s19 + $0x120] sm:$0xff] %v12603_v32  ;;  %v21950_v20 = vmax.f32 %v21949_v14, 0.0  ;;  %v21956_v61 = vmax.f32 %v21955_v38, 0.0  ;;  %v21958_v31 = vmax.f32 %v21957_v44, 0.0  ;;  %v21960_v24 = vmax.f32 %v21959_v57, 0.0 }
 0x734   : > { %12669 = vst [vmem:[%s20550_s19 + $0x130] sm:$0xff] %v12605_v30  ;;  %12671 = vst [vmem:[%s20550_s19 + $0x140] sm:$0xff] %v12607_v46  ;;  %v12568_v9 = vmul.f32 %v20617_v52, %v21946_v3  ;;  %v12570_v12 = vmul.f32 %v20617_v52, %v21948_v50  ;;  %v12574_v36 = vmul.f32 %v20617_v52, %v21952_v2  ;;  %v21962_v41 = vmax.f32 %v21961_v45, 0.0  ;;  %v21965_v32 = vld [vmem:[#allocation93_spill] sm:$0xff]  ;;  %v21967_v47 = vld [vmem:[#allocation43_spill] sm:$0xff] }
 0x735   : > { %12673 = vst [vmem:[%s20550_s19 + $0x150] sm:$0xff] %v12609_v48  ;;  %12675 = vst [vmem:[%s20550_s19 + $0x160] sm:$0xff] %v12611_v25  ;;  %v12572_v26 = vmul.f32 %v20617_v52, %v21950_v20  ;;  %v12576_v28 = vmul.f32 %v20617_v52, %v21954_v10  ;;  %v12578_v59 = vmul.f32 %v20617_v52, %v21956_v61  ;;  %v21964_v51 = vmax.f32 %v21963_v56, 0.0  ;;  %v21971_v25 = vld [vmem:[#allocation123_spill] sm:$0xff]  ;;  %v21985_v14 = vld [vmem:[#allocation65_spill] sm:$0xff] }
 0x736   : > { %12677 = vst [vmem:[%s20550_s19 + $0x170] sm:$0xff] %v12613_v15  ;;  %12679 = vst [vmem:[%s20550_s19 + $0x180] sm:$0xff] %v12615_v8  ;;  %v12580_v62 = vmul.f32 %v20617_v52, %v21958_v31  ;;  %v12582_v22 = vmul.f32 %v20617_v52, %v21960_v24  ;;  %v12584_v37 = vmul.f32 %v20617_v52, %v21962_v41  ;;  %v21966_v54 = vmax.f32 %v21965_v32, 0.0  ;;  %v21983_v13 = vld [vmem:[#allocation63_spill] sm:$0xff]  ;;  %v21989_v16 = vld [vmem:[#allocation12_spill] sm:$0xff] }
 0x737   : > { %12681 = vst [vmem:[%s20550_s19 + $0x190] sm:$0xff] %v12617_v34  ;;  %12683 = vst [vmem:[%s20550_s19 + $0x1a0] sm:$0xff] %v12619_v27  ;;  %v12586_v23 = vmul.f32 %v20617_v52, %v21964_v51  ;;  %v21968_v39 = vmax.f32 %v21967_v47, 0.0  ;;  %v21970_v48 = vmax.f32 %v21969_v58, 0.0  ;;  %v21972_v49 = vmax.f32 %v21971_v25, 0.0  ;;  %v21975_v34 = vld [vmem:[#allocation147_spill] sm:$0xff] }
 0x738   : > { %12685 = vst [vmem:[%s20550_s19 + $0x1b0] sm:$0xff] %v12621_v6  ;;  %12687 = vst [vmem:[%s20550_s19 + $0x1c0] sm:$0xff] %v12623_v60  ;;  %v12588_v30 = vmul.f32 %v20617_v52, %v21966_v54  ;;  %v21974_v8 = vmax.f32 %v21973_v63, 0.0  ;;  %v21976_v19 = vmax.f32 %v21975_v34, 0.0  ;;  %v21977_v6 = vld [vmem:[#allocation64_spill] sm:$0xff]  ;;  %v21982_v3 = vmax.f32 %v21981_v11, 0.0 }
 0x739   : > { %12689 = vst [vmem:[%s20550_s19 + $0x1d0] sm:$0xff] %v12625_v1  ;;  %12691 = vst [vmem:[%s20550_s19 + $0x1e0] sm:$0xff] %v12627_v4  ;;  %v12590_v46 = vmul.f32 %v20617_v52, %v21968_v39  ;;  %v12592_v55 = vmul.f32 %v20617_v52, %v21970_v48  ;;  %v12594_v15 = vmul.f32 %v20617_v52, %v21972_v49  ;;  %v21978_v42 = vmax.f32 %v21977_v6, 0.0  ;;  %v21979_v1 = vld [vmem:[#allocation54_spill] sm:$0xff]  ;;  %v21987_v7 = vld [vmem:[#allocation59_spill] sm:$0xff] }
 0x73a   : > { %12693 = vst [vmem:[%s20550_s19 + $0x1f0] sm:$0xff] %v12629_v33  ;;  %12632 = vst [vmem:[%s20550_s19 + $0x8] sm:$0xff] %v12568_v9  ;;  %v12596_v40 = vmul.f32 %v20617_v52, %v21974_v8  ;;  %v12598_v27 = vmul.f32 %v20617_v52, %v21976_v19  ;;  %v21980_v4 = vmax.f32 %v21979_v1, 0.0  ;;  %v12604_v9 = vmul.f32 %v20617_v52, %v21982_v3  ;;  %v21991_v38 = vld [vmem:[#allocation13_spill] sm:$0xff]  ;;  %v21993_v44 = vld [vmem:[#allocation122_spill] sm:$0xff] }
 0x73b   : > { %12634 = vst [vmem:[%s20550_s19 + $0x18] sm:$0xff] %v12570_v12  ;;  %12636 = vst [vmem:[%s20550_s19 + $0x28] sm:$0xff] %v12572_v26  ;;  %v12600_v60 = vmul.f32 %v20617_v52, %v21978_v42  ;;  %v21984_v50 = vmax.f32 %v21983_v13, 0.0  ;;  %v21986_v20 = vmax.f32 %v21985_v14, 0.0  ;;  %v21988_v2 = vmax.f32 %v21987_v7, 0.0  ;;  %v21995_v57 = vld [vmem:[#allocation70_spill] sm:$0xff] }
 0x73c   : > { %12638 = vst [vmem:[%s20550_s19 + $0x38] sm:$0xff] %v12574_v36  ;;  %12640 = vst [vmem:[%s20550_s19 + $0x48] sm:$0xff] %v12576_v28  ;;  %v12602_v33 = vmul.f32 %v20617_v52, %v21980_v4  ;;  %v21990_v10 = vmax.f32 %v21989_v16, 0.0  ;;  %v21992_v61 = vmax.f32 %v21991_v38, 0.0  ;;  %v21994_v31 = vmax.f32 %v21993_v44, 0.0 }
 0x73d   : > { %12642 = vst [vmem:[%s20550_s19 + $0x58] sm:$0xff] %v12578_v59  ;;  %12644 = vst [vmem:[%s20550_s19 + $0x68] sm:$0xff] %v12580_v62  ;;  %v12606_v12 = vmul.f32 %v20617_v52, %v21984_v50  ;;  %v12608_v26 = vmul.f32 %v20617_v52, %v21986_v20  ;;  %v12610_v36 = vmul.f32 %v20617_v52, %v21988_v2  ;;  %v21996_v24 = vmax.f32 %v21995_v57, 0.0 }
 0x73e   : > { %12646 = vst [vmem:[%s20550_s19 + $0x78] sm:$0xff] %v12582_v22  ;;  %12648 = vst [vmem:[%s20550_s19 + $0x88] sm:$0xff] %v12584_v37  ;;  %v12612_v28 = vmul.f32 %v20617_v52, %v21990_v10  ;;  %v12614_v59 = vmul.f32 %v20617_v52, %v21992_v61  ;;  %v12616_v62 = vmul.f32 %v20617_v52, %v21994_v31  ;;  %v21997_v45 = vmax.f32 %v20418_v29, 0.0 }
 0x73f   : > { %12650 = vst [vmem:[%s20550_s19 + $0x98] sm:$0xff] %v12586_v23  ;;  %12652 = vst [vmem:[%s20550_s19 + $0xa8] sm:$0xff] %v12588_v30  ;;  %v12618_v22 = vmul.f32 %v20617_v52, %v21996_v24  ;;  %v21998_v37 = vmax.f32 %v20442_v17, 0.0  ;;  %v12624_v29 = vmul.f32 %v20617_v52, %v12281_v43  ;;  %v12626_v17 = vmul.f32 %v20617_v52, %v12283_v0 }
 0x740   : > { %12654 = vst [vmem:[%s20550_s19 + $0xb8] sm:$0xff] %v12590_v46  ;;  %12656 = vst [vmem:[%s20550_s19 + $0xc8] sm:$0xff] %v12592_v55  ;;  %v12620_v41 = vmul.f32 %v20617_v52, %v21997_v45  ;;  %v21999_v51 = vmax.f32 %v20497_v5, 0.0  ;;  %v12630_v32 = vmul.f32 %v20617_v52, %v12287_v35 }
 0x741   : > { %12658 = vst [vmem:[%s20550_s19 + $0xd8] sm:$0xff] %v12594_v15  ;;  %12660 = vst [vmem:[%s20550_s19 + $0xe8] sm:$0xff] %v12596_v40  ;;  %v12622_v56 = vmul.f32 %v20617_v52, %v21998_v37 }
 0x742   : > { %12662 = vst [vmem:[%s20550_s19 + $0xf8] sm:$0xff] %v12598_v27  ;;  %12664 = vst [vmem:[%s20550_s19 + $0x108] sm:$0xff] %v12600_v60  ;;  %v12628_v23 = vmul.f32 %v20617_v52, %v21999_v51 }
 0x743   : > { %12666 = vst [vmem:[%s20550_s19 + $0x118] sm:$0xff] %v12602_v33  ;;  %12668 = vst [vmem:[%s20550_s19 + $0x128] sm:$0xff] %v12604_v9 }
 0x744   : > { %12670 = vst [vmem:[%s20550_s19 + $0x138] sm:$0xff] %v12606_v12  ;;  %12672 = vst [vmem:[%s20550_s19 + $0x148] sm:$0xff] %v12608_v26 }
 0x745   : > { %12674 = vst [vmem:[%s20550_s19 + $0x158] sm:$0xff] %v12610_v36  ;;  %12676 = vst [vmem:[%s20550_s19 + $0x168] sm:$0xff] %v12612_v28 }
 0x746   : > { %12678 = vst [vmem:[%s20550_s19 + $0x178] sm:$0xff] %v12614_v59  ;;  %12680 = vst [vmem:[%s20550_s19 + $0x188] sm:$0xff] %v12616_v62 }
 0x747   : > { %12682 = vst [vmem:[%s20550_s19 + $0x198] sm:$0xff] %v12618_v22  ;;  %12684 = vst [vmem:[%s20550_s19 + $0x1a8] sm:$0xff] %v12620_v41 }
 0x748   : > { %12686 = vst [vmem:[%s20550_s19 + $0x1b8] sm:$0xff] %v12622_v56  ;;  %12688 = vst [vmem:[%s20550_s19 + $0x1c8] sm:$0xff] %v12624_v29 }
 0x749   : > { %12690 = vst [vmem:[%s20550_s19 + $0x1d8] sm:$0xff] %v12626_v17  ;;  %12692 = vst [vmem:[%s20550_s19 + $0x1e8] sm:$0xff] %v12628_v23 }
 0x74a   : > { %12694 = vst [vmem:[%s20550_s19 + $0x1f8] sm:$0xff] %v12630_v32 }
 0x74b   : > { %15210 = shalt.err (!%p15207_p3)
}
 0x74c   : > { %s15211_s16 = scalar_lea.hbm %s20736_s20, 8192  ;;  %s15215_s25 = scalar_lea.hbm %s20818_s12, 16384 }
 0x74d   : > { %p15212_p4 = scmp.ne.s32.totalorder %s20736_s20, %s15211_s16  ;;  %p15216_p9 = scmp.lt.s32.totalorder %s20736_s20, %s20818_s12 }
 0x74e   : > { %p15217_p10 = scmp.lt.s32.totalorder %s15215_s25, %s15211_s16 }
 0x74f   : > { %p15213_p7 = pnand %p15212_p4, %p15368_p5 }
 0x750   : > { %p15218_p11 = por %p15217_p10, %p15216_p9 }
 0x751   : > { %p15214_p8 = pneg %p15213_p7 }
 0x753   : > { %p15219_p12 = pnand %p15218_p11, %p15214_p8 }
 0x755   : > { %15222 = shalt.err (!%p15219_p12)
}
 0x756   : > { %s15263_s29 = smov 256   ;;  %s15264_s17 = smov 16  }
 0x757   : > { %14266 = dma.vmem_to_hbm [thread:$0]  (%p15368_p5), %s20738_s28, 8192, %s20736_s20, %s20766_s30, %s15263_s29, %s15263_s29, %s15264_s17  }
 0x758 PF: > { %p14272_p13 = scmp.ge.s32.totalorder %s15257_s24, 2  ;;  %s12724_s18 = sand.u32 1, %s15245_s21  }
 0x759   : > { %s12725_s16 = scalar_lea.sflag [#allocation6], %s12724_s18 }
 0x75a   : > { %p14269_p0 = pnand %p14272_p13, %p15372_p6 }
 0x75c   : > { %p14270_p1 = pneg %p14269_p0 }
 0x75e   : > { %15240 = dma.done.wait (%p14270_p1), %s12725_s16, 8192  }
 0x75f   : > { %15242 = vsyncadd (%p14270_p1), %s12725_s16, 4294959104  ;;  %s22000_s19 = sld [smem:[#allocation8_spill]]  ;;  %p22_p2 = scmp.ge.s32.totalorder %s15355_s27, 4  }
 0x760   : > { %s22001_s23 = sld [smem:[#allocation9_spill]]  ;;  %s22002_s21 = smov %s15249_s22 }
 0x761   : > { %s22004_s24 = smov %s15355_s27  ;;  %24 = sbr.rel (!%p22_p2) target bundleno = 3 (0x3), region = 104 }
 0x765   : > { %s22003_s22 = smov %s22000_s19 }
 0x766   :  { %12730 = vsyncpa [#allocation6], 1 }
 0x767   :  { %12732 = vsyncpa [#allocation6 + $0x1], 1 }

</bundles_post_ra>
